<compile_context>
chip_gen: v5e
topology: v5e:2x2
jax: 0.10.0
libtpu: 0.0.40
codegen_flags: <defaults>
</compile_context>

<pallas_src>
import jax
import jax.numpy as jnp
from jax.experimental import pallas as pl
from jax.experimental.pallas import tpu as pltpu  # noqa: F401  (TPU backend)

LEAKY_SLOPE = 0.01
BN_EPS = 1e-5

IN_LEN = 100        # input length (fixed by the 64*8=512 flatten in the module)
L1, P1 = 48, 24     # conv1 out length, pool1 out length
L2, P2 = 20, 10     # conv2 out length, pool2 out length
L3 = 8              # conv3 out length
C = 64              # channel width of the trunk


# ----------------------------- fused Pallas kernel --------------------------

def _vae_kernel(xT_ref, eps_ref,
                g0_ref, b0_ref,
                w1_ref, c1b_ref, g1_ref, b1_ref,
                w2_ref, c2b_ref, g2_ref, b2_ref,
                w3_ref, c3b_ref,
                wh_ref, bh_ref, wf_ref, bf_ref,
                wd3_ref, d3b_ref, wd2_ref, d2b_ref, wd1_ref, d1b_ref,
                out_ref, h_ref, ls_ref):
    f32 = jnp.float32
    B = xT_ref.shape[1]
    H = eps_ref.shape[1]

    def sel(n_out, n_in, stride, offset):
        # Row-gather matrix: S[r, c] = 1 iff c == stride*r + offset.
        r = jax.lax.broadcasted_iota(jnp.int32, (n_out, n_in), 0)
        c = jax.lax.broadcasted_iota(jnp.int32, (n_out, n_in), 1)
        return jnp.where(c == stride * r + offset, 1.0, 0.0).astype(f32)

    def scat(n_out, n_in, stride, offset):
        # Row-scatter matrix: S[r, c] = 1 iff r == stride*c + offset.
        r = jax.lax.broadcasted_iota(jnp.int32, (n_out, n_in), 0)
        c = jax.lax.broadcasted_iota(jnp.int32, (n_out, n_in), 1)
        return jnp.where(r == stride * c + offset, 1.0, 0.0).astype(f32)

    def mm(a, b):
        return jnp.dot(a, b, preferred_element_type=f32)

    def lrelu(v):
        return jnp.where(v > 0, v, LEAKY_SLOPE * v)

    def bn_list(vals, gamma, beta):
        # Training-mode BatchNorm over (batch, length) per channel (lanes).
        n = len(vals) * vals[0].shape[0]
        mean = sum([jnp.sum(v, axis=0, keepdims=True) for v in vals]) / n
        var = sum([jnp.sum((v - mean) ** 2, axis=0, keepdims=True) for v in vals]) / n
        inv = jax.lax.rsqrt(var + BN_EPS)
        return [(v - mean) * inv * gamma + beta for v in vals]

    # ---------------- bn0 on (100, B): per-feature stats over the batch ----
    xT = xT_ref[...]
    mu0 = jnp.mean(xT, axis=1, keepdims=True)
    var0 = jnp.mean((xT - mu0) ** 2, axis=1, keepdims=True)
    xn = (xT - mu0) * jax.lax.rsqrt(var0 + BN_EPS) * g0_ref[...] + b0_ref[...]

    # ---------------- conv1: Cin=1 -> 64, k=5, stride 2 ---------------------
    w1 = w1_ref[...]                                     # (5, 64)
    taps1 = [mm(sel(L1, IN_LEN, 2, k), xn) for k in range(5)]   # (48, B) each
    y1 = []
    for b in range(B):
        acc = jnp.zeros((L1, C), f32) + c1b_ref[...]
        for k in range(5):
            acc = acc + taps1[k][:, b:b + 1] * w1[k:k + 1, :]
        y1.append(acc)                                   # (48, 64)

    # ---------------- maxpool(2)+indices, LeakyReLU, bn1 --------------------
    selE1, selO1 = sel(P1, L1, 2, 0), sel(P1, L1, 2, 1)
    p1, m1 = [], []
    for b in range(B):
        e, o = mm(selE1, y1[b]), mm(selO1, y1[b])
        m1.append(jnp.where(o > e, 1.0, 0.0).astype(f32))
        p1.append(lrelu(jnp.where(o > e, o, e)))
    a1 = bn_list(p1, g1_ref[...], b1_ref[...])           # (24, 64) per b

    # ---------------- conv2: 64 -> 64, k=5 ----------------------------------
    sel2 = [sel(L2, P1, 1, k) for k in range(5)]
    W2 = [w2_ref[pl.ds(k * C, C), :] for k in range(5)]
    y2 = []
    for b in range(B):
        acc = jnp.zeros((L2, C), f32) + c2b_ref[...]
        for k in range(5):
            acc = acc + mm(sel2[k], mm(a1[b], W2[k]))
        y2.append(acc)                                   # (20, 64)

    # ---------------- maxpool(2)+indices, LeakyReLU, bn2 --------------------
    selE2, selO2 = sel(P2, L2, 2, 0), sel(P2, L2, 2, 1)
    p2, m2 = [], []
    for b in range(B):
        e, o = mm(selE2, y2[b]), mm(selO2, y2[b])
        m2.append(jnp.where(o > e, 1.0, 0.0).astype(f32))
        p2.append(lrelu(jnp.where(o > e, o, e)))
    a2 = bn_list(p2, g2_ref[...], b2_ref[...])           # (10, 64) per b

    # ---------------- conv3: 64 -> 64, k=3 ----------------------------------
    sel3 = [sel(L3, P2, 1, k) for k in range(3)]
    W3 = [w3_ref[pl.ds(k * C, C), :] for k in range(3)]
    y3 = []
    for b in range(B):
        acc = jnp.zeros((L3, C), f32) + c3b_ref[...]
        for k in range(3):
            acc = acc + mm(sel3[k], mm(a2[b], W3[k]))
        y3.append(acc)                                   # (8, 64)

    # ------- merged latent heads (to_h | to_logsigma), reparam, from_h ------
    WH = [wh_ref[pl.ds(l * C, C), :] for l in range(L3)]     # (64, 2H) slices
    bh = bh_ref[...]
    wf = wf_ref[...]
    bf = bf_ref[...]
    row_oh = [jnp.where(jax.lax.broadcasted_iota(jnp.int32, (L3, 1), 0) == l,
                        1.0, 0.0).astype(f32) for l in range(L3)]
    y4 = []
    for b in range(B):
        hc = jnp.zeros((1, 2 * H), f32) + bh
        for l in range(L3):                              # == flat(C-major) @ W
            hc = hc + mm(y3[b][l:l + 1, :], WH[l])
        h_b, ls_b = hc[:, 0:H], hc[:, H:2 * H]
        h_ref[b:b + 1, :] = h_b
        ls_ref[b:b + 1, :] = ls_b
        z_b = h_b + eps_ref[b:b + 1, :] * jnp.exp(ls_b)
        o_lm = mm(z_b, wf) + bf                          # (1, 512), L-major
        acc = jnp.zeros((L3, C), f32)
        for l in range(L3):                              # unflatten -> (8, 64)
            acc = acc + row_oh[l] * o_lm[:, l * C:(l + 1) * C]
        y4.append(acc)

    # ---------------- deconv3 (k=3) + LeakyReLU + unpool(mask2) -------------
    dsel3 = [sel(P2, L3, 1, -k) for k in range(3)]
    WD3 = [wd3_ref[pl.ds(k * C, C), :] for k in range(3)]
    scE2, scO2 = scat(L2, P2, 2, 0), scat(L2, P2, 2, 1)
    u2 = []
    for b in range(B):
        acc = jnp.zeros((P2, C), f32) + d3b_ref[...]
        for k in range(3):
            acc = acc + mm(dsel3[k], mm(y4[b], WD3[k]))
        acc = lrelu(acc)
        u2.append(mm(scE2, acc * (1.0 - m2[b])) + mm(scO2, acc * m2[b]))  # (20,64)

    # ---------------- deconv2 (k=5) + LeakyReLU + unpool(mask1) -------------
    dsel2 = [sel(P1, L2, 1, -k) for k in range(5)]
    WD2 = [wd2_ref[pl.ds(k * C, C), :] for k in range(5)]
    scE1, scO1 = scat(L1, P1, 2, 0), scat(L1, P1, 2, 1)
    u1 = []
    for b in range(B):
        acc = jnp.zeros((P1, C), f32) + d2b_ref[...]
        for k in range(5):
            acc = acc + mm(dsel2[k], mm(u2[b], WD2[k]))
        acc = lrelu(acc)
        u1.append(mm(scE1, acc * (1.0 - m1[b])) + mm(scO1, acc * m1[b]))  # (48,64)

    # ---------------- deconv1: 64 -> 1, k=6, stride 2 -----------------------
    wd1 = wd1_ref[...]                                   # (64, 6)
    sc1 = [scat(IN_LEN, L1, 2, k) for k in range(6)]     # out[2l+k] += V[l, k]
    for b in range(B):
        V = mm(u1[b], wd1)                               # (48, 6)
        o = jnp.zeros((IN_LEN, 1), f32) + d1b_ref[...]
        for k in range(6):
            o = o + mm(sc1[k], V[:, k:k + 1])
        out_ref[b] = o                                   # (100, 1)


# ------------------------------- wrapper ------------------------------------

PARAM_ORDER = ("g0", "b0", "w1", "c1b", "g1", "b1", "w2", "c2b", "g2", "b2",
               "w3", "c3b", "wh", "bh", "wf", "bf",
               "wd3", "d3b", "wd2", "d2b", "wd1", "d1b")


def vae_forward(params, x, eps):
    """x: (B, 100) f32, eps: (B, h) f32 -> (recon (B, 100), h, logsigma)."""
    B = x.shape[0]
    H = eps.shape[1]
    out3, h, logsigma = pl.pallas_call(
        _vae_kernel,
        out_shape=(jax.ShapeDtypeStruct((B, IN_LEN, 1), jnp.float32),
                   jax.ShapeDtypeStruct((B, H), jnp.float32),
                   jax.ShapeDtypeStruct((B, H), jnp.float32)),
    )(x.T, eps, *[params[k] for k in PARAM_ORDER])
    return out3.reshape(B, IN_LEN), h, logsigma


# ------------------------------ parameters ----------------------------------

def init_params(key, h_size):
    ks = jax.random.split(key, 20)

    def n(k, shape, scale=0.1):
        return scale * jax.random.normal(k, shape, dtype=jnp.float32)

    # torch-layout raw parameters
    conv1_w = n(ks[0], (64, 1, 5));    conv1_b = n(ks[1], (64,))
    conv2_w = n(ks[2], (64, 64, 5));   conv2_b = n(ks[3], (64,))
    conv3_w = n(ks[4], (64, 64, 3));   conv3_b = n(ks[5], (64,))
    to_h_w = n(ks[6], (h_size, 512));  to_h_b = n(ks[7], (h_size,))
    to_ls_w = n(ks[8], (h_size, 512)); to_ls_b = n(ks[9], (h_size,))
    from_h_w = n(ks[10], (512, h_size)); from_h_b = n(ks[11], (512,))
    deconv3_w = n(ks[12], (64, 64, 3)); deconv3_b = n(ks[13], (64,))
    deconv2_w = n(ks[14], (64, 64, 5)); deconv2_b = n(ks[15], (64,))
    deconv1_w = n(ks[16], (64, 1, 6));  deconv1_b = n(ks[17], (1,))

    def head_arrange(w):   # torch (h, 512) [f = 8c + l] -> (512, h) rows 64l+c
        return w.T.reshape(64, 8, -1).transpose(1, 0, 2).reshape(512, -1)

    p = dict(
        # BatchNorm affine params (PyTorch default init)
        g0=jnp.ones((IN_LEN, 1), jnp.float32), b0=jnp.zeros((IN_LEN, 1), jnp.float32),
        g1=jnp.ones((1, C), jnp.float32), b1=jnp.zeros((1, C), jnp.float32),
        g2=jnp.ones((1, C), jnp.float32), b2=jnp.zeros((1, C), jnp.float32),
        # conv1: w1[k, d] = weight[d, 0, k]
        w1=conv1_w[:, 0, :].T, c1b=conv1_b.reshape(1, C),
        # conv2/conv3: rows k*64 + c, value weight[d, c, k]
        w2=conv2_w.transpose(2, 1, 0).reshape(5 * C, C), c2b=conv2_b.reshape(1, C),
        w3=conv3_w.transpose(2, 1, 0).reshape(3 * C, C), c3b=conv3_b.reshape(1, C),
        # merged latent heads (to_h | to_logsigma), rows re-ordered to L-major
        wh=jnp.concatenate([head_arrange(to_h_w), head_arrange(to_ls_w)], axis=1),
        bh=jnp.concatenate([to_h_b, to_ls_b]).reshape(1, 2 * h_size),
        # from_h with output columns re-ordered to L-major (64l + c)
        wf=from_h_w.reshape(64, 8, h_size).transpose(2, 1, 0).reshape(h_size, 512),
        bf=from_h_b.reshape(64, 8).T.reshape(1, 512),
        # deconvs: rows k*64 + c, value weight[c, d, k]  (no kernel flip needed)
        wd3=deconv3_w.transpose(2, 0, 1).reshape(3 * C, C), d3b=deconv3_b.reshape(1, C),
        wd2=deconv2_w.transpose(2, 0, 1).reshape(5 * C, C), d2b=deconv2_b.reshape(1, C),
        # deconv1: wd1[c, k] = weight[c, 0, k]
        wd1=deconv1_w[:, 0, :], d1b=deconv1_b.reshape(1, 1),
    )
    return p


if __name__ == "__main__":
    key = jax.random.PRNGKey(0)
    k_param, k_x, k_eps = jax.random.split(key, 3)
    B, h_size = 2, 32
    params = init_params(k_param, h_size)
    x = jax.random.normal(k_x, (B, IN_LEN), dtype=jnp.float32)
    eps = jax.random.normal(k_eps, (B, h_size), dtype=jnp.float32)

    fwd = jax.jit(vae_forward)
    out, h, logsigma = fwd(params, x, eps)
    jax.block_until_ready((out, h, logsigma))

    assert out.shape == (B, IN_LEN)
    assert h.shape == (B, h_size) and logsigma.shape == (B, h_size)
    assert bool(jnp.all(jnp.isfinite(out))) and bool(jnp.all(jnp.isfinite(h)))
    assert bool(jnp.all(jnp.isfinite(logsigma)))
    print("KERNEL_OK")
</pallas_src>

<mosaic_0001>
module attributes {stable_mosaic.version = 11 : i64} {
  func.func @_vae_kernel(%arg0: memref<100x2xf32, #tpu.memory_space<vmem>>, %arg1: memref<2x32xf32, #tpu.memory_space<vmem>>, %arg2: memref<100x1xf32, #tpu.memory_space<vmem>>, %arg3: memref<100x1xf32, #tpu.memory_space<vmem>>, %arg4: memref<5x64xf32, #tpu.memory_space<vmem>>, %arg5: memref<1x64xf32, #tpu.memory_space<vmem>>, %arg6: memref<1x64xf32, #tpu.memory_space<vmem>>, %arg7: memref<1x64xf32, #tpu.memory_space<vmem>>, %arg8: memref<320x64xf32, #tpu.memory_space<vmem>>, %arg9: memref<1x64xf32, #tpu.memory_space<vmem>>, %arg10: memref<1x64xf32, #tpu.memory_space<vmem>>, %arg11: memref<1x64xf32, #tpu.memory_space<vmem>>, %arg12: memref<192x64xf32, #tpu.memory_space<vmem>>, %arg13: memref<1x64xf32, #tpu.memory_space<vmem>>, %arg14: memref<512x64xf32, #tpu.memory_space<vmem>>, %arg15: memref<1x64xf32, #tpu.memory_space<vmem>>, %arg16: memref<32x512xf32, #tpu.memory_space<vmem>>, %arg17: memref<1x512xf32, #tpu.memory_space<vmem>>, %arg18: memref<192x64xf32, #tpu.memory_space<vmem>>, %arg19: memref<1x64xf32, #tpu.memory_space<vmem>>, %arg20: memref<320x64xf32, #tpu.memory_space<vmem>>, %arg21: memref<1x64xf32, #tpu.memory_space<vmem>>, %arg22: memref<64x6xf32, #tpu.memory_space<vmem>>, %arg23: memref<1x1xf32, #tpu.memory_space<vmem>>, %arg24: memref<2x100x1xf32, #tpu.memory_space<vmem>>, %arg25: memref<2x32xf32, #tpu.memory_space<vmem>>, %arg26: memref<2x32xf32, #tpu.memory_space<vmem>>) attributes {dimension_semantics = [], scalar_prefetch = 0 : i64, scratch_operands = 0 : i64, tpu.core_type = #tpu.core_type<tc>} {
    %c0 = arith.constant 0 : index
    %c0_0 = arith.constant 0 : index
    %0 = vector.load %arg0[%c0, %c0_0] : memref<100x2xf32, #tpu.memory_space<vmem>>, vector<100x2xf32>
    %cst = arith.constant dense<0.000000e+00> : vector<100xf32>
    %1 = vector.multi_reduction <add>, %0, %cst [1] : vector<100x2xf32> to vector<100xf32>
    %2 = vector.shape_cast %1 : vector<100xf32> to vector<100x1xf32>
    %cst_1 = arith.constant 2.000000e+00 : f32
    %3 = vector.broadcast %cst_1 : f32 to vector<100x1xf32>
    %4 = arith.divf %2, %3 : vector<100x1xf32>
    %5 = vector.broadcast %4 : vector<100x1xf32> to vector<100x2xf32>
    %6 = arith.subf %0, %5 : vector<100x2xf32>
    %7 = arith.mulf %6, %6 : vector<100x2xf32>
    %cst_2 = arith.constant dense<0.000000e+00> : vector<100xf32>
    %8 = vector.multi_reduction <add>, %7, %cst_2 [1] : vector<100x2xf32> to vector<100xf32>
    %9 = vector.shape_cast %8 : vector<100xf32> to vector<100x1xf32>
    %cst_3 = arith.constant 2.000000e+00 : f32
    %10 = vector.broadcast %cst_3 : f32 to vector<100x1xf32>
    %11 = arith.divf %9, %10 : vector<100x1xf32>
    %12 = vector.broadcast %4 : vector<100x1xf32> to vector<100x2xf32>
    %13 = arith.subf %0, %12 : vector<100x2xf32>
    %cst_4 = arith.constant 9.99999974E-6 : f32
    %14 = vector.broadcast %cst_4 : f32 to vector<100x1xf32>
    %15 = arith.addf %11, %14 : vector<100x1xf32>
    %16 = math.rsqrt %15 : vector<100x1xf32>
    %17 = vector.broadcast %16 : vector<100x1xf32> to vector<100x2xf32>
    %18 = arith.mulf %13, %17 : vector<100x2xf32>
    %c0_5 = arith.constant 0 : index
    %c0_6 = arith.constant 0 : index
    %19 = vector.load %arg2[%c0_5, %c0_6] : memref<100x1xf32, #tpu.memory_space<vmem>>, vector<100x1xf32>
    %20 = vector.broadcast %19 : vector<100x1xf32> to vector<100x2xf32>
    %21 = arith.mulf %18, %20 : vector<100x2xf32>
    %c0_7 = arith.constant 0 : index
    %c0_8 = arith.constant 0 : index
    %22 = vector.load %arg3[%c0_7, %c0_8] : memref<100x1xf32, #tpu.memory_space<vmem>>, vector<100x1xf32>
    %23 = vector.broadcast %22 : vector<100x1xf32> to vector<100x2xf32>
    %24 = arith.addf %21, %23 : vector<100x2xf32>
    %c0_9 = arith.constant 0 : index
    %c0_10 = arith.constant 0 : index
    %25 = vector.load %arg4[%c0_9, %c0_10] : memref<5x64xf32, #tpu.memory_space<vmem>>, vector<5x64xf32>
    %26 = tpu.iota {dimensions = array<i32: 0>} : vector<48x100xi32>
    %27 = tpu.iota {dimensions = array<i32: 1>} : vector<48x100xi32>
    %c2_i32 = arith.constant 2 : i32
    %28 = vector.broadcast %c2_i32 : i32 to vector<48x100xi32>
    %29 = arith.muli %28, %26 : vector<48x100xi32>
    %c0_i32 = arith.constant 0 : i32
    %30 = vector.broadcast %c0_i32 : i32 to vector<48x100xi32>
    %31 = arith.addi %29, %30 : vector<48x100xi32>
    %32 = arith.cmpi eq, %27, %31 : vector<48x100xi32>
    %cst_11 = arith.constant 1.000000e+00 : f32
    %cst_12 = arith.constant 0.000000e+00 : f32
    %33 = vector.broadcast %cst_11 : f32 to vector<48x100xf32>
    %34 = vector.broadcast %cst_12 : f32 to vector<48x100xf32>
    %35 = arith.select %32, %33, %34 : vector<48x100xi1>, vector<48x100xf32>
    %cst_13 = arith.constant dense<0.000000e+00> : vector<48x2xf32>
    %36 = tpu.matmul %35, %24, %cst_13 {dimension_numbers = #tpu.dot_dimension_numbers<[1], [0], [0], [1], [0, 0, 1, 1], [], []>} : vector<48x100xf32>, vector<100x2xf32>, vector<48x2xf32> -> vector<48x2xf32>
    %37 = tpu.iota {dimensions = array<i32: 0>} : vector<48x100xi32>
    %38 = tpu.iota {dimensions = array<i32: 1>} : vector<48x100xi32>
    %c2_i32_14 = arith.constant 2 : i32
    %39 = vector.broadcast %c2_i32_14 : i32 to vector<48x100xi32>
    %40 = arith.muli %39, %37 : vector<48x100xi32>
    %c1_i32 = arith.constant 1 : i32
    %41 = vector.broadcast %c1_i32 : i32 to vector<48x100xi32>
    %42 = arith.addi %40, %41 : vector<48x100xi32>
    %43 = arith.cmpi eq, %38, %42 : vector<48x100xi32>
    %cst_15 = arith.constant 1.000000e+00 : f32
    %cst_16 = arith.constant 0.000000e+00 : f32
    %44 = vector.broadcast %cst_15 : f32 to vector<48x100xf32>
    %45 = vector.broadcast %cst_16 : f32 to vector<48x100xf32>
    %46 = arith.select %43, %44, %45 : vector<48x100xi1>, vector<48x100xf32>
    %cst_17 = arith.constant dense<0.000000e+00> : vector<48x2xf32>
    %47 = tpu.matmul %46, %24, %cst_17 {dimension_numbers = #tpu.dot_dimension_numbers<[1], [0], [0], [1], [0, 0, 1, 1], [], []>} : vector<48x100xf32>, vector<100x2xf32>, vector<48x2xf32> -> vector<48x2xf32>
    %48 = tpu.iota {dimensions = array<i32: 0>} : vector<48x100xi32>
    %49 = tpu.iota {dimensions = array<i32: 1>} : vector<48x100xi32>
    %c2_i32_18 = arith.constant 2 : i32
    %50 = vector.broadcast %c2_i32_18 : i32 to vector<48x100xi32>
    %51 = arith.muli %50, %48 : vector<48x100xi32>
    %c2_i32_19 = arith.constant 2 : i32
    %52 = vector.broadcast %c2_i32_19 : i32 to vector<48x100xi32>
    %53 = arith.addi %51, %52 : vector<48x100xi32>
    %54 = arith.cmpi eq, %49, %53 : vector<48x100xi32>
    %cst_20 = arith.constant 1.000000e+00 : f32
    %cst_21 = arith.constant 0.000000e+00 : f32
    %55 = vector.broadcast %cst_20 : f32 to vector<48x100xf32>
    %56 = vector.broadcast %cst_21 : f32 to vector<48x100xf32>
    %57 = arith.select %54, %55, %56 : vector<48x100xi1>, vector<48x100xf32>
    %cst_22 = arith.constant dense<0.000000e+00> : vector<48x2xf32>
    %58 = tpu.matmul %57, %24, %cst_22 {dimension_numbers = #tpu.dot_dimension_numbers<[1], [0], [0], [1], [0, 0, 1, 1], [], []>} : vector<48x100xf32>, vector<100x2xf32>, vector<48x2xf32> -> vector<48x2xf32>
    %59 = tpu.iota {dimensions = array<i32: 0>} : vector<48x100xi32>
    %60 = tpu.iota {dimensions = array<i32: 1>} : vector<48x100xi32>
    %c2_i32_23 = arith.constant 2 : i32
    %61 = vector.broadcast %c2_i32_23 : i32 to vector<48x100xi32>
    %62 = arith.muli %61, %59 : vector<48x100xi32>
    %c3_i32 = arith.constant 3 : i32
    %63 = vector.broadcast %c3_i32 : i32 to vector<48x100xi32>
    %64 = arith.addi %62, %63 : vector<48x100xi32>
    %65 = arith.cmpi eq, %60, %64 : vector<48x100xi32>
    %cst_24 = arith.constant 1.000000e+00 : f32
    %cst_25 = arith.constant 0.000000e+00 : f32
    %66 = vector.broadcast %cst_24 : f32 to vector<48x100xf32>
    %67 = vector.broadcast %cst_25 : f32 to vector<48x100xf32>
    %68 = arith.select %65, %66, %67 : vector<48x100xi1>, vector<48x100xf32>
    %cst_26 = arith.constant dense<0.000000e+00> : vector<48x2xf32>
    %69 = tpu.matmul %68, %24, %cst_26 {dimension_numbers = #tpu.dot_dimension_numbers<[1], [0], [0], [1], [0, 0, 1, 1], [], []>} : vector<48x100xf32>, vector<100x2xf32>, vector<48x2xf32> -> vector<48x2xf32>
    %70 = tpu.iota {dimensions = array<i32: 0>} : vector<48x100xi32>
    %71 = tpu.iota {dimensions = array<i32: 1>} : vector<48x100xi32>
    %c2_i32_27 = arith.constant 2 : i32
    %72 = vector.broadcast %c2_i32_27 : i32 to vector<48x100xi32>
    %73 = arith.muli %72, %70 : vector<48x100xi32>
    %c4_i32 = arith.constant 4 : i32
    %74 = vector.broadcast %c4_i32 : i32 to vector<48x100xi32>
    %75 = arith.addi %73, %74 : vector<48x100xi32>
    %76 = arith.cmpi eq, %71, %75 : vector<48x100xi32>
    %cst_28 = arith.constant 1.000000e+00 : f32
    %cst_29 = arith.constant 0.000000e+00 : f32
    %77 = vector.broadcast %cst_28 : f32 to vector<48x100xf32>
    %78 = vector.broadcast %cst_29 : f32 to vector<48x100xf32>
    %79 = arith.select %76, %77, %78 : vector<48x100xi1>, vector<48x100xf32>
    %cst_30 = arith.constant dense<0.000000e+00> : vector<48x2xf32>
    %80 = tpu.matmul %79, %24, %cst_30 {dimension_numbers = #tpu.dot_dimension_numbers<[1], [0], [0], [1], [0, 0, 1, 1], [], []>} : vector<48x100xf32>, vector<100x2xf32>, vector<48x2xf32> -> vector<48x2xf32>
    %cst_31 = arith.constant 0.000000e+00 : f32
    %81 = vector.broadcast %cst_31 : f32 to vector<48x64xf32>
    %c0_32 = arith.constant 0 : index
    %c0_33 = arith.constant 0 : index
    %82 = vector.load %arg5[%c0_32, %c0_33] : memref<1x64xf32, #tpu.memory_space<vmem>>, vector<1x64xf32>
    %83 = vector.broadcast %82 : vector<1x64xf32> to vector<48x64xf32>
    %84 = arith.addf %81, %83 : vector<48x64xf32>
    %85 = vector.extract_strided_slice %36 {offsets = [0, 0], sizes = [48, 1], strides = [1, 1]} : vector<48x2xf32> to vector<48x1xf32>
    %86 = vector.extract_strided_slice %25 {offsets = [0, 0], sizes = [1, 64], strides = [1, 1]} : vector<5x64xf32> to vector<1x64xf32>
    %87 = vector.broadcast %85 : vector<48x1xf32> to vector<48x64xf32>
    %88 = vector.broadcast %86 : vector<1x64xf32> to vector<48x64xf32>
    %89 = arith.mulf %87, %88 : vector<48x64xf32>
    %90 = arith.addf %84, %89 : vector<48x64xf32>
    %91 = vector.extract_strided_slice %47 {offsets = [0, 0], sizes = [48, 1], strides = [1, 1]} : vector<48x2xf32> to vector<48x1xf32>
    %92 = vector.extract_strided_slice %25 {offsets = [1, 0], sizes = [1, 64], strides = [1, 1]} : vector<5x64xf32> to vector<1x64xf32>
    %93 = vector.broadcast %91 : vector<48x1xf32> to vector<48x64xf32>
    %94 = vector.broadcast %92 : vector<1x64xf32> to vector<48x64xf32>
    %95 = arith.mulf %93, %94 : vector<48x64xf32>
    %96 = arith.addf %90, %95 : vector<48x64xf32>
    %97 = vector.extract_strided_slice %58 {offsets = [0, 0], sizes = [48, 1], strides = [1, 1]} : vector<48x2xf32> to vector<48x1xf32>
    %98 = vector.extract_strided_slice %25 {offsets = [2, 0], sizes = [1, 64], strides = [1, 1]} : vector<5x64xf32> to vector<1x64xf32>
    %99 = vector.broadcast %97 : vector<48x1xf32> to vector<48x64xf32>
    %100 = vector.broadcast %98 : vector<1x64xf32> to vector<48x64xf32>
    %101 = arith.mulf %99, %100 : vector<48x64xf32>
    %102 = arith.addf %96, %101 : vector<48x64xf32>
    %103 = vector.extract_strided_slice %69 {offsets = [0, 0], sizes = [48, 1], strides = [1, 1]} : vector<48x2xf32> to vector<48x1xf32>
    %104 = vector.extract_strided_slice %25 {offsets = [3, 0], sizes = [1, 64], strides = [1, 1]} : vector<5x64xf32> to vector<1x64xf32>
    %105 = vector.broadcast %103 : vector<48x1xf32> to vector<48x64xf32>
    %106 = vector.broadcast %104 : vector<1x64xf32> to vector<48x64xf32>
    %107 = arith.mulf %105, %106 : vector<48x64xf32>
    %108 = arith.addf %102, %107 : vector<48x64xf32>
    %109 = vector.extract_strided_slice %80 {offsets = [0, 0], sizes = [48, 1], strides = [1, 1]} : vector<48x2xf32> to vector<48x1xf32>
    %110 = vector.extract_strided_slice %25 {offsets = [4, 0], sizes = [1, 64], strides = [1, 1]} : vector<5x64xf32> to vector<1x64xf32>
    %111 = vector.broadcast %109 : vector<48x1xf32> to vector<48x64xf32>
    %112 = vector.broadcast %110 : vector<1x64xf32> to vector<48x64xf32>
    %113 = arith.mulf %111, %112 : vector<48x64xf32>
    %114 = arith.addf %108, %113 : vector<48x64xf32>
    %cst_34 = arith.constant 0.000000e+00 : f32
    %115 = vector.broadcast %cst_34 : f32 to vector<48x64xf32>
    %c0_35 = arith.constant 0 : index
    %c0_36 = arith.constant 0 : index
    %116 = vector.load %arg5[%c0_35, %c0_36] : memref<1x64xf32, #tpu.memory_space<vmem>>, vector<1x64xf32>
    %117 = vector.broadcast %116 : vector<1x64xf32> to vector<48x64xf32>
    %118 = arith.addf %115, %117 : vector<48x64xf32>
    %119 = vector.extract_strided_slice %36 {offsets = [0, 1], sizes = [48, 1], strides = [1, 1]} : vector<48x2xf32> to vector<48x1xf32>
    %120 = vector.extract_strided_slice %25 {offsets = [0, 0], sizes = [1, 64], strides = [1, 1]} : vector<5x64xf32> to vector<1x64xf32>
    %121 = vector.broadcast %119 : vector<48x1xf32> to vector<48x64xf32>
    %122 = vector.broadcast %120 : vector<1x64xf32> to vector<48x64xf32>
    %123 = arith.mulf %121, %122 : vector<48x64xf32>
    %124 = arith.addf %118, %123 : vector<48x64xf32>
    %125 = vector.extract_strided_slice %47 {offsets = [0, 1], sizes = [48, 1], strides = [1, 1]} : vector<48x2xf32> to vector<48x1xf32>
    %126 = vector.extract_strided_slice %25 {offsets = [1, 0], sizes = [1, 64], strides = [1, 1]} : vector<5x64xf32> to vector<1x64xf32>
    %127 = vector.broadcast %125 : vector<48x1xf32> to vector<48x64xf32>
    %128 = vector.broadcast %126 : vector<1x64xf32> to vector<48x64xf32>
    %129 = arith.mulf %127, %128 : vector<48x64xf32>
    %130 = arith.addf %124, %129 : vector<48x64xf32>
    %131 = vector.extract_strided_slice %58 {offsets = [0, 1], sizes = [48, 1], strides = [1, 1]} : vector<48x2xf32> to vector<48x1xf32>
    %132 = vector.extract_strided_slice %25 {offsets = [2, 0], sizes = [1, 64], strides = [1, 1]} : vector<5x64xf32> to vector<1x64xf32>
    %133 = vector.broadcast %131 : vector<48x1xf32> to vector<48x64xf32>
    %134 = vector.broadcast %132 : vector<1x64xf32> to vector<48x64xf32>
    %135 = arith.mulf %133, %134 : vector<48x64xf32>
    %136 = arith.addf %130, %135 : vector<48x64xf32>
    %137 = vector.extract_strided_slice %69 {offsets = [0, 1], sizes = [48, 1], strides = [1, 1]} : vector<48x2xf32> to vector<48x1xf32>
    %138 = vector.extract_strided_slice %25 {offsets = [3, 0], sizes = [1, 64], strides = [1, 1]} : vector<5x64xf32> to vector<1x64xf32>
    %139 = vector.broadcast %137 : vector<48x1xf32> to vector<48x64xf32>
    %140 = vector.broadcast %138 : vector<1x64xf32> to vector<48x64xf32>
    %141 = arith.mulf %139, %140 : vector<48x64xf32>
    %142 = arith.addf %136, %141 : vector<48x64xf32>
    %143 = vector.extract_strided_slice %80 {offsets = [0, 1], sizes = [48, 1], strides = [1, 1]} : vector<48x2xf32> to vector<48x1xf32>
    %144 = vector.extract_strided_slice %25 {offsets = [4, 0], sizes = [1, 64], strides = [1, 1]} : vector<5x64xf32> to vector<1x64xf32>
    %145 = vector.broadcast %143 : vector<48x1xf32> to vector<48x64xf32>
    %146 = vector.broadcast %144 : vector<1x64xf32> to vector<48x64xf32>
    %147 = arith.mulf %145, %146 : vector<48x64xf32>
    %148 = arith.addf %142, %147 : vector<48x64xf32>
    %149 = tpu.iota {dimensions = array<i32: 0>} : vector<24x48xi32>
    %150 = tpu.iota {dimensions = array<i32: 1>} : vector<24x48xi32>
    %c2_i32_37 = arith.constant 2 : i32
    %151 = vector.broadcast %c2_i32_37 : i32 to vector<24x48xi32>
    %152 = arith.muli %151, %149 : vector<24x48xi32>
    %c0_i32_38 = arith.constant 0 : i32
    %153 = vector.broadcast %c0_i32_38 : i32 to vector<24x48xi32>
    %154 = arith.addi %152, %153 : vector<24x48xi32>
    %155 = arith.cmpi eq, %150, %154 : vector<24x48xi32>
    %cst_39 = arith.constant 1.000000e+00 : f32
    %cst_40 = arith.constant 0.000000e+00 : f32
    %156 = vector.broadcast %cst_39 : f32 to vector<24x48xf32>
    %157 = vector.broadcast %cst_40 : f32 to vector<24x48xf32>
    %158 = arith.select %155, %156, %157 : vector<24x48xi1>, vector<24x48xf32>
    %159 = tpu.iota {dimensions = array<i32: 0>} : vector<24x48xi32>
    %160 = tpu.iota {dimensions = array<i32: 1>} : vector<24x48xi32>
    %c2_i32_41 = arith.constant 2 : i32
    %161 = vector.broadcast %c2_i32_41 : i32 to vector<24x48xi32>
    %162 = arith.muli %161, %159 : vector<24x48xi32>
    %c1_i32_42 = arith.constant 1 : i32
    %163 = vector.broadcast %c1_i32_42 : i32 to vector<24x48xi32>
    %164 = arith.addi %162, %163 : vector<24x48xi32>
    %165 = arith.cmpi eq, %160, %164 : vector<24x48xi32>
    %cst_43 = arith.constant 1.000000e+00 : f32
    %cst_44 = arith.constant 0.000000e+00 : f32
    %166 = vector.broadcast %cst_43 : f32 to vector<24x48xf32>
    %167 = vector.broadcast %cst_44 : f32 to vector<24x48xf32>
    %168 = arith.select %165, %166, %167 : vector<24x48xi1>, vector<24x48xf32>
    %cst_45 = arith.constant dense<0.000000e+00> : vector<24x64xf32>
    %169 = tpu.matmul %158, %114, %cst_45 {dimension_numbers = #tpu.dot_dimension_numbers<[1], [0], [0], [1], [0, 0, 1, 1], [], []>} : vector<24x48xf32>, vector<48x64xf32>, vector<24x64xf32> -> vector<24x64xf32>
    %cst_46 = arith.constant dense<0.000000e+00> : vector<24x64xf32>
    %170 = tpu.matmul %168, %114, %cst_46 {dimension_numbers = #tpu.dot_dimension_numbers<[1], [0], [0], [1], [0, 0, 1, 1], [], []>} : vector<24x48xf32>, vector<48x64xf32>, vector<24x64xf32> -> vector<24x64xf32>
    %171 = arith.cmpf ogt, %170, %169 : vector<24x64xf32>
    %cst_47 = arith.constant 1.000000e+00 : f32
    %cst_48 = arith.constant 0.000000e+00 : f32
    %172 = vector.broadcast %cst_47 : f32 to vector<24x64xf32>
    %173 = vector.broadcast %cst_48 : f32 to vector<24x64xf32>
    %174 = arith.select %171, %172, %173 : vector<24x64xi1>, vector<24x64xf32>
    %175 = arith.cmpf ogt, %170, %169 : vector<24x64xf32>
    %176 = arith.select %175, %170, %169 : vector<24x64xi1>, vector<24x64xf32>
    %cst_49 = arith.constant 0.000000e+00 : f32
    %177 = vector.broadcast %cst_49 : f32 to vector<24x64xf32>
    %178 = arith.cmpf ogt, %176, %177 : vector<24x64xf32>
    %cst_50 = arith.constant 0.00999999977 : f32
    %179 = vector.broadcast %cst_50 : f32 to vector<24x64xf32>
    %180 = arith.mulf %179, %176 : vector<24x64xf32>
    %181 = arith.select %178, %176, %180 : vector<24x64xi1>, vector<24x64xf32>
    %cst_51 = arith.constant dense<0.000000e+00> : vector<24x64xf32>
    %182 = tpu.matmul %158, %148, %cst_51 {dimension_numbers = #tpu.dot_dimension_numbers<[1], [0], [0], [1], [0, 0, 1, 1], [], []>} : vector<24x48xf32>, vector<48x64xf32>, vector<24x64xf32> -> vector<24x64xf32>
    %cst_52 = arith.constant dense<0.000000e+00> : vector<24x64xf32>
    %183 = tpu.matmul %168, %148, %cst_52 {dimension_numbers = #tpu.dot_dimension_numbers<[1], [0], [0], [1], [0, 0, 1, 1], [], []>} : vector<24x48xf32>, vector<48x64xf32>, vector<24x64xf32> -> vector<24x64xf32>
    %184 = arith.cmpf ogt, %183, %182 : vector<24x64xf32>
    %cst_53 = arith.constant 1.000000e+00 : f32
    %cst_54 = arith.constant 0.000000e+00 : f32
    %185 = vector.broadcast %cst_53 : f32 to vector<24x64xf32>
    %186 = vector.broadcast %cst_54 : f32 to vector<24x64xf32>
    %187 = arith.select %184, %185, %186 : vector<24x64xi1>, vector<24x64xf32>
    %188 = arith.cmpf ogt, %183, %182 : vector<24x64xf32>
    %189 = arith.select %188, %183, %182 : vector<24x64xi1>, vector<24x64xf32>
    %cst_55 = arith.constant 0.000000e+00 : f32
    %190 = vector.broadcast %cst_55 : f32 to vector<24x64xf32>
    %191 = arith.cmpf ogt, %189, %190 : vector<24x64xf32>
    %cst_56 = arith.constant 0.00999999977 : f32
    %192 = vector.broadcast %cst_56 : f32 to vector<24x64xf32>
    %193 = arith.mulf %192, %189 : vector<24x64xf32>
    %194 = arith.select %191, %189, %193 : vector<24x64xi1>, vector<24x64xf32>
    %c0_57 = arith.constant 0 : index
    %c0_58 = arith.constant 0 : index
    %195 = vector.load %arg6[%c0_57, %c0_58] : memref<1x64xf32, #tpu.memory_space<vmem>>, vector<1x64xf32>
    %c0_59 = arith.constant 0 : index
    %c0_60 = arith.constant 0 : index
    %196 = vector.load %arg7[%c0_59, %c0_60] : memref<1x64xf32, #tpu.memory_space<vmem>>, vector<1x64xf32>
    %cst_61 = arith.constant dense<0.000000e+00> : vector<64xf32>
    %197 = vector.multi_reduction <add>, %181, %cst_61 [0] : vector<24x64xf32> to vector<64xf32>
    %198 = vector.shape_cast %197 : vector<64xf32> to vector<1x64xf32>
    %cst_62 = arith.constant dense<0.000000e+00> : vector<64xf32>
    %199 = vector.multi_reduction <add>, %194, %cst_62 [0] : vector<24x64xf32> to vector<64xf32>
    %200 = vector.shape_cast %199 : vector<64xf32> to vector<1x64xf32>
    %cst_63 = arith.constant 0.000000e+00 : f32
    %201 = vector.broadcast %cst_63 : f32 to vector<1x64xf32>
    %202 = arith.addf %201, %198 : vector<1x64xf32>
    %203 = arith.addf %202, %200 : vector<1x64xf32>
    %cst_64 = arith.constant 4.800000e+01 : f32
    %204 = vector.broadcast %cst_64 : f32 to vector<1x64xf32>
    %205 = arith.divf %203, %204 : vector<1x64xf32>
    %206 = vector.broadcast %205 : vector<1x64xf32> to vector<24x64xf32>
    %207 = arith.subf %181, %206 : vector<24x64xf32>
    %208 = arith.mulf %207, %207 : vector<24x64xf32>
    %cst_65 = arith.constant dense<0.000000e+00> : vector<64xf32>
    %209 = vector.multi_reduction <add>, %208, %cst_65 [0] : vector<24x64xf32> to vector<64xf32>
    %210 = vector.shape_cast %209 : vector<64xf32> to vector<1x64xf32>
    %211 = vector.broadcast %205 : vector<1x64xf32> to vector<24x64xf32>
    %212 = arith.subf %194, %211 : vector<24x64xf32>
    %213 = arith.mulf %212, %212 : vector<24x64xf32>
    %cst_66 = arith.constant dense<0.000000e+00> : vector<64xf32>
    %214 = vector.multi_reduction <add>, %213, %cst_66 [0] : vector<24x64xf32> to vector<64xf32>
    %215 = vector.shape_cast %214 : vector<64xf32> to vector<1x64xf32>
    %cst_67 = arith.constant 0.000000e+00 : f32
    %216 = vector.broadcast %cst_67 : f32 to vector<1x64xf32>
    %217 = arith.addf %216, %210 : vector<1x64xf32>
    %218 = arith.addf %217, %215 : vector<1x64xf32>
    %cst_68 = arith.constant 4.800000e+01 : f32
    %219 = vector.broadcast %cst_68 : f32 to vector<1x64xf32>
    %220 = arith.divf %218, %219 : vector<1x64xf32>
    %cst_69 = arith.constant 9.99999974E-6 : f32
    %221 = vector.broadcast %cst_69 : f32 to vector<1x64xf32>
    %222 = arith.addf %220, %221 : vector<1x64xf32>
    %223 = math.rsqrt %222 : vector<1x64xf32>
    %224 = vector.broadcast %205 : vector<1x64xf32> to vector<24x64xf32>
    %225 = arith.subf %181, %224 : vector<24x64xf32>
    %226 = vector.broadcast %223 : vector<1x64xf32> to vector<24x64xf32>
    %227 = arith.mulf %225, %226 : vector<24x64xf32>
    %228 = vector.broadcast %195 : vector<1x64xf32> to vector<24x64xf32>
    %229 = arith.mulf %227, %228 : vector<24x64xf32>
    %230 = vector.broadcast %196 : vector<1x64xf32> to vector<24x64xf32>
    %231 = arith.addf %229, %230 : vector<24x64xf32>
    %232 = vector.broadcast %205 : vector<1x64xf32> to vector<24x64xf32>
    %233 = arith.subf %194, %232 : vector<24x64xf32>
    %234 = vector.broadcast %223 : vector<1x64xf32> to vector<24x64xf32>
    %235 = arith.mulf %233, %234 : vector<24x64xf32>
    %236 = vector.broadcast %195 : vector<1x64xf32> to vector<24x64xf32>
    %237 = arith.mulf %235, %236 : vector<24x64xf32>
    %238 = vector.broadcast %196 : vector<1x64xf32> to vector<24x64xf32>
    %239 = arith.addf %237, %238 : vector<24x64xf32>
    %240 = tpu.iota {dimensions = array<i32: 0>} : vector<20x24xi32>
    %241 = tpu.iota {dimensions = array<i32: 1>} : vector<20x24xi32>
    %c1_i32_70 = arith.constant 1 : i32
    %242 = vector.broadcast %c1_i32_70 : i32 to vector<20x24xi32>
    %243 = arith.muli %242, %240 : vector<20x24xi32>
    %c0_i32_71 = arith.constant 0 : i32
    %244 = vector.broadcast %c0_i32_71 : i32 to vector<20x24xi32>
    %245 = arith.addi %243, %244 : vector<20x24xi32>
    %246 = arith.cmpi eq, %241, %245 : vector<20x24xi32>
    %cst_72 = arith.constant 1.000000e+00 : f32
    %cst_73 = arith.constant 0.000000e+00 : f32
    %247 = vector.broadcast %cst_72 : f32 to vector<20x24xf32>
    %248 = vector.broadcast %cst_73 : f32 to vector<20x24xf32>
    %249 = arith.select %246, %247, %248 : vector<20x24xi1>, vector<20x24xf32>
    %250 = tpu.iota {dimensions = array<i32: 0>} : vector<20x24xi32>
    %251 = tpu.iota {dimensions = array<i32: 1>} : vector<20x24xi32>
    %c1_i32_74 = arith.constant 1 : i32
    %252 = vector.broadcast %c1_i32_74 : i32 to vector<20x24xi32>
    %253 = arith.muli %252, %250 : vector<20x24xi32>
    %c1_i32_75 = arith.constant 1 : i32
    %254 = vector.broadcast %c1_i32_75 : i32 to vector<20x24xi32>
    %255 = arith.addi %253, %254 : vector<20x24xi32>
    %256 = arith.cmpi eq, %251, %255 : vector<20x24xi32>
    %cst_76 = arith.constant 1.000000e+00 : f32
    %cst_77 = arith.constant 0.000000e+00 : f32
    %257 = vector.broadcast %cst_76 : f32 to vector<20x24xf32>
    %258 = vector.broadcast %cst_77 : f32 to vector<20x24xf32>
    %259 = arith.select %256, %257, %258 : vector<20x24xi1>, vector<20x24xf32>
    %260 = tpu.iota {dimensions = array<i32: 0>} : vector<20x24xi32>
    %261 = tpu.iota {dimensions = array<i32: 1>} : vector<20x24xi32>
    %c1_i32_78 = arith.constant 1 : i32
    %262 = vector.broadcast %c1_i32_78 : i32 to vector<20x24xi32>
    %263 = arith.muli %262, %260 : vector<20x24xi32>
    %c2_i32_79 = arith.constant 2 : i32
    %264 = vector.broadcast %c2_i32_79 : i32 to vector<20x24xi32>
    %265 = arith.addi %263, %264 : vector<20x24xi32>
    %266 = arith.cmpi eq, %261, %265 : vector<20x24xi32>
    %cst_80 = arith.constant 1.000000e+00 : f32
    %cst_81 = arith.constant 0.000000e+00 : f32
    %267 = vector.broadcast %cst_80 : f32 to vector<20x24xf32>
    %268 = vector.broadcast %cst_81 : f32 to vector<20x24xf32>
    %269 = arith.select %266, %267, %268 : vector<20x24xi1>, vector<20x24xf32>
    %270 = tpu.iota {dimensions = array<i32: 0>} : vector<20x24xi32>
    %271 = tpu.iota {dimensions = array<i32: 1>} : vector<20x24xi32>
    %c1_i32_82 = arith.constant 1 : i32
    %272 = vector.broadcast %c1_i32_82 : i32 to vector<20x24xi32>
    %273 = arith.muli %272, %270 : vector<20x24xi32>
    %c3_i32_83 = arith.constant 3 : i32
    %274 = vector.broadcast %c3_i32_83 : i32 to vector<20x24xi32>
    %275 = arith.addi %273, %274 : vector<20x24xi32>
    %276 = arith.cmpi eq, %271, %275 : vector<20x24xi32>
    %cst_84 = arith.constant 1.000000e+00 : f32
    %cst_85 = arith.constant 0.000000e+00 : f32
    %277 = vector.broadcast %cst_84 : f32 to vector<20x24xf32>
    %278 = vector.broadcast %cst_85 : f32 to vector<20x24xf32>
    %279 = arith.select %276, %277, %278 : vector<20x24xi1>, vector<20x24xf32>
    %280 = tpu.iota {dimensions = array<i32: 0>} : vector<20x24xi32>
    %281 = tpu.iota {dimensions = array<i32: 1>} : vector<20x24xi32>
    %c1_i32_86 = arith.constant 1 : i32
    %282 = vector.broadcast %c1_i32_86 : i32 to vector<20x24xi32>
    %283 = arith.muli %282, %280 : vector<20x24xi32>
    %c4_i32_87 = arith.constant 4 : i32
    %284 = vector.broadcast %c4_i32_87 : i32 to vector<20x24xi32>
    %285 = arith.addi %283, %284 : vector<20x24xi32>
    %286 = arith.cmpi eq, %281, %285 : vector<20x24xi32>
    %cst_88 = arith.constant 1.000000e+00 : f32
    %cst_89 = arith.constant 0.000000e+00 : f32
    %287 = vector.broadcast %cst_88 : f32 to vector<20x24xf32>
    %288 = vector.broadcast %cst_89 : f32 to vector<20x24xf32>
    %289 = arith.select %286, %287, %288 : vector<20x24xi1>, vector<20x24xf32>
    %c0_90 = arith.constant 0 : index
    %c0_91 = arith.constant 0 : index
    %290 = vector.load %arg8[%c0_90, %c0_91] : memref<320x64xf32, #tpu.memory_space<vmem>>, vector<64x64xf32>
    %c64 = arith.constant 64 : index
    %c0_92 = arith.constant 0 : index
    %291 = vector.load %arg8[%c64, %c0_92] : memref<320x64xf32, #tpu.memory_space<vmem>>, vector<64x64xf32>
    %c128 = arith.constant 128 : index
    %c0_93 = arith.constant 0 : index
    %292 = vector.load %arg8[%c128, %c0_93] : memref<320x64xf32, #tpu.memory_space<vmem>>, vector<64x64xf32>
    %c192 = arith.constant 192 : index
    %c0_94 = arith.constant 0 : index
    %293 = vector.load %arg8[%c192, %c0_94] : memref<320x64xf32, #tpu.memory_space<vmem>>, vector<64x64xf32>
    %c256 = arith.constant 256 : index
    %c0_95 = arith.constant 0 : index
    %294 = vector.load %arg8[%c256, %c0_95] : memref<320x64xf32, #tpu.memory_space<vmem>>, vector<64x64xf32>
    %cst_96 = arith.constant 0.000000e+00 : f32
    %295 = vector.broadcast %cst_96 : f32 to vector<20x64xf32>
    %c0_97 = arith.constant 0 : index
    %c0_98 = arith.constant 0 : index
    %296 = vector.load %arg9[%c0_97, %c0_98] : memref<1x64xf32, #tpu.memory_space<vmem>>, vector<1x64xf32>
    %297 = vector.broadcast %296 : vector<1x64xf32> to vector<20x64xf32>
    %298 = arith.addf %295, %297 : vector<20x64xf32>
    %cst_99 = arith.constant dense<0.000000e+00> : vector<24x64xf32>
    %299 = tpu.matmul %231, %290, %cst_99 {dimension_numbers = #tpu.dot_dimension_numbers<[1], [0], [0], [1], [0, 0, 1, 1], [], []>} : vector<24x64xf32>, vector<64x64xf32>, vector<24x64xf32> -> vector<24x64xf32>
    %cst_100 = arith.constant dense<0.000000e+00> : vector<20x64xf32>
    %300 = tpu.matmul %249, %299, %cst_100 {dimension_numbers = #tpu.dot_dimension_numbers<[1], [0], [0], [1], [0, 0, 1, 1], [], []>} : vector<20x24xf32>, vector<24x64xf32>, vector<20x64xf32> -> vector<20x64xf32>
    %301 = arith.addf %298, %300 : vector<20x64xf32>
    %cst_101 = arith.constant dense<0.000000e+00> : vector<24x64xf32>
    %302 = tpu.matmul %231, %291, %cst_101 {dimension_numbers = #tpu.dot_dimension_numbers<[1], [0], [0], [1], [0, 0, 1, 1], [], []>} : vector<24x64xf32>, vector<64x64xf32>, vector<24x64xf32> -> vector<24x64xf32>
    %cst_102 = arith.constant dense<0.000000e+00> : vector<20x64xf32>
    %303 = tpu.matmul %259, %302, %cst_102 {dimension_numbers = #tpu.dot_dimension_numbers<[1], [0], [0], [1], [0, 0, 1, 1], [], []>} : vector<20x24xf32>, vector<24x64xf32>, vector<20x64xf32> -> vector<20x64xf32>
    %304 = arith.addf %301, %303 : vector<20x64xf32>
    %cst_103 = arith.constant dense<0.000000e+00> : vector<24x64xf32>
    %305 = tpu.matmul %231, %292, %cst_103 {dimension_numbers = #tpu.dot_dimension_numbers<[1], [0], [0], [1], [0, 0, 1, 1], [], []>} : vector<24x64xf32>, vector<64x64xf32>, vector<24x64xf32> -> vector<24x64xf32>
    %cst_104 = arith.constant dense<0.000000e+00> : vector<20x64xf32>
    %306 = tpu.matmul %269, %305, %cst_104 {dimension_numbers = #tpu.dot_dimension_numbers<[1], [0], [0], [1], [0, 0, 1, 1], [], []>} : vector<20x24xf32>, vector<24x64xf32>, vector<20x64xf32> -> vector<20x64xf32>
    %307 = arith.addf %304, %306 : vector<20x64xf32>
    %cst_105 = arith.constant dense<0.000000e+00> : vector<24x64xf32>
    %308 = tpu.matmul %231, %293, %cst_105 {dimension_numbers = #tpu.dot_dimension_numbers<[1], [0], [0], [1], [0, 0, 1, 1], [], []>} : vector<24x64xf32>, vector<64x64xf32>, vector<24x64xf32> -> vector<24x64xf32>
    %cst_106 = arith.constant dense<0.000000e+00> : vector<20x64xf32>
    %309 = tpu.matmul %279, %308, %cst_106 {dimension_numbers = #tpu.dot_dimension_numbers<[1], [0], [0], [1], [0, 0, 1, 1], [], []>} : vector<20x24xf32>, vector<24x64xf32>, vector<20x64xf32> -> vector<20x64xf32>
    %310 = arith.addf %307, %309 : vector<20x64xf32>
    %cst_107 = arith.constant dense<0.000000e+00> : vector<24x64xf32>
    %311 = tpu.matmul %231, %294, %cst_107 {dimension_numbers = #tpu.dot_dimension_numbers<[1], [0], [0], [1], [0, 0, 1, 1], [], []>} : vector<24x64xf32>, vector<64x64xf32>, vector<24x64xf32> -> vector<24x64xf32>
    %cst_108 = arith.constant dense<0.000000e+00> : vector<20x64xf32>
    %312 = tpu.matmul %289, %311, %cst_108 {dimension_numbers = #tpu.dot_dimension_numbers<[1], [0], [0], [1], [0, 0, 1, 1], [], []>} : vector<20x24xf32>, vector<24x64xf32>, vector<20x64xf32> -> vector<20x64xf32>
    %313 = arith.addf %310, %312 : vector<20x64xf32>
    %cst_109 = arith.constant 0.000000e+00 : f32
    %314 = vector.broadcast %cst_109 : f32 to vector<20x64xf32>
    %c0_110 = arith.constant 0 : index
    %c0_111 = arith.constant 0 : index
    %315 = vector.load %arg9[%c0_110, %c0_111] : memref<1x64xf32, #tpu.memory_space<vmem>>, vector<1x64xf32>
    %316 = vector.broadcast %315 : vector<1x64xf32> to vector<20x64xf32>
    %317 = arith.addf %314, %316 : vector<20x64xf32>
    %cst_112 = arith.constant dense<0.000000e+00> : vector<24x64xf32>
    %318 = tpu.matmul %239, %290, %cst_112 {dimension_numbers = #tpu.dot_dimension_numbers<[1], [0], [0], [1], [0, 0, 1, 1], [], []>} : vector<24x64xf32>, vector<64x64xf32>, vector<24x64xf32> -> vector<24x64xf32>
    %cst_113 = arith.constant dense<0.000000e+00> : vector<20x64xf32>
    %319 = tpu.matmul %249, %318, %cst_113 {dimension_numbers = #tpu.dot_dimension_numbers<[1], [0], [0], [1], [0, 0, 1, 1], [], []>} : vector<20x24xf32>, vector<24x64xf32>, vector<20x64xf32> -> vector<20x64xf32>
    %320 = arith.addf %317, %319 : vector<20x64xf32>
    %cst_114 = arith.constant dense<0.000000e+00> : vector<24x64xf32>
    %321 = tpu.matmul %239, %291, %cst_114 {dimension_numbers = #tpu.dot_dimension_numbers<[1], [0], [0], [1], [0, 0, 1, 1], [], []>} : vector<24x64xf32>, vector<64x64xf32>, vector<24x64xf32> -> vector<24x64xf32>
    %cst_115 = arith.constant dense<0.000000e+00> : vector<20x64xf32>
    %322 = tpu.matmul %259, %321, %cst_115 {dimension_numbers = #tpu.dot_dimension_numbers<[1], [0], [0], [1], [0, 0, 1, 1], [], []>} : vector<20x24xf32>, vector<24x64xf32>, vector<20x64xf32> -> vector<20x64xf32>
    %323 = arith.addf %320, %322 : vector<20x64xf32>
    %cst_116 = arith.constant dense<0.000000e+00> : vector<24x64xf32>
    %324 = tpu.matmul %239, %292, %cst_116 {dimension_numbers = #tpu.dot_dimension_numbers<[1], [0], [0], [1], [0, 0, 1, 1], [], []>} : vector<24x64xf32>, vector<64x64xf32>, vector<24x64xf32> -> vector<24x64xf32>
    %cst_117 = arith.constant dense<0.000000e+00> : vector<20x64xf32>
    %325 = tpu.matmul %269, %324, %cst_117 {dimension_numbers = #tpu.dot_dimension_numbers<[1], [0], [0], [1], [0, 0, 1, 1], [], []>} : vector<20x24xf32>, vector<24x64xf32>, vector<20x64xf32> -> vector<20x64xf32>
    %326 = arith.addf %323, %325 : vector<20x64xf32>
    %cst_118 = arith.constant dense<0.000000e+00> : vector<24x64xf32>
    %327 = tpu.matmul %239, %293, %cst_118 {dimension_numbers = #tpu.dot_dimension_numbers<[1], [0], [0], [1], [0, 0, 1, 1], [], []>} : vector<24x64xf32>, vector<64x64xf32>, vector<24x64xf32> -> vector<24x64xf32>
    %cst_119 = arith.constant dense<0.000000e+00> : vector<20x64xf32>
    %328 = tpu.matmul %279, %327, %cst_119 {dimension_numbers = #tpu.dot_dimension_numbers<[1], [0], [0], [1], [0, 0, 1, 1], [], []>} : vector<20x24xf32>, vector<24x64xf32>, vector<20x64xf32> -> vector<20x64xf32>
    %329 = arith.addf %326, %328 : vector<20x64xf32>
    %cst_120 = arith.constant dense<0.000000e+00> : vector<24x64xf32>
    %330 = tpu.matmul %239, %294, %cst_120 {dimension_numbers = #tpu.dot_dimension_numbers<[1], [0], [0], [1], [0, 0, 1, 1], [], []>} : vector<24x64xf32>, vector<64x64xf32>, vector<24x64xf32> -> vector<24x64xf32>
    %cst_121 = arith.constant dense<0.000000e+00> : vector<20x64xf32>
    %331 = tpu.matmul %289, %330, %cst_121 {dimension_numbers = #tpu.dot_dimension_numbers<[1], [0], [0], [1], [0, 0, 1, 1], [], []>} : vector<20x24xf32>, vector<24x64xf32>, vector<20x64xf32> -> vector<20x64xf32>
    %332 = arith.addf %329, %331 : vector<20x64xf32>
    %333 = tpu.iota {dimensions = array<i32: 0>} : vector<10x20xi32>
    %334 = tpu.iota {dimensions = array<i32: 1>} : vector<10x20xi32>
    %c2_i32_122 = arith.constant 2 : i32
    %335 = vector.broadcast %c2_i32_122 : i32 to vector<10x20xi32>
    %336 = arith.muli %335, %333 : vector<10x20xi32>
    %c0_i32_123 = arith.constant 0 : i32
    %337 = vector.broadcast %c0_i32_123 : i32 to vector<10x20xi32>
    %338 = arith.addi %336, %337 : vector<10x20xi32>
    %339 = arith.cmpi eq, %334, %338 : vector<10x20xi32>
    %cst_124 = arith.constant 1.000000e+00 : f32
    %cst_125 = arith.constant 0.000000e+00 : f32
    %340 = vector.broadcast %cst_124 : f32 to vector<10x20xf32>
    %341 = vector.broadcast %cst_125 : f32 to vector<10x20xf32>
    %342 = arith.select %339, %340, %341 : vector<10x20xi1>, vector<10x20xf32>
    %343 = tpu.iota {dimensions = array<i32: 0>} : vector<10x20xi32>
    %344 = tpu.iota {dimensions = array<i32: 1>} : vector<10x20xi32>
    %c2_i32_126 = arith.constant 2 : i32
    %345 = vector.broadcast %c2_i32_126 : i32 to vector<10x20xi32>
    %346 = arith.muli %345, %343 : vector<10x20xi32>
    %c1_i32_127 = arith.constant 1 : i32
    %347 = vector.broadcast %c1_i32_127 : i32 to vector<10x20xi32>
    %348 = arith.addi %346, %347 : vector<10x20xi32>
    %349 = arith.cmpi eq, %344, %348 : vector<10x20xi32>
    %cst_128 = arith.constant 1.000000e+00 : f32
    %cst_129 = arith.constant 0.000000e+00 : f32
    %350 = vector.broadcast %cst_128 : f32 to vector<10x20xf32>
    %351 = vector.broadcast %cst_129 : f32 to vector<10x20xf32>
    %352 = arith.select %349, %350, %351 : vector<10x20xi1>, vector<10x20xf32>
    %cst_130 = arith.constant dense<0.000000e+00> : vector<10x64xf32>
    %353 = tpu.matmul %342, %313, %cst_130 {dimension_numbers = #tpu.dot_dimension_numbers<[1], [0], [0], [1], [0, 0, 1, 1], [], []>} : vector<10x20xf32>, vector<20x64xf32>, vector<10x64xf32> -> vector<10x64xf32>
    %cst_131 = arith.constant dense<0.000000e+00> : vector<10x64xf32>
    %354 = tpu.matmul %352, %313, %cst_131 {dimension_numbers = #tpu.dot_dimension_numbers<[1], [0], [0], [1], [0, 0, 1, 1], [], []>} : vector<10x20xf32>, vector<20x64xf32>, vector<10x64xf32> -> vector<10x64xf32>
    %355 = arith.cmpf ogt, %354, %353 : vector<10x64xf32>
    %cst_132 = arith.constant 1.000000e+00 : f32
    %cst_133 = arith.constant 0.000000e+00 : f32
    %356 = vector.broadcast %cst_132 : f32 to vector<10x64xf32>
    %357 = vector.broadcast %cst_133 : f32 to vector<10x64xf32>
    %358 = arith.select %355, %356, %357 : vector<10x64xi1>, vector<10x64xf32>
    %359 = arith.cmpf ogt, %354, %353 : vector<10x64xf32>
    %360 = arith.select %359, %354, %353 : vector<10x64xi1>, vector<10x64xf32>
    %cst_134 = arith.constant 0.000000e+00 : f32
    %361 = vector.broadcast %cst_134 : f32 to vector<10x64xf32>
    %362 = arith.cmpf ogt, %360, %361 : vector<10x64xf32>
    %cst_135 = arith.constant 0.00999999977 : f32
    %363 = vector.broadcast %cst_135 : f32 to vector<10x64xf32>
    %364 = arith.mulf %363, %360 : vector<10x64xf32>
    %365 = arith.select %362, %360, %364 : vector<10x64xi1>, vector<10x64xf32>
    %cst_136 = arith.constant dense<0.000000e+00> : vector<10x64xf32>
    %366 = tpu.matmul %342, %332, %cst_136 {dimension_numbers = #tpu.dot_dimension_numbers<[1], [0], [0], [1], [0, 0, 1, 1], [], []>} : vector<10x20xf32>, vector<20x64xf32>, vector<10x64xf32> -> vector<10x64xf32>
    %cst_137 = arith.constant dense<0.000000e+00> : vector<10x64xf32>
    %367 = tpu.matmul %352, %332, %cst_137 {dimension_numbers = #tpu.dot_dimension_numbers<[1], [0], [0], [1], [0, 0, 1, 1], [], []>} : vector<10x20xf32>, vector<20x64xf32>, vector<10x64xf32> -> vector<10x64xf32>
    %368 = arith.cmpf ogt, %367, %366 : vector<10x64xf32>
    %cst_138 = arith.constant 1.000000e+00 : f32
    %cst_139 = arith.constant 0.000000e+00 : f32
    %369 = vector.broadcast %cst_138 : f32 to vector<10x64xf32>
    %370 = vector.broadcast %cst_139 : f32 to vector<10x64xf32>
    %371 = arith.select %368, %369, %370 : vector<10x64xi1>, vector<10x64xf32>
    %372 = arith.cmpf ogt, %367, %366 : vector<10x64xf32>
    %373 = arith.select %372, %367, %366 : vector<10x64xi1>, vector<10x64xf32>
    %cst_140 = arith.constant 0.000000e+00 : f32
    %374 = vector.broadcast %cst_140 : f32 to vector<10x64xf32>
    %375 = arith.cmpf ogt, %373, %374 : vector<10x64xf32>
    %cst_141 = arith.constant 0.00999999977 : f32
    %376 = vector.broadcast %cst_141 : f32 to vector<10x64xf32>
    %377 = arith.mulf %376, %373 : vector<10x64xf32>
    %378 = arith.select %375, %373, %377 : vector<10x64xi1>, vector<10x64xf32>
    %c0_142 = arith.constant 0 : index
    %c0_143 = arith.constant 0 : index
    %379 = vector.load %arg10[%c0_142, %c0_143] : memref<1x64xf32, #tpu.memory_space<vmem>>, vector<1x64xf32>
    %c0_144 = arith.constant 0 : index
    %c0_145 = arith.constant 0 : index
    %380 = vector.load %arg11[%c0_144, %c0_145] : memref<1x64xf32, #tpu.memory_space<vmem>>, vector<1x64xf32>
    %cst_146 = arith.constant dense<0.000000e+00> : vector<64xf32>
    %381 = vector.multi_reduction <add>, %365, %cst_146 [0] : vector<10x64xf32> to vector<64xf32>
    %382 = vector.shape_cast %381 : vector<64xf32> to vector<1x64xf32>
    %cst_147 = arith.constant dense<0.000000e+00> : vector<64xf32>
    %383 = vector.multi_reduction <add>, %378, %cst_147 [0] : vector<10x64xf32> to vector<64xf32>
    %384 = vector.shape_cast %383 : vector<64xf32> to vector<1x64xf32>
    %cst_148 = arith.constant 0.000000e+00 : f32
    %385 = vector.broadcast %cst_148 : f32 to vector<1x64xf32>
    %386 = arith.addf %385, %382 : vector<1x64xf32>
    %387 = arith.addf %386, %384 : vector<1x64xf32>
    %cst_149 = arith.constant 2.000000e+01 : f32
    %388 = vector.broadcast %cst_149 : f32 to vector<1x64xf32>
    %389 = arith.divf %387, %388 : vector<1x64xf32>
    %390 = vector.broadcast %389 : vector<1x64xf32> to vector<10x64xf32>
    %391 = arith.subf %365, %390 : vector<10x64xf32>
    %392 = arith.mulf %391, %391 : vector<10x64xf32>
    %cst_150 = arith.constant dense<0.000000e+00> : vector<64xf32>
    %393 = vector.multi_reduction <add>, %392, %cst_150 [0] : vector<10x64xf32> to vector<64xf32>
    %394 = vector.shape_cast %393 : vector<64xf32> to vector<1x64xf32>
    %395 = vector.broadcast %389 : vector<1x64xf32> to vector<10x64xf32>
    %396 = arith.subf %378, %395 : vector<10x64xf32>
    %397 = arith.mulf %396, %396 : vector<10x64xf32>
    %cst_151 = arith.constant dense<0.000000e+00> : vector<64xf32>
    %398 = vector.multi_reduction <add>, %397, %cst_151 [0] : vector<10x64xf32> to vector<64xf32>
    %399 = vector.shape_cast %398 : vector<64xf32> to vector<1x64xf32>
    %cst_152 = arith.constant 0.000000e+00 : f32
    %400 = vector.broadcast %cst_152 : f32 to vector<1x64xf32>
    %401 = arith.addf %400, %394 : vector<1x64xf32>
    %402 = arith.addf %401, %399 : vector<1x64xf32>
    %cst_153 = arith.constant 2.000000e+01 : f32
    %403 = vector.broadcast %cst_153 : f32 to vector<1x64xf32>
    %404 = arith.divf %402, %403 : vector<1x64xf32>
    %cst_154 = arith.constant 9.99999974E-6 : f32
    %405 = vector.broadcast %cst_154 : f32 to vector<1x64xf32>
    %406 = arith.addf %404, %405 : vector<1x64xf32>
    %407 = math.rsqrt %406 : vector<1x64xf32>
    %408 = vector.broadcast %389 : vector<1x64xf32> to vector<10x64xf32>
    %409 = arith.subf %365, %408 : vector<10x64xf32>
    %410 = vector.broadcast %407 : vector<1x64xf32> to vector<10x64xf32>
    %411 = arith.mulf %409, %410 : vector<10x64xf32>
    %412 = vector.broadcast %379 : vector<1x64xf32> to vector<10x64xf32>
    %413 = arith.mulf %411, %412 : vector<10x64xf32>
    %414 = vector.broadcast %380 : vector<1x64xf32> to vector<10x64xf32>
    %415 = arith.addf %413, %414 : vector<10x64xf32>
    %416 = vector.broadcast %389 : vector<1x64xf32> to vector<10x64xf32>
    %417 = arith.subf %378, %416 : vector<10x64xf32>
    %418 = vector.broadcast %407 : vector<1x64xf32> to vector<10x64xf32>
    %419 = arith.mulf %417, %418 : vector<10x64xf32>
    %420 = vector.broadcast %379 : vector<1x64xf32> to vector<10x64xf32>
    %421 = arith.mulf %419, %420 : vector<10x64xf32>
    %422 = vector.broadcast %380 : vector<1x64xf32> to vector<10x64xf32>
    %423 = arith.addf %421, %422 : vector<10x64xf32>
    %424 = tpu.iota {dimensions = array<i32: 0>} : vector<8x10xi32>
    %425 = tpu.iota {dimensions = array<i32: 1>} : vector<8x10xi32>
    %c1_i32_155 = arith.constant 1 : i32
    %426 = vector.broadcast %c1_i32_155 : i32 to vector<8x10xi32>
    %427 = arith.muli %426, %424 : vector<8x10xi32>
    %c0_i32_156 = arith.constant 0 : i32
    %428 = vector.broadcast %c0_i32_156 : i32 to vector<8x10xi32>
    %429 = arith.addi %427, %428 : vector<8x10xi32>
    %430 = arith.cmpi eq, %425, %429 : vector<8x10xi32>
    %cst_157 = arith.constant 1.000000e+00 : f32
    %cst_158 = arith.constant 0.000000e+00 : f32
    %431 = vector.broadcast %cst_157 : f32 to vector<8x10xf32>
    %432 = vector.broadcast %cst_158 : f32 to vector<8x10xf32>
    %433 = arith.select %430, %431, %432 : vector<8x10xi1>, vector<8x10xf32>
    %434 = tpu.iota {dimensions = array<i32: 0>} : vector<8x10xi32>
    %435 = tpu.iota {dimensions = array<i32: 1>} : vector<8x10xi32>
    %c1_i32_159 = arith.constant 1 : i32
    %436 = vector.broadcast %c1_i32_159 : i32 to vector<8x10xi32>
    %437 = arith.muli %436, %434 : vector<8x10xi32>
    %c1_i32_160 = arith.constant 1 : i32
    %438 = vector.broadcast %c1_i32_160 : i32 to vector<8x10xi32>
    %439 = arith.addi %437, %438 : vector<8x10xi32>
    %440 = arith.cmpi eq, %435, %439 : vector<8x10xi32>
    %cst_161 = arith.constant 1.000000e+00 : f32
    %cst_162 = arith.constant 0.000000e+00 : f32
    %441 = vector.broadcast %cst_161 : f32 to vector<8x10xf32>
    %442 = vector.broadcast %cst_162 : f32 to vector<8x10xf32>
    %443 = arith.select %440, %441, %442 : vector<8x10xi1>, vector<8x10xf32>
    %444 = tpu.iota {dimensions = array<i32: 0>} : vector<8x10xi32>
    %445 = tpu.iota {dimensions = array<i32: 1>} : vector<8x10xi32>
    %c1_i32_163 = arith.constant 1 : i32
    %446 = vector.broadcast %c1_i32_163 : i32 to vector<8x10xi32>
    %447 = arith.muli %446, %444 : vector<8x10xi32>
    %c2_i32_164 = arith.constant 2 : i32
    %448 = vector.broadcast %c2_i32_164 : i32 to vector<8x10xi32>
    %449 = arith.addi %447, %448 : vector<8x10xi32>
    %450 = arith.cmpi eq, %445, %449 : vector<8x10xi32>
    %cst_165 = arith.constant 1.000000e+00 : f32
    %cst_166 = arith.constant 0.000000e+00 : f32
    %451 = vector.broadcast %cst_165 : f32 to vector<8x10xf32>
    %452 = vector.broadcast %cst_166 : f32 to vector<8x10xf32>
    %453 = arith.select %450, %451, %452 : vector<8x10xi1>, vector<8x10xf32>
    %c0_167 = arith.constant 0 : index
    %c0_168 = arith.constant 0 : index
    %454 = vector.load %arg12[%c0_167, %c0_168] : memref<192x64xf32, #tpu.memory_space<vmem>>, vector<64x64xf32>
    %c64_169 = arith.constant 64 : index
    %c0_170 = arith.constant 0 : index
    %455 = vector.load %arg12[%c64_169, %c0_170] : memref<192x64xf32, #tpu.memory_space<vmem>>, vector<64x64xf32>
    %c128_171 = arith.constant 128 : index
    %c0_172 = arith.constant 0 : index
    %456 = vector.load %arg12[%c128_171, %c0_172] : memref<192x64xf32, #tpu.memory_space<vmem>>, vector<64x64xf32>
    %cst_173 = arith.constant 0.000000e+00 : f32
    %457 = vector.broadcast %cst_173 : f32 to vector<8x64xf32>
    %c0_174 = arith.constant 0 : index
    %c0_175 = arith.constant 0 : index
    %458 = vector.load %arg13[%c0_174, %c0_175] : memref<1x64xf32, #tpu.memory_space<vmem>>, vector<1x64xf32>
    %459 = vector.broadcast %458 : vector<1x64xf32> to vector<8x64xf32>
    %460 = arith.addf %457, %459 : vector<8x64xf32>
    %cst_176 = arith.constant dense<0.000000e+00> : vector<10x64xf32>
    %461 = tpu.matmul %415, %454, %cst_176 {dimension_numbers = #tpu.dot_dimension_numbers<[1], [0], [0], [1], [0, 0, 1, 1], [], []>} : vector<10x64xf32>, vector<64x64xf32>, vector<10x64xf32> -> vector<10x64xf32>
    %cst_177 = arith.constant dense<0.000000e+00> : vector<8x64xf32>
    %462 = tpu.matmul %433, %461, %cst_177 {dimension_numbers = #tpu.dot_dimension_numbers<[1], [0], [0], [1], [0, 0, 1, 1], [], []>} : vector<8x10xf32>, vector<10x64xf32>, vector<8x64xf32> -> vector<8x64xf32>
    %463 = arith.addf %460, %462 : vector<8x64xf32>
    %cst_178 = arith.constant dense<0.000000e+00> : vector<10x64xf32>
    %464 = tpu.matmul %415, %455, %cst_178 {dimension_numbers = #tpu.dot_dimension_numbers<[1], [0], [0], [1], [0, 0, 1, 1], [], []>} : vector<10x64xf32>, vector<64x64xf32>, vector<10x64xf32> -> vector<10x64xf32>
    %cst_179 = arith.constant dense<0.000000e+00> : vector<8x64xf32>
    %465 = tpu.matmul %443, %464, %cst_179 {dimension_numbers = #tpu.dot_dimension_numbers<[1], [0], [0], [1], [0, 0, 1, 1], [], []>} : vector<8x10xf32>, vector<10x64xf32>, vector<8x64xf32> -> vector<8x64xf32>
    %466 = arith.addf %463, %465 : vector<8x64xf32>
    %cst_180 = arith.constant dense<0.000000e+00> : vector<10x64xf32>
    %467 = tpu.matmul %415, %456, %cst_180 {dimension_numbers = #tpu.dot_dimension_numbers<[1], [0], [0], [1], [0, 0, 1, 1], [], []>} : vector<10x64xf32>, vector<64x64xf32>, vector<10x64xf32> -> vector<10x64xf32>
    %cst_181 = arith.constant dense<0.000000e+00> : vector<8x64xf32>
    %468 = tpu.matmul %453, %467, %cst_181 {dimension_numbers = #tpu.dot_dimension_numbers<[1], [0], [0], [1], [0, 0, 1, 1], [], []>} : vector<8x10xf32>, vector<10x64xf32>, vector<8x64xf32> -> vector<8x64xf32>
    %469 = arith.addf %466, %468 : vector<8x64xf32>
    %cst_182 = arith.constant 0.000000e+00 : f32
    %470 = vector.broadcast %cst_182 : f32 to vector<8x64xf32>
    %c0_183 = arith.constant 0 : index
    %c0_184 = arith.constant 0 : index
    %471 = vector.load %arg13[%c0_183, %c0_184] : memref<1x64xf32, #tpu.memory_space<vmem>>, vector<1x64xf32>
    %472 = vector.broadcast %471 : vector<1x64xf32> to vector<8x64xf32>
    %473 = arith.addf %470, %472 : vector<8x64xf32>
    %cst_185 = arith.constant dense<0.000000e+00> : vector<10x64xf32>
    %474 = tpu.matmul %423, %454, %cst_185 {dimension_numbers = #tpu.dot_dimension_numbers<[1], [0], [0], [1], [0, 0, 1, 1], [], []>} : vector<10x64xf32>, vector<64x64xf32>, vector<10x64xf32> -> vector<10x64xf32>
    %cst_186 = arith.constant dense<0.000000e+00> : vector<8x64xf32>
    %475 = tpu.matmul %433, %474, %cst_186 {dimension_numbers = #tpu.dot_dimension_numbers<[1], [0], [0], [1], [0, 0, 1, 1], [], []>} : vector<8x10xf32>, vector<10x64xf32>, vector<8x64xf32> -> vector<8x64xf32>
    %476 = arith.addf %473, %475 : vector<8x64xf32>
    %cst_187 = arith.constant dense<0.000000e+00> : vector<10x64xf32>
    %477 = tpu.matmul %423, %455, %cst_187 {dimension_numbers = #tpu.dot_dimension_numbers<[1], [0], [0], [1], [0, 0, 1, 1], [], []>} : vector<10x64xf32>, vector<64x64xf32>, vector<10x64xf32> -> vector<10x64xf32>
    %cst_188 = arith.constant dense<0.000000e+00> : vector<8x64xf32>
    %478 = tpu.matmul %443, %477, %cst_188 {dimension_numbers = #tpu.dot_dimension_numbers<[1], [0], [0], [1], [0, 0, 1, 1], [], []>} : vector<8x10xf32>, vector<10x64xf32>, vector<8x64xf32> -> vector<8x64xf32>
    %479 = arith.addf %476, %478 : vector<8x64xf32>
    %cst_189 = arith.constant dense<0.000000e+00> : vector<10x64xf32>
    %480 = tpu.matmul %423, %456, %cst_189 {dimension_numbers = #tpu.dot_dimension_numbers<[1], [0], [0], [1], [0, 0, 1, 1], [], []>} : vector<10x64xf32>, vector<64x64xf32>, vector<10x64xf32> -> vector<10x64xf32>
    %cst_190 = arith.constant dense<0.000000e+00> : vector<8x64xf32>
    %481 = tpu.matmul %453, %480, %cst_190 {dimension_numbers = #tpu.dot_dimension_numbers<[1], [0], [0], [1], [0, 0, 1, 1], [], []>} : vector<8x10xf32>, vector<10x64xf32>, vector<8x64xf32> -> vector<8x64xf32>
    %482 = arith.addf %479, %481 : vector<8x64xf32>
    %c0_191 = arith.constant 0 : index
    %c0_192 = arith.constant 0 : index
    %483 = vector.load %arg14[%c0_191, %c0_192] : memref<512x64xf32, #tpu.memory_space<vmem>>, vector<64x64xf32>
    %c64_193 = arith.constant 64 : index
    %c0_194 = arith.constant 0 : index
    %484 = vector.load %arg14[%c64_193, %c0_194] : memref<512x64xf32, #tpu.memory_space<vmem>>, vector<64x64xf32>
    %c128_195 = arith.constant 128 : index
    %c0_196 = arith.constant 0 : index
    %485 = vector.load %arg14[%c128_195, %c0_196] : memref<512x64xf32, #tpu.memory_space<vmem>>, vector<64x64xf32>
    %c192_197 = arith.constant 192 : index
    %c0_198 = arith.constant 0 : index
    %486 = vector.load %arg14[%c192_197, %c0_198] : memref<512x64xf32, #tpu.memory_space<vmem>>, vector<64x64xf32>
    %c256_199 = arith.constant 256 : index
    %c0_200 = arith.constant 0 : index
    %487 = vector.load %arg14[%c256_199, %c0_200] : memref<512x64xf32, #tpu.memory_space<vmem>>, vector<64x64xf32>
    %c320 = arith.constant 320 : index
    %c0_201 = arith.constant 0 : index
    %488 = vector.load %arg14[%c320, %c0_201] : memref<512x64xf32, #tpu.memory_space<vmem>>, vector<64x64xf32>
    %c384 = arith.constant 384 : index
    %c0_202 = arith.constant 0 : index
    %489 = vector.load %arg14[%c384, %c0_202] : memref<512x64xf32, #tpu.memory_space<vmem>>, vector<64x64xf32>
    %c448 = arith.constant 448 : index
    %c0_203 = arith.constant 0 : index
    %490 = vector.load %arg14[%c448, %c0_203] : memref<512x64xf32, #tpu.memory_space<vmem>>, vector<64x64xf32>
    %c0_204 = arith.constant 0 : index
    %c0_205 = arith.constant 0 : index
    %491 = vector.load %arg15[%c0_204, %c0_205] : memref<1x64xf32, #tpu.memory_space<vmem>>, vector<1x64xf32>
    %c0_206 = arith.constant 0 : index
    %c0_207 = arith.constant 0 : index
    %492 = vector.load %arg16[%c0_206, %c0_207] : memref<32x512xf32, #tpu.memory_space<vmem>>, vector<32x512xf32>
    %c0_208 = arith.constant 0 : index
    %c0_209 = arith.constant 0 : index
    %493 = vector.load %arg17[%c0_208, %c0_209] : memref<1x512xf32, #tpu.memory_space<vmem>>, vector<1x512xf32>
    %494 = tpu.iota {dimensions = array<i32: 0>} : vector<8x1xi32>
    %c0_i32_210 = arith.constant 0 : i32
    %495 = vector.broadcast %c0_i32_210 : i32 to vector<8x1xi32>
    %496 = arith.cmpi eq, %494, %495 : vector<8x1xi32>
    %cst_211 = arith.constant 1.000000e+00 : f32
    %cst_212 = arith.constant 0.000000e+00 : f32
    %497 = vector.broadcast %cst_211 : f32 to vector<8x1xf32>
    %498 = vector.broadcast %cst_212 : f32 to vector<8x1xf32>
    %499 = arith.select %496, %497, %498 : vector<8x1xi1>, vector<8x1xf32>
    %500 = tpu.iota {dimensions = array<i32: 0>} : vector<8x1xi32>
    %c1_i32_213 = arith.constant 1 : i32
    %501 = vector.broadcast %c1_i32_213 : i32 to vector<8x1xi32>
    %502 = arith.cmpi eq, %500, %501 : vector<8x1xi32>
    %cst_214 = arith.constant 1.000000e+00 : f32
    %cst_215 = arith.constant 0.000000e+00 : f32
    %503 = vector.broadcast %cst_214 : f32 to vector<8x1xf32>
    %504 = vector.broadcast %cst_215 : f32 to vector<8x1xf32>
    %505 = arith.select %502, %503, %504 : vector<8x1xi1>, vector<8x1xf32>
    %506 = tpu.iota {dimensions = array<i32: 0>} : vector<8x1xi32>
    %c2_i32_216 = arith.constant 2 : i32
    %507 = vector.broadcast %c2_i32_216 : i32 to vector<8x1xi32>
    %508 = arith.cmpi eq, %506, %507 : vector<8x1xi32>
    %cst_217 = arith.constant 1.000000e+00 : f32
    %cst_218 = arith.constant 0.000000e+00 : f32
    %509 = vector.broadcast %cst_217 : f32 to vector<8x1xf32>
    %510 = vector.broadcast %cst_218 : f32 to vector<8x1xf32>
    %511 = arith.select %508, %509, %510 : vector<8x1xi1>, vector<8x1xf32>
    %512 = tpu.iota {dimensions = array<i32: 0>} : vector<8x1xi32>
    %c3_i32_219 = arith.constant 3 : i32
    %513 = vector.broadcast %c3_i32_219 : i32 to vector<8x1xi32>
    %514 = arith.cmpi eq, %512, %513 : vector<8x1xi32>
    %cst_220 = arith.constant 1.000000e+00 : f32
    %cst_221 = arith.constant 0.000000e+00 : f32
    %515 = vector.broadcast %cst_220 : f32 to vector<8x1xf32>
    %516 = vector.broadcast %cst_221 : f32 to vector<8x1xf32>
    %517 = arith.select %514, %515, %516 : vector<8x1xi1>, vector<8x1xf32>
    %518 = tpu.iota {dimensions = array<i32: 0>} : vector<8x1xi32>
    %c4_i32_222 = arith.constant 4 : i32
    %519 = vector.broadcast %c4_i32_222 : i32 to vector<8x1xi32>
    %520 = arith.cmpi eq, %518, %519 : vector<8x1xi32>
    %cst_223 = arith.constant 1.000000e+00 : f32
    %cst_224 = arith.constant 0.000000e+00 : f32
    %521 = vector.broadcast %cst_223 : f32 to vector<8x1xf32>
    %522 = vector.broadcast %cst_224 : f32 to vector<8x1xf32>
    %523 = arith.select %520, %521, %522 : vector<8x1xi1>, vector<8x1xf32>
    %524 = tpu.iota {dimensions = array<i32: 0>} : vector<8x1xi32>
    %c5_i32 = arith.constant 5 : i32
    %525 = vector.broadcast %c5_i32 : i32 to vector<8x1xi32>
    %526 = arith.cmpi eq, %524, %525 : vector<8x1xi32>
    %cst_225 = arith.constant 1.000000e+00 : f32
    %cst_226 = arith.constant 0.000000e+00 : f32
    %527 = vector.broadcast %cst_225 : f32 to vector<8x1xf32>
    %528 = vector.broadcast %cst_226 : f32 to vector<8x1xf32>
    %529 = arith.select %526, %527, %528 : vector<8x1xi1>, vector<8x1xf32>
    %530 = tpu.iota {dimensions = array<i32: 0>} : vector<8x1xi32>
    %c6_i32 = arith.constant 6 : i32
    %531 = vector.broadcast %c6_i32 : i32 to vector<8x1xi32>
    %532 = arith.cmpi eq, %530, %531 : vector<8x1xi32>
    %cst_227 = arith.constant 1.000000e+00 : f32
    %cst_228 = arith.constant 0.000000e+00 : f32
    %533 = vector.broadcast %cst_227 : f32 to vector<8x1xf32>
    %534 = vector.broadcast %cst_228 : f32 to vector<8x1xf32>
    %535 = arith.select %532, %533, %534 : vector<8x1xi1>, vector<8x1xf32>
    %536 = tpu.iota {dimensions = array<i32: 0>} : vector<8x1xi32>
    %c7_i32 = arith.constant 7 : i32
    %537 = vector.broadcast %c7_i32 : i32 to vector<8x1xi32>
    %538 = arith.cmpi eq, %536, %537 : vector<8x1xi32>
    %cst_229 = arith.constant 1.000000e+00 : f32
    %cst_230 = arith.constant 0.000000e+00 : f32
    %539 = vector.broadcast %cst_229 : f32 to vector<8x1xf32>
    %540 = vector.broadcast %cst_230 : f32 to vector<8x1xf32>
    %541 = arith.select %538, %539, %540 : vector<8x1xi1>, vector<8x1xf32>
    %cst_231 = arith.constant 0.000000e+00 : f32
    %542 = vector.broadcast %cst_231 : f32 to vector<1x64xf32>
    %543 = arith.addf %542, %491 : vector<1x64xf32>
    %544 = vector.extract_strided_slice %469 {offsets = [0, 0], sizes = [1, 64], strides = [1, 1]} : vector<8x64xf32> to vector<1x64xf32>
    %cst_232 = arith.constant dense<0.000000e+00> : vector<1x64xf32>
    %545 = tpu.matmul %544, %483, %cst_232 {dimension_numbers = #tpu.dot_dimension_numbers<[1], [0], [0], [1], [0, 0, 1, 1], [], []>} : vector<1x64xf32>, vector<64x64xf32>, vector<1x64xf32> -> vector<1x64xf32>
    %546 = arith.addf %543, %545 : vector<1x64xf32>
    %547 = vector.extract_strided_slice %469 {offsets = [1, 0], sizes = [1, 64], strides = [1, 1]} : vector<8x64xf32> to vector<1x64xf32>
    %cst_233 = arith.constant dense<0.000000e+00> : vector<1x64xf32>
    %548 = tpu.matmul %547, %484, %cst_233 {dimension_numbers = #tpu.dot_dimension_numbers<[1], [0], [0], [1], [0, 0, 1, 1], [], []>} : vector<1x64xf32>, vector<64x64xf32>, vector<1x64xf32> -> vector<1x64xf32>
    %549 = arith.addf %546, %548 : vector<1x64xf32>
    %550 = vector.extract_strided_slice %469 {offsets = [2, 0], sizes = [1, 64], strides = [1, 1]} : vector<8x64xf32> to vector<1x64xf32>
    %cst_234 = arith.constant dense<0.000000e+00> : vector<1x64xf32>
    %551 = tpu.matmul %550, %485, %cst_234 {dimension_numbers = #tpu.dot_dimension_numbers<[1], [0], [0], [1], [0, 0, 1, 1], [], []>} : vector<1x64xf32>, vector<64x64xf32>, vector<1x64xf32> -> vector<1x64xf32>
    %552 = arith.addf %549, %551 : vector<1x64xf32>
    %553 = vector.extract_strided_slice %469 {offsets = [3, 0], sizes = [1, 64], strides = [1, 1]} : vector<8x64xf32> to vector<1x64xf32>
    %cst_235 = arith.constant dense<0.000000e+00> : vector<1x64xf32>
    %554 = tpu.matmul %553, %486, %cst_235 {dimension_numbers = #tpu.dot_dimension_numbers<[1], [0], [0], [1], [0, 0, 1, 1], [], []>} : vector<1x64xf32>, vector<64x64xf32>, vector<1x64xf32> -> vector<1x64xf32>
    %555 = arith.addf %552, %554 : vector<1x64xf32>
    %556 = vector.extract_strided_slice %469 {offsets = [4, 0], sizes = [1, 64], strides = [1, 1]} : vector<8x64xf32> to vector<1x64xf32>
    %cst_236 = arith.constant dense<0.000000e+00> : vector<1x64xf32>
    %557 = tpu.matmul %556, %487, %cst_236 {dimension_numbers = #tpu.dot_dimension_numbers<[1], [0], [0], [1], [0, 0, 1, 1], [], []>} : vector<1x64xf32>, vector<64x64xf32>, vector<1x64xf32> -> vector<1x64xf32>
    %558 = arith.addf %555, %557 : vector<1x64xf32>
    %559 = vector.extract_strided_slice %469 {offsets = [5, 0], sizes = [1, 64], strides = [1, 1]} : vector<8x64xf32> to vector<1x64xf32>
    %cst_237 = arith.constant dense<0.000000e+00> : vector<1x64xf32>
    %560 = tpu.matmul %559, %488, %cst_237 {dimension_numbers = #tpu.dot_dimension_numbers<[1], [0], [0], [1], [0, 0, 1, 1], [], []>} : vector<1x64xf32>, vector<64x64xf32>, vector<1x64xf32> -> vector<1x64xf32>
    %561 = arith.addf %558, %560 : vector<1x64xf32>
    %562 = vector.extract_strided_slice %469 {offsets = [6, 0], sizes = [1, 64], strides = [1, 1]} : vector<8x64xf32> to vector<1x64xf32>
    %cst_238 = arith.constant dense<0.000000e+00> : vector<1x64xf32>
    %563 = tpu.matmul %562, %489, %cst_238 {dimension_numbers = #tpu.dot_dimension_numbers<[1], [0], [0], [1], [0, 0, 1, 1], [], []>} : vector<1x64xf32>, vector<64x64xf32>, vector<1x64xf32> -> vector<1x64xf32>
    %564 = arith.addf %561, %563 : vector<1x64xf32>
    %565 = vector.extract_strided_slice %469 {offsets = [7, 0], sizes = [1, 64], strides = [1, 1]} : vector<8x64xf32> to vector<1x64xf32>
    %cst_239 = arith.constant dense<0.000000e+00> : vector<1x64xf32>
    %566 = tpu.matmul %565, %490, %cst_239 {dimension_numbers = #tpu.dot_dimension_numbers<[1], [0], [0], [1], [0, 0, 1, 1], [], []>} : vector<1x64xf32>, vector<64x64xf32>, vector<1x64xf32> -> vector<1x64xf32>
    %567 = arith.addf %564, %566 : vector<1x64xf32>
    %568 = vector.extract_strided_slice %567 {offsets = [0, 0], sizes = [1, 32], strides = [1, 1]} : vector<1x64xf32> to vector<1x32xf32>
    %569 = vector.extract_strided_slice %567 {offsets = [0, 32], sizes = [1, 32], strides = [1, 1]} : vector<1x64xf32> to vector<1x32xf32>
    %c0_240 = arith.constant 0 : index
    %c0_241 = arith.constant 0 : index
    %570 = vector.load %arg25[%c0_240, %c0_241] : memref<2x32xf32, #tpu.memory_space<vmem>>, vector<1x32xf32>
    tpu.vector_store %arg25[%c0_240, %c0_241], %568 {strides = array<i32>} : memref<2x32xf32, #tpu.memory_space<vmem>>, vector<1x32xf32>,
    %c0_242 = arith.constant 0 : index
    %c0_243 = arith.constant 0 : index
    %571 = vector.load %arg26[%c0_242, %c0_243] : memref<2x32xf32, #tpu.memory_space<vmem>>, vector<1x32xf32>
    tpu.vector_store %arg26[%c0_242, %c0_243], %569 {strides = array<i32>} : memref<2x32xf32, #tpu.memory_space<vmem>>, vector<1x32xf32>,
    %c0_244 = arith.constant 0 : index
    %c0_245 = arith.constant 0 : index
    %572 = vector.load %arg1[%c0_244, %c0_245] : memref<2x32xf32, #tpu.memory_space<vmem>>, vector<1x32xf32>
    %573 = math.exp %569 : vector<1x32xf32>
    %574 = arith.mulf %572, %573 : vector<1x32xf32>
    %575 = arith.addf %568, %574 : vector<1x32xf32>
    %cst_246 = arith.constant dense<0.000000e+00> : vector<1x512xf32>
    %576 = tpu.matmul %575, %492, %cst_246 {dimension_numbers = #tpu.dot_dimension_numbers<[1], [0], [0], [1], [0, 0, 1, 1], [], []>} : vector<1x32xf32>, vector<32x512xf32>, vector<1x512xf32> -> vector<1x512xf32>
    %577 = arith.addf %576, %493 : vector<1x512xf32>
    %cst_247 = arith.constant 0.000000e+00 : f32
    %578 = vector.broadcast %cst_247 : f32 to vector<8x64xf32>
    %579 = vector.extract_strided_slice %577 {offsets = [0, 0], sizes = [1, 64], strides = [1, 1]} : vector<1x512xf32> to vector<1x64xf32>
    %580 = vector.broadcast %499 : vector<8x1xf32> to vector<8x64xf32>
    %581 = vector.broadcast %579 : vector<1x64xf32> to vector<8x64xf32>
    %582 = arith.mulf %580, %581 : vector<8x64xf32>
    %583 = arith.addf %578, %582 : vector<8x64xf32>
    %584 = vector.extract_strided_slice %577 {offsets = [0, 64], sizes = [1, 64], strides = [1, 1]} : vector<1x512xf32> to vector<1x64xf32>
    %585 = vector.broadcast %505 : vector<8x1xf32> to vector<8x64xf32>
    %586 = vector.broadcast %584 : vector<1x64xf32> to vector<8x64xf32>
    %587 = arith.mulf %585, %586 : vector<8x64xf32>
    %588 = arith.addf %583, %587 : vector<8x64xf32>
    %589 = vector.extract_strided_slice %577 {offsets = [0, 128], sizes = [1, 64], strides = [1, 1]} : vector<1x512xf32> to vector<1x64xf32>
    %590 = vector.broadcast %511 : vector<8x1xf32> to vector<8x64xf32>
    %591 = vector.broadcast %589 : vector<1x64xf32> to vector<8x64xf32>
    %592 = arith.mulf %590, %591 : vector<8x64xf32>
    %593 = arith.addf %588, %592 : vector<8x64xf32>
    %594 = vector.extract_strided_slice %577 {offsets = [0, 192], sizes = [1, 64], strides = [1, 1]} : vector<1x512xf32> to vector<1x64xf32>
    %595 = vector.broadcast %517 : vector<8x1xf32> to vector<8x64xf32>
    %596 = vector.broadcast %594 : vector<1x64xf32> to vector<8x64xf32>
    %597 = arith.mulf %595, %596 : vector<8x64xf32>
    %598 = arith.addf %593, %597 : vector<8x64xf32>
    %599 = vector.extract_strided_slice %577 {offsets = [0, 256], sizes = [1, 64], strides = [1, 1]} : vector<1x512xf32> to vector<1x64xf32>
    %600 = vector.broadcast %523 : vector<8x1xf32> to vector<8x64xf32>
    %601 = vector.broadcast %599 : vector<1x64xf32> to vector<8x64xf32>
    %602 = arith.mulf %600, %601 : vector<8x64xf32>
    %603 = arith.addf %598, %602 : vector<8x64xf32>
    %604 = vector.extract_strided_slice %577 {offsets = [0, 320], sizes = [1, 64], strides = [1, 1]} : vector<1x512xf32> to vector<1x64xf32>
    %605 = vector.broadcast %529 : vector<8x1xf32> to vector<8x64xf32>
    %606 = vector.broadcast %604 : vector<1x64xf32> to vector<8x64xf32>
    %607 = arith.mulf %605, %606 : vector<8x64xf32>
    %608 = arith.addf %603, %607 : vector<8x64xf32>
    %609 = vector.extract_strided_slice %577 {offsets = [0, 384], sizes = [1, 64], strides = [1, 1]} : vector<1x512xf32> to vector<1x64xf32>
    %610 = vector.broadcast %535 : vector<8x1xf32> to vector<8x64xf32>
    %611 = vector.broadcast %609 : vector<1x64xf32> to vector<8x64xf32>
    %612 = arith.mulf %610, %611 : vector<8x64xf32>
    %613 = arith.addf %608, %612 : vector<8x64xf32>
    %614 = vector.extract_strided_slice %577 {offsets = [0, 448], sizes = [1, 64], strides = [1, 1]} : vector<1x512xf32> to vector<1x64xf32>
    %615 = vector.broadcast %541 : vector<8x1xf32> to vector<8x64xf32>
    %616 = vector.broadcast %614 : vector<1x64xf32> to vector<8x64xf32>
    %617 = arith.mulf %615, %616 : vector<8x64xf32>
    %618 = arith.addf %613, %617 : vector<8x64xf32>
    %cst_248 = arith.constant 0.000000e+00 : f32
    %619 = vector.broadcast %cst_248 : f32 to vector<1x64xf32>
    %620 = arith.addf %619, %491 : vector<1x64xf32>
    %621 = vector.extract_strided_slice %482 {offsets = [0, 0], sizes = [1, 64], strides = [1, 1]} : vector<8x64xf32> to vector<1x64xf32>
    %cst_249 = arith.constant dense<0.000000e+00> : vector<1x64xf32>
    %622 = tpu.matmul %621, %483, %cst_249 {dimension_numbers = #tpu.dot_dimension_numbers<[1], [0], [0], [1], [0, 0, 1, 1], [], []>} : vector<1x64xf32>, vector<64x64xf32>, vector<1x64xf32> -> vector<1x64xf32>
    %623 = arith.addf %620, %622 : vector<1x64xf32>
    %624 = vector.extract_strided_slice %482 {offsets = [1, 0], sizes = [1, 64], strides = [1, 1]} : vector<8x64xf32> to vector<1x64xf32>
    %cst_250 = arith.constant dense<0.000000e+00> : vector<1x64xf32>
    %625 = tpu.matmul %624, %484, %cst_250 {dimension_numbers = #tpu.dot_dimension_numbers<[1], [0], [0], [1], [0, 0, 1, 1], [], []>} : vector<1x64xf32>, vector<64x64xf32>, vector<1x64xf32> -> vector<1x64xf32>
    %626 = arith.addf %623, %625 : vector<1x64xf32>
    %627 = vector.extract_strided_slice %482 {offsets = [2, 0], sizes = [1, 64], strides = [1, 1]} : vector<8x64xf32> to vector<1x64xf32>
    %cst_251 = arith.constant dense<0.000000e+00> : vector<1x64xf32>
    %628 = tpu.matmul %627, %485, %cst_251 {dimension_numbers = #tpu.dot_dimension_numbers<[1], [0], [0], [1], [0, 0, 1, 1], [], []>} : vector<1x64xf32>, vector<64x64xf32>, vector<1x64xf32> -> vector<1x64xf32>
    %629 = arith.addf %626, %628 : vector<1x64xf32>
    %630 = vector.extract_strided_slice %482 {offsets = [3, 0], sizes = [1, 64], strides = [1, 1]} : vector<8x64xf32> to vector<1x64xf32>
    %cst_252 = arith.constant dense<0.000000e+00> : vector<1x64xf32>
    %631 = tpu.matmul %630, %486, %cst_252 {dimension_numbers = #tpu.dot_dimension_numbers<[1], [0], [0], [1], [0, 0, 1, 1], [], []>} : vector<1x64xf32>, vector<64x64xf32>, vector<1x64xf32> -> vector<1x64xf32>
    %632 = arith.addf %629, %631 : vector<1x64xf32>
    %633 = vector.extract_strided_slice %482 {offsets = [4, 0], sizes = [1, 64], strides = [1, 1]} : vector<8x64xf32> to vector<1x64xf32>
    %cst_253 = arith.constant dense<0.000000e+00> : vector<1x64xf32>
    %634 = tpu.matmul %633, %487, %cst_253 {dimension_numbers = #tpu.dot_dimension_numbers<[1], [0], [0], [1], [0, 0, 1, 1], [], []>} : vector<1x64xf32>, vector<64x64xf32>, vector<1x64xf32> -> vector<1x64xf32>
    %635 = arith.addf %632, %634 : vector<1x64xf32>
    %636 = vector.extract_strided_slice %482 {offsets = [5, 0], sizes = [1, 64], strides = [1, 1]} : vector<8x64xf32> to vector<1x64xf32>
    %cst_254 = arith.constant dense<0.000000e+00> : vector<1x64xf32>
    %637 = tpu.matmul %636, %488, %cst_254 {dimension_numbers = #tpu.dot_dimension_numbers<[1], [0], [0], [1], [0, 0, 1, 1], [], []>} : vector<1x64xf32>, vector<64x64xf32>, vector<1x64xf32> -> vector<1x64xf32>
    %638 = arith.addf %635, %637 : vector<1x64xf32>
    %639 = vector.extract_strided_slice %482 {offsets = [6, 0], sizes = [1, 64], strides = [1, 1]} : vector<8x64xf32> to vector<1x64xf32>
    %cst_255 = arith.constant dense<0.000000e+00> : vector<1x64xf32>
    %640 = tpu.matmul %639, %489, %cst_255 {dimension_numbers = #tpu.dot_dimension_numbers<[1], [0], [0], [1], [0, 0, 1, 1], [], []>} : vector<1x64xf32>, vector<64x64xf32>, vector<1x64xf32> -> vector<1x64xf32>
    %641 = arith.addf %638, %640 : vector<1x64xf32>
    %642 = vector.extract_strided_slice %482 {offsets = [7, 0], sizes = [1, 64], strides = [1, 1]} : vector<8x64xf32> to vector<1x64xf32>
    %cst_256 = arith.constant dense<0.000000e+00> : vector<1x64xf32>
    %643 = tpu.matmul %642, %490, %cst_256 {dimension_numbers = #tpu.dot_dimension_numbers<[1], [0], [0], [1], [0, 0, 1, 1], [], []>} : vector<1x64xf32>, vector<64x64xf32>, vector<1x64xf32> -> vector<1x64xf32>
    %644 = arith.addf %641, %643 : vector<1x64xf32>
    %645 = vector.extract_strided_slice %644 {offsets = [0, 0], sizes = [1, 32], strides = [1, 1]} : vector<1x64xf32> to vector<1x32xf32>
    %646 = vector.extract_strided_slice %644 {offsets = [0, 32], sizes = [1, 32], strides = [1, 1]} : vector<1x64xf32> to vector<1x32xf32>
    %c1 = arith.constant 1 : index
    %c0_257 = arith.constant 0 : index
    %647 = vector.load %arg25[%c1, %c0_257] : memref<2x32xf32, #tpu.memory_space<vmem>>, vector<1x32xf32>
    tpu.vector_store %arg25[%c1, %c0_257], %645 {strides = array<i32>} : memref<2x32xf32, #tpu.memory_space<vmem>>, vector<1x32xf32>,
    %c1_258 = arith.constant 1 : index
    %c0_259 = arith.constant 0 : index
    %648 = vector.load %arg26[%c1_258, %c0_259] : memref<2x32xf32, #tpu.memory_space<vmem>>, vector<1x32xf32>
    tpu.vector_store %arg26[%c1_258, %c0_259], %646 {strides = array<i32>} : memref<2x32xf32, #tpu.memory_space<vmem>>, vector<1x32xf32>,
    %c1_260 = arith.constant 1 : index
    %c0_261 = arith.constant 0 : index
    %649 = vector.load %arg1[%c1_260, %c0_261] : memref<2x32xf32, #tpu.memory_space<vmem>>, vector<1x32xf32>
    %650 = math.exp %646 : vector<1x32xf32>
    %651 = arith.mulf %649, %650 : vector<1x32xf32>
    %652 = arith.addf %645, %651 : vector<1x32xf32>
    %cst_262 = arith.constant dense<0.000000e+00> : vector<1x512xf32>
    %653 = tpu.matmul %652, %492, %cst_262 {dimension_numbers = #tpu.dot_dimension_numbers<[1], [0], [0], [1], [0, 0, 1, 1], [], []>} : vector<1x32xf32>, vector<32x512xf32>, vector<1x512xf32> -> vector<1x512xf32>
    %654 = arith.addf %653, %493 : vector<1x512xf32>
    %cst_263 = arith.constant 0.000000e+00 : f32
    %655 = vector.broadcast %cst_263 : f32 to vector<8x64xf32>
    %656 = vector.extract_strided_slice %654 {offsets = [0, 0], sizes = [1, 64], strides = [1, 1]} : vector<1x512xf32> to vector<1x64xf32>
    %657 = vector.broadcast %499 : vector<8x1xf32> to vector<8x64xf32>
    %658 = vector.broadcast %656 : vector<1x64xf32> to vector<8x64xf32>
    %659 = arith.mulf %657, %658 : vector<8x64xf32>
    %660 = arith.addf %655, %659 : vector<8x64xf32>
    %661 = vector.extract_strided_slice %654 {offsets = [0, 64], sizes = [1, 64], strides = [1, 1]} : vector<1x512xf32> to vector<1x64xf32>
    %662 = vector.broadcast %505 : vector<8x1xf32> to vector<8x64xf32>
    %663 = vector.broadcast %661 : vector<1x64xf32> to vector<8x64xf32>
    %664 = arith.mulf %662, %663 : vector<8x64xf32>
    %665 = arith.addf %660, %664 : vector<8x64xf32>
    %666 = vector.extract_strided_slice %654 {offsets = [0, 128], sizes = [1, 64], strides = [1, 1]} : vector<1x512xf32> to vector<1x64xf32>
    %667 = vector.broadcast %511 : vector<8x1xf32> to vector<8x64xf32>
    %668 = vector.broadcast %666 : vector<1x64xf32> to vector<8x64xf32>
    %669 = arith.mulf %667, %668 : vector<8x64xf32>
    %670 = arith.addf %665, %669 : vector<8x64xf32>
    %671 = vector.extract_strided_slice %654 {offsets = [0, 192], sizes = [1, 64], strides = [1, 1]} : vector<1x512xf32> to vector<1x64xf32>
    %672 = vector.broadcast %517 : vector<8x1xf32> to vector<8x64xf32>
    %673 = vector.broadcast %671 : vector<1x64xf32> to vector<8x64xf32>
    %674 = arith.mulf %672, %673 : vector<8x64xf32>
    %675 = arith.addf %670, %674 : vector<8x64xf32>
    %676 = vector.extract_strided_slice %654 {offsets = [0, 256], sizes = [1, 64], strides = [1, 1]} : vector<1x512xf32> to vector<1x64xf32>
    %677 = vector.broadcast %523 : vector<8x1xf32> to vector<8x64xf32>
    %678 = vector.broadcast %676 : vector<1x64xf32> to vector<8x64xf32>
    %679 = arith.mulf %677, %678 : vector<8x64xf32>
    %680 = arith.addf %675, %679 : vector<8x64xf32>
    %681 = vector.extract_strided_slice %654 {offsets = [0, 320], sizes = [1, 64], strides = [1, 1]} : vector<1x512xf32> to vector<1x64xf32>
    %682 = vector.broadcast %529 : vector<8x1xf32> to vector<8x64xf32>
    %683 = vector.broadcast %681 : vector<1x64xf32> to vector<8x64xf32>
    %684 = arith.mulf %682, %683 : vector<8x64xf32>
    %685 = arith.addf %680, %684 : vector<8x64xf32>
    %686 = vector.extract_strided_slice %654 {offsets = [0, 384], sizes = [1, 64], strides = [1, 1]} : vector<1x512xf32> to vector<1x64xf32>
    %687 = vector.broadcast %535 : vector<8x1xf32> to vector<8x64xf32>
    %688 = vector.broadcast %686 : vector<1x64xf32> to vector<8x64xf32>
    %689 = arith.mulf %687, %688 : vector<8x64xf32>
    %690 = arith.addf %685, %689 : vector<8x64xf32>
    %691 = vector.extract_strided_slice %654 {offsets = [0, 448], sizes = [1, 64], strides = [1, 1]} : vector<1x512xf32> to vector<1x64xf32>
    %692 = vector.broadcast %541 : vector<8x1xf32> to vector<8x64xf32>
    %693 = vector.broadcast %691 : vector<1x64xf32> to vector<8x64xf32>
    %694 = arith.mulf %692, %693 : vector<8x64xf32>
    %695 = arith.addf %690, %694 : vector<8x64xf32>
    %696 = tpu.iota {dimensions = array<i32: 0>} : vector<10x8xi32>
    %697 = tpu.iota {dimensions = array<i32: 1>} : vector<10x8xi32>
    %c1_i32_264 = arith.constant 1 : i32
    %698 = vector.broadcast %c1_i32_264 : i32 to vector<10x8xi32>
    %699 = arith.muli %698, %696 : vector<10x8xi32>
    %c0_i32_265 = arith.constant 0 : i32
    %700 = vector.broadcast %c0_i32_265 : i32 to vector<10x8xi32>
    %701 = arith.addi %699, %700 : vector<10x8xi32>
    %702 = arith.cmpi eq, %697, %701 : vector<10x8xi32>
    %cst_266 = arith.constant 1.000000e+00 : f32
    %cst_267 = arith.constant 0.000000e+00 : f32
    %703 = vector.broadcast %cst_266 : f32 to vector<10x8xf32>
    %704 = vector.broadcast %cst_267 : f32 to vector<10x8xf32>
    %705 = arith.select %702, %703, %704 : vector<10x8xi1>, vector<10x8xf32>
    %706 = tpu.iota {dimensions = array<i32: 0>} : vector<10x8xi32>
    %707 = tpu.iota {dimensions = array<i32: 1>} : vector<10x8xi32>
    %c1_i32_268 = arith.constant 1 : i32
    %708 = vector.broadcast %c1_i32_268 : i32 to vector<10x8xi32>
    %709 = arith.muli %708, %706 : vector<10x8xi32>
    %c-1_i32 = arith.constant -1 : i32
    %710 = vector.broadcast %c-1_i32 : i32 to vector<10x8xi32>
    %711 = arith.addi %709, %710 : vector<10x8xi32>
    %712 = arith.cmpi eq, %707, %711 : vector<10x8xi32>
    %cst_269 = arith.constant 1.000000e+00 : f32
    %cst_270 = arith.constant 0.000000e+00 : f32
    %713 = vector.broadcast %cst_269 : f32 to vector<10x8xf32>
    %714 = vector.broadcast %cst_270 : f32 to vector<10x8xf32>
    %715 = arith.select %712, %713, %714 : vector<10x8xi1>, vector<10x8xf32>
    %716 = tpu.iota {dimensions = array<i32: 0>} : vector<10x8xi32>
    %717 = tpu.iota {dimensions = array<i32: 1>} : vector<10x8xi32>
    %c1_i32_271 = arith.constant 1 : i32
    %718 = vector.broadcast %c1_i32_271 : i32 to vector<10x8xi32>
    %719 = arith.muli %718, %716 : vector<10x8xi32>
    %c-2_i32 = arith.constant -2 : i32
    %720 = vector.broadcast %c-2_i32 : i32 to vector<10x8xi32>
    %721 = arith.addi %719, %720 : vector<10x8xi32>
    %722 = arith.cmpi eq, %717, %721 : vector<10x8xi32>
    %cst_272 = arith.constant 1.000000e+00 : f32
    %cst_273 = arith.constant 0.000000e+00 : f32
    %723 = vector.broadcast %cst_272 : f32 to vector<10x8xf32>
    %724 = vector.broadcast %cst_273 : f32 to vector<10x8xf32>
    %725 = arith.select %722, %723, %724 : vector<10x8xi1>, vector<10x8xf32>
    %c0_274 = arith.constant 0 : index
    %c0_275 = arith.constant 0 : index
    %726 = vector.load %arg18[%c0_274, %c0_275] : memref<192x64xf32, #tpu.memory_space<vmem>>, vector<64x64xf32>
    %c64_276 = arith.constant 64 : index
    %c0_277 = arith.constant 0 : index
    %727 = vector.load %arg18[%c64_276, %c0_277] : memref<192x64xf32, #tpu.memory_space<vmem>>, vector<64x64xf32>
    %c128_278 = arith.constant 128 : index
    %c0_279 = arith.constant 0 : index
    %728 = vector.load %arg18[%c128_278, %c0_279] : memref<192x64xf32, #tpu.memory_space<vmem>>, vector<64x64xf32>
    %729 = tpu.iota {dimensions = array<i32: 0>} : vector<20x10xi32>
    %730 = tpu.iota {dimensions = array<i32: 1>} : vector<20x10xi32>
    %c2_i32_280 = arith.constant 2 : i32
    %731 = vector.broadcast %c2_i32_280 : i32 to vector<20x10xi32>
    %732 = arith.muli %731, %730 : vector<20x10xi32>
    %c0_i32_281 = arith.constant 0 : i32
    %733 = vector.broadcast %c0_i32_281 : i32 to vector<20x10xi32>
    %734 = arith.addi %732, %733 : vector<20x10xi32>
    %735 = arith.cmpi eq, %729, %734 : vector<20x10xi32>
    %cst_282 = arith.constant 1.000000e+00 : f32
    %cst_283 = arith.constant 0.000000e+00 : f32
    %736 = vector.broadcast %cst_282 : f32 to vector<20x10xf32>
    %737 = vector.broadcast %cst_283 : f32 to vector<20x10xf32>
    %738 = arith.select %735, %736, %737 : vector<20x10xi1>, vector<20x10xf32>
    %739 = tpu.iota {dimensions = array<i32: 0>} : vector<20x10xi32>
    %740 = tpu.iota {dimensions = array<i32: 1>} : vector<20x10xi32>
    %c2_i32_284 = arith.constant 2 : i32
    %741 = vector.broadcast %c2_i32_284 : i32 to vector<20x10xi32>
    %742 = arith.muli %741, %740 : vector<20x10xi32>
    %c1_i32_285 = arith.constant 1 : i32
    %743 = vector.broadcast %c1_i32_285 : i32 to vector<20x10xi32>
    %744 = arith.addi %742, %743 : vector<20x10xi32>
    %745 = arith.cmpi eq, %739, %744 : vector<20x10xi32>
    %cst_286 = arith.constant 1.000000e+00 : f32
    %cst_287 = arith.constant 0.000000e+00 : f32
    %746 = vector.broadcast %cst_286 : f32 to vector<20x10xf32>
    %747 = vector.broadcast %cst_287 : f32 to vector<20x10xf32>
    %748 = arith.select %745, %746, %747 : vector<20x10xi1>, vector<20x10xf32>
    %cst_288 = arith.constant 0.000000e+00 : f32
    %749 = vector.broadcast %cst_288 : f32 to vector<10x64xf32>
    %c0_289 = arith.constant 0 : index
    %c0_290 = arith.constant 0 : index
    %750 = vector.load %arg19[%c0_289, %c0_290] : memref<1x64xf32, #tpu.memory_space<vmem>>, vector<1x64xf32>
    %751 = vector.broadcast %750 : vector<1x64xf32> to vector<10x64xf32>
    %752 = arith.addf %749, %751 : vector<10x64xf32>
    %cst_291 = arith.constant dense<0.000000e+00> : vector<8x64xf32>
    %753 = tpu.matmul %618, %726, %cst_291 {dimension_numbers = #tpu.dot_dimension_numbers<[1], [0], [0], [1], [0, 0, 1, 1], [], []>} : vector<8x64xf32>, vector<64x64xf32>, vector<8x64xf32> -> vector<8x64xf32>
    %cst_292 = arith.constant dense<0.000000e+00> : vector<10x64xf32>
    %754 = tpu.matmul %705, %753, %cst_292 {dimension_numbers = #tpu.dot_dimension_numbers<[1], [0], [0], [1], [0, 0, 1, 1], [], []>} : vector<10x8xf32>, vector<8x64xf32>, vector<10x64xf32> -> vector<10x64xf32>
    %755 = arith.addf %752, %754 : vector<10x64xf32>
    %cst_293 = arith.constant dense<0.000000e+00> : vector<8x64xf32>
    %756 = tpu.matmul %618, %727, %cst_293 {dimension_numbers = #tpu.dot_dimension_numbers<[1], [0], [0], [1], [0, 0, 1, 1], [], []>} : vector<8x64xf32>, vector<64x64xf32>, vector<8x64xf32> -> vector<8x64xf32>
    %cst_294 = arith.constant dense<0.000000e+00> : vector<10x64xf32>
    %757 = tpu.matmul %715, %756, %cst_294 {dimension_numbers = #tpu.dot_dimension_numbers<[1], [0], [0], [1], [0, 0, 1, 1], [], []>} : vector<10x8xf32>, vector<8x64xf32>, vector<10x64xf32> -> vector<10x64xf32>
    %758 = arith.addf %755, %757 : vector<10x64xf32>
    %cst_295 = arith.constant dense<0.000000e+00> : vector<8x64xf32>
    %759 = tpu.matmul %618, %728, %cst_295 {dimension_numbers = #tpu.dot_dimension_numbers<[1], [0], [0], [1], [0, 0, 1, 1], [], []>} : vector<8x64xf32>, vector<64x64xf32>, vector<8x64xf32> -> vector<8x64xf32>
    %cst_296 = arith.constant dense<0.000000e+00> : vector<10x64xf32>
    %760 = tpu.matmul %725, %759, %cst_296 {dimension_numbers = #tpu.dot_dimension_numbers<[1], [0], [0], [1], [0, 0, 1, 1], [], []>} : vector<10x8xf32>, vector<8x64xf32>, vector<10x64xf32> -> vector<10x64xf32>
    %761 = arith.addf %758, %760 : vector<10x64xf32>
    %cst_297 = arith.constant 0.000000e+00 : f32
    %762 = vector.broadcast %cst_297 : f32 to vector<10x64xf32>
    %763 = arith.cmpf ogt, %761, %762 : vector<10x64xf32>
    %cst_298 = arith.constant 0.00999999977 : f32
    %764 = vector.broadcast %cst_298 : f32 to vector<10x64xf32>
    %765 = arith.mulf %764, %761 : vector<10x64xf32>
    %766 = arith.select %763, %761, %765 : vector<10x64xi1>, vector<10x64xf32>
    %cst_299 = arith.constant 1.000000e+00 : f32
    %767 = vector.broadcast %cst_299 : f32 to vector<10x64xf32>
    %768 = arith.subf %767, %358 : vector<10x64xf32>
    %769 = arith.mulf %766, %768 : vector<10x64xf32>
    %cst_300 = arith.constant dense<0.000000e+00> : vector<20x64xf32>
    %770 = tpu.matmul %738, %769, %cst_300 {dimension_numbers = #tpu.dot_dimension_numbers<[1], [0], [0], [1], [0, 0, 1, 1], [], []>} : vector<20x10xf32>, vector<10x64xf32>, vector<20x64xf32> -> vector<20x64xf32>
    %771 = arith.mulf %766, %358 : vector<10x64xf32>
    %cst_301 = arith.constant dense<0.000000e+00> : vector<20x64xf32>
    %772 = tpu.matmul %748, %771, %cst_301 {dimension_numbers = #tpu.dot_dimension_numbers<[1], [0], [0], [1], [0, 0, 1, 1], [], []>} : vector<20x10xf32>, vector<10x64xf32>, vector<20x64xf32> -> vector<20x64xf32>
    %773 = arith.addf %770, %772 : vector<20x64xf32>
    %cst_302 = arith.constant 0.000000e+00 : f32
    %774 = vector.broadcast %cst_302 : f32 to vector<10x64xf32>
    %c0_303 = arith.constant 0 : index
    %c0_304 = arith.constant 0 : index
    %775 = vector.load %arg19[%c0_303, %c0_304] : memref<1x64xf32, #tpu.memory_space<vmem>>, vector<1x64xf32>
    %776 = vector.broadcast %775 : vector<1x64xf32> to vector<10x64xf32>
    %777 = arith.addf %774, %776 : vector<10x64xf32>
    %cst_305 = arith.constant dense<0.000000e+00> : vector<8x64xf32>
    %778 = tpu.matmul %695, %726, %cst_305 {dimension_numbers = #tpu.dot_dimension_numbers<[1], [0], [0], [1], [0, 0, 1, 1], [], []>} : vector<8x64xf32>, vector<64x64xf32>, vector<8x64xf32> -> vector<8x64xf32>
    %cst_306 = arith.constant dense<0.000000e+00> : vector<10x64xf32>
    %779 = tpu.matmul %705, %778, %cst_306 {dimension_numbers = #tpu.dot_dimension_numbers<[1], [0], [0], [1], [0, 0, 1, 1], [], []>} : vector<10x8xf32>, vector<8x64xf32>, vector<10x64xf32> -> vector<10x64xf32>
    %780 = arith.addf %777, %779 : vector<10x64xf32>
    %cst_307 = arith.constant dense<0.000000e+00> : vector<8x64xf32>
    %781 = tpu.matmul %695, %727, %cst_307 {dimension_numbers = #tpu.dot_dimension_numbers<[1], [0], [0], [1], [0, 0, 1, 1], [], []>} : vector<8x64xf32>, vector<64x64xf32>, vector<8x64xf32> -> vector<8x64xf32>
    %cst_308 = arith.constant dense<0.000000e+00> : vector<10x64xf32>
    %782 = tpu.matmul %715, %781, %cst_308 {dimension_numbers = #tpu.dot_dimension_numbers<[1], [0], [0], [1], [0, 0, 1, 1], [], []>} : vector<10x8xf32>, vector<8x64xf32>, vector<10x64xf32> -> vector<10x64xf32>
    %783 = arith.addf %780, %782 : vector<10x64xf32>
    %cst_309 = arith.constant dense<0.000000e+00> : vector<8x64xf32>
    %784 = tpu.matmul %695, %728, %cst_309 {dimension_numbers = #tpu.dot_dimension_numbers<[1], [0], [0], [1], [0, 0, 1, 1], [], []>} : vector<8x64xf32>, vector<64x64xf32>, vector<8x64xf32> -> vector<8x64xf32>
    %cst_310 = arith.constant dense<0.000000e+00> : vector<10x64xf32>
    %785 = tpu.matmul %725, %784, %cst_310 {dimension_numbers = #tpu.dot_dimension_numbers<[1], [0], [0], [1], [0, 0, 1, 1], [], []>} : vector<10x8xf32>, vector<8x64xf32>, vector<10x64xf32> -> vector<10x64xf32>
    %786 = arith.addf %783, %785 : vector<10x64xf32>
    %cst_311 = arith.constant 0.000000e+00 : f32
    %787 = vector.broadcast %cst_311 : f32 to vector<10x64xf32>
    %788 = arith.cmpf ogt, %786, %787 : vector<10x64xf32>
    %cst_312 = arith.constant 0.00999999977 : f32
    %789 = vector.broadcast %cst_312 : f32 to vector<10x64xf32>
    %790 = arith.mulf %789, %786 : vector<10x64xf32>
    %791 = arith.select %788, %786, %790 : vector<10x64xi1>, vector<10x64xf32>
    %cst_313 = arith.constant 1.000000e+00 : f32
    %792 = vector.broadcast %cst_313 : f32 to vector<10x64xf32>
    %793 = arith.subf %792, %371 : vector<10x64xf32>
    %794 = arith.mulf %791, %793 : vector<10x64xf32>
    %cst_314 = arith.constant dense<0.000000e+00> : vector<20x64xf32>
    %795 = tpu.matmul %738, %794, %cst_314 {dimension_numbers = #tpu.dot_dimension_numbers<[1], [0], [0], [1], [0, 0, 1, 1], [], []>} : vector<20x10xf32>, vector<10x64xf32>, vector<20x64xf32> -> vector<20x64xf32>
    %796 = arith.mulf %791, %371 : vector<10x64xf32>
    %cst_315 = arith.constant dense<0.000000e+00> : vector<20x64xf32>
    %797 = tpu.matmul %748, %796, %cst_315 {dimension_numbers = #tpu.dot_dimension_numbers<[1], [0], [0], [1], [0, 0, 1, 1], [], []>} : vector<20x10xf32>, vector<10x64xf32>, vector<20x64xf32> -> vector<20x64xf32>
    %798 = arith.addf %795, %797 : vector<20x64xf32>
    %799 = tpu.iota {dimensions = array<i32: 0>} : vector<24x20xi32>
    %800 = tpu.iota {dimensions = array<i32: 1>} : vector<24x20xi32>
    %c1_i32_316 = arith.constant 1 : i32
    %801 = vector.broadcast %c1_i32_316 : i32 to vector<24x20xi32>
    %802 = arith.muli %801, %799 : vector<24x20xi32>
    %c0_i32_317 = arith.constant 0 : i32
    %803 = vector.broadcast %c0_i32_317 : i32 to vector<24x20xi32>
    %804 = arith.addi %802, %803 : vector<24x20xi32>
    %805 = arith.cmpi eq, %800, %804 : vector<24x20xi32>
    %cst_318 = arith.constant 1.000000e+00 : f32
    %cst_319 = arith.constant 0.000000e+00 : f32
    %806 = vector.broadcast %cst_318 : f32 to vector<24x20xf32>
    %807 = vector.broadcast %cst_319 : f32 to vector<24x20xf32>
    %808 = arith.select %805, %806, %807 : vector<24x20xi1>, vector<24x20xf32>
    %809 = tpu.iota {dimensions = array<i32: 0>} : vector<24x20xi32>
    %810 = tpu.iota {dimensions = array<i32: 1>} : vector<24x20xi32>
    %c1_i32_320 = arith.constant 1 : i32
    %811 = vector.broadcast %c1_i32_320 : i32 to vector<24x20xi32>
    %812 = arith.muli %811, %809 : vector<24x20xi32>
    %c-1_i32_321 = arith.constant -1 : i32
    %813 = vector.broadcast %c-1_i32_321 : i32 to vector<24x20xi32>
    %814 = arith.addi %812, %813 : vector<24x20xi32>
    %815 = arith.cmpi eq, %810, %814 : vector<24x20xi32>
    %cst_322 = arith.constant 1.000000e+00 : f32
    %cst_323 = arith.constant 0.000000e+00 : f32
    %816 = vector.broadcast %cst_322 : f32 to vector<24x20xf32>
    %817 = vector.broadcast %cst_323 : f32 to vector<24x20xf32>
    %818 = arith.select %815, %816, %817 : vector<24x20xi1>, vector<24x20xf32>
    %819 = tpu.iota {dimensions = array<i32: 0>} : vector<24x20xi32>
    %820 = tpu.iota {dimensions = array<i32: 1>} : vector<24x20xi32>
    %c1_i32_324 = arith.constant 1 : i32
    %821 = vector.broadcast %c1_i32_324 : i32 to vector<24x20xi32>
    %822 = arith.muli %821, %819 : vector<24x20xi32>
    %c-2_i32_325 = arith.constant -2 : i32
    %823 = vector.broadcast %c-2_i32_325 : i32 to vector<24x20xi32>
    %824 = arith.addi %822, %823 : vector<24x20xi32>
    %825 = arith.cmpi eq, %820, %824 : vector<24x20xi32>
    %cst_326 = arith.constant 1.000000e+00 : f32
    %cst_327 = arith.constant 0.000000e+00 : f32
    %826 = vector.broadcast %cst_326 : f32 to vector<24x20xf32>
    %827 = vector.broadcast %cst_327 : f32 to vector<24x20xf32>
    %828 = arith.select %825, %826, %827 : vector<24x20xi1>, vector<24x20xf32>
    %829 = tpu.iota {dimensions = array<i32: 0>} : vector<24x20xi32>
    %830 = tpu.iota {dimensions = array<i32: 1>} : vector<24x20xi32>
    %c1_i32_328 = arith.constant 1 : i32
    %831 = vector.broadcast %c1_i32_328 : i32 to vector<24x20xi32>
    %832 = arith.muli %831, %829 : vector<24x20xi32>
    %c-3_i32 = arith.constant -3 : i32
    %833 = vector.broadcast %c-3_i32 : i32 to vector<24x20xi32>
    %834 = arith.addi %832, %833 : vector<24x20xi32>
    %835 = arith.cmpi eq, %830, %834 : vector<24x20xi32>
    %cst_329 = arith.constant 1.000000e+00 : f32
    %cst_330 = arith.constant 0.000000e+00 : f32
    %836 = vector.broadcast %cst_329 : f32 to vector<24x20xf32>
    %837 = vector.broadcast %cst_330 : f32 to vector<24x20xf32>
    %838 = arith.select %835, %836, %837 : vector<24x20xi1>, vector<24x20xf32>
    %839 = tpu.iota {dimensions = array<i32: 0>} : vector<24x20xi32>
    %840 = tpu.iota {dimensions = array<i32: 1>} : vector<24x20xi32>
    %c1_i32_331 = arith.constant 1 : i32
    %841 = vector.broadcast %c1_i32_331 : i32 to vector<24x20xi32>
    %842 = arith.muli %841, %839 : vector<24x20xi32>
    %c-4_i32 = arith.constant -4 : i32
    %843 = vector.broadcast %c-4_i32 : i32 to vector<24x20xi32>
    %844 = arith.addi %842, %843 : vector<24x20xi32>
    %845 = arith.cmpi eq, %840, %844 : vector<24x20xi32>
    %cst_332 = arith.constant 1.000000e+00 : f32
    %cst_333 = arith.constant 0.000000e+00 : f32
    %846 = vector.broadcast %cst_332 : f32 to vector<24x20xf32>
    %847 = vector.broadcast %cst_333 : f32 to vector<24x20xf32>
    %848 = arith.select %845, %846, %847 : vector<24x20xi1>, vector<24x20xf32>
    %c0_334 = arith.constant 0 : index
    %c0_335 = arith.constant 0 : index
    %849 = vector.load %arg20[%c0_334, %c0_335] : memref<320x64xf32, #tpu.memory_space<vmem>>, vector<64x64xf32>
    %c64_336 = arith.constant 64 : index
    %c0_337 = arith.constant 0 : index
    %850 = vector.load %arg20[%c64_336, %c0_337] : memref<320x64xf32, #tpu.memory_space<vmem>>, vector<64x64xf32>
    %c128_338 = arith.constant 128 : index
    %c0_339 = arith.constant 0 : index
    %851 = vector.load %arg20[%c128_338, %c0_339] : memref<320x64xf32, #tpu.memory_space<vmem>>, vector<64x64xf32>
    %c192_340 = arith.constant 192 : index
    %c0_341 = arith.constant 0 : index
    %852 = vector.load %arg20[%c192_340, %c0_341] : memref<320x64xf32, #tpu.memory_space<vmem>>, vector<64x64xf32>
    %c256_342 = arith.constant 256 : index
    %c0_343 = arith.constant 0 : index
    %853 = vector.load %arg20[%c256_342, %c0_343] : memref<320x64xf32, #tpu.memory_space<vmem>>, vector<64x64xf32>
    %854 = tpu.iota {dimensions = array<i32: 0>} : vector<48x24xi32>
    %855 = tpu.iota {dimensions = array<i32: 1>} : vector<48x24xi32>
    %c2_i32_344 = arith.constant 2 : i32
    %856 = vector.broadcast %c2_i32_344 : i32 to vector<48x24xi32>
    %857 = arith.muli %856, %855 : vector<48x24xi32>
    %c0_i32_345 = arith.constant 0 : i32
    %858 = vector.broadcast %c0_i32_345 : i32 to vector<48x24xi32>
    %859 = arith.addi %857, %858 : vector<48x24xi32>
    %860 = arith.cmpi eq, %854, %859 : vector<48x24xi32>
    %cst_346 = arith.constant 1.000000e+00 : f32
    %cst_347 = arith.constant 0.000000e+00 : f32
    %861 = vector.broadcast %cst_346 : f32 to vector<48x24xf32>
    %862 = vector.broadcast %cst_347 : f32 to vector<48x24xf32>
    %863 = arith.select %860, %861, %862 : vector<48x24xi1>, vector<48x24xf32>
    %864 = tpu.iota {dimensions = array<i32: 0>} : vector<48x24xi32>
    %865 = tpu.iota {dimensions = array<i32: 1>} : vector<48x24xi32>
    %c2_i32_348 = arith.constant 2 : i32
    %866 = vector.broadcast %c2_i32_348 : i32 to vector<48x24xi32>
    %867 = arith.muli %866, %865 : vector<48x24xi32>
    %c1_i32_349 = arith.constant 1 : i32
    %868 = vector.broadcast %c1_i32_349 : i32 to vector<48x24xi32>
    %869 = arith.addi %867, %868 : vector<48x24xi32>
    %870 = arith.cmpi eq, %864, %869 : vector<48x24xi32>
    %cst_350 = arith.constant 1.000000e+00 : f32
    %cst_351 = arith.constant 0.000000e+00 : f32
    %871 = vector.broadcast %cst_350 : f32 to vector<48x24xf32>
    %872 = vector.broadcast %cst_351 : f32 to vector<48x24xf32>
    %873 = arith.select %870, %871, %872 : vector<48x24xi1>, vector<48x24xf32>
    %cst_352 = arith.constant 0.000000e+00 : f32
    %874 = vector.broadcast %cst_352 : f32 to vector<24x64xf32>
    %c0_353 = arith.constant 0 : index
    %c0_354 = arith.constant 0 : index
    %875 = vector.load %arg21[%c0_353, %c0_354] : memref<1x64xf32, #tpu.memory_space<vmem>>, vector<1x64xf32>
    %876 = vector.broadcast %875 : vector<1x64xf32> to vector<24x64xf32>
    %877 = arith.addf %874, %876 : vector<24x64xf32>
    %cst_355 = arith.constant dense<0.000000e+00> : vector<20x64xf32>
    %878 = tpu.matmul %773, %849, %cst_355 {dimension_numbers = #tpu.dot_dimension_numbers<[1], [0], [0], [1], [0, 0, 1, 1], [], []>} : vector<20x64xf32>, vector<64x64xf32>, vector<20x64xf32> -> vector<20x64xf32>
    %cst_356 = arith.constant dense<0.000000e+00> : vector<24x64xf32>
    %879 = tpu.matmul %808, %878, %cst_356 {dimension_numbers = #tpu.dot_dimension_numbers<[1], [0], [0], [1], [0, 0, 1, 1], [], []>} : vector<24x20xf32>, vector<20x64xf32>, vector<24x64xf32> -> vector<24x64xf32>
    %880 = arith.addf %877, %879 : vector<24x64xf32>
    %cst_357 = arith.constant dense<0.000000e+00> : vector<20x64xf32>
    %881 = tpu.matmul %773, %850, %cst_357 {dimension_numbers = #tpu.dot_dimension_numbers<[1], [0], [0], [1], [0, 0, 1, 1], [], []>} : vector<20x64xf32>, vector<64x64xf32>, vector<20x64xf32> -> vector<20x64xf32>
    %cst_358 = arith.constant dense<0.000000e+00> : vector<24x64xf32>
    %882 = tpu.matmul %818, %881, %cst_358 {dimension_numbers = #tpu.dot_dimension_numbers<[1], [0], [0], [1], [0, 0, 1, 1], [], []>} : vector<24x20xf32>, vector<20x64xf32>, vector<24x64xf32> -> vector<24x64xf32>
    %883 = arith.addf %880, %882 : vector<24x64xf32>
    %cst_359 = arith.constant dense<0.000000e+00> : vector<20x64xf32>
    %884 = tpu.matmul %773, %851, %cst_359 {dimension_numbers = #tpu.dot_dimension_numbers<[1], [0], [0], [1], [0, 0, 1, 1], [], []>} : vector<20x64xf32>, vector<64x64xf32>, vector<20x64xf32> -> vector<20x64xf32>
    %cst_360 = arith.constant dense<0.000000e+00> : vector<24x64xf32>
    %885 = tpu.matmul %828, %884, %cst_360 {dimension_numbers = #tpu.dot_dimension_numbers<[1], [0], [0], [1], [0, 0, 1, 1], [], []>} : vector<24x20xf32>, vector<20x64xf32>, vector<24x64xf32> -> vector<24x64xf32>
    %886 = arith.addf %883, %885 : vector<24x64xf32>
    %cst_361 = arith.constant dense<0.000000e+00> : vector<20x64xf32>
    %887 = tpu.matmul %773, %852, %cst_361 {dimension_numbers = #tpu.dot_dimension_numbers<[1], [0], [0], [1], [0, 0, 1, 1], [], []>} : vector<20x64xf32>, vector<64x64xf32>, vector<20x64xf32> -> vector<20x64xf32>
    %cst_362 = arith.constant dense<0.000000e+00> : vector<24x64xf32>
    %888 = tpu.matmul %838, %887, %cst_362 {dimension_numbers = #tpu.dot_dimension_numbers<[1], [0], [0], [1], [0, 0, 1, 1], [], []>} : vector<24x20xf32>, vector<20x64xf32>, vector<24x64xf32> -> vector<24x64xf32>
    %889 = arith.addf %886, %888 : vector<24x64xf32>
    %cst_363 = arith.constant dense<0.000000e+00> : vector<20x64xf32>
    %890 = tpu.matmul %773, %853, %cst_363 {dimension_numbers = #tpu.dot_dimension_numbers<[1], [0], [0], [1], [0, 0, 1, 1], [], []>} : vector<20x64xf32>, vector<64x64xf32>, vector<20x64xf32> -> vector<20x64xf32>
    %cst_364 = arith.constant dense<0.000000e+00> : vector<24x64xf32>
    %891 = tpu.matmul %848, %890, %cst_364 {dimension_numbers = #tpu.dot_dimension_numbers<[1], [0], [0], [1], [0, 0, 1, 1], [], []>} : vector<24x20xf32>, vector<20x64xf32>, vector<24x64xf32> -> vector<24x64xf32>
    %892 = arith.addf %889, %891 : vector<24x64xf32>
    %cst_365 = arith.constant 0.000000e+00 : f32
    %893 = vector.broadcast %cst_365 : f32 to vector<24x64xf32>
    %894 = arith.cmpf ogt, %892, %893 : vector<24x64xf32>
    %cst_366 = arith.constant 0.00999999977 : f32
    %895 = vector.broadcast %cst_366 : f32 to vector<24x64xf32>
    %896 = arith.mulf %895, %892 : vector<24x64xf32>
    %897 = arith.select %894, %892, %896 : vector<24x64xi1>, vector<24x64xf32>
    %cst_367 = arith.constant 1.000000e+00 : f32
    %898 = vector.broadcast %cst_367 : f32 to vector<24x64xf32>
    %899 = arith.subf %898, %174 : vector<24x64xf32>
    %900 = arith.mulf %897, %899 : vector<24x64xf32>
    %cst_368 = arith.constant dense<0.000000e+00> : vector<48x64xf32>
    %901 = tpu.matmul %863, %900, %cst_368 {dimension_numbers = #tpu.dot_dimension_numbers<[1], [0], [0], [1], [0, 0, 1, 1], [], []>} : vector<48x24xf32>, vector<24x64xf32>, vector<48x64xf32> -> vector<48x64xf32>
    %902 = arith.mulf %897, %174 : vector<24x64xf32>
    %cst_369 = arith.constant dense<0.000000e+00> : vector<48x64xf32>
    %903 = tpu.matmul %873, %902, %cst_369 {dimension_numbers = #tpu.dot_dimension_numbers<[1], [0], [0], [1], [0, 0, 1, 1], [], []>} : vector<48x24xf32>, vector<24x64xf32>, vector<48x64xf32> -> vector<48x64xf32>
    %904 = arith.addf %901, %903 : vector<48x64xf32>
    %cst_370 = arith.constant 0.000000e+00 : f32
    %905 = vector.broadcast %cst_370 : f32 to vector<24x64xf32>
    %c0_371 = arith.constant 0 : index
    %c0_372 = arith.constant 0 : index
    %906 = vector.load %arg21[%c0_371, %c0_372] : memref<1x64xf32, #tpu.memory_space<vmem>>, vector<1x64xf32>
    %907 = vector.broadcast %906 : vector<1x64xf32> to vector<24x64xf32>
    %908 = arith.addf %905, %907 : vector<24x64xf32>
    %cst_373 = arith.constant dense<0.000000e+00> : vector<20x64xf32>
    %909 = tpu.matmul %798, %849, %cst_373 {dimension_numbers = #tpu.dot_dimension_numbers<[1], [0], [0], [1], [0, 0, 1, 1], [], []>} : vector<20x64xf32>, vector<64x64xf32>, vector<20x64xf32> -> vector<20x64xf32>
    %cst_374 = arith.constant dense<0.000000e+00> : vector<24x64xf32>
    %910 = tpu.matmul %808, %909, %cst_374 {dimension_numbers = #tpu.dot_dimension_numbers<[1], [0], [0], [1], [0, 0, 1, 1], [], []>} : vector<24x20xf32>, vector<20x64xf32>, vector<24x64xf32> -> vector<24x64xf32>
    %911 = arith.addf %908, %910 : vector<24x64xf32>
    %cst_375 = arith.constant dense<0.000000e+00> : vector<20x64xf32>
    %912 = tpu.matmul %798, %850, %cst_375 {dimension_numbers = #tpu.dot_dimension_numbers<[1], [0], [0], [1], [0, 0, 1, 1], [], []>} : vector<20x64xf32>, vector<64x64xf32>, vector<20x64xf32> -> vector<20x64xf32>
    %cst_376 = arith.constant dense<0.000000e+00> : vector<24x64xf32>
    %913 = tpu.matmul %818, %912, %cst_376 {dimension_numbers = #tpu.dot_dimension_numbers<[1], [0], [0], [1], [0, 0, 1, 1], [], []>} : vector<24x20xf32>, vector<20x64xf32>, vector<24x64xf32> -> vector<24x64xf32>
    %914 = arith.addf %911, %913 : vector<24x64xf32>
    %cst_377 = arith.constant dense<0.000000e+00> : vector<20x64xf32>
    %915 = tpu.matmul %798, %851, %cst_377 {dimension_numbers = #tpu.dot_dimension_numbers<[1], [0], [0], [1], [0, 0, 1, 1], [], []>} : vector<20x64xf32>, vector<64x64xf32>, vector<20x64xf32> -> vector<20x64xf32>
    %cst_378 = arith.constant dense<0.000000e+00> : vector<24x64xf32>
    %916 = tpu.matmul %828, %915, %cst_378 {dimension_numbers = #tpu.dot_dimension_numbers<[1], [0], [0], [1], [0, 0, 1, 1], [], []>} : vector<24x20xf32>, vector<20x64xf32>, vector<24x64xf32> -> vector<24x64xf32>
    %917 = arith.addf %914, %916 : vector<24x64xf32>
    %cst_379 = arith.constant dense<0.000000e+00> : vector<20x64xf32>
    %918 = tpu.matmul %798, %852, %cst_379 {dimension_numbers = #tpu.dot_dimension_numbers<[1], [0], [0], [1], [0, 0, 1, 1], [], []>} : vector<20x64xf32>, vector<64x64xf32>, vector<20x64xf32> -> vector<20x64xf32>
    %cst_380 = arith.constant dense<0.000000e+00> : vector<24x64xf32>
    %919 = tpu.matmul %838, %918, %cst_380 {dimension_numbers = #tpu.dot_dimension_numbers<[1], [0], [0], [1], [0, 0, 1, 1], [], []>} : vector<24x20xf32>, vector<20x64xf32>, vector<24x64xf32> -> vector<24x64xf32>
    %920 = arith.addf %917, %919 : vector<24x64xf32>
    %cst_381 = arith.constant dense<0.000000e+00> : vector<20x64xf32>
    %921 = tpu.matmul %798, %853, %cst_381 {dimension_numbers = #tpu.dot_dimension_numbers<[1], [0], [0], [1], [0, 0, 1, 1], [], []>} : vector<20x64xf32>, vector<64x64xf32>, vector<20x64xf32> -> vector<20x64xf32>
    %cst_382 = arith.constant dense<0.000000e+00> : vector<24x64xf32>
    %922 = tpu.matmul %848, %921, %cst_382 {dimension_numbers = #tpu.dot_dimension_numbers<[1], [0], [0], [1], [0, 0, 1, 1], [], []>} : vector<24x20xf32>, vector<20x64xf32>, vector<24x64xf32> -> vector<24x64xf32>
    %923 = arith.addf %920, %922 : vector<24x64xf32>
    %cst_383 = arith.constant 0.000000e+00 : f32
    %924 = vector.broadcast %cst_383 : f32 to vector<24x64xf32>
    %925 = arith.cmpf ogt, %923, %924 : vector<24x64xf32>
    %cst_384 = arith.constant 0.00999999977 : f32
    %926 = vector.broadcast %cst_384 : f32 to vector<24x64xf32>
    %927 = arith.mulf %926, %923 : vector<24x64xf32>
    %928 = arith.select %925, %923, %927 : vector<24x64xi1>, vector<24x64xf32>
    %cst_385 = arith.constant 1.000000e+00 : f32
    %929 = vector.broadcast %cst_385 : f32 to vector<24x64xf32>
    %930 = arith.subf %929, %187 : vector<24x64xf32>
    %931 = arith.mulf %928, %930 : vector<24x64xf32>
    %cst_386 = arith.constant dense<0.000000e+00> : vector<48x64xf32>
    %932 = tpu.matmul %863, %931, %cst_386 {dimension_numbers = #tpu.dot_dimension_numbers<[1], [0], [0], [1], [0, 0, 1, 1], [], []>} : vector<48x24xf32>, vector<24x64xf32>, vector<48x64xf32> -> vector<48x64xf32>
    %933 = arith.mulf %928, %187 : vector<24x64xf32>
    %cst_387 = arith.constant dense<0.000000e+00> : vector<48x64xf32>
    %934 = tpu.matmul %873, %933, %cst_387 {dimension_numbers = #tpu.dot_dimension_numbers<[1], [0], [0], [1], [0, 0, 1, 1], [], []>} : vector<48x24xf32>, vector<24x64xf32>, vector<48x64xf32> -> vector<48x64xf32>
    %935 = arith.addf %932, %934 : vector<48x64xf32>
    %c0_388 = arith.constant 0 : index
    %c0_389 = arith.constant 0 : index
    %936 = vector.load %arg22[%c0_388, %c0_389] : memref<64x6xf32, #tpu.memory_space<vmem>>, vector<64x6xf32>
    %937 = tpu.iota {dimensions = array<i32: 0>} : vector<100x48xi32>
    %938 = tpu.iota {dimensions = array<i32: 1>} : vector<100x48xi32>
    %c2_i32_390 = arith.constant 2 : i32
    %939 = vector.broadcast %c2_i32_390 : i32 to vector<100x48xi32>
    %940 = arith.muli %939, %938 : vector<100x48xi32>
    %c0_i32_391 = arith.constant 0 : i32
    %941 = vector.broadcast %c0_i32_391 : i32 to vector<100x48xi32>
    %942 = arith.addi %940, %941 : vector<100x48xi32>
    %943 = arith.cmpi eq, %937, %942 : vector<100x48xi32>
    %cst_392 = arith.constant 1.000000e+00 : f32
    %cst_393 = arith.constant 0.000000e+00 : f32
    %944 = vector.broadcast %cst_392 : f32 to vector<100x48xf32>
    %945 = vector.broadcast %cst_393 : f32 to vector<100x48xf32>
    %946 = arith.select %943, %944, %945 : vector<100x48xi1>, vector<100x48xf32>
    %947 = tpu.iota {dimensions = array<i32: 0>} : vector<100x48xi32>
    %948 = tpu.iota {dimensions = array<i32: 1>} : vector<100x48xi32>
    %c2_i32_394 = arith.constant 2 : i32
    %949 = vector.broadcast %c2_i32_394 : i32 to vector<100x48xi32>
    %950 = arith.muli %949, %948 : vector<100x48xi32>
    %c1_i32_395 = arith.constant 1 : i32
    %951 = vector.broadcast %c1_i32_395 : i32 to vector<100x48xi32>
    %952 = arith.addi %950, %951 : vector<100x48xi32>
    %953 = arith.cmpi eq, %947, %952 : vector<100x48xi32>
    %cst_396 = arith.constant 1.000000e+00 : f32
    %cst_397 = arith.constant 0.000000e+00 : f32
    %954 = vector.broadcast %cst_396 : f32 to vector<100x48xf32>
    %955 = vector.broadcast %cst_397 : f32 to vector<100x48xf32>
    %956 = arith.select %953, %954, %955 : vector<100x48xi1>, vector<100x48xf32>
    %957 = tpu.iota {dimensions = array<i32: 0>} : vector<100x48xi32>
    %958 = tpu.iota {dimensions = array<i32: 1>} : vector<100x48xi32>
    %c2_i32_398 = arith.constant 2 : i32
    %959 = vector.broadcast %c2_i32_398 : i32 to vector<100x48xi32>
    %960 = arith.muli %959, %958 : vector<100x48xi32>
    %c2_i32_399 = arith.constant 2 : i32
    %961 = vector.broadcast %c2_i32_399 : i32 to vector<100x48xi32>
    %962 = arith.addi %960, %961 : vector<100x48xi32>
    %963 = arith.cmpi eq, %957, %962 : vector<100x48xi32>
    %cst_400 = arith.constant 1.000000e+00 : f32
    %cst_401 = arith.constant 0.000000e+00 : f32
    %964 = vector.broadcast %cst_400 : f32 to vector<100x48xf32>
    %965 = vector.broadcast %cst_401 : f32 to vector<100x48xf32>
    %966 = arith.select %963, %964, %965 : vector<100x48xi1>, vector<100x48xf32>
    %967 = tpu.iota {dimensions = array<i32: 0>} : vector<100x48xi32>
    %968 = tpu.iota {dimensions = array<i32: 1>} : vector<100x48xi32>
    %c2_i32_402 = arith.constant 2 : i32
    %969 = vector.broadcast %c2_i32_402 : i32 to vector<100x48xi32>
    %970 = arith.muli %969, %968 : vector<100x48xi32>
    %c3_i32_403 = arith.constant 3 : i32
    %971 = vector.broadcast %c3_i32_403 : i32 to vector<100x48xi32>
    %972 = arith.addi %970, %971 : vector<100x48xi32>
    %973 = arith.cmpi eq, %967, %972 : vector<100x48xi32>
    %cst_404 = arith.constant 1.000000e+00 : f32
    %cst_405 = arith.constant 0.000000e+00 : f32
    %974 = vector.broadcast %cst_404 : f32 to vector<100x48xf32>
    %975 = vector.broadcast %cst_405 : f32 to vector<100x48xf32>
    %976 = arith.select %973, %974, %975 : vector<100x48xi1>, vector<100x48xf32>
    %977 = tpu.iota {dimensions = array<i32: 0>} : vector<100x48xi32>
    %978 = tpu.iota {dimensions = array<i32: 1>} : vector<100x48xi32>
    %c2_i32_406 = arith.constant 2 : i32
    %979 = vector.broadcast %c2_i32_406 : i32 to vector<100x48xi32>
    %980 = arith.muli %979, %978 : vector<100x48xi32>
    %c4_i32_407 = arith.constant 4 : i32
    %981 = vector.broadcast %c4_i32_407 : i32 to vector<100x48xi32>
    %982 = arith.addi %980, %981 : vector<100x48xi32>
    %983 = arith.cmpi eq, %977, %982 : vector<100x48xi32>
    %cst_408 = arith.constant 1.000000e+00 : f32
    %cst_409 = arith.constant 0.000000e+00 : f32
    %984 = vector.broadcast %cst_408 : f32 to vector<100x48xf32>
    %985 = vector.broadcast %cst_409 : f32 to vector<100x48xf32>
    %986 = arith.select %983, %984, %985 : vector<100x48xi1>, vector<100x48xf32>
    %987 = tpu.iota {dimensions = array<i32: 0>} : vector<100x48xi32>
    %988 = tpu.iota {dimensions = array<i32: 1>} : vector<100x48xi32>
    %c2_i32_410 = arith.constant 2 : i32
    %989 = vector.broadcast %c2_i32_410 : i32 to vector<100x48xi32>
    %990 = arith.muli %989, %988 : vector<100x48xi32>
    %c5_i32_411 = arith.constant 5 : i32
    %991 = vector.broadcast %c5_i32_411 : i32 to vector<100x48xi32>
    %992 = arith.addi %990, %991 : vector<100x48xi32>
    %993 = arith.cmpi eq, %987, %992 : vector<100x48xi32>
    %cst_412 = arith.constant 1.000000e+00 : f32
    %cst_413 = arith.constant 0.000000e+00 : f32
    %994 = vector.broadcast %cst_412 : f32 to vector<100x48xf32>
    %995 = vector.broadcast %cst_413 : f32 to vector<100x48xf32>
    %996 = arith.select %993, %994, %995 : vector<100x48xi1>, vector<100x48xf32>
    %cst_414 = arith.constant dense<0.000000e+00> : vector<48x6xf32>
    %997 = tpu.matmul %904, %936, %cst_414 {dimension_numbers = #tpu.dot_dimension_numbers<[1], [0], [0], [1], [0, 0, 1, 1], [], []>} : vector<48x64xf32>, vector<64x6xf32>, vector<48x6xf32> -> vector<48x6xf32>
    %cst_415 = arith.constant 0.000000e+00 : f32
    %998 = vector.broadcast %cst_415 : f32 to vector<100x1xf32>
    %c0_416 = arith.constant 0 : index
    %c0_417 = arith.constant 0 : index
    %999 = vector.load %arg23[%c0_416, %c0_417] : memref<1x1xf32, #tpu.memory_space<vmem>>, vector<1x1xf32>
    %1000 = vector.broadcast %999 : vector<1x1xf32> to vector<100x1xf32>
    %1001 = arith.addf %998, %1000 : vector<100x1xf32>
    %1002 = vector.extract_strided_slice %997 {offsets = [0, 0], sizes = [48, 1], strides = [1, 1]} : vector<48x6xf32> to vector<48x1xf32>
    %cst_418 = arith.constant dense<0.000000e+00> : vector<100x1xf32>
    %1003 = tpu.matmul %946, %1002, %cst_418 {dimension_numbers = #tpu.dot_dimension_numbers<[1], [0], [0], [1], [0, 0, 1, 1], [], []>} : vector<100x48xf32>, vector<48x1xf32>, vector<100x1xf32> -> vector<100x1xf32>
    %1004 = arith.addf %1001, %1003 : vector<100x1xf32>
    %1005 = vector.extract_strided_slice %997 {offsets = [0, 1], sizes = [48, 1], strides = [1, 1]} : vector<48x6xf32> to vector<48x1xf32>
    %cst_419 = arith.constant dense<0.000000e+00> : vector<100x1xf32>
    %1006 = tpu.matmul %956, %1005, %cst_419 {dimension_numbers = #tpu.dot_dimension_numbers<[1], [0], [0], [1], [0, 0, 1, 1], [], []>} : vector<100x48xf32>, vector<48x1xf32>, vector<100x1xf32> -> vector<100x1xf32>
    %1007 = arith.addf %1004, %1006 : vector<100x1xf32>
    %1008 = vector.extract_strided_slice %997 {offsets = [0, 2], sizes = [48, 1], strides = [1, 1]} : vector<48x6xf32> to vector<48x1xf32>
    %cst_420 = arith.constant dense<0.000000e+00> : vector<100x1xf32>
    %1009 = tpu.matmul %966, %1008, %cst_420 {dimension_numbers = #tpu.dot_dimension_numbers<[1], [0], [0], [1], [0, 0, 1, 1], [], []>} : vector<100x48xf32>, vector<48x1xf32>, vector<100x1xf32> -> vector<100x1xf32>
    %1010 = arith.addf %1007, %1009 : vector<100x1xf32>
    %1011 = vector.extract_strided_slice %997 {offsets = [0, 3], sizes = [48, 1], strides = [1, 1]} : vector<48x6xf32> to vector<48x1xf32>
    %cst_421 = arith.constant dense<0.000000e+00> : vector<100x1xf32>
    %1012 = tpu.matmul %976, %1011, %cst_421 {dimension_numbers = #tpu.dot_dimension_numbers<[1], [0], [0], [1], [0, 0, 1, 1], [], []>} : vector<100x48xf32>, vector<48x1xf32>, vector<100x1xf32> -> vector<100x1xf32>
    %1013 = arith.addf %1010, %1012 : vector<100x1xf32>
    %1014 = vector.extract_strided_slice %997 {offsets = [0, 4], sizes = [48, 1], strides = [1, 1]} : vector<48x6xf32> to vector<48x1xf32>
    %cst_422 = arith.constant dense<0.000000e+00> : vector<100x1xf32>
    %1015 = tpu.matmul %986, %1014, %cst_422 {dimension_numbers = #tpu.dot_dimension_numbers<[1], [0], [0], [1], [0, 0, 1, 1], [], []>} : vector<100x48xf32>, vector<48x1xf32>, vector<100x1xf32> -> vector<100x1xf32>
    %1016 = arith.addf %1013, %1015 : vector<100x1xf32>
    %1017 = vector.extract_strided_slice %997 {offsets = [0, 5], sizes = [48, 1], strides = [1, 1]} : vector<48x6xf32> to vector<48x1xf32>
    %cst_423 = arith.constant dense<0.000000e+00> : vector<100x1xf32>
    %1018 = tpu.matmul %996, %1017, %cst_423 {dimension_numbers = #tpu.dot_dimension_numbers<[1], [0], [0], [1], [0, 0, 1, 1], [], []>} : vector<100x48xf32>, vector<48x1xf32>, vector<100x1xf32> -> vector<100x1xf32>
    %1019 = arith.addf %1016, %1018 : vector<100x1xf32>
    %c0_424 = arith.constant 0 : index
    %c0_425 = arith.constant 0 : index
    %c0_426 = arith.constant 0 : index
    %1020 = vector.load %arg24[%c0_424, %c0_425, %c0_426] : memref<2x100x1xf32, #tpu.memory_space<vmem>>, vector<1x100x1xf32>
    %1021 = vector.shape_cast %1020 : vector<1x100x1xf32> to vector<100x1xf32>
    %1022 = vector.shape_cast %1019 : vector<100x1xf32> to vector<1x100x1xf32>
    tpu.vector_store %arg24[%c0_424, %c0_425, %c0_426], %1022 {strides = array<i32>} : memref<2x100x1xf32, #tpu.memory_space<vmem>>, vector<1x100x1xf32>,
    %cst_427 = arith.constant dense<0.000000e+00> : vector<48x6xf32>
    %1023 = tpu.matmul %935, %936, %cst_427 {dimension_numbers = #tpu.dot_dimension_numbers<[1], [0], [0], [1], [0, 0, 1, 1], [], []>} : vector<48x64xf32>, vector<64x6xf32>, vector<48x6xf32> -> vector<48x6xf32>
    %cst_428 = arith.constant 0.000000e+00 : f32
    %1024 = vector.broadcast %cst_428 : f32 to vector<100x1xf32>
    %c0_429 = arith.constant 0 : index
    %c0_430 = arith.constant 0 : index
    %1025 = vector.load %arg23[%c0_429, %c0_430] : memref<1x1xf32, #tpu.memory_space<vmem>>, vector<1x1xf32>
    %1026 = vector.broadcast %1025 : vector<1x1xf32> to vector<100x1xf32>
    %1027 = arith.addf %1024, %1026 : vector<100x1xf32>
    %1028 = vector.extract_strided_slice %1023 {offsets = [0, 0], sizes = [48, 1], strides = [1, 1]} : vector<48x6xf32> to vector<48x1xf32>
    %cst_431 = arith.constant dense<0.000000e+00> : vector<100x1xf32>
    %1029 = tpu.matmul %946, %1028, %cst_431 {dimension_numbers = #tpu.dot_dimension_numbers<[1], [0], [0], [1], [0, 0, 1, 1], [], []>} : vector<100x48xf32>, vector<48x1xf32>, vector<100x1xf32> -> vector<100x1xf32>
    %1030 = arith.addf %1027, %1029 : vector<100x1xf32>
    %1031 = vector.extract_strided_slice %1023 {offsets = [0, 1], sizes = [48, 1], strides = [1, 1]} : vector<48x6xf32> to vector<48x1xf32>
    %cst_432 = arith.constant dense<0.000000e+00> : vector<100x1xf32>
    %1032 = tpu.matmul %956, %1031, %cst_432 {dimension_numbers = #tpu.dot_dimension_numbers<[1], [0], [0], [1], [0, 0, 1, 1], [], []>} : vector<100x48xf32>, vector<48x1xf32>, vector<100x1xf32> -> vector<100x1xf32>
    %1033 = arith.addf %1030, %1032 : vector<100x1xf32>
    %1034 = vector.extract_strided_slice %1023 {offsets = [0, 2], sizes = [48, 1], strides = [1, 1]} : vector<48x6xf32> to vector<48x1xf32>
    %cst_433 = arith.constant dense<0.000000e+00> : vector<100x1xf32>
    %1035 = tpu.matmul %966, %1034, %cst_433 {dimension_numbers = #tpu.dot_dimension_numbers<[1], [0], [0], [1], [0, 0, 1, 1], [], []>} : vector<100x48xf32>, vector<48x1xf32>, vector<100x1xf32> -> vector<100x1xf32>
    %1036 = arith.addf %1033, %1035 : vector<100x1xf32>
    %1037 = vector.extract_strided_slice %1023 {offsets = [0, 3], sizes = [48, 1], strides = [1, 1]} : vector<48x6xf32> to vector<48x1xf32>
    %cst_434 = arith.constant dense<0.000000e+00> : vector<100x1xf32>
    %1038 = tpu.matmul %976, %1037, %cst_434 {dimension_numbers = #tpu.dot_dimension_numbers<[1], [0], [0], [1], [0, 0, 1, 1], [], []>} : vector<100x48xf32>, vector<48x1xf32>, vector<100x1xf32> -> vector<100x1xf32>
    %1039 = arith.addf %1036, %1038 : vector<100x1xf32>
    %1040 = vector.extract_strided_slice %1023 {offsets = [0, 4], sizes = [48, 1], strides = [1, 1]} : vector<48x6xf32> to vector<48x1xf32>
    %cst_435 = arith.constant dense<0.000000e+00> : vector<100x1xf32>
    %1041 = tpu.matmul %986, %1040, %cst_435 {dimension_numbers = #tpu.dot_dimension_numbers<[1], [0], [0], [1], [0, 0, 1, 1], [], []>} : vector<100x48xf32>, vector<48x1xf32>, vector<100x1xf32> -> vector<100x1xf32>
    %1042 = arith.addf %1039, %1041 : vector<100x1xf32>
    %1043 = vector.extract_strided_slice %1023 {offsets = [0, 5], sizes = [48, 1], strides = [1, 1]} : vector<48x6xf32> to vector<48x1xf32>
    %cst_436 = arith.constant dense<0.000000e+00> : vector<100x1xf32>
    %1044 = tpu.matmul %996, %1043, %cst_436 {dimension_numbers = #tpu.dot_dimension_numbers<[1], [0], [0], [1], [0, 0, 1, 1], [], []>} : vector<100x48xf32>, vector<48x1xf32>, vector<100x1xf32> -> vector<100x1xf32>
    %1045 = arith.addf %1042, %1044 : vector<100x1xf32>
    %c1_437 = arith.constant 1 : index
    %c0_438 = arith.constant 0 : index
    %c0_439 = arith.constant 0 : index
    %1046 = vector.load %arg24[%c1_437, %c0_438, %c0_439] : memref<2x100x1xf32, #tpu.memory_space<vmem>>, vector<1x100x1xf32>
    %1047 = vector.shape_cast %1046 : vector<1x100x1xf32> to vector<100x1xf32>
    %1048 = vector.shape_cast %1045 : vector<100x1xf32> to vector<1x100x1xf32>
    tpu.vector_store %arg24[%c1_437, %c0_438, %c0_439], %1048 {strides = array<i32>} : memref<2x100x1xf32, #tpu.memory_space<vmem>>, vector<1x100x1xf32>,
    return
  }
}

</mosaic_0001>

<bundles_post_ra>
// kernel: vae_forward.1
= control target key start
LH: loop header
LB: loop body
LE: loop exit
PB: predicated region body
PF: predicated region fallthrough
CT: control target
= control target key end

     0   :  { %s11989_s0 = inlined_call_operand.vmem [shape: f32[100,2], index: 0, kind: input, shape index: {}]   ;;  %s11990_s1 = inlined_call_operand.vmem [shape: f32[2,32], index: 1, kind: input, shape index: {}]   ;;  %s11991_s2 = inlined_call_operand.vmem [shape: f32[100,1], index: 2, kind: input, shape index: {}]   ;;  %s11992_s3 = inlined_call_operand.vmem [shape: f32[100,1], index: 3, kind: input, shape index: {}]   ;;  %s11993_s4 = inlined_call_operand.vmem [shape: f32[5,64], index: 4, kind: input, shape index: {}]   ;;  %s11994_s5 = inlined_call_operand.vmem [shape: f32[1,64], index: 5, kind: input, shape index: {}]   ;;  %s11995_s6 = inlined_call_operand.vmem [shape: f32[1,64], index: 6, kind: input, shape index: {}]   ;;  %s11996_s7 = inlined_call_operand.vmem [shape: f32[1,64], index: 7, kind: input, shape index: {}]   ;;  %s11997_s8 = inlined_call_operand.vmem [shape: f32[320,64], index: 8, kind: input, shape index: {}]   ;;  %s11998_s9 = inlined_call_operand.vmem [shape: f32[1,64], index: 9, kind: input, shape index: {}]   ;;  %s11999_s10 = inlined_call_operand.vmem [shape: f32[1,64], index: 10, kind: input, shape index: {}]   ;;  %s12000_s11 = inlined_call_operand.vmem [shape: f32[1,64], index: 11, kind: input, shape index: {}]   ;;  %s12001_s12 = inlined_call_operand.vmem [shape: f32[192,64], index: 12, kind: input, shape index: {}]   ;;  %s12002_s13 = inlined_call_operand.vmem [shape: f32[1,64], index: 13, kind: input, shape index: {}]   ;;  %s12003_s14 = inlined_call_operand.vmem [shape: f32[512,64], index: 14, kind: input, shape index: {}]   ;;  %s12004_s15 = inlined_call_operand.vmem [shape: f32[1,64], index: 15, kind: input, shape index: {}]   ;;  %s12005_s16 = inlined_call_operand.vmem [shape: f32[32,512], index: 16, kind: input, shape index: {}]   ;;  %s12006_s17 = inlined_call_operand.vmem [shape: f32[1,512], index: 17, kind: input, shape index: {}]   ;;  %s12007_s18 = inlined_call_operand.vmem [shape: f32[192,64], index: 18, kind: input, shape index: {}]   ;;  %s12008_s19 = inlined_call_operand.vmem [shape: f32[1,64], index: 19, kind: input, shape index: {}]   ;;  %s12009_s20 = inlined_call_operand.vmem [shape: f32[320,64], index: 20, kind: input, shape index: {}]   ;;  %s12010_s21 = inlined_call_operand.vmem [shape: f32[1,64], index: 21, kind: input, shape index: {}]   ;;  %s12011_s22 = inlined_call_operand.vmem [shape: f32[64,6], index: 22, kind: input, shape index: {}]   ;;  %s12012_s23 = inlined_call_operand.<no memory space> [shape: f32[1,1], index: 23, kind: input, shape index: {}]   ;;  %s12013_s24 = inlined_call_operand.vmem [shape: f32[2,100,1], index: 24, kind: output, shape index: {0}]   ;;  %s12014_s25 = inlined_call_operand.hbm [shape: f32[2,32], index: 25, kind: output, shape index: {1}]   ;;  %s12015_s26 = inlined_call_operand.hbm [shape: f32[2,32], index: 26, kind: output, shape index: {2}]  }
   0x1   :  { %12134 = sst [smem:[#allocation83_spill]] %s11989_s0  ;;  %v32_v0 = vstv %s12012_s23 }
   0x2   :  { %12135 = sst [smem:[#allocation84_spill]] %s11990_s1  ;;  %33 = vst [vmem:[#allocation2] sm:$0x1] %v32_v0 }
   0x3   :  { %12136 = sst [smem:[#allocation85_spill]] %s11991_s2 }
   0x4   :  { %12137 = sst [smem:[#allocation86_spill]] %s11992_s3 }
   0x5   :  { %12138 = sst [smem:[#allocation87_spill]] %s11993_s4 }
   0x6   :  { %12139 = sst [smem:[#allocation88_spill]] %s11994_s5 }
   0x7   :  { %12140 = sst [smem:[#allocation89_spill]] %s11995_s6 }
   0x8   :  { %12141 = sst [smem:[#allocation90_spill]] %s11996_s7 }
   0x9   :  { %12142 = sst [smem:[#allocation91_spill]] %s11997_s8 }
   0xa   :  { %12143 = sst [smem:[#allocation92_spill]] %s11998_s9 }
   0xb   :  { %12144 = sst [smem:[#allocation93_spill]] %s11999_s10 }
   0xc   :  { %34 = vsyncpa [#allocation4], 0  ;;  %s12145_s8 = sld [smem:[#allocation83_spill]]  ;;  %vm134_vm0 = vcmask 11264   ;;  %vm97_vm1 = vcmask 15360   ;;  %v7413_v13 = vmov 0  }
   0xd   :  { %7130 = vset.pattern.permute.xlu2 %v7413_v13  ;;  %7132 = vset.pattern.permute.xlu1 %v7413_v13 }
   0xe   :  { %7131 = vset.pattern.permute.xlu0 %v7413_v13 }
  0x12   :  { %v7569_v1 = vld [vmem:[%s12145_s8 + $0x60] sm:$0xf]  ;;  %v7574_v2 = vld [vmem:[%s12145_s8 + $0x50] sm:$0xff]  ;;  %v7590_v7 = vld [vmem:[%s12145_s8 + $0x58] sm:$0xff] }
  0x13   :  { %v7579_v3 = vld [vmem:[%s12145_s8 + $0x40] sm:$0xff]  ;;  %v135_v4 = vsel %vm134_vm0, %v7569_v1, 0.0  ;;  %v128_v5 = vsel %vm97_vm1, %v7574_v2, 0.0  ;;  %v7595_v8 = vld [vmem:[%s12145_s8 + $0x48] sm:$0xff]  ;;  %v7600_v9 = vld [vmem:[%s12145_s8 + $0x38] sm:$0xff]  ;;  %v131_v10 = vsel %vm97_vm1, %v7590_v7, 0.0 }
  0x14   :  { %v122_v6 = vsel %vm97_vm1, %v7579_v3, 0.0  ;;  %136 = vadd.xlane.f32.xlu0 %v135_v4  ;;  %129 = vadd.xlane.f32.xlu1 %v128_v5  ;;  %v125_v11 = vsel %vm97_vm1, %v7595_v8, 0.0  ;;  %v119_v12 = vsel %vm97_vm1, %v7600_v9, 0.0 }
  0x15   :  { %123 = vadd.xlane.f32.xlu2 %v122_v6 }
  0x16   :  { %35 = vsyncpa [#allocation6], 0  ;;  %v7614_v14 = vld [vmem:[%s12145_s8 + $0x30] sm:$0xff]  ;;  %v7619_v15 = vld [vmem:[%s12145_s8 + $0x28] sm:$0xff]  ;;  %s12146_s27 = sld [smem:[#allocation85_spill]]  ;;  %v7414_v42 = vmov 2.0  }
  0x17   :  { %v7624_v16 = vld [vmem:[%s12145_s8 + $0x20] sm:$0xff]  ;;  %v116_v17 = vsel %vm97_vm1, %v7614_v14, 0.0  ;;  %v113_v18 = vsel %vm97_vm1, %v7619_v15, 0.0  ;;  %v7635_v20 = vld [vmem:[%s12145_s8 + $0x18] sm:$0xff]  ;;  %v7640_v21 = vld [vmem:[%s12145_s8 + $0x10] sm:$0xff]  ;;  %s12147_s28 = sld [smem:[#allocation86_spill]]  ;;  %7321 = vrcp.f32 %v7414_v42 }
  0x18   :  { %v110_v19 = vsel %vm97_vm1, %v7624_v16, 0.0  ;;  %v7645_v22 = vld [vmem:[%s12145_s8 + $0x8] sm:$0xff]  ;;  %v107_v23 = vsel %vm97_vm1, %v7635_v20, 0.0  ;;  %v104_v24 = vsel %vm97_vm1, %v7640_v21, 0.0  ;;  %v7656_v26 = vld [vmem:[%s12145_s8] sm:$0xff]  ;;  %vm621_vm6 = vcmask 1043456  }
  0x19   :  { %v101_v25 = vsel %vm97_vm1, %v7645_v22, 0.0  ;;  %v98_v27 = vsel %vm97_vm1, %v7656_v26, 0.0  ;;  %s12164_s30 = sld [smem:[#allocation87_spill]]  ;;  %s7423_s9 = smov 125  }
  0x1a   :  { %s12165_s10 = sld [smem:[#allocation88_spill]]  ;;  %s7425_s23 = smov 124  }
  0x1b   :  { %s12178_s3 = sld [smem:[#allocation91_spill]] }
  0x1c   :  { %132 = vadd.xlane.f32.xlu0 %v131_v10  ;;  %126 = vadd.xlane.f32.xlu1 %v125_v11  ;;  %v404_v28 = vld [vmem:[%s12146_s27 + $0x60] sm:$0xf]  ;;  %v403_v30 = vld [vmem:[%s12146_s27 + $0x58] sm:$0xff]  ;;  %v402_v31 = vld [vmem:[%s12146_s27 + $0x50] sm:$0xff]  ;;  %s12179_s0 = sld [smem:[#allocation89_spill]] }
  0x1d   :  { %120 = vadd.xlane.f32.xlu2 %v119_v12  ;;  %v495_v29 = vld [vmem:[%s12147_s28 + $0x60] sm:$0xf]  ;;  %v401_v32 = vld [vmem:[%s12146_s27 + $0x48] sm:$0xff]  ;;  %v494_v34 = vld [vmem:[%s12147_s28 + $0x58] sm:$0xff]  ;;  %v7322_v43 = vpop.eup %7321  ;;  %s12183_s2 = sld [smem:[#allocation92_spill]] }
  0x1e   :  { %v492_v33 = vld [vmem:[%s12147_s28 + $0x48] sm:$0xff]  ;;  %v400_v35 = vld [vmem:[%s12146_s27 + $0x40] sm:$0xff]  ;;  %v398_v36 = vld [vmem:[%s12146_s27 + $0x30] sm:$0xff]  ;;  %v139_v44 = vmul.f32 2.0, %v7322_v43  ;;  %vm143_vm2 = vweird.f32 %v7322_v43  ;;  %s12190_s5 = sld [smem:[#allocation84_spill]] }
  0x1f   :  { %v493_v37 = vld [vmem:[%s12147_s28 + $0x50] sm:$0xff]  ;;  %v491_v38 = vld [vmem:[%s12147_s28 + $0x40] sm:$0xff]  ;;  %v399_v39 = vld [vmem:[%s12146_s27 + $0x38] sm:$0xff] }
  0x20   :  { %v397_v40 = vld [vmem:[%s12146_s27 + $0x28] sm:$0xff]  ;;  %v490_v41 = vld [vmem:[%s12147_s28 + $0x38] sm:$0xff]  ;;  %v140_v45 = vsub.f32 1.0, %v139_v44 }
  0x22   :  { %v141_v46 = vmul.f32 %v7322_v43, %v140_v45 }
  0x24   :  { %117 = vadd.xlane.f32.xlu0 %v116_v17  ;;  %114 = vadd.xlane.f32.xlu1 %v113_v18  ;;  %v142_v47 = vadd.f32 %v7322_v43, %v141_v46 }
  0x25   :  { %111 = vadd.xlane.f32.xlu2 %v110_v19 }
  0x26   :  { %v7702_v48 = vsel %vm143_vm2, %v7322_v43, %v142_v47 }
  0x2c   :  { %108 = vadd.xlane.f32.xlu0 %v107_v23  ;;  %105 = vadd.xlane.f32.xlu1 %v104_v24 }
  0x2d   :  { %102 = vadd.xlane.f32.xlu2 %v101_v25 }
  0x34   :  { %99 = vadd.xlane.f32.xlu0 %v98_v27 }
  0x45   :  { %467 = vperm.xlu2 %7130, %v404_v28   ;;  %558 = vperm.xlu1 %7132, %v495_v29  }
  0x48   :  { %462 = vperm.xlu0 %7131, %v403_v30  }
  0x4d   :  { %457 = vperm.xlu2 %7130, %v402_v31   ;;  %452 = vperm.xlu1 %7132, %v401_v32  }
  0x50   :  { %543 = vperm.xlu0 %7131, %v492_v33  }
  0x55   :  { %553 = vperm.xlu2 %7130, %v494_v34   ;;  %447 = vperm.xlu1 %7132, %v400_v35  }
  0x58   :  { %437 = vperm.xlu0 %7131, %v398_v36  }
  0x5d   :  { %548 = vperm.xlu2 %7130, %v493_v37   ;;  %538 = vperm.xlu1 %7132, %v491_v38  }
  0x65   :  { %442 = vperm.xlu2 %7130, %v399_v39   ;;  %432 = vperm.xlu1 %7132, %v397_v40  }
  0x6d   :  { %533 = vperm.xlu2 %7130, %v490_v41  }
  0x87   :  { %v137_v49 = vpop.xlane.xlu0 %136  ;;  %v130_v50 = vpop.xlane.xlu1 %129 }
  0x88   :  { %v157_v51 = vmul.f32 %v7702_v48, %v137_v49  ;;  %v155_v52 = vmul.f32 %v7702_v48, %v130_v50  ;;  %v124_v53 = vpop.xlane.xlu2 %123 }
  0x8a   :  { %v7707_v54 = vsub.f32 %v7569_v1, %v157_v51  ;;  %v7710_v55 = vsub.f32 %v7574_v2, %v155_v52  ;;  %v153_v2 = vmul.f32 %v7702_v48, %v124_v53  ;;  %v489_v53 = vld [vmem:[%s12147_s28 + $0x30] sm:$0xff] }
  0x8c   :  { %v183_v56 = vmul.f32 %v7707_v54, %v7707_v54  ;;  %v181_v57 = vmul.f32 %v7710_v55, %v7710_v55  ;;  %v7738_v17 = vsub.f32 %v7579_v3, %v153_v2 }
  0x8e   :  { %v220_v58 = vsel %vm134_vm0, %v183_v56, 0.0  ;;  %v214_v59 = vsel %vm97_vm1, %v181_v57, 0.0  ;;  %v179_v28 = vmul.f32 %v7738_v17, %v7738_v17  ;;  %v396_v56 = vld [vmem:[%s12146_s27 + $0x20] sm:$0xff]  ;;  %v488_v57 = vld [vmem:[%s12147_s28 + $0x28] sm:$0xff] }
  0x8f   :  { %v133_v60 = vpop.xlane.xlu0 %132  ;;  %v127_v61 = vpop.xlane.xlu1 %126  ;;  %221 = vadd.xlane.f32.xlu1 %v220_v58  ;;  %215 = vadd.xlane.f32.xlu0 %v214_v59  ;;  %v486_v58 = vld [vmem:[%s12147_s28 + $0x18] sm:$0xff]  ;;  %v487_v59 = vld [vmem:[%s12147_s28 + $0x20] sm:$0xff] }
  0x90   :  { %v156_v62 = vmul.f32 %v7702_v48, %v133_v60  ;;  %v154_v63 = vmul.f32 %v7702_v48, %v127_v61  ;;  %v121_v0 = vpop.xlane.xlu2 %120  ;;  %v208_v33 = vsel %vm97_vm1, %v179_v28, 0.0  ;;  %v394_v60 = vld [vmem:[%s12146_s27 + $0x10] sm:$0xff] }
  0x91   :  { %v152_v1 = vmul.f32 %v7702_v48, %v121_v0  ;;  %v393_v0 = vld [vmem:[%s12146_s27 + $0x8] sm:$0xff] }
  0x92   :  { %v7723_v4 = vsub.f32 %v7590_v7, %v156_v62  ;;  %v7726_v5 = vsub.f32 %v7595_v8, %v154_v63  ;;  %v392_v62 = vld [vmem:[%s12146_s27] sm:$0xff] }
  0x93   :  { %v7729_v6 = vsub.f32 %v7600_v9, %v152_v1  ;;  %v485_v1 = vld [vmem:[%s12147_s28 + $0x10] sm:$0xff] }
  0x94   :  { %v180_v10 = vmul.f32 %v7726_v5, %v7726_v5  ;;  %v182_v11 = vmul.f32 %v7723_v4, %v7723_v4 }
  0x95   :  { %v178_v12 = vmul.f32 %v7729_v6, %v7729_v6 }
  0x96   :  { %v211_v7 = vsel %vm97_vm1, %v180_v10, 0.0  ;;  %v217_v8 = vsel %vm97_vm1, %v182_v11, 0.0  ;;  %v484_v11 = vld [vmem:[%s12147_s28 + $0x8] sm:$0xff] }
  0x97   :  { %v118_v18 = vpop.xlane.xlu0 %117  ;;  %v115_v19 = vpop.xlane.xlu1 %114  ;;  %212 = vadd.xlane.f32.xlu1 %v211_v7  ;;  %218 = vadd.xlane.f32.xlu2 %v217_v8  ;;  %v205_v9 = vsel %vm97_vm1, %v178_v12, 0.0  ;;  %v483_v12 = vld [vmem:[%s12147_s28] sm:$0xff] }
  0x98   :  { %v151_v23 = vmul.f32 %v7702_v48, %v118_v18  ;;  %v112_v24 = vpop.xlane.xlu2 %111  ;;  %206 = vadd.xlane.f32.xlu0 %v205_v9  ;;  %v150_v3 = vmul.f32 %v7702_v48, %v115_v19 }
  0x99   :  { %v149_v25 = vmul.f32 %v7702_v48, %v112_v24 }
  0x9a   :  { %v7746_v27 = vsub.f32 %v7614_v14, %v151_v23  ;;  %v7759_v32 = vsub.f32 %v7619_v15, %v150_v3 }
  0x9b   :  { %v7752_v29 = vsub.f32 %v7624_v16, %v149_v25 }
  0x9c   :  { %v177_v30 = vmul.f32 %v7746_v27, %v7746_v27  ;;  %v176_v40 = vmul.f32 %v7759_v32, %v7759_v32 }
  0x9d   :  { %v175_v31 = vmul.f32 %v7752_v29, %v7752_v29 }
  0x9e   :  { %v202_v14 = vsel %vm97_vm1, %v177_v30, 0.0  ;;  %v199_v45 = vsel %vm97_vm1, %v176_v40, 0.0 }
  0x9f   :  { %v109_v34 = vpop.xlane.xlu0 %108  ;;  %203 = vadd.xlane.f32.xlu1 %v202_v14  ;;  %v106_v35 = vpop.xlane.xlu1 %105  ;;  %209 = vadd.xlane.f32.xlu2 %v208_v33  ;;  %v196_v16 = vsel %vm97_vm1, %v175_v31, 0.0 }
  0xa0   :  { %v148_v36 = vmul.f32 %v7702_v48, %v109_v34  ;;  %v103_v37 = vpop.xlane.xlu2 %102  ;;  %197 = vadd.xlane.f32.xlu0 %v196_v16  ;;  %v147_v15 = vmul.f32 %v7702_v48, %v106_v35 }
  0xa1   :  { %v146_v38 = vmul.f32 %v7702_v48, %v103_v37 }
  0xa2   :  { %v7767_v39 = vsub.f32 %v7635_v20, %v148_v36  ;;  %v7780_v44 = vsub.f32 %v7640_v21, %v147_v15 }
  0xa3   :  { %v7773_v41 = vsub.f32 %v7645_v22, %v146_v38 }
  0xa4   :  { %v174_v42 = vmul.f32 %v7767_v39, %v7767_v39  ;;  %v173_v50 = vmul.f32 %v7780_v44, %v7780_v44 }
  0xa5   :  { %v172_v43 = vmul.f32 %v7773_v41, %v7773_v41 }
  0xa6   :  { %v193_v20 = vsel %vm97_vm1, %v174_v42, 0.0  ;;  %v190_v51 = vsel %vm97_vm1, %v173_v50, 0.0 }
  0xa7   :  { %194 = vadd.xlane.f32.xlu1 %v193_v20  ;;  %200 = vadd.xlane.f32.xlu2 %v199_v45  ;;  %v187_v46 = vsel %vm97_vm1, %v172_v43, 0.0  ;;  %v100_v47 = vpop.xlane.xlu0 %99 }
  0xa8   :  { %188 = vadd.xlane.f32.xlu0 %v187_v46  ;;  %v145_v22 = vmul.f32 %v7702_v48, %v100_v47  ;;  %v7816_v61 = vpop.permute.xlu2 %467 }
  0xaa   :  { %v7787_v49 = vsub.f32 %v7656_v26, %v145_v22  ;;  %v395_v26 = vld [vmem:[%s12146_s27 + $0x18] sm:$0xff]  ;;  %s12180_s27 = sld [smem:[#allocation90_spill]] }
  0xac   :  { %v171_v21 = vmul.f32 %v7787_v49, %v7787_v49 }
  0xae   :  { %v184_v52 = vsel %vm97_vm1, %v171_v21, 0.0 }
  0xaf   :  { %191 = vadd.xlane.f32.xlu2 %v190_v51  ;;  %185 = vadd.xlane.f32.xlu1 %v184_v52 }
  0xb0   :  { %v7829_v2 = vpop.permute.xlu2 %457 }
  0xb7   :  { %v7821_v63 = vpop.permute.xlu1 %558 }
  0xb8   :  { %v7839_v7 = vpop.permute.xlu2 %553 }
  0xba   :  { %v7841_v8 = vpop.permute.xlu0 %462 }
  0xbc   :  { %528 = vperm.xlu0 %7131, %v489_v53  }
  0xbf   :  { %v7831_v10 = vpop.permute.xlu1 %452 }
  0xc0   :  { %v7845_v19 = vpop.permute.xlu2 %548 }
  0xc2   :  { %v7847_v9 = vpop.permute.xlu0 %543 }
  0xc4   :  { %422 = vperm.xlu0 %7131, %v395_v26  }
  0xc7   :  { %427 = vperm.xlu2 %7130, %v396_v56   ;;  %v7843_v18 = vpop.permute.xlu1 %447 }
  0xc8   :  { %523 = vperm.xlu1 %7132, %v488_v57   ;;  %v7851_v24 = vpop.permute.xlu2 %442 }
  0xca   :  { %v7853_v25 = vpop.permute.xlu0 %437 }
  0xcc   :  { %513 = vperm.xlu0 %7131, %v486_v58  }
  0xcf   :  { %518 = vperm.xlu2 %7130, %v487_v59   ;;  %v7849_v23 = vpop.permute.xlu1 %538 }
  0xd0   :  { %417 = vperm.xlu1 %7132, %v394_v60   ;;  %v7857_v28 = vpop.permute.xlu2 %533 }
  0xd4   :  { %407 = vperm.xlu0 %7131, %v392_v62  }
  0xd7   :  { %412 = vperm.xlu2 %7130, %v393_v0   ;;  %v7855_v3 = vpop.permute.xlu1 %432 }
  0xd8   :  { %508 = vperm.xlu1 %7132, %v485_v1  }
  0xdf   :  { %503 = vperm.xlu2 %7130, %v484_v11  }
  0xe0   :  { %498 = vperm.xlu1 %7132, %v483_v12  }
 0x102   :  { %v222_v30 = vpop.xlane.xlu1 %221  ;;  %v216_v31 = vpop.xlane.xlu0 %215 }
 0x103   :  { %v235_v14 = vmul.f32 %v222_v30, %v7702_v48  ;;  %v233_v33 = vmul.f32 %v216_v31, %v7702_v48 }
 0x105   :  { %v248_v34 = vadd.f32 1e-05, %v235_v14  ;;  %v7861_v35 = vadd.f32 1e-05, %v233_v33 }
 0x107   :  { %7323 = vrsqrt.f32 %v248_v34  ;;  %vm375_vm4 = vweird.f32 %v248_v34  ;;  %vm355_vm8 = vweird.f32 %v7861_v35 }
 0x108   :  { %7325 = vrsqrt.f32 %v7861_v35 }
 0x10a   :  { %v213_v16 = vpop.xlane.xlu1 %212  ;;  %v219_v36 = vpop.xlane.xlu2 %218 }
 0x10b   :  { %v232_v37 = vmul.f32 %v213_v16, %v7702_v48  ;;  %v234_v38 = vmul.f32 %v219_v36, %v7702_v48  ;;  %v207_v15 = vpop.xlane.xlu0 %206 }
 0x10c   :  { %v230_v40 = vmul.f32 %v207_v15, %v7702_v48 }
 0x10d   :  { %v7324_v42 = vpop.eup %7323  ;;  %v7867_v43 = vadd.f32 1e-05, %v232_v37  ;;  %v7869_v20 = vadd.f32 1e-05, %v234_v38 }
 0x10e   :  { %v7871_v45 = vpop.eup %7325  ;;  %v370_v46 = vmul.f32 %v7324_v42, %v248_v34  ;;  %v7873_v47 = vadd.f32 1e-05, %v230_v40  ;;  %vm376_vm3 = vweird.f32 %v7324_v42 }
 0x10f   :  { %v350_v22 = vmul.f32 %v7871_v45, %v7861_v35  ;;  %7327 = vrsqrt.f32 %v7867_v43  ;;  %vm377_vm5 = vmor %vm375_vm4, %vm376_vm3  ;;  %vm356_vm7 = vweird.f32 %v7871_v45  ;;  %vm345_vm9 = vweird.f32 %v7867_v43 }
 0x110   :  { %v371_v50 = vmul.f32 %v7324_v42, %v370_v46  ;;  %7329 = vrsqrt.f32 %v7869_v20  ;;  %vm7911_vm11 = vmor %vm355_vm8, %vm356_vm7  ;;  %vm365_vm13 = vweird.f32 %v7869_v20  ;;  %vm325_vm15 = vweird.f32 %v7873_v47 }
 0x111   :  { %v351_v21 = vmul.f32 %v7871_v45, %v350_v22  ;;  %7331 = vrsqrt.f32 %v7873_v47 }
 0x112   :  { %v372_v51 = vmul.f32 0.5, %v371_v50  ;;  %v204_v52 = vpop.xlane.xlu1 %203  ;;  %v210_v53 = vpop.xlane.xlu2 %209 }
 0x113   :  { %v352_v26 = vmul.f32 0.5, %v351_v21  ;;  %v229_v56 = vmul.f32 %v204_v52, %v7702_v48  ;;  %v231_v57 = vmul.f32 %v210_v53, %v7702_v48  ;;  %v198_v58 = vpop.xlane.xlu0 %197 }
 0x114   :  { %v373_v59 = vsub.f32 1.5, %v372_v51  ;;  %v227_v60 = vmul.f32 %v198_v58, %v7702_v48 }
 0x115   :  { %v7884_v62 = vpop.eup %7327  ;;  %v353_v0 = vsub.f32 1.5, %v352_v26  ;;  %v7886_v1 = vadd.f32 1e-05, %v229_v56  ;;  %v7890_v31 = vadd.f32 1e-05, %v231_v57 }
 0x116   :  { %v7330_v11 = vpop.eup %7329  ;;  %v374_v12 = vmul.f32 %v7324_v42, %v373_v59  ;;  %v340_v30 = vmul.f32 %v7884_v62, %v7867_v43  ;;  %v7896_v16 = vadd.f32 1e-05, %v227_v60  ;;  %vm346_vm10 = vweird.f32 %v7884_v62 }
 0x117   :  { %v7892_v14 = vpop.eup %7331  ;;  %v360_v33 = vmul.f32 %v7330_v11, %v7869_v20  ;;  %7333 = vrsqrt.f32 %v7886_v1  ;;  %v354_v15 = vmul.f32 %v7871_v45, %v353_v0  ;;  %vm366_vm12 = vweird.f32 %v7330_v11  ;;  %vm7930_vm14 = vmor %vm345_vm9, %vm346_vm10 }
 0x118   :  { %v378_v36 = vsel %vm377_vm5, %v7324_v42, %v374_v12  ;;  %v341_v37 = vmul.f32 %v7884_v62, %v340_v30  ;;  %v320_v34 = vmul.f32 %v7892_v14, %v7873_v47  ;;  %7335 = vrsqrt.f32 %v7890_v31  ;;  %vm367_vm1 = vmor %vm365_vm13, %vm366_vm12 }
 0x119   :  { %v391_v38 = vmul.f32 %v378_v36, %v7707_v54  ;;  %v361_v40 = vmul.f32 %v7330_v11, %v360_v33  ;;  %7337 = vrsqrt.f32 %v7896_v16  ;;  %v358_v26 = vsel %vm7911_vm11, %v7871_v45, %v354_v15 }
 0x11a   :  { %v342_v46 = vmul.f32 0.5, %v341_v37  ;;  %v321_v22 = vmul.f32 %v7892_v14, %v320_v34  ;;  %v195_v42 = vpop.xlane.xlu1 %194  ;;  %v201_v50 = vpop.xlane.xlu2 %200  ;;  %vm326_vm0 = vweird.f32 %v7892_v14  ;;  %v389_v33 = vmul.f32 %v358_v26, %v7710_v55 }
 0x11b   :  { %v362_v21 = vmul.f32 0.5, %v361_v40  ;;  %v482_v54 = vmul.f32 %v7816_v61, %v391_v38  ;;  %v226_v57 = vmul.f32 %v195_v42, %v7702_v48  ;;  %v228_v58 = vmul.f32 %v201_v50, %v7702_v48  ;;  %v189_v0 = vpop.xlane.xlu0 %188  ;;  %vm7979_vm3 = vmor %vm325_vm15, %vm326_vm0 }
 0x11c   :  { %v343_v35 = vsub.f32 1.5, %v342_v46  ;;  %v322_v52 = vmul.f32 0.5, %v321_v22  ;;  %v224_v55 = vmul.f32 %v189_v0, %v7702_v48  ;;  %vm315_vm5 = vweird.f32 %v7886_v1 }
 0x11d   :  { %v7915_v53 = vpop.eup %7333  ;;  %v363_v56 = vsub.f32 1.5, %v362_v21  ;;  %v7936_v30 = vadd.f32 1e-05, %v226_v57  ;;  %v7947_v37 = vadd.f32 %v7821_v63, %v482_v54  ;;  %v7953_v40 = vadd.f32 1e-05, %v228_v58 }
 0x11e   :  { %v344_v61 = vmul.f32 %v7884_v62, %v343_v35  ;;  %v323_v59 = vsub.f32 1.5, %v322_v52  ;;  %v310_v60 = vmul.f32 %v7915_v53, %v7886_v1  ;;  %v7938_v20 = vpop.eup %7335  ;;  %vm316_vm2 = vweird.f32 %v7915_v53 }
 0x11f   :  { %v364_v12 = vmul.f32 %v7330_v11, %v363_v56  ;;  %v7949_v34 = vpop.eup %7337  ;;  %v330_v15 = vmul.f32 %v7938_v20, %v7890_v31  ;;  %6625 = vmatpush.msk.msra.mxu0 %vm621_vm6, %v7947_v37  ;;  %6632 = vmatpush.msk.msra.mxu1 %vm621_vm6, %v7947_v37  ;;  %7339 = vrsqrt.f32 %v7936_v30  ;;  %vm336_vm4 = vweird.f32 %v7938_v20  ;;  %vm8004_vm8 = vmor %vm315_vm5, %vm316_vm2 }
 0x120   :  { %v348_v36 = vsel %vm7930_vm14, %v7884_v62, %v344_v61  ;;  %v311_v43 = vmul.f32 %v7915_v53, %v310_v60  ;;  %v324_v62 = vmul.f32 %v7892_v14, %v323_v59  ;;  %v290_v42 = vmul.f32 %v7949_v34, %v7896_v16  ;;  %6639 = vmatpush.msk.msra.mxu2 %vm621_vm6, %v7947_v37 }
 0x121   :  { %v368_v38 = vsel %vm367_vm1, %v7330_v11, %v364_v12  ;;  %v388_v11 = vmul.f32 %v348_v36, %v7726_v5  ;;  %v331_v50 = vmul.f32 %v7938_v20, %v330_v15  ;;  %6646 = vmatpush.msk.msra.mxu3 %vm621_vm6, %v7947_v37  ;;  %7341 = vrsqrt.f32 %v7953_v40 }
 0x122   :  { %v390_v46 = vmul.f32 %v368_v38, %v7723_v4  ;;  %v312_v22 = vmul.f32 0.5, %v311_v43  ;;  %v192_v63 = vpop.xlane.xlu2 %191  ;;  %v480_v4 = vmul.f32 %v7829_v2, %v389_v33  ;;  %v291_v54 = vmul.f32 %v7949_v34, %v290_v42  ;;  %v186_v51 = vpop.xlane.xlu1 %185 }
 0x123   :  { %v332_v52 = vmul.f32 0.5, %v331_v50  ;;  %v7984_v2 = vadd.f32 1e-05, %v224_v55  ;;  %v225_v56 = vmul.f32 %v192_v63, %v7702_v48  ;;  %v479_v47 = vmul.f32 %v7831_v10, %v388_v11 }
 0x124   :  { %v481_v21 = vmul.f32 %v7841_v8, %v390_v46  ;;  %v313_v35 = vsub.f32 1.5, %v312_v22  ;;  %v328_v8 = vsel %vm7979_vm3, %v7892_v14, %v324_v62  ;;  %v292_v26 = vmul.f32 0.5, %v291_v54 }
 0x125   :  { %v333_v57 = vsub.f32 1.5, %v332_v52  ;;  %v223_v58 = vmul.f32 %v186_v51, %v7702_v48  ;;  %vm335_vm7 = vweird.f32 %v7890_v31  ;;  %v7998_v59 = vadd.f32 1e-05, %v225_v56  ;;  %v8000_v14 = vpop.eup %7339 }
 0x126   :  { %v7994_v61 = vadd.f32 %v7839_v7, %v481_v21  ;;  %7343 = vrsqrt.f32 %v7984_v2  ;;  %v8013_v48 = vadd.f32 %v7845_v19, %v480_v4  ;;  %v314_v7 = vmul.f32 %v7915_v53, %v313_v35  ;;  %vm337_vm9 = vmor %vm335_vm7, %vm336_vm4 }
 0x127   :  { %v334_v10 = vmul.f32 %v7938_v20, %v333_v57  ;;  %v386_v1 = vmul.f32 %v328_v8, %v7729_v6  ;;  %v293_v31 = vsub.f32 1.5, %v292_v26  ;;  %v280_v0 = vmul.f32 %v8000_v14, %v7936_v30  ;;  %v8024_v45 = vpop.eup %7341 }
 0x128   :  { %629 = vmatpush.msra.mxu0 %v7994_v61  ;;  %700 = vmatpush.msra.mxu1 %v7994_v61  ;;  %7345 = vrsqrt.f32 %v7998_v59  ;;  %v8027_v12 = vadd.f32 1e-05, %v223_v58  ;;  %v8032_v6 = vadd.f32 %v7847_v9, %v479_v47  ;;  %v318_v33 = vsel %vm8004_vm8, %v7915_v53, %v314_v7 }
 0x129   :  { %771 = vmatpush.msra.mxu2 %v7994_v61  ;;  %842 = vmatpush.msra.mxu3 %v7994_v61  ;;  %v338_v19 = vsel %vm337_vm9, %v7938_v20, %v334_v10  ;;  %v281_v43 = vmul.f32 %v8000_v14, %v280_v0  ;;  %v300_v20 = vmul.f32 %v8024_v45, %v7953_v40  ;;  %vm295_vm10 = vweird.f32 %v7896_v16 }
 0x12a   :  { %630 = vmatpush.msra.mxu0 %v8013_v48  ;;  %701 = vmatpush.msra.mxu1 %v8013_v48  ;;  %v387_v36 = vmul.f32 %v338_v19, %v7738_v17  ;;  %v428_v38 = vpop.permute.xlu2 %427  ;;  %v385_v9 = vmul.f32 %v318_v33, %v7746_v27  ;;  %v477_v17 = vmul.f32 %v7851_v24, %v386_v1  ;;  %7347 = vrsqrt.f32 %v8027_v12 }
 0x12b   :  { %772 = vmatpush.msra.mxu2 %v8013_v48  ;;  %843 = vmatpush.msra.mxu3 %v8013_v48  ;;  %v282_v15 = vmul.f32 0.5, %v281_v43  ;;  %v301_v55 = vmul.f32 %v8024_v45, %v300_v20  ;;  %v294_v22 = vmul.f32 %v7949_v34, %v293_v31  ;;  %vm296_vm11 = vweird.f32 %v7949_v34 }
 0x12c   :  { %631 = vmatpush.msra.mxu0 %v8032_v6  ;;  %702 = vmatpush.msra.mxu1 %v8032_v6  ;;  %v478_v53 = vmul.f32 %v7843_v18, %v387_v36  ;;  %v8052_v62 = vpop.eup %7343  ;;  %v476_v27 = vmul.f32 %v7853_v25, %v385_v9  ;;  %vm306_vm12 = vweird.f32 %v8024_v45  ;;  %vm8070_vm13 = vmor %vm295_vm10, %vm296_vm11  ;;  %vm305_vm14 = vweird.f32 %v7953_v40 }
 0x12d   :  { %773 = vmatpush.msra.mxu2 %v8032_v6  ;;  %844 = vmatpush.msra.mxu3 %v8032_v6  ;;  %v283_v18 = vsub.f32 1.5, %v282_v15  ;;  %v302_v42 = vmul.f32 0.5, %v301_v55  ;;  %v260_v4 = vmul.f32 %v8052_v62, %v7984_v2  ;;  %v298_v21 = vsel %vm8070_vm13, %v7949_v34, %v294_v22  ;;  %vm307_vm0 = vmor %vm305_vm14, %vm306_vm12 }
 0x12e   :  { %v529_v46 = vpop.permute.xlu0 %528  ;;  %v8058_v24 = vpop.eup %7345  ;;  %v8061_v63 = vadd.f32 %v7849_v23, %v478_v53  ;;  %v8077_v23 = vadd.f32 %v7857_v28, %v477_v17  ;;  %vm286_vm15 = vweird.f32 %v8000_v14  ;;  %vm285_vm1 = vweird.f32 %v7936_v30 }
 0x12f   :  { %v270_v11 = vmul.f32 %v8058_v24, %v7998_v59  ;;  %v303_v50 = vsub.f32 1.5, %v302_v42  ;;  %v8083_v54 = vadd.f32 %v529_v46, %v476_v27  ;;  %v284_v28 = vmul.f32 %v8000_v14, %v283_v18  ;;  %vm287_vm2 = vmor %vm285_vm1, %vm286_vm15 }
 0x130   :  { %632 = vmatpush.msra.mxu0 %v8061_v63  ;;  %703 = vmatpush.msra.mxu1 %v8061_v63  ;;  %v8093_v51 = vpop.eup %7347  ;;  %v261_v34 = vmul.f32 %v8052_v62, %v260_v4  ;;  %v383_v8 = vmul.f32 %v298_v21, %v7752_v29  ;;  %vm276_vm3 = vweird.f32 %v8058_v24  ;;  %v575_v36 = vlaneseq }
 0x131   :  { %774 = vmatpush.msra.mxu2 %v8061_v63  ;;  %845 = vmatpush.msra.mxu3 %v8061_v63  ;;  %v271_v16 = vmul.f32 %v8058_v24, %v270_v11  ;;  %v304_v40 = vmul.f32 %v8024_v45, %v303_v50  ;;  %v250_v56 = vmul.f32 %v8093_v51, %v8027_v12  ;;  %vm265_vm4 = vweird.f32 %v7984_v2 }
 0x132   :  { %633 = vmatpush.msra.mxu0 %v8077_v23  ;;  %704 = vmatpush.msra.mxu1 %v8077_v23  ;;  %v519_v5 = vpop.permute.xlu2 %518  ;;  %v288_v47 = vsel %vm287_vm2, %v8000_v14, %v284_v28  ;;  %v262_v58 = vmul.f32 0.5, %v261_v34  ;;  %v474_v29 = vmul.f32 %v428_v38, %v383_v8  ;;  %vm275_vm5 = vweird.f32 %v7998_v59 }
 0x133   :  { %775 = vmatpush.msra.mxu2 %v8077_v23  ;;  %846 = vmatpush.msra.mxu3 %v8077_v23  ;;  %v308_v52 = vsel %vm307_vm0, %v8024_v45, %v304_v40  ;;  %v272_v26 = vmul.f32 0.5, %v271_v16  ;;  %v382_v10 = vmul.f32 %v288_v47, %v7767_v39  ;;  %v251_v31 = vmul.f32 %v8093_v51, %v250_v56  ;;  %vm277_vm8 = vmor %vm275_vm5, %vm276_vm3 }
 0x134   :  { %634 = vmatpush.msra.mxu0 %v8083_v54  ;;  %705 = vmatpush.msra.mxu1 %v8083_v54  ;;  %v384_v30 = vmul.f32 %v308_v52, %v7759_v32  ;;  %v8118_v0 = vadd.f32 %v519_v5, %v474_v29  ;;  %v263_v14 = vsub.f32 1.5, %v262_v58  ;;  %vm266_vm7 = vweird.f32 %v8052_v62 }
 0x135   :  { %776 = vmatpush.msra.mxu2 %v8083_v54  ;;  %847 = vmatpush.msra.mxu3 %v8083_v54  ;;  %v273_v1 = vsub.f32 1.5, %v272_v26  ;;  %v252_v39 = vmul.f32 0.5, %v251_v31  ;;  %vm267_vm9 = vmor %vm265_vm4, %vm266_vm7  ;;  %v8141_v17 = vshrl.u32 %v575_v36, 7  ;;  %vm256_vm10 = vweird.f32 %v8093_v51 }
 0x136   :  { %v423_v35 = vpop.permute.xlu0 %422  ;;  %v475_v57 = vmul.f32 %v7855_v3, %v384_v30  ;;  %v264_v43 = vmul.f32 %v8052_v62, %v263_v14  ;;  %vm255_vm11 = vweird.f32 %v8027_v12  ;;  %v12021_v40 = vmov 0.0  }
 0x137   :  { %v473_v32 = vmul.f32 %v423_v35, %v382_v10  ;;  %v274_v33 = vmul.f32 %v8058_v24, %v273_v1  ;;  %v253_v38 = vsub.f32 1.5, %v252_v39  ;;  %12158 = vst [vmem:[#allocation9_spill] sm:$0xff] %v8141_v17  ;;  %v8149_v46 = vmul.u32 2, %v8141_v17  ;;  %vm257_vm12 = vmor %vm255_vm11, %vm256_vm10 }
 0x138   :  { %v268_v2 = vsel %vm267_vm9, %v8052_v62, %v264_v43  ;;  %v8169_v4 = vadd.s32 8, %v8141_v17  ;;  %vm602_vm1 = vcmask 818176   ;;  %v8195_v52 = vadd.s32 16, %v8141_v17 }
 0x139   :  { %v278_v9 = vsel %vm277_vm8, %v8058_v24, %v274_v33  ;;  %v254_v53 = vmul.f32 %v8093_v51, %v253_v38  ;;  %v380_v15 = vmul.f32 %v268_v2, %v7773_v41  ;;  %v8159_v41 = vand.u32 127, %v575_v36 }
 0x13a   :  { %v524_v60 = vpop.permute.xlu1 %523  ;;  %v413_v19 = vpop.permute.xlu2 %412  ;;  %v381_v59 = vmul.f32 %v278_v9, %v7780_v44  ;;  %v660_v42 = vadd.s32 1, %v8149_v46  ;;  %v731_v12 = vadd.s32 2, %v8149_v46  ;;  %12159 = vst [vmem:[#allocation10_spill] sm:$0xff] %v8169_v4  ;;  %v802_v25 = vadd.s32 3, %v8149_v46 }
 0x13b   :  { %v8115_v7 = vadd.f32 %v524_v60, %v475_v57  ;;  %v471_v24 = vmul.f32 %v413_v19, %v380_v15  ;;  %v258_v44 = vsel %vm257_vm12, %v8093_v51, %v254_v53  ;;  %vm590_vm13 = vcmp.eq.s32.totalorder %v8159_v41, %v8149_v46  ;;  %12160 = vst [vmem:[#allocation11_spill] sm:$0xff] %v8195_v52 }
 0x13c   :  { %v379_v50 = vmul.f32 %v258_v44, %v7787_v49  ;;  %vm666_vm14 = vcmp.eq.s32.totalorder %v8159_v41, %v660_v42  ;;  %vm737_vm15 = vcmp.eq.s32.totalorder %v8159_v41, %v731_v12  ;;  %v8181_v28 = vmul.u32 2, %v8169_v4 }
 0x13d   :  { %635 = vmatpush.msra.mxu0 %v8115_v7  ;;  %706 = vmatpush.msra.mxu1 %v8115_v7  ;;  %vm808_vm0 = vcmp.eq.s32.totalorder %v8159_v41, %v802_v25  ;;  %v8185_v51 = vsel %vm590_vm13, 1.0, %v12021_v40  ;;  %v8188_v34 = vsel %vm666_vm14, 1.0, %v12021_v40  ;;  %v743_v5 = vsel %vm737_vm15, 1.0, %v12021_v40 }
 0x13e   :  { %777 = vmatpush.msra.mxu2 %v8115_v7  ;;  %848 = vmatpush.msra.mxu3 %v8115_v7  ;;  %v514_v3 = vpop.permute.xlu0 %513  ;;  %v661_v35 = vadd.s32 1, %v8181_v28  ;;  %v814_v8 = vsel %vm808_vm0, 1.0, %v12021_v40  ;;  %v732_v30 = vadd.s32 2, %v8181_v28  ;;  %v803_v26 = vadd.s32 3, %v8181_v28 }
 0x13f   :  { %v8124_v45 = vadd.f32 %v514_v3, %v473_v32  ;;  %636 = vmatpush.msra.mxu0 %v8118_v0  ;;  %707 = vmatpush.msra.mxu1 %v8118_v0  ;;  %vm591_vm2 = vcmp.eq.s32.totalorder %v8159_v41, %v8181_v28  ;;  %v8214_v56 = vmul.u32 2, %v8195_v52  ;;  %v8229_v60 = vadd.s32 24, %v8141_v17 }
 0x140   :  { %778 = vmatpush.msra.mxu2 %v8118_v0  ;;  %849 = vmatpush.msra.mxu3 %v8118_v0  ;;  %vm667_vm3 = vcmp.eq.s32.totalorder %v8159_v41, %v661_v35  ;;  %vm738_vm4 = vcmp.eq.s32.totalorder %v8159_v41, %v732_v30  ;;  %vm809_vm5 = vcmp.eq.s32.totalorder %v8159_v41, %v803_v26  ;;  %v8261_v32 = vadd.s32 32, %v8141_v17 }
 0x141   :  { %637 = vmatpush.msra.mxu0 %v8124_v45  ;;  %708 = vmatpush.msra.mxu1 %v8124_v45  ;;  %v8224_v47 = vsel %vm667_vm3, 1.0, %v12021_v40  ;;  %v744_v57 = vsel %vm738_vm4, 1.0, %v12021_v40  ;;  %v662_v58 = vadd.s32 1, %v8214_v56  ;;  %12161 = vst [vmem:[#allocation12_spill] sm:$0xff] %v8229_v60  ;;  %v733_v29 = vadd.s32 2, %v8214_v56 }
 0x142   :  { %779 = vmatpush.msra.mxu2 %v8124_v45  ;;  %850 = vmatpush.msra.mxu3 %v8124_v45  ;;  %v418_v20 = vpop.permute.xlu1 %417  ;;  %v504_v22 = vpop.permute.xlu2 %503  ;;  %vm592_vm8 = vcmp.eq.s32.totalorder %v8159_v41, %v8214_v56  ;;  %12162 = vst [vmem:[#allocation13_spill] sm:$0xff] %v8261_v32  ;;  %v8289_v33 = vadd.s32 40, %v8141_v17  ;;  %v874_v42 = vadd.s32 4, %v8181_v28  ;;  %v875_v12 = vadd.s32 4, %v8214_v56 }
 0x143   :  { %v472_v55 = vmul.f32 %v418_v20, %v381_v59  ;;  %v8155_v62 = vadd.f32 %v504_v22, %v471_v24  ;;  %vm668_vm7 = vcmp.eq.s32.totalorder %v8159_v41, %v662_v58  ;;  %vm739_vm9 = vcmp.eq.s32.totalorder %v8159_v41, %v733_v29 }
 0x144   :  { %v8256_v10 = vsel %vm592_vm8, 1.0, %v12021_v40  ;;  %v745_v1 = vsel %vm739_vm9, 1.0, %v12021_v40  ;;  %12163 = vst [vmem:[#allocation14_spill] sm:$0xff] %v8289_v33  ;;  %v589_v20 = vmul.u32 2, %v8289_v33  ;;  %v873_v24 = vadd.s32 4, %v8149_v46  ;;  %v9562_v33 = vld [vmem:[%s12003_s14 + $0x150] sm:$0xff] }
 0x145   :  { %v7416_v46 = vmov 1  }
 0x146   :  { %v408_v11 = vpop.permute.xlu0 %407  ;;  %v665_v59 = vadd.s32 1, %v589_v20  ;;  %v736_v15 = vadd.s32 2, %v589_v20  ;;  %vm879_vm9 = vcmp.eq.s32.totalorder %v8159_v41, %v873_v24  ;;  %7133 = vset.pattern.permute.xlu2 %v7416_v46  ;;  %v878_v28 = vadd.s32 4, %v589_v20 }
 0x147   :  { %v470_v21 = vmul.f32 %v408_v11, %v379_v50 }
 0x148   :  { %vm671_vm4 = vcmp.eq.s32.totalorder %v8159_v41, %v665_v59 }
 0x149   :  { %v677_v22 = vsel %vm671_vm4, 1.0, %v12021_v40 }
 0x14a   :  { %v509_v27 = vpop.permute.xlu1 %508 }
 0x14b   :  { %v8152_v18 = vadd.f32 %v509_v27, %v472_v55  ;;  %v807_v55 = vadd.s32 3, %v589_v20 }
 0x14d   :  { %638 = vmatpush.msra.mxu0 %v8152_v18  ;;  %709 = vmatpush.msra.mxu1 %v8152_v18  ;;  %vm813_vm8 = vcmp.eq.s32.totalorder %v8159_v41, %v807_v55 }
 0x14e   :  { %780 = vmatpush.msra.mxu2 %v8152_v18  ;;  %851 = vmatpush.msra.mxu3 %v8152_v18  ;;  %v819_v44 = vsel %vm813_vm8, 1.0, %v12021_v40 }
 0x14f   :  { %639 = vmatpush.msra.mxu0 %v8155_v62  ;;  %710 = vmatpush.msra.mxu1 %v8155_v62 }
 0x150   :  { %781 = vmatpush.msra.mxu2 %v8155_v62  ;;  %852 = vmatpush.msra.mxu3 %v8155_v62 }
 0x152   :  { %v499_v49 = vpop.permute.xlu1 %498 }
 0x153   :  { %v8178_v16 = vadd.f32 %v499_v49, %v470_v21 }
 0x155   :  { %640 = vmatpush.msra.mxu0 %v8178_v16  ;;  %711 = vmatpush.msra.mxu1 %v8178_v16 }
 0x156   :  { %782 = vmatpush.msra.mxu2 %v8178_v16  ;;  %853 = vmatpush.msra.mxu3 %v8178_v16 }
 0x157   :  { %6626 = vmatmul.msk.f32.vlgmr.msra.gmra.mxu0 %vm602_vm1, %v8185_v51  ;;  %6633 = vmatmul.msk.f32.vlgmr.msra.gmra.mxu1 %vm602_vm1, %v8188_v34 }
 0x158   :  { %6653 = vmatpush.msk.msrb.mxu0 %vm621_vm6, %v7947_v37  ;;  %6640 = vmatmul.msk.f32.vlgmr.msra.gmra.mxu2 %vm602_vm1, %v743_v5  ;;  %v8221_v37 = vsel %vm591_vm2, 1.0, %v12021_v40 }
 0x159   :  { %6647 = vmatmul.msk.f32.vlgmr.msra.gmra.mxu3 %vm602_vm1, %v814_v8 }
 0x15a   :  { %913 = vmatpush.msrb.mxu0 %v7994_v61  ;;  %v815_v61 = vsel %vm809_vm5, 1.0, %v12021_v40  ;;  %vm595_vm5 = vcmp.eq.s32.totalorder %v8159_v41, %v589_v20 }
 0x15b   :  { %v601_v27 = vsel %vm595_vm5, 1.0, %v12021_v40 }
 0x15c   :  { %914 = vmatpush.msrb.mxu0 %v8013_v48  ;;  %v804_v48 = vadd.s32 3, %v8214_v56 }
 0x15e   :  { %915 = vmatpush.msrb.mxu0 %v8032_v6  ;;  %v8246_v6 = vmul.u32 2, %v8229_v60  ;;  %vm810_vm10 = vcmp.eq.s32.totalorder %v8159_v41, %v804_v48  ;;  %v9574_v60 = vld [vmem:[%s12003_s14 + $0x148] sm:$0xff] }
 0x15f   :  { %6627 = vmatmul.msk.f32.gmra.mxu0 %vm602_vm1, %v8221_v37  ;;  %6634 = vmatmul.msk.f32.gmra.mxu1 %vm602_vm1, %v8224_v47 }
 0x160   :  { %916 = vmatpush.msrb.mxu0 %v8061_v63  ;;  %6641 = vmatmul.msk.f32.gmra.mxu2 %vm602_vm1, %v744_v57  ;;  %v8253_v63 = vsel %vm668_vm7, 1.0, %v12021_v40  ;;  %v663_v31 = vadd.s32 1, %v8246_v6  ;;  %v734_v14 = vadd.s32 2, %v8246_v6  ;;  %vm593_vm12 = vcmp.eq.s32.totalorder %v8159_v41, %v8246_v6 }
 0x161   :  { %6648 = vmatmul.msk.f32.gmra.mxu3 %vm602_vm1, %v815_v61  ;;  %v599_v3 = vsel %vm593_vm12, 1.0, %v12021_v40  ;;  %vm742_vm7 = vcmp.eq.s32.totalorder %v8159_v41, %v736_v15  ;;  %v876_v25 = vadd.s32 4, %v8246_v6 }
 0x162   :  { %917 = vmatpush.msrb.mxu0 %v8077_v23  ;;  %v816_v23 = vsel %vm810_vm10, 1.0, %v12021_v40  ;;  %vm669_vm11 = vcmp.eq.s32.totalorder %v8159_v41, %v663_v31  ;;  %vm740_vm13 = vcmp.eq.s32.totalorder %v8159_v41, %v734_v14  ;;  %vm880_vm10 = vcmp.eq.s32.totalorder %v8159_v41, %v874_v42 }
 0x163   :  { %v746_v39 = vsel %vm740_vm13, 1.0, %v12021_v40  ;;  %v886_v11 = vsel %vm880_vm10, 1.0, %v12021_v40  ;;  %vm882_vm12 = vcmp.eq.s32.totalorder %v8159_v41, %v876_v25 }
 0x164   :  { %918 = vmatpush.msrb.mxu0 %v8083_v54  ;;  %v805_v54 = vadd.s32 3, %v8246_v6  ;;  %v888_v21 = vsel %vm882_vm12, 1.0, %v12021_v40 }
 0x166   :  { %919 = vmatpush.msrb.mxu0 %v8115_v7  ;;  %v8276_v7 = vmul.u32 2, %v8261_v32  ;;  %vm811_vm14 = vcmp.eq.s32.totalorder %v8159_v41, %v805_v54  ;;  %v9569_v32 = vld [vmem:[%s12003_s14 + $0x100] sm:$0xff] }
 0x167   :  { %6635 = vmatmul.msk.f32.gmra.mxu1 %vm602_vm1, %v8253_v63  ;;  %6628 = vmatmul.msk.f32.gmra.mxu0 %vm602_vm1, %v8256_v10  ;;  %v817_v36 = vsel %vm811_vm14, 1.0, %v12021_v40  ;;  %vm884_vm14 = vcmp.eq.s32.totalorder %v8159_v41, %v878_v28 }
 0x168   :  { %920 = vmatpush.msrb.mxu0 %v8118_v0  ;;  %6642 = vmatmul.msk.f32.gmra.mxu2 %vm602_vm1, %v745_v1  ;;  %v675_v0 = vsel %vm669_vm11, 1.0, %v12021_v40  ;;  %v664_v19 = vadd.s32 1, %v8276_v7  ;;  %v806_v43 = vadd.s32 3, %v8276_v7  ;;  %vm594_vm0 = vcmp.eq.s32.totalorder %v8159_v41, %v8276_v7 }
 0x169   :  { %6649 = vmatmul.msk.f32.gmra.mxu3 %vm602_vm1, %v816_v23  ;;  %v600_v9 = vsel %vm594_vm0, 1.0, %v12021_v40  ;;  %vm881_vm11 = vcmp.eq.s32.totalorder %v8159_v41, %v875_v12  ;;  %v877_v49 = vadd.s32 4, %v8276_v7  ;;  %v890_v5 = vsel %vm884_vm14, 1.0, %v12021_v40 }
 0x16a   :  { %921 = vmatpush.msrb.mxu0 %v8124_v45  ;;  %v735_v45 = vadd.s32 2, %v8276_v7  ;;  %vm670_vm15 = vcmp.eq.s32.totalorder %v8159_v41, %v664_v19  ;;  %vm812_vm3 = vcmp.eq.s32.totalorder %v8159_v41, %v806_v43  ;;  %v887_v50 = vsel %vm881_vm11, 1.0, %v12021_v40 }
 0x16b   :  { %v676_v38 = vsel %vm670_vm15, 1.0, %v12021_v40  ;;  %v818_v53 = vsel %vm812_vm3, 1.0, %v12021_v40  ;;  %vm883_vm13 = vcmp.eq.s32.totalorder %v8159_v41, %v877_v49 }
 0x16c   :  { %922 = vmatpush.msrb.mxu0 %v8152_v18  ;;  %vm741_vm2 = vcmp.eq.s32.totalorder %v8159_v41, %v735_v45  ;;  %v748_v18 = vsel %vm742_vm7, 1.0, %v12021_v40  ;;  %vm1499_vm7 = vcmask 523264  }
 0x16d   :  { %v747_v2 = vsel %vm741_vm2, 1.0, %v12021_v40 }
 0x16e   :  { %923 = vmatpush.msrb.mxu0 %v8155_v62  ;;  %v885_v62 = vsel %vm879_vm9, 1.0, %v12021_v40 }
 0x16f   :  { %6636 = vmatmul.msk.f32.gmra.mxu1 %vm602_vm1, %v675_v0  ;;  %6629 = vmatmul.msk.f32.gmra.mxu0 %vm602_vm1, %v599_v3 }
 0x170   :  { %924 = vmatpush.msrb.mxu0 %v8178_v16  ;;  %6643 = vmatmul.msk.f32.gmra.mxu2 %vm602_vm1, %v746_v39  ;;  %v889_v16 = vsel %vm883_vm13, 1.0, %v12021_v40  ;;  %v8852_v40 = vld [vmem:[%s12178_s3 + $0x88] sm:$0xff] }
 0x171   :  { %6650 = vmatmul.msk.f32.gmra.mxu3 %vm602_vm1, %v817_v36 }
 0x177   :  { %6637 = vmatmul.msk.f32.gmra.mxu1 %vm602_vm1, %v676_v38  ;;  %6630 = vmatmul.msk.f32.gmra.mxu0 %vm602_vm1, %v600_v9 }
 0x178   :  { %6644 = vmatmul.msk.f32.gmra.mxu2 %vm602_vm1, %v747_v2  ;;  %v8396_v2 = vld [vmem:[%s12164_s30] sm:$0x1f]  ;;  %s7427_s30 = smov [#allocation5]  }
 0x179   :  { %6651 = vmatmul.msk.f32.gmra.mxu3 %vm602_vm1, %v818_v53  ;;  %v8401_v53 = vperm.slane %v8396_v2, 0  ;;  %v8406_v55 = vperm.slane %v8396_v2, 1 }
 0x17f   :  { %6638 = vmatmul.msk.f32.gmra.mxu1 %vm602_vm1, %v677_v22  ;;  %6631 = vmatmul.msk.f32.gmra.mxu0 %vm602_vm1, %v601_v27  ;;  %v8411_v27 = vld [vmem:[%s12165_s10] ss:$0 sm:$0xff]  ;;  %s12188_s10 = sld [smem:[#allocation93_spill]] }
 0x180   :  { %6645 = vmatmul.msk.f32.gmra.mxu2 %vm602_vm1, %v748_v18 }
 0x181   :  { %6652 = vmatmul.msk.f32.gmra.mxu3 %vm602_vm1, %v819_v44 }
 0x187   :  { %6654 = vmatmul.msk.f32.vlgmr.msrb.gmra.mxu0 %vm602_vm1, %v885_v62 }
 0x18f   :  { %6655 = vmatmul.msk.f32.gmra.mxu0 %vm602_vm1, %v886_v11 }
 0x197   :  { %6656 = vmatmul.msk.f32.gmra.mxu0 %vm602_vm1, %v887_v50 }
 0x19f   :  { %6657 = vmatmul.msk.f32.gmra.mxu0 %vm602_vm1, %v888_v21 }
 0x1a7   :  { %6658 = vmatmul.msk.f32.gmra.mxu0 %vm602_vm1, %v889_v16 }
 0x1af   :  { %6659 = vmatmul.msk.f32.gmra.mxu0 %vm602_vm1, %v890_v5  ;;  %v8424_v5 = vperm.slane %v8396_v2, 2  ;;  %vm12052_vm1 = vcmask 392192  }
 0x1d4   :  { %v642_v35 = vpop.f32.mrf.mxu0  ;;  %v8350_v8 = vpop.f32.mrf.mxu1 }
 0x1d5   :  { %994 = vperm.xlu1 %7132, %v8350_v8   ;;  %1165 = vperm.xlu2 %7133, %v642_v35  }
 0x1d6   :  { %951 = vperm.xlu0 %7131, %v642_v35  }
 0x1db   :  { %v8353_v30 = vpop.f32.mrf.mxu2 }
 0x1dc   :  { %v645_v26 = vpop.f32.mrf.mxu0  ;;  %v8358_v56 = vpop.f32.mrf.mxu3 }
 0x1dd   :  { %7135 = vset.pattern.permute.xlu1 %v7416_v46  ;;  %7134 = vset.pattern.permute.xlu2 %v7413_v13  ;;  %v716_v57 = vpop.f32.mrf.mxu1 }
 0x1de   :  { %1037 = vperm.xlu0 %7131, %v8353_v30   ;;  %1169 = vperm.xlu1 %7135, %v645_v26  }
 0x1df   :  { %956 = vperm.xlu2 %7134, %v645_v26  }
 0x1e3   :  { %v8361_v58 = vpop.f32.mrf.mxu2 }
 0x1e4   :  { %v8363_v61 = vpop.f32.mrf.mxu3  ;;  %v648_v48 = vpop.f32.mrf.mxu0 }
 0x1e5   :  { %v719_v29 = vpop.f32.mrf.mxu1 }
 0x1e6   :  { %1080 = vperm.xlu0 %7131, %v8358_v56   ;;  %1205 = vperm.xlu1 %7135, %v716_v57  }
 0x1e7   :  { %999 = vperm.xlu2 %7134, %v716_v57  }
 0x1eb   :  { %v790_v6 = vpop.f32.mrf.mxu2 }
 0x1ec   :  { %v8370_v31 = vpop.f32.mrf.mxu3  ;;  %v651_v54 = vpop.f32.mrf.mxu0 }
 0x1ed   :  { %v722_v1 = vpop.f32.mrf.mxu1 }
 0x1ee   :  { %1042 = vperm.xlu0 %7131, %v8361_v58   ;;  %7136 = vset.pattern.permute.xlu1 %v7413_v13 }
 0x1ef   :  { %1085 = vperm.xlu2 %7134, %v8363_v61   ;;  %1004 = vperm.xlu1 %7136, %v719_v29  }
 0x1f3   :  { %v793_v23 = vpop.f32.mrf.mxu2 }
 0x1f4   :  { %v864_v7 = vpop.f32.mrf.mxu3  ;;  %v654_v0 = vpop.f32.mrf.mxu0 }
 0x1f5   :  { %v725_v14 = vpop.f32.mrf.mxu1 }
 0x1f6   :  { %961 = vperm.xlu0 %7131, %v648_v48  }
 0x1f7   :  { %7137 = vset.pattern.permute.xlu2 %v7416_v46  ;;  %1047 = vperm.xlu1 %7136, %v790_v6  }
 0x1f8   :  { %1173 = vperm.xlu2 %7137, %v648_v48  }
 0x1fb   :  { %v796_v3 = vpop.f32.mrf.mxu2 }
 0x1fc   :  { %v867_v39 = vpop.f32.mrf.mxu3  ;;  %v657_v19 = vpop.f32.mrf.mxu0 }
 0x1fd   :  { %v728_v45 = vpop.f32.mrf.mxu1 }
 0x1fe   :  { %7138 = vset.pattern.permute.xlu0 %v7416_v46 }
 0x1ff   :  { %1209 = vperm.xlu0 %7138, %v719_v29   ;;  %7142 = vset.pattern.permute.xlu1 %v7416_v46 }
 0x200   :  { %7139 = vset.pattern.permute.xlu2 %v7413_v13  ;;  %1213 = vperm.xlu1 %7142, %v722_v1  }
 0x201   :  { %1090 = vperm.xlu2 %7139, %v8370_v31  }
 0x203   :  { %v799_v38 = vpop.f32.mrf.mxu2 }
 0x204   :  { %v8379_v36 = vpop.f32.mrf.mxu0  ;;  %v870_v18 = vpop.f32.mrf.mxu3 }
 0x207   :  { %1245 = vperm.xlu0 %7138, %v790_v6  }
 0x208   :  { %1217 = vperm.xlu1 %7142, %v725_v14  }
 0x209   :  { %1009 = vperm.xlu2 %7139, %v722_v1  }
 0x20c   :  { %v8385_v43 = vpop.f32.mrf.mxu0 }
 0x20f   :  { %7140 = vset.pattern.permute.xlu0 %v7413_v13 }
 0x210   :  { %966 = vperm.xlu0 %7140, %v651_v54   ;;  %7145 = vset.pattern.permute.xlu1 %v7413_v13 }
 0x211   :  { %7141 = vset.pattern.permute.xlu2 %v7416_v46  ;;  %1057 = vperm.xlu1 %7145, %v796_v3  }
 0x212   :  { %1177 = vperm.xlu2 %7141, %v651_v54  }
 0x214   :  { %v8391_v9 = vpop.f32.mrf.mxu0 }
 0x218   :  { %1052 = vperm.xlu0 %7140, %v793_v23  }
 0x219   :  { %7148 = vset.pattern.permute.xlu1 %v7416_v46 }
 0x21a   :  { %1249 = vperm.xlu2 %7141, %v793_v23   ;;  %1289 = vperm.xlu1 %7148, %v867_v39   ;;  %v8431_v23 = vperm.slane %v8396_v2, 3 }
 0x21c   :  { %v935_v22 = vpop.f32.mrf.mxu0 }
 0x220   :  { %1095 = vperm.xlu0 %7140, %v864_v7  }
 0x222   :  { %1285 = vperm.xlu2 %7141, %v864_v7   ;;  %7150 = vset.pattern.permute.xlu1 %v7413_v13 }
 0x223   :  { %1019 = vperm.xlu1 %7150, %v728_v45  }
 0x224   :  { %v938_v21 = vpop.f32.mrf.mxu0 }
 0x228   :  { %7147 = vset.pattern.permute.xlu0 %v7416_v46 }
 0x229   :  { %1253 = vperm.xlu0 %7147, %v796_v3  }
 0x22a   :  { %7143 = vset.pattern.permute.xlu2 %v7413_v13 }
 0x22b   :  { %971 = vperm.xlu2 %7143, %v654_v0   ;;  %7152 = vset.pattern.permute.xlu1 %v7416_v46 }
 0x22c   :  { %1221 = vperm.xlu1 %7152, %v728_v45   ;;  %v941_v6 = vpop.f32.mrf.mxu0 }
 0x22f   :  { %v8387_v20 = vpop.permute.xlu2 %1165 }
 0x231   :  { %7149 = vset.pattern.permute.xlu0 %v7413_v13 }
 0x232   :  { %976 = vperm.xlu0 %7149, %v657_v19  }
 0x233   :  { %1014 = vperm.xlu2 %7143, %v725_v14  }
 0x234   :  { %7153 = vset.pattern.permute.xlu1 %v7413_v13 }
 0x235   :  { %1062 = vperm.xlu1 %7153, %v799_v38  }
 0x239   :  { %v957_v59 = vpop.permute.xlu2 %956 }
 0x23a   :  { %7151 = vset.pattern.permute.xlu0 %v7416_v46  ;;  %v981_v15 = vmul.f32 %v8401_v53, %v957_v59 }
 0x23b   :  { %7144 = vset.pattern.permute.xlu2 %v7416_v46  ;;  %1185 = vperm.xlu0 %7151, %v657_v19  }
 0x23c   :  { %1181 = vperm.xlu2 %7144, %v654_v0   ;;  %v987_v44 = vadd.f32 %v8411_v27, %v981_v15 }
 0x23d   :  { %1123 = vperm.xlu1 %7153, %v8379_v36  }
 0x241   :  { %v1000_v24 = vpop.permute.xlu2 %999 }
 0x242   :  { %v1024_v62 = vmul.f32 %v8406_v55, %v1000_v24 }
 0x243   :  { %7154 = vset.pattern.permute.xlu0 %v7413_v13 }
 0x244   :  { %v1030_v42 = vadd.f32 %v1024_v62, %v987_v44  ;;  %7146 = vset.pattern.permute.xlu2 %v7413_v13  ;;  %1105 = vperm.xlu0 %7154, %v870_v18  }
 0x245   :  { %1100 = vperm.xlu2 %7146, %v867_v39   ;;  %1133 = vperm.xlu1 %7153, %v8391_v9  }
 0x247   :  { %v995_v11 = vpop.permute.xlu1 %994 }
 0x248   :  { %v952_v12 = vpop.permute.xlu0 %951  ;;  %v1023_v49 = vmul.f32 %v8406_v55, %v995_v11 }
 0x249   :  { %v980_v50 = vmul.f32 %v8401_v53, %v952_v12  ;;  %v1086_v25 = vpop.permute.xlu2 %1085 }
 0x24a   :  { %v1110_v59 = vmul.f32 %v8431_v23, %v1086_v25 }
 0x24b   :  { %v986_v16 = vadd.f32 %v8411_v27, %v980_v50 }
 0x24c   :  { %7155 = vset.pattern.permute.xlu0 %v7416_v46 }
 0x24d   :  { %7156 = vset.pattern.permute.xlu2 %v7416_v46  ;;  %1257 = vperm.xlu0 %7155, %v799_v38   ;;  %v1029_v28 = vadd.f32 %v1023_v49, %v986_v16 }
 0x24e   :  { %1293 = vperm.xlu2 %7156, %v870_v18   ;;  %1138 = vperm.xlu1 %7153, %v935_v22  }
 0x250   :  { %v1038_v35 = vpop.permute.xlu0 %1037  ;;  %v1170_v26 = vpop.permute.xlu1 %1169 }
 0x251   :  { %v1066_v57 = vmul.f32 %v8424_v5, %v1038_v35  ;;  %v1189_v1 = vmul.f32 %v1170_v26, %v8401_v53 }
 0x252   :  { %v1174_v29 = vpop.permute.xlu2 %1173 }
 0x253   :  { %v1072_v48 = vadd.f32 %v1066_v57, %v1029_v28  ;;  %v1195_v7 = vadd.f32 %v8411_v27, %v1189_v1 }
 0x255   :  { %1201 = vperm.xlu0 %7155, %v8350_v8  }
 0x256   :  { %7157 = vset.pattern.permute.xlu2 %v7413_v13  ;;  %1148 = vperm.xlu1 %7153, %v941_v6  }
 0x257   :  { %1128 = vperm.xlu2 %7157, %v8385_v43  }
 0x258   :  { %v1081_v14 = vpop.permute.xlu0 %1080  ;;  %v1206_v54 = vpop.permute.xlu1 %1205 }
 0x259   :  { %v1109_v0 = vmul.f32 %v8431_v23, %v1081_v14  ;;  %v1225_v3 = vmul.f32 %v1206_v54, %v8406_v55 }
 0x25b   :  { %v8437_v39 = vadd.f32 %v1109_v0, %v1072_v48  ;;  %v8439_v19 = vadd.f32 %v1225_v3, %v1195_v7  ;;  %v1091_v8 = vpop.permute.xlu2 %1090 }
 0x25d   :  { %1321 = vperm.xlu0 %7155, %v935_v22  }
 0x25e   :  { %7158 = vset.pattern.permute.xlu1 %v7416_v46 }
 0x25f   :  { %1143 = vperm.xlu2 %7157, %v938_v21   ;;  %1325 = vperm.xlu1 %7158, %v938_v21  }
 0x260   :  { %v1043_v13 = vpop.permute.xlu0 %1042 }
 0x261   :  { %v1067_v45 = vmul.f32 %v8424_v5, %v1043_v13  ;;  %v1005_v38 = vpop.permute.xlu1 %1004 }
 0x262   :  { %v1025_v11 = vmul.f32 %v8406_v55, %v1005_v38 }
 0x263   :  { %v1073_v15 = vadd.f32 %v1067_v45, %v1030_v42  ;;  %v8444_v24 = vpop.permute.xlu2 %1009 }
 0x265   :  { %1329 = vperm.xlu0 %7155, %v941_v6   ;;  %v8446_v18 = vadd.f32 %v1110_v59, %v1073_v15 }
 0x267   :  { %7159 = vset.pattern.permute.xlu2 %v7416_v46  ;;  %1281 = vperm.xlu1 %7158, %v8370_v31   ;;  %v1190_v46 = vmul.f32 %v1174_v29, %v8401_v53  ;;  %v1111_v31 = vmul.f32 %v8431_v23, %v1091_v8 }
 0x268   :  { %v962_v22 = vpop.permute.xlu0 %961  ;;  %1241 = vperm.xlu2 %7159, %v8361_v58  }
 0x269   :  { %v982_v44 = vmul.f32 %v8401_v53, %v962_v22  ;;  %v1048_v62 = vpop.permute.xlu1 %1047  ;;  %v1196_v28 = vadd.f32 %v8411_v27, %v1190_v46 }
 0x26a   :  { %v1068_v25 = vmul.f32 %v8424_v5, %v1048_v62 }
 0x26b   :  { %v988_v12 = vadd.f32 %v8411_v27, %v982_v44 }
 0x26c   :  { %v1178_v42 = vpop.permute.xlu2 %1177 }
 0x26d   :  { %v1031_v50 = vadd.f32 %v1025_v11, %v988_v12  ;;  %1317 = vperm.xlu0 %7155, %v8391_v9   ;;  %v1191_v58 = vmul.f32 %v1178_v42, %v8401_v53 }
 0x26f   :  { %v1074_v21 = vadd.f32 %v1068_v25, %v1031_v50  ;;  %1277 = vperm.xlu1 %7158, %v8363_v61   ;;  %v1197_v9 = vadd.f32 %v8411_v27, %v1191_v58 }
 0x270   :  { %1237 = vperm.xlu2 %7159, %v8353_v30  }
 0x271   :  { %v1210_v49 = vpop.permute.xlu0 %1209  ;;  %v8461_v16 = vadd.f32 %v1111_v31, %v1074_v21 }
 0x272   :  { %v1226_v35 = vmul.f32 %v1210_v49, %v8406_v55  ;;  %v1214_v26 = vpop.permute.xlu1 %1213 }
 0x273   :  { %v1227_v57 = vmul.f32 %v1214_v26, %v8406_v55 }
 0x274   :  { %v1232_v29 = vadd.f32 %v1226_v35, %v1196_v28  ;;  %v1250_v48 = vpop.permute.xlu2 %1249 }
 0x275   :  { %v1233_v6 = vadd.f32 %v1227_v57, %v1197_v9  ;;  %v1263_v1 = vmul.f32 %v1250_v48, %v8424_v5  ;;  %1309 = vperm.xlu0 %7155, %v8379_v36  }
 0x277   :  { %v1269_v30 = vadd.f32 %v1263_v1, %v1233_v6  ;;  %1313 = vperm.xlu1 %7158, %v8385_v43  }
 0x278   :  { %1273 = vperm.xlu2 %7159, %v8358_v56  }
 0x279   :  { %v1246_v61 = vpop.permute.xlu0 %1245 }
 0x27a   :  { %v1262_v14 = vmul.f32 %v1246_v61, %v8424_v5  ;;  %v1218_v54 = vpop.permute.xlu1 %1217 }
 0x27b   :  { %v1228_v62 = vmul.f32 %v1218_v54, %v8406_v55 }
 0x27c   :  { %v8472_v7 = vadd.f32 %v1262_v14, %v1232_v29  ;;  %v1286_v0 = vpop.permute.xlu2 %1285 }
 0x27d   :  { %v1299_v3 = vmul.f32 %v1286_v0, %v8431_v23 }
 0x27f   :  { %v8475_v8 = vadd.f32 %v1299_v3, %v1269_v30 }
 0x282   :  { %v967_v13 = vpop.permute.xlu0 %966 }
 0x283   :  { %v1058_v45 = vpop.permute.xlu1 %1057  ;;  %v983_v14 = vmul.f32 %v8401_v53, %v967_v13 }
 0x284   :  { %v1070_v13 = vmul.f32 %v8424_v5, %v1058_v45 }
 0x285   :  { %v972_v38 = vpop.permute.xlu2 %971 }
 0x286   :  { %v984_v1 = vmul.f32 %v8401_v53, %v972_v38 }
 0x28a   :  { %v1053_v36 = vpop.permute.xlu0 %1052 }
 0x28c   :  { %v1290_v59 = vpop.permute.xlu1 %1289 }
 0x28d   :  { %v1015_v15 = vpop.permute.xlu2 %1014  ;;  %v1300_v25 = vmul.f32 %v1290_v59, %v8431_v23  ;;  %v990_v59 = vadd.f32 %v8411_v27, %v984_v1 }
 0x28e   :  { %v1027_v54 = vmul.f32 %v8406_v55, %v1015_v15  ;;  %v1069_v15 = vmul.f32 %v8424_v5, %v1053_v36 }
 0x292   :  { %v1096_v43 = vpop.permute.xlu0 %1095 }
 0x295   :  { %v1020_v22 = vpop.permute.xlu1 %1019 }
 0x296   :  { %v1182_v56 = vpop.permute.xlu2 %1181  ;;  %v1028_v3 = vmul.f32 %v8406_v55, %v1020_v22 }
 0x297   :  { %v1192_v44 = vmul.f32 %v1182_v56, %v8401_v53 }
 0x299   :  { %v1198_v11 = vadd.f32 %v8411_v27, %v1192_v44 }
 0x29b   :  { %v1254_v12 = vpop.permute.xlu0 %1253  ;;  %v1234_v42 = vadd.f32 %v1228_v62, %v1198_v11  ;;  %v989_v62 = vadd.f32 %v8411_v27, %v983_v14  ;;  %v1033_v11 = vadd.f32 %v1027_v54, %v990_v59 }
 0x29c   :  { %v1264_v50 = vmul.f32 %v1254_v12, %v8424_v5  ;;  %v1026_v12 = vmul.f32 %v8406_v55, %v8444_v24 }
 0x29e   :  { %v1270_v46 = vadd.f32 %v1264_v50, %v1234_v42  ;;  %v1222_v31 = vpop.permute.xlu1 %1221 }
 0x29f   :  { %v1101_v28 = vpop.permute.xlu2 %1100 }
 0x2a0   :  { %v8482_v21 = vadd.f32 %v1300_v25, %v1270_v46  ;;  %v1113_v22 = vmul.f32 %v8431_v23, %v1101_v28  ;;  %v8502_v25 = vperm.slane %v8396_v2, 4 }
 0x2a4   :  { %v977_v58 = vpop.permute.xlu0 %976 }
 0x2a5   :  { %v985_v48 = vmul.f32 %v8401_v53, %v977_v58  ;;  %v1032_v58 = vadd.f32 %v1026_v12, %v989_v62 }
 0x2a7   :  { %v1063_v49 = vpop.permute.xlu1 %1062  ;;  %v991_v30 = vadd.f32 %v8411_v27, %v985_v48 }
 0x2a8   :  { %v8484_v9 = vpop.permute.xlu2 %1293  ;;  %v1071_v44 = vmul.f32 %v8424_v5, %v1063_v49  ;;  %v1076_v49 = vadd.f32 %v1070_v13, %v1033_v11 }
 0x2a9   :  { %v1034_v56 = vadd.f32 %v1028_v3, %v991_v30  ;;  %v1075_v30 = vadd.f32 %v1069_v15, %v1032_v58 }
 0x2aa   :  { %v1119_v28 = vadd.f32 %v1113_v22, %v1076_v49 }
 0x2ab   :  { %v1077_v50 = vadd.f32 %v1071_v44, %v1034_v56 }
 0x2ad   :  { %v1186_v35 = vpop.permute.xlu0 %1185 }
 0x2ae   :  { %v1193_v36 = vmul.f32 %v1186_v35, %v8401_v53  ;;  %v1229_v35 = vmul.f32 %v1222_v31, %v8406_v55 }
 0x2af   :  { %v1124_v26 = vpop.permute.xlu1 %1123 }
 0x2b1   :  { %v1129_v6 = vpop.permute.xlu2 %1128 }
 0x2b2   :  { %v1153_v56 = vmul.f32 %v8502_v25, %v1129_v6 }
 0x2b4   :  { %v1159_v6 = vadd.f32 %v1153_v56, %v8446_v18 }
 0x2b6   :  { %v1106_v57 = vpop.permute.xlu0 %1105 }
 0x2b7   :  { %v1134_v29 = vpop.permute.xlu1 %1133  ;;  %v1114_v38 = vmul.f32 %v8431_v23, %v1106_v57  ;;  %v1112_v57 = vmul.f32 %v8431_v23, %v1096_v43  ;;  %v1199_v43 = vadd.f32 %v8411_v27, %v1193_v36 }
 0x2b8   :  { %v1154_v3 = vmul.f32 %v8502_v25, %v1134_v29 }
 0x2b9   :  { %v1144_v42 = vpop.permute.xlu2 %1143  ;;  %v1120_v1 = vadd.f32 %v1114_v38, %v1077_v50  ;;  %v1118_v54 = vadd.f32 %v1112_v57, %v1075_v30  ;;  %v1235_v13 = vadd.f32 %v1229_v35, %v1199_v43 }
 0x2ba   :  { %v1156_v24 = vmul.f32 %v8502_v25, %v1144_v42  ;;  %v1160_v12 = vadd.f32 %v1154_v3, %v8461_v16 }
 0x2bc   :  { %v1162_v59 = vadd.f32 %v1156_v24, %v1119_v28 }
 0x2bf   :  { %v1258_v61 = vpop.permute.xlu0 %1257 }
 0x2c0   :  { %v1139_v0 = vpop.permute.xlu1 %1138  ;;  %v1265_v11 = vmul.f32 %v1258_v61, %v8424_v5 }
 0x2c1   :  { %v1155_v14 = vmul.f32 %v8502_v25, %v1139_v0  ;;  %v1152_v0 = vmul.f32 %v8502_v25, %v1124_v26  ;;  %v1301_v26 = vmul.f32 %v8484_v9, %v8431_v23 }
 0x2c2   :  { %v1242_v38 = vpop.permute.xlu2 %1241  ;;  %v1271_v42 = vadd.f32 %v1265_v11, %v1235_v13 }
 0x2c3   :  { %v1161_v62 = vadd.f32 %v1155_v14, %v1118_v54  ;;  %v1158_v31 = vadd.f32 %v1152_v0, %v8437_v39 }
 0x2c4   :  { %v1307_v18 = vadd.f32 %v1301_v26, %v1271_v42 }
 0x2c7   :  { %v8504_v46 = vpop.permute.xlu0 %1201 }
 0x2c8   :  { %v1149_v48 = vpop.permute.xlu1 %1148 }
 0x2c9   :  { %v1157_v45 = vmul.f32 %v8502_v25, %v1149_v48 }
 0x2ca   :  { %v1238_v58 = vpop.permute.xlu2 %1237 }
 0x2cb   :  { %v1163_v2 = vadd.f32 %v1157_v45, %v1120_v1  ;;  %v1188_v1 = vmul.f32 %v8387_v20, %v8401_v53  ;;  %v1261_v20 = vmul.f32 %v1242_v38, %v8424_v5  ;;  %v1260_v28 = vmul.f32 %v1238_v58, %v8424_v5 }
 0x2cd   :  { %1361 = vmatpush.msrb.mxu1 %v1163_v2  ;;  %1393 = vmatpush.msrb.mxu2 %v1163_v2  ;;  %v1267_v54 = vadd.f32 %v1261_v20, %v8439_v19 }
 0x2cf   :  { %v1322_v44 = vpop.permute.xlu0 %1321  ;;  %1362 = vmatpush.msrb.mxu1 %v1162_v59  ;;  %1394 = vmatpush.msrb.mxu2 %v1162_v59 }
 0x2d0   :  { %v1335_v39 = vmul.f32 %v1322_v44, %v8502_v25 }
 0x2d1   :  { %1363 = vmatpush.msrb.mxu1 %v1161_v62  ;;  %1395 = vmatpush.msrb.mxu2 %v1161_v62  ;;  %v1326_v29 = vpop.permute.xlu1 %1325 }
 0x2d2   :  { %v1336_v15 = vmul.f32 %v1326_v29, %v8502_v25  ;;  %v1341_v48 = vadd.f32 %v1335_v39, %v8475_v8  ;;  %v1194_v8 = vadd.f32 %v8411_v27, %v1188_v1  ;;  %v1274_v53 = vpop.permute.xlu2 %1273 }
 0x2d3   :  { %1364 = vmatpush.msrb.mxu1 %v1160_v12  ;;  %1396 = vmatpush.msrb.mxu2 %v1160_v12 }
 0x2d4   :  { %v1342_v49 = vadd.f32 %v1336_v15, %v8482_v21  ;;  %v1224_v21 = vmul.f32 %v8504_v46, %v8406_v55  ;;  %v1296_v55 = vmul.f32 %v1274_v53, %v8431_v23 }
 0x2d5   :  { %1365 = vmatpush.msrb.mxu1 %v1159_v6  ;;  %1397 = vmatpush.msrb.mxu2 %v1159_v6 }
 0x2d7   :  { %v1330_v61 = vpop.permute.xlu0 %1329  ;;  %1366 = vmatpush.msrb.mxu1 %v1158_v31  ;;  %1398 = vmatpush.msrb.mxu2 %v1158_v31 }
 0x2d8   :  { %v1337_v16 = vmul.f32 %v1330_v61, %v8502_v25  ;;  %6663 = vmatmul.msk.f32.vlgmr.msrb.gmra.mxu2 %vm12052_vm1, %v8188_v34  ;;  %6660 = vmatmul.msk.f32.vlgmr.msrb.gmra.mxu1 %vm12052_vm1, %v8185_v51 }
 0x2d9   :  { %v1282_v22 = vpop.permute.xlu1 %1281 }
 0x2da   :  { %v1343_v50 = vadd.f32 %v1337_v16, %v1307_v18  ;;  %v1298_v9 = vmul.f32 %v1282_v22, %v8431_v23 }
 0x2dc   :  { %1437 = vmatpush.msrb.mxu3 %v1343_v50  ;;  %1463 = vmatpush.msra.mxu1 %v1343_v50  ;;  %v1304_v24 = vadd.f32 %v1298_v9, %v8472_v7  ;;  %v1230_v7 = vadd.f32 %v1224_v21, %v1194_v8 }
 0x2de   :  { %1438 = vmatpush.msrb.mxu3 %v1342_v49  ;;  %1464 = vmatpush.msra.mxu1 %v1342_v49  ;;  %v1266_v27 = vadd.f32 %v1260_v28, %v1230_v7 }
 0x2df   :  { %v1318_v57 = vpop.permute.xlu0 %1317 }
 0x2e0   :  { %v1334_v45 = vmul.f32 %v1318_v57, %v8502_v25  ;;  %6664 = vmatmul.msk.f32.gmra.mxu2 %vm12052_vm1, %v8224_v47  ;;  %1439 = vmatpush.msrb.mxu3 %v1341_v48  ;;  %v1302_v5 = vadd.f32 %v1296_v55, %v1266_v27 }
 0x2e1   :  { %1465 = vmatpush.msra.mxu1 %v1341_v48  ;;  %v1278_v36 = vpop.permute.xlu1 %1277  ;;  %v7417_v48 = vmov 48.0  }
 0x2e2   :  { %v1340_v30 = vadd.f32 %v1334_v45, %v1304_v24  ;;  %6661 = vmatmul.msk.f32.gmra.mxu1 %vm12052_vm1, %v8221_v37  ;;  %v1297_v14 = vmul.f32 %v1278_v36, %v8431_v23  ;;  %7349 = vrcp.f32 %v7417_v48 }
 0x2e4   :  { %1440 = vmatpush.msrb.mxu3 %v1340_v30  ;;  %1466 = vmatpush.msra.mxu1 %v1340_v30  ;;  %v1303_v3 = vadd.f32 %v1297_v14, %v1267_v54 }
 0x2e7   :  { %v1310_v2 = vpop.permute.xlu0 %1309 }
 0x2e8   :  { %6665 = vmatmul.msk.f32.gmra.mxu2 %vm12052_vm1, %v8253_v63  ;;  %v1332_v59 = vmul.f32 %v1310_v2, %v8502_v25  ;;  %v7350_v21 = vpop.eup %7349 }
 0x2e9   :  { %v1314_v46 = vpop.permute.xlu1 %1313  ;;  %v1525_v14 = vmul.f32 48.0, %v7350_v21  ;;  %vm1529_vm14 = vweird.f32 %v7350_v21 }
 0x2ea   :  { %v1333_v43 = vmul.f32 %v1314_v46, %v8502_v25  ;;  %6662 = vmatmul.msk.f32.gmra.mxu1 %vm12052_vm1, %v8256_v10  ;;  %v1338_v19 = vadd.f32 %v1332_v59, %v1302_v5 }
 0x2ec   :  { %v1339_v56 = vadd.f32 %v1333_v43, %v1303_v3  ;;  %v1526_v3 = vsub.f32 1.0, %v1525_v14 }
 0x2ee   :  { %1441 = vmatpush.msrb.mxu3 %v1339_v56  ;;  %1467 = vmatpush.msra.mxu1 %v1339_v56  ;;  %v1527_v56 = vmul.f32 %v7350_v21, %v1526_v3  ;;  %v8674_v3 = vld [vmem:[%s12178_s3 + $0x38] sm:$0xff] }
 0x2ef   :  { %1708 = vmatpush.msra.mxu2 %v8674_v3 }
 0x2f0   :  { %1442 = vmatpush.msrb.mxu3 %v1338_v19  ;;  %1468 = vmatpush.msra.mxu1 %v1338_v19 }
 0x2f1   :  { %6666 = vmatmul.msk.f32.vlgmr.msrb.gmra.mxu3 %vm12052_vm1, %v8185_v51 }
 0x2f2   :  { %6669 = vmatmul.msk.f32.vlgmr.msra.gmra.mxu1 %vm12052_vm1, %v8188_v34 }
 0x2f9   :  { %6667 = vmatmul.msk.f32.gmra.mxu3 %vm12052_vm1, %v8221_v37 }
 0x2fa   :  { %6670 = vmatmul.msk.f32.gmra.mxu1 %vm12052_vm1, %v8224_v47 }
 0x301   :  { %6668 = vmatmul.msk.f32.gmra.mxu3 %vm12052_vm1, %v8256_v10 }
 0x302   :  { %6671 = vmatmul.msk.f32.gmra.mxu1 %vm12052_vm1, %v8253_v63  ;;  %vm2940_vm1 = vcmp.eq.s32.totalorder %v8141_v17, 1 }
 0x355   :  { %v8566_v23 = vpop.f32.mrf.mxu1 }
 0x356   :  { %12166 = vst [vmem:[#allocation15_spill] sm:$0xff] %v8566_v23 }
 0x35b   :  { %v8568_v25 = vpop.f32.mrf.mxu2 }
 0x35c   :  { %12167 = vst [vmem:[#allocation16_spill] sm:$0xff] %v8568_v25  ;;  %vm12055_vm0 = vcmp.gt.f32.partialorder %v8568_v25, %v8566_v23 }
 0x35d   :  { %v1415_v0 = vsel %vm12055_vm0, %v8568_v25, %v8566_v23  ;;  %v9583_v23 = vld [vmem:[%s12003_s14 + $0x140] sm:$0xff]  ;;  %vm2950_vm0 = vcmp.eq.s32.totalorder %v8141_v17, 6 }
 0x35e   :  { %v1421_v13 = vmul.f32 0.01, %v1415_v0  ;;  %vm1418_vm4 = vcmp.gt.f32.partialorder %v1415_v0, 0.0 }
 0x35f   :  { %v8570_v44 = vpop.f32.mrf.mxu1 }
 0x360   :  { %12168 = vst [vmem:[#allocation17_spill] sm:$0xff] %v8570_v44  ;;  %v1424_v26 = vsel %vm1418_vm4, %v1415_v0, %v1421_v13 }
 0x361   :  { %v1500_v16 = vsel %vm1499_vm7, %v1424_v26, 0.0 }
 0x363   :  { %v8572_v62 = vpop.f32.mrf.mxu2 }
 0x364   :  { %12169 = vst [vmem:[#allocation18_spill] sm:$0xff] %v8572_v62  ;;  %vm1410_vm15 = vcmp.gt.f32.partialorder %v8572_v62, %v8570_v44 }
 0x365   :  { %v1416_v10 = vsel %vm1410_vm15, %v8572_v62, %v8570_v44  ;;  %v9589_v44 = vld [vmem:[%s12002_s13] ss:$0 sm:$0xff] }
 0x366   :  { %v1422_v29 = vmul.f32 0.01, %v1416_v10  ;;  %vm1419_vm3 = vcmp.gt.f32.partialorder %v1416_v10, 0.0 }
 0x367   :  { %v8574_v35 = vpop.f32.mrf.mxu1 }
 0x368   :  { %12170 = vst [vmem:[#allocation19_spill] sm:$0xff] %v8574_v35  ;;  %v1425_v42 = vsel %vm1419_vm3, %v1416_v10, %v1422_v29 }
 0x369   :  { %v1501_v15 = vsel %vm1499_vm7, %v1425_v42, 0.0 }
 0x36a   :  { %v1502_v39 = vadd.f32 %v1501_v15, %v1500_v16 }
 0x36b   :  { %v8576_v11 = vpop.f32.mrf.mxu2 }
 0x36c   :  { %12171 = vst [vmem:[#allocation20_spill] sm:$0xff] %v8576_v11  ;;  %vm1411_vm2 = vcmp.gt.f32.partialorder %v8576_v11, %v8574_v35 }
 0x36d   :  { %v1417_v38 = vsel %vm1411_vm2, %v8576_v11, %v8574_v35 }
 0x36e   :  { %v1423_v6 = vmul.f32 0.01, %v1417_v38  ;;  %vm1420_vm5 = vcmp.gt.f32.partialorder %v1417_v38, 0.0 }
 0x36f   :  { %v8584_v63 = vpop.f32.mrf.mxu1 }
 0x370   :  { %12172 = vst [vmem:[#allocation21_spill] sm:$0xff] %v8584_v63  ;;  %v1426_v61 = vsel %vm1420_vm5, %v1417_v38, %v1423_v6  ;;  %v1528_v38 = vadd.f32 %v7350_v21, %v1527_v56  ;;  %v8686_v56 = vld [vmem:[%s12178_s3 + $0x30] sm:$0xff] }
 0x371   :  { %v1503_v18 = vsel %vm1499_vm7, %v1426_v61, 0.0  ;;  %1709 = vmatpush.msra.mxu2 %v8686_v56 }
 0x372   :  { %v1504_v9 = vadd.f32 %v1503_v18, %v1502_v39  ;;  %v8638_v15 = vsel %vm1529_vm14, %v7350_v21, %v1528_v38  ;;  %v8698_v38 = vld [vmem:[%s12178_s3 + $0x28] sm:$0xff]  ;;  %vm1606_vm14 = vcmp.eq.s32.totalorder %v8159_v41, %v8195_v52 }
 0x373   :  { %1710 = vmatpush.msra.mxu2 %v8698_v38 }
 0x374   :  { %v8601_v12 = vpop.f32.mrf.mxu3  ;;  %v1505_v24 = vrot.slane %v1504_v9, 4 }
 0x375   :  { %12173 = vst [vmem:[#allocation22_spill] sm:$0xff] %v8601_v12  ;;  %vm12029_vm8 = vcmp.gt.f32.partialorder %v8584_v63, %v8601_v12 }
 0x376   :  { %v1485_v50 = vsel %vm12029_vm8, %v8584_v63, %v8601_v12  ;;  %v1506_v53 = vadd.f32 %v1505_v24, %v1504_v9 }
 0x377   :  { %v8603_v31 = vpop.f32.mrf.mxu1  ;;  %v1491_v57 = vmul.f32 0.01, %v1485_v50  ;;  %vm1488_vm11 = vcmp.gt.f32.partialorder %v1485_v50, 0.0 }
 0x378   :  { %12174 = vst [vmem:[#allocation23_spill] sm:$0xff] %v8603_v31  ;;  %v1507_v46 = vrot.slane %v1506_v53, 2 }
 0x379   :  { %v1494_v30 = vsel %vm1488_vm11, %v1485_v50, %v1491_v57  ;;  %vm12053_vm11 = vcmask 195584  }
 0x37a   :  { %v1511_v28 = vsel %vm1499_vm7, %v1494_v30, 0.0  ;;  %v1508_v43 = vadd.f32 %v1507_v46, %v1506_v53 }
 0x37c   :  { %v8610_v22 = vpop.f32.mrf.mxu3  ;;  %v1509_v10 = vrot.slane %v1508_v43, 1 }
 0x37d   :  { %12175 = vst [vmem:[#allocation24_spill] sm:$0xff] %v8610_v22  ;;  %vm12030_vm9 = vcmp.gt.f32.partialorder %v8603_v31, %v8610_v22 }
 0x37e   :  { %v1486_v58 = vsel %vm12030_vm9, %v8603_v31, %v8610_v22  ;;  %v1510_v13 = vadd.f32 %v1509_v10, %v1508_v43 }
 0x37f   :  { %v1492_v49 = vmul.f32 0.01, %v1486_v58  ;;  %vm1489_vm10 = vcmp.gt.f32.partialorder %v1486_v58, 0.0  ;;  %v8624_v1 = vpop.f32.mrf.mxu1 }
 0x380   :  { %12176 = vst [vmem:[#allocation25_spill] sm:$0xff] %v8624_v1 }
 0x381   :  { %v1495_v45 = vsel %vm1489_vm10, %v1486_v58, %v1492_v49  ;;  %vm1604_vm10 = vcmp.eq.s32.totalorder %v8159_v41, %v8141_v17 }
 0x382   :  { %v1512_v8 = vsel %vm1499_vm7, %v1495_v45, 0.0 }
 0x383   :  { %v1513_v2 = vadd.f32 %v1512_v8, %v1511_v28 }
 0x384   :  { %v8626_v36 = vpop.f32.mrf.mxu3 }
 0x385   :  { %12177 = vst [vmem:[#allocation26_spill] sm:$0xff] %v8626_v36  ;;  %vm12051_vm12 = vcmp.gt.f32.partialorder %v8624_v1, %v8626_v36 }
 0x386   :  { %v1487_v20 = vsel %vm12051_vm12, %v8624_v1, %v8626_v36  ;;  %v8876_v36 = vld [vmem:[%s12180_s27] ss:$0 sm:$0xff]  ;;  %s7419_s27 = smov 96   ;;  %vm3174_vm12 = vcmask 261120  }
 0x387   :  { %vm1490_vm13 = vcmp.gt.f32.partialorder %v1487_v20, 0.0  ;;  %v1493_v7 = vmul.f32 0.01, %v1487_v20 }
 0x389   :  { %v1496_v54 = vsel %vm1490_vm13, %v1487_v20, %v1493_v7  ;;  %vm1605_vm13 = vcmp.eq.s32.totalorder %v8159_v41, %v8169_v4 }
 0x38a   :  { %v1514_v55 = vsel %vm1499_vm7, %v1496_v54, 0.0 }
 0x38b   :  { %v1515_v27 = vadd.f32 %v1514_v55, %v1513_v2 }
 0x38d   :  { %v1516_v59 = vrot.slane %v1515_v27, 4 }
 0x38f   :  { %v1517_v5 = vadd.f32 %v1516_v59, %v1515_v27  ;;  %v8679_v59 = vld [vmem:[%s12178_s3 + $0x78] sm:$0xff] }
 0x390   :  { %1773 = vmatpush.msra.mxu0 %v8679_v59 }
 0x391   :  { %v1518_v19 = vrot.slane %v1517_v5, 2 }
 0x393   :  { %v1519_v0 = vadd.f32 %v1518_v19, %v1517_v5  ;;  %v8691_v19 = vld [vmem:[%s12178_s3 + $0x70] sm:$0xff] }
 0x394   :  { %1774 = vmatpush.msra.mxu0 %v8691_v19 }
 0x395   :  { %v1520_v29 = vrot.slane %v1519_v0, 1 }
 0x397   :  { %v1521_v6 = vadd.f32 %v1520_v29, %v1519_v0  ;;  %v8703_v29 = vld [vmem:[%s12178_s3 + $0x68] sm:$0xff] }
 0x398   :  { %1775 = vmatpush.msra.mxu0 %v8703_v29 }
 0x399   :  { %v1523_v16 = vadd.f32 %v1521_v6, %v1510_v13  ;;  %v8710_v6 = vld [vmem:[%s12178_s3 + $0x20] sm:$0xff] }
 0x39a   :  { %1711 = vmatpush.msra.mxu2 %v8710_v6 }
 0x39b   :  { %v1531_v18 = vmul.f32 %v8638_v15, %v1523_v16  ;;  %v8715_v16 = vld [vmem:[%s12178_s3 + $0x60] sm:$0xff] }
 0x39c   :  { %1776 = vmatpush.msra.mxu0 %v8715_v16 }
 0x39d   :  { %v8641_v39 = vsub.f32 %v1424_v26, %v1531_v18  ;;  %v8643_v50 = vsub.f32 %v1425_v42, %v1531_v18  ;;  %v8645_v58 = vsub.f32 %v1426_v61, %v1531_v18  ;;  %v8647_v9 = vsub.f32 %v1494_v30, %v1531_v18 }
 0x39e   :  { %v8649_v49 = vsub.f32 %v1495_v45, %v1531_v18  ;;  %v8651_v48 = vsub.f32 %v1496_v54, %v1531_v18 }
 0x39f   :  { %v1535_v57 = vmul.f32 %v8641_v39, %v8641_v39  ;;  %v1536_v24 = vmul.f32 %v8643_v50, %v8643_v50  ;;  %v1537_v26 = vmul.f32 %v8645_v58, %v8645_v58  ;;  %v1552_v42 = vmul.f32 %v8647_v9, %v8647_v9 }
 0x3a0   :  { %v1553_v61 = vmul.f32 %v8649_v49, %v8649_v49  ;;  %v1554_v45 = vmul.f32 %v8651_v48, %v8651_v48 }
 0x3a1   :  { %v1538_v21 = vsel %vm1499_vm7, %v1535_v57, 0.0  ;;  %v1539_v30 = vsel %vm1499_vm7, %v1536_v24, 0.0  ;;  %v1555_v8 = vsel %vm1499_vm7, %v1552_v42, 0.0  ;;  %v1541_v7 = vsel %vm1499_vm7, %v1537_v26, 0.0  ;;  %v8720_v57 = vld [vmem:[%s12178_s3 + $0x18] sm:$0xff] }
 0x3a2   :  { %v1540_v20 = vadd.f32 %v1539_v30, %v1538_v21  ;;  %v1556_v53 = vsel %vm1499_vm7, %v1553_v61, 0.0  ;;  %v1558_v2 = vsel %vm1499_vm7, %v1554_v45, 0.0  ;;  %v8725_v24 = vld [vmem:[%s12178_s3 + $0x58] sm:$0xff]  ;;  %v8732_v61 = vld [vmem:[%s12178_s3 + $0x10] sm:$0xff]  ;;  %1712 = vmatpush.msra.mxu2 %v8720_v57  ;;  %v8744_v30 = vld [vmem:[%s12178_s3 + $0x8] sm:$0xff] }
 0x3a3   :  { %v1557_v28 = vadd.f32 %v1556_v53, %v1555_v8  ;;  %v8737_v45 = vld [vmem:[%s12178_s3 + $0x50] sm:$0xff]  ;;  %1777 = vmatpush.msra.mxu0 %v8725_v24  ;;  %v8749_v8 = vld [vmem:[%s12178_s3 + $0x48] sm:$0xff]  ;;  %v8756_v53 = vld [vmem:[%s12178_s3] sm:$0xff] }
 0x3a4   :  { %v1542_v14 = vadd.f32 %v1541_v7, %v1540_v20  ;;  %1713 = vmatpush.msra.mxu2 %v8732_v61  ;;  %v8761_v7 = vld [vmem:[%s12178_s3 + $0x40] sm:$0xff] }
 0x3a5   :  { %v1559_v54 = vadd.f32 %v1558_v2, %v1557_v28  ;;  %1778 = vmatpush.msra.mxu0 %v8737_v45 }
 0x3a6   :  { %v1543_v55 = vrot.slane %v1542_v14, 4  ;;  %1714 = vmatpush.msra.mxu2 %v8744_v30 }
 0x3a7   :  { %v1560_v46 = vrot.slane %v1559_v54, 4  ;;  %1779 = vmatpush.msra.mxu0 %v8749_v8 }
 0x3a8   :  { %v1544_v27 = vadd.f32 %v1543_v55, %v1542_v14  ;;  %v8769_v14 = vld [vmem:[%s12178_s3 + $0xf8] sm:$0xff]  ;;  %1715 = vmatpush.msra.mxu2 %v8756_v53 }
 0x3a9   :  { %v1561_v43 = vadd.f32 %v1560_v46, %v1559_v54  ;;  %1780 = vmatpush.msra.mxu0 %v8761_v7  ;;  %v8776_v54 = vld [vmem:[%s12178_s3 + $0xf0] sm:$0xff]  ;;  %v8787_v55 = vld [vmem:[%s12178_s3 + $0xb8] sm:$0xff] }
 0x3aa   :  { %v1545_v5 = vrot.slane %v1544_v27, 2  ;;  %v8792_v46 = vld [vmem:[%s12178_s3 + $0xb0] sm:$0xff]  ;;  %1837 = vmatpush.msrb.mxu2 %v8787_v55 }
 0x3ab   :  { %v1562_v10 = vrot.slane %v1561_v43, 2  ;;  %1901 = vmatpush.msrb.mxu0 %v8769_v14 }
 0x3ac   :  { %v1546_v0 = vadd.f32 %v1545_v5, %v1544_v27  ;;  %v8799_v27 = vld [vmem:[%s12178_s3 + $0xe0] sm:$0xff]  ;;  %1838 = vmatpush.msrb.mxu2 %v8792_v46  ;;  %v8811_v5 = vld [vmem:[%s12178_s3 + $0xd8] sm:$0xff] }
 0x3ad   :  { %v1563_v13 = vadd.f32 %v1562_v10, %v1561_v43  ;;  %1902 = vmatpush.msrb.mxu0 %v8776_v54  ;;  %v8804_v43 = vld [vmem:[%s12178_s3 + $0xa8] sm:$0xff]  ;;  %v8816_v10 = vld [vmem:[%s12178_s3 + $0xa0] sm:$0xff] }
 0x3ae   :  { %v1547_v18 = vrot.slane %v1546_v0, 1  ;;  %1839 = vmatpush.msrb.mxu2 %v8804_v43 }
 0x3af   :  { %v1564_v26 = vrot.slane %v1563_v13, 1 }
 0x3b0   :  { %v1548_v42 = vadd.f32 %v1547_v18, %v1546_v0  ;;  %1840 = vmatpush.msrb.mxu2 %v8816_v10 }
 0x3b1   :  { %v1565_v21 = vadd.f32 %v1564_v26, %v1563_v13  ;;  %v8823_v13 = vld [vmem:[%s12178_s3 + $0xd0] sm:$0xff]  ;;  %v8830_v26 = vld [vmem:[%s12178_s3 + $0xc8] sm:$0xff] }
 0x3b3   :  { %v1567_v20 = vadd.f32 %v1565_v21, %v1548_v42  ;;  %v8835_v42 = vld [vmem:[%s12178_s3 + $0x98] sm:$0xff]  ;;  %v8840_v21 = vld [vmem:[%s12178_s3 + $0x90] sm:$0xff] }
 0x3b4   :  { %1841 = vmatpush.msrb.mxu2 %v8835_v42 }
 0x3b5   :  { %v1568_v28 = vmul.f32 %v1567_v20, %v8638_v15  ;;  %v8782_v15 = vld [vmem:[%s12178_s3 + $0xe8] sm:$0xff] }
 0x3b6   :  { %1903 = vmatpush.msrb.mxu0 %v8782_v15  ;;  %1842 = vmatpush.msrb.mxu2 %v8840_v21 }
 0x3b7   :  { %v1569_v2 = vadd.f32 1e-05, %v1568_v28  ;;  %v8847_v28 = vld [vmem:[%s12178_s3 + $0xc0] sm:$0xff] }
 0x3b8   :  { %1904 = vmatpush.msrb.mxu0 %v8799_v27  ;;  %1843 = vmatpush.msrb.mxu2 %v8852_v40 }
 0x3b9   :  { %7351 = vrsqrt.f32 %v1569_v2  ;;  %vm1576_vm4 = vweird.f32 %v1569_v2 }
 0x3ba   :  { %1905 = vmatpush.msrb.mxu0 %v8811_v5 }
 0x3bc   :  { %1906 = vmatpush.msrb.mxu0 %v8823_v13 }
 0x3be   :  { %1907 = vmatpush.msrb.mxu0 %v8830_v26 }
 0x3bf   :  { %v7352_v0 = vpop.eup %7351 }
 0x3c0   :  { %v1571_v18 = vmul.f32 %v7352_v0, %v1569_v2  ;;  %vm1577_vm3 = vweird.f32 %v7352_v0  ;;  %1908 = vmatpush.msrb.mxu0 %v8847_v28 }
 0x3c1   :  { %vm1578_vm5 = vmor %vm1576_vm4, %vm1577_vm3 }
 0x3c2   :  { %v1572_v20 = vmul.f32 %v7352_v0, %v1571_v18  ;;  %v8859_v18 = vld [vmem:[%s12178_s3 + $0x80] sm:$0xff] }
 0x3c3   :  { %1844 = vmatpush.msrb.mxu2 %v8859_v18 }
 0x3c4   :  { %v1573_v12 = vmul.f32 0.5, %v1572_v20  ;;  %v8867_v20 = vld [vmem:[%s12179_s0] ss:$0 sm:$0xff] }
 0x3c6   :  { %v1574_v63 = vsub.f32 1.5, %v1573_v12 }
 0x3c8   :  { %v1575_v22 = vmul.f32 %v7352_v0, %v1574_v63 }
 0x3ca   :  { %v8869_v31 = vsel %vm1578_vm5, %v7352_v0, %v1575_v22  ;;  %v1685_v22 = vld [vmem:[%s12178_s3 + $0x138] sm:$0xff] }
 0x3cb   :  { %v1580_v12 = vmul.f32 %v8869_v31, %v8641_v39  ;;  %v1581_v1 = vmul.f32 %v8869_v31, %v8643_v50  ;;  %v1684_v39 = vld [vmem:[%s12178_s3 + $0x130] sm:$0xff]  ;;  %v1683_v50 = vld [vmem:[%s12178_s3 + $0x128] sm:$0xff] }
 0x3cd   :  { %v1586_v63 = vmul.f32 %v8867_v20, %v1580_v12  ;;  %v1587_v0 = vmul.f32 %v8867_v20, %v1581_v1  ;;  %v1682_v12 = vld [vmem:[%s12178_s3 + $0x120] sm:$0xff]  ;;  %v1582_v1 = vmul.f32 %v8869_v31, %v8645_v58 }
 0x3cf   :  { %v8880_v2 = vadd.f32 %v8876_v36, %v1586_v63  ;;  %v8905_v63 = vadd.f32 %v8876_v36, %v1587_v0  ;;  %v1588_v58 = vmul.f32 %v8867_v20, %v1582_v1 }
 0x3d1   :  { %6672 = vmatmul.msk.f32.vlgmr.msra.gmra.mxu2 %vm1499_vm7, %v8880_v2  ;;  %6678 = vmatmul.msk.f32.vlgmr.msra.gmra.mxu0 %vm1499_vm7, %v8880_v2  ;;  %v8931_v0 = vadd.f32 %v8876_v36, %v1588_v58 }
 0x3d2   :  { %2038 = vmatpush.msra.mxu0 %v8674_v3  ;;  %1965 = vmatpush.msra.mxu2 %v1685_v22  ;;  %v1681_v3 = vld [vmem:[%s12178_s3 + $0x118] sm:$0xff] }
 0x3d4   :  { %2039 = vmatpush.msra.mxu0 %v8686_v56  ;;  %1966 = vmatpush.msra.mxu2 %v1684_v39  ;;  %v1680_v56 = vld [vmem:[%s12178_s3 + $0x110] sm:$0xff] }
 0x3d6   :  { %2040 = vmatpush.msra.mxu0 %v8698_v38  ;;  %1967 = vmatpush.msra.mxu2 %v1683_v50  ;;  %v1679_v38 = vld [vmem:[%s12178_s3 + $0x108] sm:$0xff] }
 0x3d8   :  { %2041 = vmatpush.msra.mxu0 %v8710_v6  ;;  %1968 = vmatpush.msra.mxu2 %v1682_v12  ;;  %v1678_v6 = vld [vmem:[%s12178_s3 + $0x100] sm:$0xff] }
 0x3d9   :  { %6673 = vmatmul.msk.f32.gmra.mxu2 %vm1499_vm7, %v8905_v63  ;;  %6679 = vmatmul.msk.f32.gmra.mxu0 %vm1499_vm7, %v8905_v63 }
 0x3da   :  { %2042 = vmatpush.msra.mxu0 %v8720_v57  ;;  %1969 = vmatpush.msra.mxu2 %v1681_v3  ;;  %v1595_v57 = vmul.f32 %v8869_v31, %v8647_v9  ;;  %v1596_v9 = vmul.f32 %v8869_v31, %v8649_v49 }
 0x3dc   :  { %2043 = vmatpush.msra.mxu0 %v8732_v61  ;;  %1970 = vmatpush.msra.mxu2 %v1680_v56  ;;  %v1598_v61 = vmul.f32 %v8867_v20, %v1595_v57  ;;  %v1610_v57 = vadd.s32 1, %v8141_v17 }
 0x3de   :  { %2044 = vmatpush.msra.mxu0 %v8744_v30  ;;  %1971 = vmatpush.msra.mxu2 %v1679_v38  ;;  %v1599_v30 = vmul.f32 %v8867_v20, %v1596_v9 }
 0x3e0   :  { %2045 = vmatpush.msra.mxu0 %v8756_v53  ;;  %1972 = vmatpush.msra.mxu2 %v1678_v6  ;;  %v1597_v53 = vmul.f32 %v8869_v31, %v8651_v48 }
 0x3e1   :  { %6674 = vmatmul.msk.f32.gmra.mxu2 %vm1499_vm7, %v8931_v0  ;;  %6690 = vmatmul.msk.f32.vlgmr.msrb.gmra.mxu0 %vm1499_vm7, %v8880_v2 }
 0x3e2   :  { %2148 = vmatpush.msrb.mxu0 %v8787_v55  ;;  %v1602_v55 = vadd.f32 %v8876_v36, %v1599_v30  ;;  %v1600_v49 = vmul.f32 %v8867_v20, %v1597_v53  ;;  %v1611_v53 = vadd.s32 1, %v8169_v4 }
 0x3e4   :  { %2149 = vmatpush.msrb.mxu0 %v8792_v46  ;;  %v1603_v31 = vadd.f32 %v8876_v36, %v1600_v49  ;;  %v1639_v49 = vadd.s32 4, %v8195_v52 }
 0x3e6   :  { %2150 = vmatpush.msrb.mxu0 %v8804_v43 }
 0x3e8   :  { %2151 = vmatpush.msrb.mxu0 %v8816_v10 }
 0x3e9   :  { %6684 = vmatmul.msk.f32.vlgmr.msrb.gmra.mxu2 %vm1499_vm7, %v8880_v2  ;;  %6691 = vmatmul.msk.f32.gmra.mxu0 %vm1499_vm7, %v8905_v63 }
 0x3ea   :  { %2093 = vmatpush.msrb.mxu2 %v8679_v59  ;;  %2152 = vmatpush.msrb.mxu0 %v8835_v42 }
 0x3ec   :  { %2094 = vmatpush.msrb.mxu2 %v8691_v19  ;;  %2153 = vmatpush.msrb.mxu0 %v8840_v21  ;;  %v1637_v21 = vadd.s32 4, %v8141_v17 }
 0x3ee   :  { %2095 = vmatpush.msrb.mxu2 %v8703_v29  ;;  %2154 = vmatpush.msrb.mxu0 %v8852_v40  ;;  %v1601_v40 = vadd.f32 %v8876_v36, %v1598_v61 }
 0x3f0   :  { %2096 = vmatpush.msrb.mxu2 %v8715_v16  ;;  %2155 = vmatpush.msrb.mxu0 %v8859_v18 }
 0x3f1   :  { %6685 = vmatmul.msk.f32.gmra.mxu2 %vm1499_vm7, %v8905_v63  ;;  %6692 = vmatmul.msk.f32.gmra.mxu0 %vm1499_vm7, %v8931_v0 }
 0x3f2   :  { %2097 = vmatpush.msrb.mxu2 %v8725_v24 }
 0x3f4   :  { %2098 = vmatpush.msrb.mxu2 %v8737_v45 }
 0x3f6   :  { %2099 = vmatpush.msrb.mxu2 %v8749_v8 }
 0x3f8   :  { %2100 = vmatpush.msrb.mxu2 %v8761_v7 }
 0x3f9   :  { %6686 = vmatmul.msk.f32.gmra.mxu2 %vm1499_vm7, %v8931_v0  ;;  %6702 = vmatmul.msk.f32.vlgmr.msra.gmra.mxu0 %vm1499_vm7, %v1601_v40 }
 0x3fa   :  { %2258 = vmatpush.msra.mxu0 %v1685_v22 }
 0x3fc   :  { %2259 = vmatpush.msra.mxu0 %v1684_v39 }
 0x3fe   :  { %2260 = vmatpush.msra.mxu0 %v1683_v50 }
 0x400   :  { %2261 = vmatpush.msra.mxu0 %v1682_v12 }
 0x401   :  { %6696 = vmatmul.msk.f32.vlgmr.msra.gmra.mxu2 %vm1499_vm7, %v8880_v2  ;;  %6703 = vmatmul.msk.f32.gmra.mxu0 %vm1499_vm7, %v1602_v55 }
 0x402   :  { %2203 = vmatpush.msra.mxu2 %v8769_v14  ;;  %2262 = vmatpush.msra.mxu0 %v1681_v3 }
 0x404   :  { %2204 = vmatpush.msra.mxu2 %v8776_v54  ;;  %2263 = vmatpush.msra.mxu0 %v1680_v56  ;;  %v12181_v54 = vmov 0.0  }
 0x406   :  { %2205 = vmatpush.msra.mxu2 %v8782_v15  ;;  %2264 = vmatpush.msra.mxu0 %v1679_v38  ;;  %v9008_v15 = vsel %vm1604_vm10, 1.0, %v12181_v54  ;;  %vm1640_vm10 = vcmp.eq.s32.totalorder %v8159_v41, %v1637_v21 }
 0x408   :  { %2206 = vmatpush.msra.mxu2 %v8799_v27  ;;  %2265 = vmatpush.msra.mxu0 %v1678_v6  ;;  %v9017_v27 = vsel %vm1605_vm13, 1.0, %v12181_v54  ;;  %vm1613_vm13 = vcmp.eq.s32.totalorder %v8159_v41, %v1610_v57 }
 0x409   :  { %6697 = vmatmul.msk.f32.gmra.mxu2 %vm1499_vm7, %v8905_v63  ;;  %6704 = vmatmul.msk.f32.gmra.mxu0 %vm1499_vm7, %v1603_v31  ;;  %v9074_v9 = vsel %vm1613_vm13, 1.0, %v12181_v54 }
 0x40a   :  { %2207 = vmatpush.msra.mxu2 %v8811_v5 }
 0x40c   :  { %2208 = vmatpush.msra.mxu2 %v8823_v13  ;;  %v1621_v13 = vadd.s32 2, %v8195_v52 }
 0x40e   :  { %2209 = vmatpush.msra.mxu2 %v8830_v26  ;;  %vm1624_vm5 = vcmp.eq.s32.totalorder %v8159_v41, %v1621_v13 }
 0x40f   :  { %v9053_v26 = vsel %vm1624_vm5, 1.0, %v12181_v54 }
 0x410   :  { %2210 = vmatpush.msra.mxu2 %v8847_v28  ;;  %v9060_v28 = vsel %vm1640_vm10, 1.0, %v12181_v54 }
 0x411   :  { %6698 = vmatmul.msk.f32.gmra.mxu2 %vm1499_vm7, %v8931_v0  ;;  %6714 = vmatmul.msk.f32.vlgmr.msrb.gmra.mxu0 %vm1499_vm7, %v1601_v40 }
 0x419   :  { %6708 = vmatmul.msk.f32.vlgmr.msrb.gmra.mxu2 %vm1499_vm7, %v1601_v40  ;;  %6715 = vmatmul.msk.f32.gmra.mxu0 %vm1499_vm7, %v1602_v55 }
 0x421   :  { %6709 = vmatmul.msk.f32.gmra.mxu2 %vm1499_vm7, %v1602_v55  ;;  %6716 = vmatmul.msk.f32.gmra.mxu0 %vm1499_vm7, %v1603_v31 }
 0x429   :  { %6710 = vmatmul.msk.f32.gmra.mxu2 %vm1499_vm7, %v1603_v31  ;;  %6726 = vmatmul.msk.f32.vlgmr.msra.gmra.mxu0 %vm1499_vm7, %v1601_v40 }
 0x431   :  { %6720 = vmatmul.msk.f32.vlgmr.msra.gmra.mxu2 %vm1499_vm7, %v1601_v40  ;;  %6727 = vmatmul.msk.f32.gmra.mxu0 %vm1499_vm7, %v1602_v55  ;;  %v1638_v40 = vadd.s32 4, %v8169_v4 }
 0x439   :  { %6721 = vmatmul.msk.f32.gmra.mxu2 %vm1499_vm7, %v1602_v55  ;;  %6728 = vmatmul.msk.f32.gmra.mxu0 %vm1499_vm7, %v1603_v31 }
 0x441   :  { %6722 = vmatmul.msk.f32.gmra.mxu2 %vm1499_vm7, %v1603_v31 }
 0x44e   :  { %v1782_v2 = vpop.f32.mrf.mxu0 }
 0x454   :  { %v1717_v36 = vpop.f32.mrf.mxu2 }
 0x456   :  { %v1785_v39 = vpop.f32.mrf.mxu0 }
 0x45c   :  { %v1720_v48 = vpop.f32.mrf.mxu2 }
 0x45e   :  { %v1910_v12 = vpop.f32.mrf.mxu0 }
 0x464   :  { %v1723_v14 = vpop.f32.mrf.mxu2 }
 0x465   :  { %1749 = vmatpush.msra.mxu3 %v1723_v14 }
 0x466   :  { %v1913_v63 = vpop.f32.mrf.mxu0 }
 0x467   :  { %1750 = vmatpush.msra.mxu3 %v1720_v48  ;;  %v1612_v48 = vadd.s32 1, %v8195_v52 }
 0x469   :  { %1751 = vmatpush.msra.mxu3 %v1717_v36  ;;  %vm1615_vm5 = vcmp.eq.s32.totalorder %v8159_v41, %v1612_v48 }
 0x46a   :  { %6675 = vmatmul.msk.f32.vlgmr.msra.gmra.mxu3 %vm12053_vm11, %v9008_v15 }
 0x46b   :  { %7101 = vmatpush.msrb.mxu3 %v8679_v59  ;;  %v9028_v59 = vsel %vm1606_vm14, 1.0, %v12181_v54  ;;  %vm1641_vm14 = vcmp.eq.s32.totalorder %v8159_v41, %v1638_v40 }
 0x46c   :  { %v1846_v46 = vpop.f32.mrf.mxu2  ;;  %12182 = vst [vmem:[#allocation27_spill] sm:$0xff] %v9028_v59  ;;  %v1644_v55 = vsel %vm1641_vm14, 1.0, %v12181_v54 }
 0x46d   :  { %7102 = vmatpush.msrb.mxu3 %v8691_v19 }
 0x46e   :  { %v1916_v1 = vpop.f32.mrf.mxu0 }
 0x46f   :  { %7103 = vmatpush.msrb.mxu3 %v8703_v29 }
 0x471   :  { %7104 = vmatpush.msrb.mxu3 %v8715_v16 }
 0x472   :  { %6676 = vmatmul.msk.f32.gmra.mxu3 %vm12053_vm11, %v9017_v27 }
 0x473   :  { %7105 = vmatpush.msrb.mxu3 %v8725_v24  ;;  %v1619_v24 = vadd.s32 2, %v8141_v17 }
 0x474   :  { %v1849_v43 = vpop.f32.mrf.mxu2 }
 0x475   :  { %7106 = vmatpush.msrb.mxu3 %v8737_v45  ;;  %vm1622_vm3 = vcmp.eq.s32.totalorder %v8159_v41, %v1619_v24 }
 0x476   :  { %v9039_v45 = vsel %vm1622_vm3, 1.0, %v12181_v54  ;;  %v2047_v3 = vpop.f32.mrf.mxu0  ;;  %vm1614_vm3 = vcmp.eq.s32.totalorder %v8159_v41, %v1611_v53 }
 0x477   :  { %7107 = vmatpush.msrb.mxu3 %v8749_v8  ;;  %v1617_v36 = vsel %vm1614_vm3, 1.0, %v12181_v54  ;;  %vm2305_vm3 = vcmask 162816  }
 0x479   :  { %7108 = vmatpush.msrb.mxu3 %v8761_v7  ;;  %v1620_v7 = vadd.s32 2, %v8169_v4 }
 0x47a   :  { %6677 = vmatmul.msk.f32.gmra.mxu3 %vm12053_vm11, %v9028_v59 }
 0x47b   :  { %vm1623_vm4 = vcmp.eq.s32.totalorder %v8159_v41, %v1620_v7  ;;  %v1630_v7 = vadd.s32 3, %v8195_v52 }
 0x47c   :  { %v1852_v19 = vpop.f32.mrf.mxu2  ;;  %v9046_v5 = vsel %vm1623_vm4, 1.0, %v12181_v54  ;;  %vm1642_vm4 = vcmp.eq.s32.totalorder %v8159_v41, %v1639_v49 }
 0x47d   :  { %1877 = vmatpush.msra.mxu3 %v1852_v19  ;;  %v1645_v31 = vsel %vm1642_vm4, 1.0, %v12181_v54  ;;  %vm1633_vm14 = vcmp.eq.s32.totalorder %v8159_v41, %v1630_v7 }
 0x47e   :  { %v2050_v38 = vpop.f32.mrf.mxu0 }
 0x47f   :  { %1878 = vmatpush.msra.mxu3 %v1849_v43  ;;  %v1628_v43 = vadd.s32 3, %v8141_v17 }
 0x481   :  { %1879 = vmatpush.msra.mxu3 %v1846_v46  ;;  %v1618_v46 = vsel %vm1615_vm5, 1.0, %v12181_v54  ;;  %vm1631_vm10 = vcmp.eq.s32.totalorder %v8159_v41, %v1628_v43 }
 0x482   :  { %6680 = vmatmul.msk.f32.vlgmr.msrb.gmra.mxu3 %vm1499_vm7, %v8931_v0 }
 0x484   :  { %v1974_v29 = vpop.f32.mrf.mxu2 }
 0x486   :  { %v2053_v0 = vpop.f32.mrf.mxu0 }
 0x48a   :  { %6687 = vmatmul.msk.f32.vlgmr.msra.gmra.mxu3 %vm12053_vm11, %v9039_v45 }
 0x48c   :  { %v1977_v16 = vpop.f32.mrf.mxu2 }
 0x48e   :  { %v2157_v30 = vpop.f32.mrf.mxu0 }
 0x492   :  { %6688 = vmatmul.msk.f32.gmra.mxu3 %vm12053_vm11, %v9046_v5 }
 0x494   :  { %v1980_v8 = vpop.f32.mrf.mxu2 }
 0x495   :  { %2005 = vmatpush.msrb.mxu3 %v1980_v8 }
 0x496   :  { %v2160_v14 = vpop.f32.mrf.mxu0 }
 0x497   :  { %2006 = vmatpush.msrb.mxu3 %v1977_v16  ;;  %v1629_v16 = vadd.s32 3, %v8169_v4 }
 0x499   :  { %2007 = vmatpush.msrb.mxu3 %v1974_v29  ;;  %v1634_v29 = vsel %vm1631_vm10, 1.0, %v12181_v54  ;;  %vm1632_vm13 = vcmp.eq.s32.totalorder %v8159_v41, %v1629_v16 }
 0x49a   :  { %6689 = vmatmul.msk.f32.gmra.mxu3 %vm12053_vm11, %v9053_v26  ;;  %v1635_v8 = vsel %vm1632_vm13, 1.0, %v12181_v54 }
 0x49c   :  { %v2102_v10 = vpop.f32.mrf.mxu2 }
 0x49e   :  { %v2163_v19 = vpop.f32.mrf.mxu0 }
 0x4a2   :  { %6699 = vmatmul.msk.f32.vlgmr.msrb.gmra.mxu3 %vm12053_vm11, %v9060_v28 }
 0x4a4   :  { %v2105_v42 = vpop.f32.mrf.mxu2 }
 0x4a6   :  { %v2267_v24 = vpop.f32.mrf.mxu0 }
 0x4aa   :  { %6700 = vmatmul.msk.f32.gmra.mxu3 %vm12053_vm11, %v1644_v55 }
 0x4ac   :  { %v2108_v18 = vpop.f32.mrf.mxu2 }
 0x4ad   :  { %2124 = vmatpush.msra.mxu3 %v2108_v18 }
 0x4ae   :  { %v2270_v13 = vpop.f32.mrf.mxu0 }
 0x4af   :  { %2125 = vmatpush.msra.mxu3 %v2105_v42 }
 0x4b1   :  { %2126 = vmatpush.msra.mxu3 %v2102_v10  ;;  %v1636_v10 = vsel %vm1633_vm14, 1.0, %v12181_v54  ;;  %vm2439_vm14 = vcmask 517120  }
 0x4b2   :  { %6701 = vmatmul.msk.f32.gmra.mxu3 %vm12053_vm11, %v1645_v31 }
 0x4b4   :  { %v2212_v20 = vpop.f32.mrf.mxu2 }
 0x4b6   :  { %v2273_v42 = vpop.f32.mrf.mxu0 }
 0x4ba   :  { %6711 = vmatmul.msk.f32.vlgmr.msra.gmra.mxu3 %vm12053_vm11, %v9074_v9 }
 0x4bc   :  { %v2215_v22 = vpop.f32.mrf.mxu2 }
 0x4c2   :  { %6712 = vmatmul.msk.f32.gmra.mxu3 %vm12053_vm11, %v1617_v36 }
 0x4c4   :  { %v2218_v50 = vpop.f32.mrf.mxu2 }
 0x4c5   :  { %2234 = vmatpush.msrb.mxu3 %v2218_v50 }
 0x4c7   :  { %2235 = vmatpush.msrb.mxu3 %v2215_v22 }
 0x4c9   :  { %2236 = vmatpush.msrb.mxu3 %v2212_v20 }
 0x4ca   :  { %6713 = vmatmul.msk.f32.gmra.mxu3 %vm12053_vm11, %v1618_v46 }
 0x4d2   :  { %6723 = vmatmul.msk.f32.vlgmr.msrb.gmra.mxu3 %vm12053_vm11, %v1634_v29 }
 0x4da   :  { %6724 = vmatmul.msk.f32.gmra.mxu3 %vm12053_vm11, %v1635_v8 }
 0x4e2   :  { %6725 = vmatmul.msk.f32.gmra.mxu3 %vm12053_vm11, %v1636_v10 }
 0x4ed   :  { %v9064_v56 = vpop.f32.mrf.mxu3 }
 0x4f5   :  { %v9066_v58 = vpop.f32.mrf.mxu3 }
 0x4fd   :  { %v9068_v6 = vpop.f32.mrf.mxu3 }
 0x505   :  { %v1788_v61 = vpop.f32.mrf.mxu3 }
 0x506   :  { %1813 = vmatpush.msrb.mxu1 %v1788_v61 }
 0x508   :  { %1814 = vmatpush.msrb.mxu1 %v1785_v39 }
 0x50a   :  { %1815 = vmatpush.msrb.mxu1 %v1782_v2 }
 0x50b   :  { %6681 = vmatmul.msk.f32.vlgmr.msrb.gmra.mxu1 %vm12053_vm11, %v9074_v9 }
 0x50c   :  { %1941 = vmatpush.msra.mxu1 %v1916_v1 }
 0x50d   :  { %v1881_v21 = vpop.f32.mrf.mxu3 }
 0x50e   :  { %1942 = vmatpush.msra.mxu1 %v1913_v63 }
 0x510   :  { %1943 = vmatpush.msra.mxu1 %v1910_v12 }
 0x512   :  { %2069 = vmatpush.msrb.mxu1 %v2053_v0 }
 0x513   :  { %6682 = vmatmul.msk.f32.gmra.mxu1 %vm12053_vm11, %v1617_v36 }
 0x514   :  { %2070 = vmatpush.msrb.mxu1 %v2050_v38 }
 0x515   :  { %v1884_v20 = vpop.f32.mrf.mxu3 }
 0x516   :  { %2071 = vmatpush.msrb.mxu1 %v2047_v3 }
 0x51b   :  { %6683 = vmatmul.msk.f32.gmra.mxu1 %vm12053_vm11, %v1618_v46 }
 0x51d   :  { %v1887_v22 = vpop.f32.mrf.mxu3 }
 0x523   :  { %6693 = vmatmul.msk.f32.vlgmr.msra.gmra.mxu1 %vm12053_vm11, %v1634_v29 }
 0x524   :  { %2179 = vmatpush.msra.mxu1 %v2163_v19 }
 0x525   :  { %v2009_v50 = vpop.f32.mrf.mxu3 }
 0x526   :  { %2180 = vmatpush.msra.mxu1 %v2160_v14 }
 0x528   :  { %2181 = vmatpush.msra.mxu1 %v2157_v30 }
 0x52b   :  { %6694 = vmatmul.msk.f32.gmra.mxu1 %vm12053_vm11, %v1635_v8 }
 0x52d   :  { %v2012_v63 = vpop.f32.mrf.mxu3 }
 0x533   :  { %6695 = vmatmul.msk.f32.gmra.mxu1 %vm12053_vm11, %v1636_v10 }
 0x535   :  { %v2015_v53 = vpop.f32.mrf.mxu3 }
 0x53b   :  { %6705 = vmatmul.msk.f32.vlgmr.msrb.gmra.mxu1 %vm12053_vm11, %v9008_v15 }
 0x53c   :  { %2289 = vmatpush.msrb.mxu1 %v2273_v42 }
 0x53d   :  { %v2128_v46 = vpop.f32.mrf.mxu3 }
 0x53e   :  { %2290 = vmatpush.msrb.mxu1 %v2270_v13 }
 0x540   :  { %2291 = vmatpush.msrb.mxu1 %v2267_v24 }
 0x543   :  { %6706 = vmatmul.msk.f32.gmra.mxu1 %vm12053_vm11, %v9017_v27 }
 0x545   :  { %v2131_v19 = vpop.f32.mrf.mxu3 }
 0x54b   :  { %6707 = vmatmul.msk.f32.gmra.mxu1 %vm12053_vm11, %v9028_v59 }
 0x54d   :  { %v2134_v16 = vpop.f32.mrf.mxu3 }
 0x553   :  { %6717 = vmatmul.msk.f32.vlgmr.msra.gmra.mxu1 %vm12053_vm11, %v9039_v45 }
 0x555   :  { %v2238_v8 = vpop.f32.mrf.mxu3 }
 0x55b   :  { %6718 = vmatmul.msk.f32.gmra.mxu1 %vm12053_vm11, %v9046_v5  ;;  %v7313_v5 = vld [vmem:[%s12183_s2] ss:$0 sm:$0xff]  ;;  %s6609_s2 = sshll.u32 %s12015_s26, 4  ;;  %s6610_s2 = int_to_ptr.hbm [resolvable:$true] %s6609_s2 }
 0x55c   :  { %v1764_v1 = vadd.f32 %v7313_v5, %v9068_v6  ;;  %v1762_v3 = vadd.f32 %v7313_v5, %v9064_v56 }
 0x55d   :  { %v2241_v13 = vpop.f32.mrf.mxu3 }
 0x563   :  { %6719 = vmatmul.msk.f32.gmra.mxu1 %vm12053_vm11, %v9053_v26 }
 0x56b   :  { %6729 = vmatmul.msk.f32.vlgmr.msrb.gmra.mxu1 %vm12053_vm11, %v9060_v28  ;;  %v1763_v28 = vadd.f32 %v7313_v5, %v9066_v58 }
 0x573   :  { %6730 = vmatmul.msk.f32.gmra.mxu1 %vm12053_vm11, %v1644_v55 }
 0x57b   :  { %6731 = vmatmul.msk.f32.gmra.mxu1 %vm12053_vm11, %v1645_v31  ;;  %vm2944_vm11 = vcmp.eq.s32.totalorder %v8141_v17, 3 }
 0x588   :  { %v1817_v18 = vpop.f32.mrf.mxu1 }
 0x589   :  { %v1826_v57 = vadd.f32 %v1817_v18, %v1762_v3 }
 0x58b   :  { %v1890_v55 = vadd.f32 %v1881_v21, %v1826_v57 }
 0x590   :  { %v1820_v2 = vpop.f32.mrf.mxu1 }
 0x591   :  { %v1827_v38 = vadd.f32 %v1820_v2, %v1763_v28 }
 0x593   :  { %v1891_v61 = vadd.f32 %v1884_v20, %v1827_v38 }
 0x598   :  { %v1823_v39 = vpop.f32.mrf.mxu1 }
 0x599   :  { %v1828_v0 = vadd.f32 %v1823_v39, %v1764_v1 }
 0x59b   :  { %v1892_v40 = vadd.f32 %v1887_v22, %v1828_v0 }
 0x5a0   :  { %v1945_v12 = vpop.f32.mrf.mxu1 }
 0x5a1   :  { %v1954_v36 = vadd.f32 %v1945_v12, %v1890_v55 }
 0x5a3   :  { %v2018_v58 = vadd.f32 %v2009_v50, %v1954_v36  ;;  %v2244_v50 = vpop.f32.mrf.mxu3 }
 0x5a8   :  { %v1948_v26 = vpop.f32.mrf.mxu1 }
 0x5a9   :  { %v1955_v49 = vadd.f32 %v1948_v26, %v1891_v61 }
 0x5ab   :  { %v2019_v14 = vadd.f32 %v2012_v63, %v1955_v49 }
 0x5b0   :  { %v1951_v30 = vpop.f32.mrf.mxu1 }
 0x5b1   :  { %v1956_v31 = vadd.f32 %v1951_v30, %v1892_v40 }
 0x5b3   :  { %v2020_v48 = vadd.f32 %v2015_v53, %v1956_v31 }
 0x5b5   :  { %6732 = vmatpush.msk.msrb.mxu2 %vm621_vm6, %v2020_v48  ;;  %6735 = vmatpush.msk.msra.mxu3 %vm621_vm6, %v2020_v48 }
 0x5b7   :  { %2327 = vmatpush.msrb.mxu2 %v2019_v14  ;;  %2354 = vmatpush.msra.mxu3 %v2019_v14 }
 0x5b8   :  { %v2073_v56 = vpop.f32.mrf.mxu1 }
 0x5b9   :  { %2328 = vmatpush.msrb.mxu2 %v2018_v58  ;;  %2355 = vmatpush.msra.mxu3 %v2018_v58  ;;  %v2082_v20 = vadd.f32 %v7313_v5, %v2073_v56  ;;  %v7418_v56 = vmov 20.0  }
 0x5ba   :  { %6733 = vmatmul.msk.f32.vlgmr.msrb.gmra.mxu2 %vm2305_vm3, %v8185_v51  ;;  %6736 = vmatmul.msk.f32.vlgmr.msra.gmra.mxu3 %vm2305_vm3, %v8188_v34  ;;  %7353 = vrcp.f32 %v7418_v56 }
 0x5bb   :  { %v2137_v12 = vadd.f32 %v2128_v46, %v2082_v20 }
 0x5c0   :  { %v2076_v6 = vpop.f32.mrf.mxu1 }
 0x5c1   :  { %v2083_v21 = vadd.f32 %v7313_v5, %v2076_v6 }
 0x5c2   :  { %6734 = vmatmul.msk.f32.gmra.mxu2 %vm2305_vm3, %v8221_v37  ;;  %6737 = vmatmul.msk.f32.gmra.mxu3 %vm2305_vm3, %v8224_v47 }
 0x5c3   :  { %v2138_v22 = vadd.f32 %v2131_v19, %v2083_v21 }
 0x5c8   :  { %v2079_v43 = vpop.f32.mrf.mxu1 }
 0x5c9   :  { %v2084_v42 = vadd.f32 %v7313_v5, %v2079_v43 }
 0x5cb   :  { %v2139_v2 = vadd.f32 %v2134_v16, %v2084_v42  ;;  %v7354_v16 = vpop.eup %7353 }
 0x5d0   :  { %v2183_v29 = vpop.f32.mrf.mxu1 }
 0x5d1   :  { %v2192_v26 = vadd.f32 %v2183_v29, %v2137_v12 }
 0x5d3   :  { %v2247_v0 = vadd.f32 %v2238_v8, %v2192_v26 }
 0x5d8   :  { %v2186_v24 = vpop.f32.mrf.mxu1 }
 0x5d9   :  { %v2193_v63 = vadd.f32 %v2186_v24, %v2138_v22 }
 0x5db   :  { %v2248_v3 = vadd.f32 %v2241_v13, %v2193_v63  ;;  %v2460_v13 = vmul.f32 20.0, %v7354_v16 }
 0x5dd   :  { %v2461_v22 = vsub.f32 1.0, %v2460_v13  ;;  %v9228_v13 = vld [vmem:[%s12001_s12 + $0x38] sm:$0xff] }
 0x5de   :  { %2568 = vmatpush.msrb.mxu0 %v9228_v13 }
 0x5df   :  { %v2462_v63 = vmul.f32 %v7354_v16, %v2461_v22  ;;  %v2539_v22 = vld [vmem:[%s12001_s12 + $0x70] sm:$0xff] }
 0x5e0   :  { %v2189_v7 = vpop.f32.mrf.mxu1 }
 0x5e1   :  { %v2194_v39 = vadd.f32 %v2189_v7, %v2139_v2 }
 0x5e3   :  { %v2249_v28 = vadd.f32 %v2244_v50, %v2194_v39 }
 0x5e8   :  { %v2293_v10 = vpop.f32.mrf.mxu1 }
 0x5e9   :  { %v2302_v61 = vadd.f32 %v2293_v10, %v2247_v0 }
 0x5f0   :  { %v2296_v18 = vpop.f32.mrf.mxu1 }
 0x5f1   :  { %v2303_v57 = vadd.f32 %v2296_v18, %v2248_v3  ;;  %v2463_v3 = vadd.f32 %v7354_v16, %v2462_v63  ;;  %v9258_v63 = vld [vmem:[%s12001_s12 + $0x28] sm:$0xff] }
 0x5f8   :  { %v2299_v1 = vpop.f32.mrf.mxu1 }
 0x5f9   :  { %v2304_v38 = vadd.f32 %v2299_v1, %v2249_v28 }
 0x5fb   :  { %6738 = vmatpush.msk.msra.mxu2 %vm621_vm6, %v2304_v38  ;;  %6741 = vmatpush.msk.msrb.mxu3 %vm621_vm6, %v2304_v38 }
 0x5fd   :  { %2392 = vmatpush.msra.mxu2 %v2303_v57  ;;  %2415 = vmatpush.msrb.mxu3 %v2303_v57 }
 0x5ff   :  { %2393 = vmatpush.msra.mxu2 %v2302_v61  ;;  %2416 = vmatpush.msrb.mxu3 %v2302_v61 }
 0x600   :  { %6739 = vmatmul.msk.f32.vlgmr.msra.gmra.mxu2 %vm2305_vm3, %v8185_v51  ;;  %6742 = vmatmul.msk.f32.vlgmr.msrb.gmra.mxu3 %vm2305_vm3, %v8188_v34 }
 0x608   :  { %6740 = vmatmul.msk.f32.gmra.mxu2 %vm2305_vm3, %v8221_v37  ;;  %6743 = vmatmul.msk.f32.gmra.mxu3 %vm2305_vm3, %v8224_v47 }
 0x63d   :  { %v9154_v5 = vpop.f32.mrf.mxu2  ;;  %v9156_v40 = vpop.f32.mrf.mxu3 }
 0x63e   :  { %vm2363_vm4 = vcmp.gt.f32.partialorder %v9156_v40, %v9154_v5 }
 0x63f   :  { %v2367_v51 = vsel %vm2363_vm4, %v9156_v40, %v9154_v5 }
 0x640   :  { %v2371_v37 = vmul.f32 0.01, %v2367_v51  ;;  %vm2369_vm10 = vcmp.gt.f32.partialorder %v2367_v51, 0.0 }
 0x642   :  { %v2373_v55 = vsel %vm2369_vm10, %v2367_v51, %v2371_v37 }
 0x643   :  { %v2438_v31 = vsel %vm1499_vm7, %v2373_v55, 0.0 }
 0x645   :  { %v9158_v30 = vpop.f32.mrf.mxu2  ;;  %v9160_v53 = vpop.f32.mrf.mxu3 }
 0x646   :  { %vm2364_vm5 = vcmp.gt.f32.partialorder %v9160_v53, %v9158_v30 }
 0x647   :  { %v2368_v34 = vsel %vm2364_vm5, %v9160_v53, %v9158_v30 }
 0x648   :  { %v2372_v47 = vmul.f32 0.01, %v2368_v34  ;;  %vm2370_vm13 = vcmp.gt.f32.partialorder %v2368_v34, 0.0 }
 0x64a   :  { %v2374_v49 = vsel %vm2370_vm13, %v2368_v34, %v2372_v47 }
 0x64b   :  { %v2440_v36 = vsel %vm2439_vm14, %v2374_v49, 0.0 }
 0x64c   :  { %v2441_v58 = vadd.f32 %v2440_v36, %v2438_v31 }
 0x64e   :  { %v2442_v46 = vrot.slane %v2441_v58, 4 }
 0x650   :  { %v2443_v8 = vadd.f32 %v2442_v46, %v2441_v58 }
 0x652   :  { %v2444_v20 = vrot.slane %v2443_v8, 2 }
 0x654   :  { %v2445_v50 = vadd.f32 %v2444_v20, %v2443_v8 }
 0x656   :  { %v2446_v28 = vrot.slane %v2445_v50, 1 }
 0x658   :  { %v2447_v0 = vadd.f32 %v2446_v28, %v2445_v50  ;;  %v9267_v28 = vld [vmem:[%s12001_s12 + $0xa8] sm:$0xff] }
 0x683   :  { %v9178_v48 = vpop.f32.mrf.mxu2  ;;  %v9180_v14 = vpop.f32.mrf.mxu3 }
 0x684   :  { %12184 = vst [vmem:[#allocation28_spill] sm:$0xff] %v9178_v48  ;;  %vm2424_vm8 = vcmp.gt.f32.partialorder %v9180_v14, %v9178_v48 }
 0x685   :  { %12185 = vst [vmem:[#allocation29_spill] sm:$0xff] %v9180_v14  ;;  %v2428_v6 = vsel %vm2424_vm8, %v9180_v14, %v9178_v48 }
 0x686   :  { %v2432_v43 = vmul.f32 0.01, %v2428_v6  ;;  %vm2430_vm10 = vcmp.gt.f32.partialorder %v2428_v6, 0.0 }
 0x688   :  { %v2434_v7 = vsel %vm2430_vm10, %v2428_v6, %v2432_v43  ;;  %vm2464_vm10 = vweird.f32 %v7354_v16 }
 0x689   :  { %v2448_v21 = vsel %vm1499_vm7, %v2434_v7, 0.0  ;;  %v9202_v61 = vsel %vm2464_vm10, %v7354_v16, %v2463_v3 }
 0x68b   :  { %v9189_v19 = vpop.f32.mrf.mxu2  ;;  %v9191_v29 = vpop.f32.mrf.mxu3 }
 0x68c   :  { %12186 = vst [vmem:[#allocation30_spill] sm:$0xff] %v9189_v19  ;;  %vm2425_vm13 = vcmp.gt.f32.partialorder %v9191_v29, %v9189_v19 }
 0x68d   :  { %12187 = vst [vmem:[#allocation31_spill] sm:$0xff] %v9191_v29  ;;  %v2429_v24 = vsel %vm2425_vm13, %v9191_v29, %v9189_v19 }
 0x68e   :  { %vm2431_vm9 = vcmp.gt.f32.partialorder %v2429_v24, 0.0  ;;  %v2433_v10 = vmul.f32 0.01, %v2429_v24 }
 0x690   :  { %v2435_v42 = vsel %vm2431_vm9, %v2429_v24, %v2433_v10 }
 0x691   :  { %v2449_v18 = vsel %vm2439_vm14, %v2435_v42, 0.0 }
 0x692   :  { %v2450_v2 = vadd.f32 %v2449_v18, %v2448_v21  ;;  %v9236_v21 = vld [vmem:[%s12001_s12 + $0xb8] sm:$0xff] }
 0x693   :  { %2668 = vmatpush.msra.mxu3 %v9236_v21 }
 0x694   :  { %v2451_v39 = vrot.slane %v2450_v2, 4 }
 0x696   :  { %v2452_v12 = vadd.f32 %v2451_v39, %v2450_v2  ;;  %v9243_v2 = vld [vmem:[%s12001_s12 + $0x30] sm:$0xff] }
 0x697   :  { %v9251_v39 = vld [vmem:[%s12001_s12 + $0xb0] sm:$0xff]  ;;  %2569 = vmatpush.msrb.mxu0 %v9243_v2 }
 0x698   :  { %v2453_v26 = vrot.slane %v2452_v12, 2  ;;  %2669 = vmatpush.msra.mxu3 %v9251_v39 }
 0x699   :  { %2570 = vmatpush.msrb.mxu0 %v9258_v63 }
 0x69a   :  { %v2454_v1 = vadd.f32 %v2453_v26, %v2452_v12  ;;  %v2538_v26 = vld [vmem:[%s12001_s12 + $0x68] sm:$0xff]  ;;  %2670 = vmatpush.msra.mxu3 %v9267_v28 }
 0x69c   :  { %v2455_v38 = vrot.slane %v2454_v1, 1 }
 0x69e   :  { %v2456_v57 = vadd.f32 %v2455_v38, %v2454_v1  ;;  %v9273_v38 = vld [vmem:[%s12001_s12 + $0x20] sm:$0xff] }
 0x69f   :  { %2571 = vmatpush.msrb.mxu0 %v9273_v38 }
 0x6a0   :  { %v2458_v51 = vadd.f32 %v2456_v57, %v2447_v0  ;;  %v2537_v0 = vld [vmem:[%s12001_s12 + $0x60] sm:$0xff] }
 0x6a1   :  { %v9281_v57 = vld [vmem:[%s12001_s12 + $0xa0] sm:$0xff] }
 0x6a2   :  { %v2466_v34 = vmul.f32 %v9202_v61, %v2458_v51  ;;  %v9287_v51 = vld [vmem:[%s12001_s12 + $0x18] sm:$0xff]  ;;  %2671 = vmatpush.msra.mxu3 %v9281_v57 }
 0x6a3   :  { %2572 = vmatpush.msrb.mxu0 %v9287_v51 }
 0x6a4   :  { %v9205_v37 = vsub.f32 %v2373_v55, %v2466_v34  ;;  %v9207_v47 = vsub.f32 %v2374_v49, %v2466_v34  ;;  %v9209_v31 = vsub.f32 %v2434_v7, %v2466_v34  ;;  %v9211_v36 = vsub.f32 %v2435_v42, %v2466_v34  ;;  %v2540_v42 = vld [vmem:[%s12001_s12 + $0x78] sm:$0xff] }
 0x6a5   :  { %2619 = vmatpush.msrb.mxu2 %v2540_v42  ;;  %v2536_v34 = vld [vmem:[%s12001_s12 + $0x58] sm:$0xff] }
 0x6a6   :  { %v2469_v58 = vmul.f32 %v9205_v37, %v9205_v37  ;;  %v2470_v56 = vmul.f32 %v9207_v47, %v9207_v47  ;;  %v2482_v6 = vmul.f32 %v9209_v31, %v9209_v31  ;;  %v2483_v46 = vmul.f32 %v9211_v36, %v9211_v36 }
 0x6a7   :  { %2620 = vmatpush.msrb.mxu2 %v2539_v22 }
 0x6a8   :  { %v2471_v55 = vsel %vm1499_vm7, %v2469_v58, 0.0  ;;  %v2472_v49 = vsel %vm2439_vm14, %v2470_v56, 0.0  ;;  %v2484_v43 = vsel %vm1499_vm7, %v2482_v6, 0.0  ;;  %v2485_v16 = vsel %vm2439_vm14, %v2483_v46, 0.0  ;;  %v9295_v58 = vld [vmem:[%s12001_s12 + $0x98] sm:$0xff]  ;;  %v9301_v46 = vld [vmem:[%s12001_s12 + $0x10] sm:$0xff] }
 0x6a9   :  { %v2473_v24 = vadd.f32 %v2472_v49, %v2471_v55  ;;  %v2486_v8 = vadd.f32 %v2485_v16, %v2484_v43  ;;  %2621 = vmatpush.msrb.mxu2 %v2538_v26  ;;  %v2535_v55 = vld [vmem:[%s12001_s12 + $0x50] sm:$0xff]  ;;  %2672 = vmatpush.msra.mxu3 %v9295_v58 }
 0x6aa   :  { %v9310_v49 = vld [vmem:[%s12001_s12 + $0x90] sm:$0xff]  ;;  %2573 = vmatpush.msrb.mxu0 %v9301_v46 }
 0x6ab   :  { %v2474_v7 = vrot.slane %v2473_v24, 4  ;;  %v2487_v10 = vrot.slane %v2486_v8, 4  ;;  %2622 = vmatpush.msrb.mxu2 %v2537_v0  ;;  %2673 = vmatpush.msra.mxu3 %v9310_v49 }
 0x6ad   :  { %v2475_v18 = vadd.f32 %v2474_v7, %v2473_v24  ;;  %v2488_v20 = vadd.f32 %v2487_v10, %v2486_v8  ;;  %2623 = vmatpush.msrb.mxu2 %v2536_v34  ;;  %v9316_v24 = vld [vmem:[%s12001_s12 + $0x8] sm:$0xff] }
 0x6ae   :  { %v2534_v8 = vld [vmem:[%s12001_s12 + $0x48] sm:$0xff]  ;;  %2574 = vmatpush.msrb.mxu0 %v9316_v24 }
 0x6af   :  { %v2476_v50 = vrot.slane %v2475_v18, 2  ;;  %v2489_v12 = vrot.slane %v2488_v20, 2  ;;  %2624 = vmatpush.msrb.mxu2 %v2535_v55  ;;  %v9325_v7 = vld [vmem:[%s12001_s12 + $0x88] sm:$0xff] }
 0x6b0   :  { %2674 = vmatpush.msra.mxu3 %v9325_v7 }
 0x6b1   :  { %v2477_v1 = vadd.f32 %v2476_v50, %v2475_v18  ;;  %v2490_v3 = vadd.f32 %v2489_v12, %v2488_v20  ;;  %v9331_v18 = vld [vmem:[%s12001_s12] sm:$0xff]  ;;  %2625 = vmatpush.msrb.mxu2 %v2534_v8 }
 0x6b2   :  { %v2533_v20 = vld [vmem:[%s12001_s12 + $0x40] sm:$0xff]  ;;  %2575 = vmatpush.msrb.mxu0 %v9331_v18 }
 0x6b3   :  { %v2478_v56 = vrot.slane %v2477_v1, 1  ;;  %v2491_v6 = vrot.slane %v2490_v3, 1  ;;  %v9340_v50 = vld [vmem:[%s12001_s12 + $0x80] sm:$0xff]  ;;  %2626 = vmatpush.msrb.mxu2 %v2533_v20 }
 0x6b4   :  { %2675 = vmatpush.msra.mxu3 %v9340_v50 }
 0x6b5   :  { %v2479_v43 = vadd.f32 %v2478_v56, %v2477_v1  ;;  %v2492_v16 = vadd.f32 %v2491_v6, %v2490_v3  ;;  %2770 = vmatpush.msra.mxu2 %v2540_v42  ;;  %v7314_v42 = vld [vmem:[%s12188_s10] ss:$0 sm:$0xff] }
 0x6b7   :  { %v2494_v10 = vadd.f32 %v2492_v16, %v2479_v43  ;;  %2771 = vmatpush.msra.mxu2 %v2539_v22 }
 0x6b9   :  { %v2495_v12 = vmul.f32 %v2494_v10, %v9202_v61  ;;  %2772 = vmatpush.msra.mxu2 %v2538_v26 }
 0x6bb   :  { %v2496_v1 = vadd.f32 1e-05, %v2495_v12  ;;  %2773 = vmatpush.msra.mxu2 %v2537_v0  ;;  %v7315_v0 = vld [vmem:[%s12000_s11] ss:$0 sm:$0xff] }
 0x6bd   :  { %7355 = vrsqrt.f32 %v2496_v1  ;;  %2774 = vmatpush.msra.mxu2 %v2536_v34  ;;  %vm2503_vm14 = vweird.f32 %v2496_v1 }
 0x6bf   :  { %2775 = vmatpush.msra.mxu2 %v2535_v55 }
 0x6c1   :  { %2776 = vmatpush.msra.mxu2 %v2534_v8 }
 0x6c3   :  { %v7356_v3 = vpop.eup %7355  ;;  %2777 = vmatpush.msra.mxu2 %v2533_v20 }
 0x6c4   :  { %v2498_v56 = vmul.f32 %v7356_v3, %v2496_v1  ;;  %vm2504_vm9 = vweird.f32 %v7356_v3 }
 0x6c5   :  { %vm2505_vm10 = vmor %vm2503_vm14, %vm2504_vm9  ;;  %vm2586_vm9 = vcmask 1041408   ;;  %vm2583_vm14 = vcmask 80896  }
 0x6c6   :  { %v2499_v6 = vmul.f32 %v7356_v3, %v2498_v56 }
 0x6c8   :  { %v2500_v61 = vmul.f32 0.5, %v2499_v6 }
 0x6ca   :  { %v2501_v43 = vsub.f32 1.5, %v2500_v61 }
 0x6cc   :  { %v2502_v16 = vmul.f32 %v7356_v3, %v2501_v43 }
 0x6ce   :  { %v2506_v22 = vsel %vm2505_vm10, %v7356_v3, %v2502_v16  ;;  %v9380_v16 = vld [vmem:[%s12003_s14 + $0x70] sm:$0xff]  ;;  %vm12054_vm10 = vcmask 253952  }
 0x6cf   :  { %v2507_v26 = vmul.f32 %v2506_v22, %v9205_v37  ;;  %v2508_v8 = vmul.f32 %v2506_v22, %v9207_v47  ;;  %v2519_v20 = vmul.f32 %v2506_v22, %v9209_v31  ;;  %v2520_v1 = vmul.f32 %v2506_v22, %v9211_v36  ;;  %v9374_v36 = vld [vmem:[%s12003_s14 + $0x78] sm:$0xff] }
 0x6d1   :  { %v2512_v34 = vmul.f32 %v7314_v42, %v2507_v26  ;;  %v2513_v10 = vmul.f32 %v7314_v42, %v2508_v8  ;;  %v2521_v37 = vmul.f32 %v7314_v42, %v2519_v20  ;;  %v2522_v3 = vmul.f32 %v7314_v42, %v2520_v1  ;;  %v9387_v42 = vld [vmem:[%s12003_s14 + $0x68] sm:$0xff]  ;;  %v9393_v26 = vld [vmem:[%s12003_s14 + $0x60] sm:$0xff]  ;;  %v9485_v20 = vld [vmem:[%s12003_s14 + $0x138] sm:$0xff] }
 0x6d2   :  { %v9473_v8 = vld [vmem:[%s12003_s14] sm:$0xff]  ;;  %v9504_v1 = vld [vmem:[%s12003_s14 + $0x178] sm:$0xff] }
 0x6d3   :  { %v2517_v55 = vadd.f32 %v7315_v0, %v2512_v34  ;;  %v2518_v12 = vadd.f32 %v7315_v0, %v2513_v10  ;;  %v9362_v47 = vadd.f32 %v7315_v0, %v2521_v37  ;;  %v9366_v56 = vadd.f32 %v7315_v0, %v2522_v3  ;;  %v9478_v10 = vld [vmem:[%s12003_s14 + $0x48] sm:$0xff]  ;;  %v9499_v37 = vld [vmem:[%s12003_s14 + $0x130] sm:$0xff] }
 0x6d4   :  { %v9511_v3 = vld [vmem:[%s12003_s14 + $0x128] sm:$0xff] }
 0x6d5   :  { %6744 = vmatmul.msk.f32.vlgmr.msrb.gmra.mxu0 %vm1499_vm7, %v2517_v55  ;;  %6748 = vmatmul.msk.f32.vlgmr.msrb.gmra.mxu2 %vm1499_vm7, %v2517_v55 }
 0x6d6   :  { %6752 = vmatmul.msk.f32.vlgmr.msra.gmra.mxu3 %vm1499_vm7, %v2517_v55  ;;  %2990 = vmatpush.msrb.mxu2 %v9374_v36 }
 0x6d8   :  { %2991 = vmatpush.msrb.mxu2 %v9380_v16 }
 0x6da   :  { %2992 = vmatpush.msrb.mxu2 %v9387_v42 }
 0x6dc   :  { %2993 = vmatpush.msrb.mxu2 %v9393_v26 }
 0x6dd   :  { %6745 = vmatmul.msk.f32.gmra.mxu0 %vm1499_vm7, %v2518_v12  ;;  %6749 = vmatmul.msk.f32.gmra.mxu2 %vm1499_vm7, %v2518_v12 }
 0x6de   :  { %6753 = vmatmul.msk.f32.gmra.mxu3 %vm1499_vm7, %v2518_v12  ;;  %v9490_v12 = vld [vmem:[%s12003_s14 + $0x40] sm:$0xff] }
 0x6e5   :  { %6760 = vmatmul.msk.f32.vlgmr.msra.gmra.mxu2 %vm1499_vm7, %v9362_v47 }
 0x6ed   :  { %6761 = vmatmul.msk.f32.gmra.mxu2 %vm1499_vm7, %v9366_v56 }
 0x752   :  { %v2577_v31 = vpop.f32.mrf.mxu0 }
 0x758   :  { %v2628_v6 = vpop.f32.mrf.mxu2 }
 0x759   :  { %v2677_v61 = vpop.f32.mrf.mxu3 }
 0x75a   :  { %v2580_v43 = vpop.f32.mrf.mxu0 }
 0x75b   :  { %6746 = vmatpush.msk.msra.mxu1 %vm2586_vm9, %v2580_v43  ;;  %v9533_v43 = vld [vmem:[%s12003_s14 + $0x118] sm:$0xff] }
 0x75d   :  { %2605 = vmatpush.msra.mxu1 %v2577_v31  ;;  %v9516_v31 = vld [vmem:[%s12003_s14 + $0x170] sm:$0xff] }
 0x75e   :  { %6747 = vmatmul.msk.f32.vlgmr.msra.gmra.mxu1 %vm2583_vm14, %v9008_v15 }
 0x760   :  { %v2631_v22 = vpop.f32.mrf.mxu2 }
 0x761   :  { %v2680_v0 = vpop.f32.mrf.mxu3  ;;  %6750 = vmatpush.msk.msrb.mxu1 %vm2586_vm9, %v2631_v22  ;;  %v9538_v22 = vld [vmem:[%s12003_s14 + $0x160] sm:$0xff] }
 0x762   :  { %6754 = vmatpush.msk.msra.mxu0 %vm2586_vm9, %v2680_v0  ;;  %v9545_v0 = vld [vmem:[%s12003_s14 + $0x110] sm:$0xff] }
 0x763   :  { %2654 = vmatpush.msrb.mxu1 %v2628_v6  ;;  %v9521_v6 = vld [vmem:[%s12003_s14 + $0x120] sm:$0xff] }
 0x764   :  { %2703 = vmatpush.msra.mxu0 %v2677_v61  ;;  %v9528_v61 = vld [vmem:[%s12003_s14 + $0x168] sm:$0xff] }
 0x765   :  { %2723 = vmatpush.msra.mxu1 %v9228_v13  ;;  %6755 = vmatmul.msk.f32.vlgmr.msra.gmra.mxu0 %vm2583_vm14, %v9039_v45  ;;  %v9414_v13 = vld [vmem:[%s12003_s14 + $0x38] sm:$0xff] }
 0x766   :  { %6751 = vmatmul.msk.f32.vlgmr.msrb.gmra.mxu1 %vm2583_vm14, %v9074_v9 }
 0x767   :  { %2724 = vmatpush.msra.mxu1 %v9243_v2  ;;  %v9422_v2 = vld [vmem:[%s12003_s14 + $0x30] sm:$0xff] }
 0x768   :  { %v2779_v34 = vpop.f32.mrf.mxu2 }
 0x769   :  { %2725 = vmatpush.msra.mxu1 %v9258_v63  ;;  %v9430_v63 = vld [vmem:[%s12003_s14 + $0x28] sm:$0xff] }
 0x76b   :  { %2726 = vmatpush.msra.mxu1 %v9273_v38  ;;  %v9436_v38 = vld [vmem:[%s12003_s14 + $0x20] sm:$0xff] }
 0x76d   :  { %2727 = vmatpush.msra.mxu1 %v9287_v51  ;;  %v9451_v51 = vld [vmem:[%s12003_s14 + $0x10] sm:$0xff] }
 0x76f   :  { %2728 = vmatpush.msra.mxu1 %v9301_v46  ;;  %v9456_v46 = vld [vmem:[%s12003_s14 + $0x58] sm:$0xff] }
 0x770   :  { %v2782_v55 = vpop.f32.mrf.mxu2  ;;  %2994 = vmatpush.msrb.mxu2 %v9456_v46 }
 0x771   :  { %2729 = vmatpush.msra.mxu1 %v9316_v24  ;;  %6762 = vmatpush.msk.msrb.mxu3 %vm2586_vm9, %v2782_v55  ;;  %v9461_v24 = vld [vmem:[%s12003_s14 + $0x8] sm:$0xff] }
 0x772   :  { %v9557_v55 = vld [vmem:[%s12003_s14 + $0x108] sm:$0xff] }
 0x773   :  { %2730 = vmatpush.msra.mxu1 %v9331_v18  ;;  %2803 = vmatpush.msrb.mxu3 %v2779_v34  ;;  %v9468_v18 = vld [vmem:[%s12003_s14 + $0x50] sm:$0xff]  ;;  %v9550_v34 = vld [vmem:[%s12003_s14 + $0x158] sm:$0xff] }
 0x774   :  { %6756 = vmatmul.msk.f32.vlgmr.msra.gmra.mxu1 %vm1499_vm7, %v9362_v47  ;;  %6763 = vmatmul.msk.f32.vlgmr.msrb.gmra.mxu3 %vm2583_vm14, %v9074_v9  ;;  %v9442_v9 = vld [vmem:[%s12003_s14 + $0x18] sm:$0xff] }
 0x775   :  { %2966 = vmatpush.msrb.mxu1 %v9414_v13  ;;  %2995 = vmatpush.msrb.mxu2 %v9468_v18 }
 0x777   :  { %2967 = vmatpush.msrb.mxu1 %v9422_v2  ;;  %2996 = vmatpush.msrb.mxu2 %v9478_v10 }
 0x779   :  { %2968 = vmatpush.msrb.mxu1 %v9430_v63  ;;  %2997 = vmatpush.msrb.mxu2 %v9490_v12 }
 0x77b   :  { %2969 = vmatpush.msrb.mxu1 %v9436_v38  ;;  %3086 = vmatpush.msra.mxu2 %v9504_v1 }
 0x77c   :  { %6757 = vmatmul.msk.f32.gmra.mxu1 %vm1499_vm7, %v9366_v56 }
 0x77d   :  { %2970 = vmatpush.msrb.mxu1 %v9442_v9  ;;  %3087 = vmatpush.msra.mxu2 %v9516_v31 }
 0x77f   :  { %2971 = vmatpush.msrb.mxu1 %v9451_v51  ;;  %3088 = vmatpush.msra.mxu2 %v9528_v61 }
 0x781   :  { %2972 = vmatpush.msrb.mxu1 %v9461_v24  ;;  %3089 = vmatpush.msra.mxu2 %v9538_v22 }
 0x783   :  { %2973 = vmatpush.msrb.mxu1 %v9473_v8  ;;  %3090 = vmatpush.msra.mxu2 %v9550_v34 }
 0x785   :  { %3062 = vmatpush.msra.mxu1 %v9485_v20  ;;  %3091 = vmatpush.msra.mxu2 %v9562_v33 }
 0x787   :  { %3063 = vmatpush.msra.mxu1 %v9499_v37  ;;  %3092 = vmatpush.msra.mxu2 %v9574_v60 }
 0x789   :  { %3064 = vmatpush.msra.mxu1 %v9511_v3  ;;  %3093 = vmatpush.msra.mxu2 %v9583_v23 }
 0x78b   :  { %3065 = vmatpush.msra.mxu1 %v9521_v6 }
 0x78d   :  { %3066 = vmatpush.msra.mxu1 %v9533_v43 }
 0x78f   :  { %3067 = vmatpush.msra.mxu1 %v9545_v0 }
 0x791   :  { %3068 = vmatpush.msra.mxu1 %v9557_v55 }
 0x793   :  { %3069 = vmatpush.msra.mxu1 %v9569_v32 }
 0x7db   :  { %v2607_v25 = vpop.f32.mrf.mxu1 }
 0x7dc   :  { %v2610_v62 = vadd.f32 %v9589_v44, %v2607_v25 }
 0x7e2   :  { %v2705_v11 = vpop.f32.mrf.mxu0 }
 0x7e3   :  { %v2656_v35 = vpop.f32.mrf.mxu1 }
 0x7e4   :  { %v2659_v59 = vadd.f32 %v2656_v35, %v2610_v62  ;;  %v9623_v62 = vld [vmem:[%s12003_s14 + $0xf0] sm:$0xff]  ;;  %v9629_v35 = vld [vmem:[%s12003_s14 + $0xe8] sm:$0xff] }
 0x7e6   :  { %v9592_v48 = vadd.f32 %v2705_v11, %v2659_v59  ;;  %v9635_v11 = vld [vmem:[%s12003_s14 + $0xe0] sm:$0xff]  ;;  %v9641_v59 = vld [vmem:[%s12003_s14 + $0xd8] sm:$0xff] }
 0x7e8   :  { %6768 = vmatmul.msk.f32.vlgmr.msrb.gmra.mxu1 %vm1499_vm7, %v9592_v48  ;;  %v2979_v14 = vrot.slane %v9592_v48, 1  ;;  %v3051_v19 = vrot.slane %v9592_v48, 4  ;;  %v3075_v29 = vrot.slane %v9592_v48, 5 }
 0x7ea   :  { %6769 = vmatmul.msk.f32.vlgmr.msrb.gmra.mxu2 %vm1499_vm7, %v2979_v14  ;;  %v9649_v14 = vld [vmem:[%s12003_s14 + $0xd0] sm:$0xff] }
 0x7f0   :  { %6772 = vmatmul.msk.f32.vlgmr.msra.gmra.mxu1 %vm1499_vm7, %v3051_v19  ;;  %v9655_v19 = vld [vmem:[%s12003_s14 + $0xc8] sm:$0xff] }
 0x7f1   :  { %v2732_v52 = vpop.f32.mrf.mxu1 }
 0x7f2   :  { %6773 = vmatmul.msk.f32.vlgmr.msra.gmra.mxu2 %vm1499_vm7, %v3075_v29  ;;  %v9661_v29 = vld [vmem:[%s12003_s14 + $0xc0] sm:$0xff] }
 0x7f9   :  { %v2735_v25 = vpop.f32.mrf.mxu1 }
 0x7fa   :  { %6758 = vmatpush.msk.msrb.mxu0 %vm2586_vm9, %v2735_v25  ;;  %v9818_v25 = vld [vmem:[%s12003_s14 + $0x190] sm:$0xff] }
 0x7fc   :  { %2756 = vmatpush.msrb.mxu0 %v2732_v52  ;;  %v9615_v52 = vld [vmem:[%s12003_s14 + $0xf8] sm:$0xff] }
 0x7fd   :  { %6759 = vmatmul.msk.f32.vlgmr.msrb.gmra.mxu0 %vm2583_vm14, %v9008_v15 }
 0x7fe   :  { %2817 = vmatpush.msra.mxu0 %v9236_v21  ;;  %v9667_v21 = vld [vmem:[%s12003_s14 + $0x1f8] sm:$0xff] }
 0x800   :  { %2818 = vmatpush.msra.mxu0 %v9251_v39  ;;  %v3027_v39 = vrot.slane %v9592_v48, 3 }
 0x802   :  { %2819 = vmatpush.msra.mxu0 %v9267_v28  ;;  %v9674_v28 = vld [vmem:[%s12003_s14 + $0x1f0] sm:$0xff] }
 0x804   :  { %2820 = vmatpush.msra.mxu0 %v9281_v57  ;;  %v9681_v57 = vld [vmem:[%s12003_s14 + $0x1e8] sm:$0xff] }
 0x806   :  { %2821 = vmatpush.msra.mxu0 %v9295_v58  ;;  %v9687_v58 = vld [vmem:[%s12003_s14 + $0x1e0] sm:$0xff] }
 0x808   :  { %2822 = vmatpush.msra.mxu0 %v9310_v49  ;;  %v9693_v49 = vld [vmem:[%s12003_s14 + $0x1d8] sm:$0xff] }
 0x80a   :  { %2823 = vmatpush.msra.mxu0 %v9325_v7  ;;  %v9699_v7 = vld [vmem:[%s12003_s14 + $0x1d0] sm:$0xff] }
 0x80c   :  { %2824 = vmatpush.msra.mxu0 %v9340_v50  ;;  %v9705_v50 = vld [vmem:[%s12003_s14 + $0x1c8] sm:$0xff] }
 0x80d   :  { %6764 = vmatmul.msk.f32.vlgmr.msra.gmra.mxu0 %vm1499_vm7, %v9362_v47  ;;  %v9711_v47 = vld [vmem:[%s12003_s14 + $0x1c0] sm:$0xff] }
 0x80e   :  { %3038 = vmatpush.msrb.mxu0 %v9615_v52 }
 0x810   :  { %3039 = vmatpush.msrb.mxu0 %v9623_v62 }
 0x812   :  { %3040 = vmatpush.msrb.mxu0 %v9629_v35 }
 0x814   :  { %3041 = vmatpush.msrb.mxu0 %v9635_v11 }
 0x815   :  { %6765 = vmatmul.msk.f32.gmra.mxu0 %vm1499_vm7, %v9366_v56  ;;  %v3123_v56 = vrot.slane %v9592_v48, 7 }
 0x816   :  { %3042 = vmatpush.msrb.mxu0 %v9641_v59 }
 0x818   :  { %3043 = vmatpush.msrb.mxu0 %v9649_v14 }
 0x81a   :  { %3044 = vmatpush.msrb.mxu0 %v9655_v19 }
 0x81c   :  { %3045 = vmatpush.msrb.mxu0 %v9661_v29 }
 0x81d   :  { %6771 = vmatmul.msk.f32.vlgmr.msrb.gmra.mxu0 %vm1499_vm7, %v3027_v39  ;;  %v9824_v39 = vld [vmem:[%s12003_s14 + $0x188] sm:$0xff] }
 0x81e   :  { %3134 = vmatpush.msra.mxu0 %v9667_v21 }
 0x820   :  { %3135 = vmatpush.msra.mxu0 %v9674_v28 }
 0x822   :  { %3136 = vmatpush.msra.mxu0 %v9681_v57 }
 0x824   :  { %3137 = vmatpush.msra.mxu0 %v9687_v58 }
 0x826   :  { %3138 = vmatpush.msra.mxu0 %v9693_v49 }
 0x828   :  { %3139 = vmatpush.msra.mxu0 %v9699_v7 }
 0x82a   :  { %3140 = vmatpush.msra.mxu0 %v9705_v50 }
 0x82c   :  { %3141 = vmatpush.msra.mxu0 %v9711_v47 }
 0x82d   :  { %6775 = vmatmul.msk.f32.vlgmr.msra.gmra.mxu0 %vm1499_vm7, %v3123_v56  ;;  %v9830_v56 = vld [vmem:[%s12003_s14 + $0x180] sm:$0xff] }
 0x82e   :  { %3329 = vmatpush.msrb.mxu0 %v9374_v36 }
 0x830   :  { %3330 = vmatpush.msrb.mxu0 %v9380_v16 }
 0x832   :  { %3331 = vmatpush.msrb.mxu0 %v9387_v42 }
 0x834   :  { %3332 = vmatpush.msrb.mxu0 %v9393_v26  ;;  %v9737_v26 = vld [vmem:[%s12003_s14 + $0xb8] sm:$0xff] }
 0x836   :  { %3333 = vmatpush.msrb.mxu0 %v9456_v46  ;;  %v9768_v46 = vld [vmem:[%s12003_s14 + $0x90] sm:$0xff] }
 0x838   :  { %3334 = vmatpush.msrb.mxu0 %v9468_v18  ;;  %v9774_v18 = vld [vmem:[%s12003_s14 + $0x88] sm:$0xff] }
 0x83a   :  { %3335 = vmatpush.msrb.mxu0 %v9478_v10  ;;  %v9780_v10 = vld [vmem:[%s12003_s14 + $0x80] sm:$0xff] }
 0x83c   :  { %3336 = vmatpush.msrb.mxu0 %v9490_v12  ;;  %v3003_v12 = vrot.slane %v9592_v48, 2 }
 0x83e   :  { %3425 = vmatpush.msra.mxu0 %v9504_v1  ;;  %v9787_v1 = vld [vmem:[%s12003_s14 + $0x1b8] sm:$0xff] }
 0x840   :  { %3426 = vmatpush.msra.mxu0 %v9516_v31  ;;  %v9794_v31 = vld [vmem:[%s12003_s14 + $0x1b0] sm:$0xff] }
 0x842   :  { %3427 = vmatpush.msra.mxu0 %v9528_v61  ;;  %v9800_v61 = vld [vmem:[%s12003_s14 + $0x1a8] sm:$0xff] }
 0x844   :  { %3428 = vmatpush.msra.mxu0 %v9538_v22  ;;  %v9806_v22 = vld [vmem:[%s12003_s14 + $0x1a0] sm:$0xff] }
 0x846   :  { %3429 = vmatpush.msra.mxu0 %v9550_v34  ;;  %v9812_v34 = vld [vmem:[%s12003_s14 + $0x198] sm:$0xff] }
 0x848   :  { %3430 = vmatpush.msra.mxu0 %v9562_v33  ;;  %v9750_v33 = vld [vmem:[%s12003_s14 + $0xa8] sm:$0xff] }
 0x84a   :  { %3431 = vmatpush.msra.mxu0 %v9574_v60  ;;  %v9744_v60 = vld [vmem:[%s12003_s14 + $0xb0] sm:$0xff] }
 0x84c   :  { %3432 = vmatpush.msra.mxu0 %v9583_v23  ;;  %v9756_v23 = vld [vmem:[%s12003_s14 + $0xa0] sm:$0xff] }
 0x87a   :  { %v2758_v36 = vpop.f32.mrf.mxu0 }
 0x88a   :  { %v2826_v16 = vpop.f32.mrf.mxu0 }
 0x892   :  { %v2829_v42 = vpop.f32.mrf.mxu0 }
 0x893   :  { %6766 = vmatpush.msk.msra.mxu3 %vm2586_vm9, %v2829_v42 }
 0x895   :  { %2850 = vmatpush.msra.mxu3 %v2826_v16  ;;  %v3099_v16 = vrot.slane %v9592_v48, 6  ;;  %v2805_v48 = vpop.f32.mrf.mxu3 }
 0x896   :  { %6767 = vmatmul.msk.f32.vlgmr.msra.gmra.mxu3 %vm2583_vm14, %v9039_v45  ;;  %v9762_v45 = vld [vmem:[%s12003_s14 + $0x98] sm:$0xff] }
 0x897   :  { %3014 = vmatpush.msrb.mxu3 %v9737_v26 }
 0x899   :  { %3015 = vmatpush.msrb.mxu3 %v9744_v60 }
 0x89a   :  { %v3047_v42 = vpop.f32.mrf.mxu0 }
 0x89b   :  { %3016 = vmatpush.msrb.mxu3 %v9750_v33 }
 0x89d   :  { %3017 = vmatpush.msrb.mxu3 %v9756_v23 }
 0x89f   :  { %3018 = vmatpush.msrb.mxu3 %v9762_v45 }
 0x8a1   :  { %3019 = vmatpush.msrb.mxu3 %v9768_v46 }
 0x8a3   :  { %3020 = vmatpush.msrb.mxu3 %v9774_v18 }
 0x8a5   :  { %3021 = vmatpush.msrb.mxu3 %v9780_v10 }
 0x8a6   :  { %6770 = vmatmul.msk.f32.vlgmr.msrb.gmra.mxu3 %vm1499_vm7, %v3003_v12 }
 0x8a7   :  { %3110 = vmatpush.msra.mxu3 %v9787_v1 }
 0x8a9   :  { %3111 = vmatpush.msra.mxu3 %v9794_v31 }
 0x8ab   :  { %3112 = vmatpush.msra.mxu3 %v9800_v61 }
 0x8ad   :  { %3113 = vmatpush.msra.mxu3 %v9806_v22 }
 0x8af   :  { %3114 = vmatpush.msra.mxu3 %v9812_v34 }
 0x8b1   :  { %3115 = vmatpush.msra.mxu3 %v9818_v25 }
 0x8b3   :  { %3116 = vmatpush.msra.mxu3 %v9824_v39 }
 0x8b5   :  { %3117 = vmatpush.msra.mxu3 %v9830_v56 }
 0x8b6   :  { %6774 = vmatmul.msk.f32.vlgmr.msra.gmra.mxu3 %vm1499_vm7, %v3099_v16 }
 0x8b7   :  { %3305 = vmatpush.msrb.mxu3 %v9414_v13  ;;  %v2761_v13 = vadd.f32 %v9589_v44, %v2758_v36  ;;  %v9865_v44 = vld [vmem:[%s12004_s15] sm:$0x1]  ;;  %s7424_s15 = smov 123  }
 0x8b9   :  { %3306 = vmatpush.msrb.mxu3 %v9422_v2  ;;  %v2808_v2 = vadd.f32 %v2805_v48, %v2761_v13 }
 0x8bb   :  { %3307 = vmatpush.msrb.mxu3 %v9430_v63 }
 0x8bd   :  { %3308 = vmatpush.msrb.mxu3 %v9436_v38 }
 0x8bf   :  { %3309 = vmatpush.msrb.mxu3 %v9442_v9 }
 0x8c1   :  { %3310 = vmatpush.msrb.mxu3 %v9451_v51 }
 0x8c3   :  { %3311 = vmatpush.msrb.mxu3 %v9461_v24  ;;  %v2975_v24 = vpop.f32.mrf.mxu1 }
 0x8c5   :  { %3312 = vmatpush.msrb.mxu3 %v9473_v8  ;;  %v2999_v8 = vpop.f32.mrf.mxu2 }
 0x8c7   :  { %3401 = vmatpush.msra.mxu3 %v9485_v20  ;;  %v2978_v20 = vadd.f32 %v2975_v24, %v9865_v44 }
 0x8c9   :  { %3402 = vmatpush.msra.mxu3 %v9499_v37 }
 0x8cb   :  { %3403 = vmatpush.msra.mxu3 %v9511_v3  ;;  %v2933_v3 = vld [vmem:[%s12005_s16 + $0x60] sm:$0xff]  ;;  %v3071_v16 = vpop.f32.mrf.mxu1 }
 0x8cc   :  { %3190 = vmatpush.msrb.mxu1 %v2933_v3 }
 0x8cd   :  { %3404 = vmatpush.msra.mxu3 %v9521_v6  ;;  %v2934_v6 = vld [vmem:[%s12005_s16 + $0x68] sm:$0xff]  ;;  %v3095_v13 = vpop.f32.mrf.mxu2 }
 0x8ce   :  { %3210 = vmatpush.msrb.mxu2 %v2934_v6 }
 0x8cf   :  { %3405 = vmatpush.msra.mxu3 %v9533_v43  ;;  %v2929_v43 = vld [vmem:[%s12005_s16 + $0x40] sm:$0xff] }
 0x8d0   :  { %3191 = vmatpush.msrb.mxu1 %v2929_v43 }
 0x8d1   :  { %3406 = vmatpush.msra.mxu3 %v9545_v0  ;;  %v3002_v0 = vadd.f32 %v2999_v8, %v2978_v20 }
 0x8d3   :  { %3407 = vmatpush.msra.mxu3 %v9557_v55  ;;  %v2930_v55 = vld [vmem:[%s12005_s16 + $0x48] sm:$0xff] }
 0x8d4   :  { %3211 = vmatpush.msrb.mxu2 %v2930_v55 }
 0x8d5   :  { %3408 = vmatpush.msra.mxu3 %v9569_v32 }
 0x919   :  { %v2852_v63 = vpop.f32.mrf.mxu3 }
 0x91a   :  { %v9853_v38 = vadd.f32 %v2852_v63, %v2808_v2 }
 0x91c   :  { %6780 = vmatmul.msk.f32.vlgmr.msrb.gmra.mxu3 %vm1499_vm7, %v9853_v38  ;;  %v3318_v9 = vrot.slane %v9853_v38, 1  ;;  %v3390_v51 = vrot.slane %v9853_v38, 4  ;;  %v3414_v32 = vrot.slane %v9853_v38, 5 }
 0x91d   :  { %3518 = vmatpush.msrb.mxu3 %v2933_v3  ;;  %v2926_v3 = vld [vmem:[%s12005_s16 + $0x28] sm:$0xff] }
 0x91e   :  { %6781 = vmatmul.msk.f32.vlgmr.msrb.gmra.mxu0 %vm1499_vm7, %v3318_v9  ;;  %3212 = vmatpush.msrb.mxu2 %v2926_v3 }
 0x91f   :  { %3538 = vmatpush.msrb.mxu0 %v2934_v6  ;;  %3519 = vmatpush.msrb.mxu3 %v2929_v43  ;;  %v2921_v6 = vld [vmem:[%s12005_s16] sm:$0xff]  ;;  %v2922_v43 = vld [vmem:[%s12005_s16 + $0x8] sm:$0xff] }
 0x920   :  { %3213 = vmatpush.msrb.mxu2 %v2922_v43 }
 0x921   :  { %3539 = vmatpush.msrb.mxu0 %v2930_v55  ;;  %v9907_v55 = vld [vmem:[%s12005_s16 + $0x78] sm:$0xff] }
 0x922   :  { %3250 = vmatpush.msra.mxu2 %v9907_v55 }
 0x923   :  { %3540 = vmatpush.msrb.mxu0 %v2926_v3 }
 0x924   :  { %6784 = vmatmul.msk.f32.vlgmr.msra.gmra.mxu3 %vm1499_vm7, %v3390_v51  ;;  %v3143_v51 = vpop.f32.mrf.mxu0 }
 0x925   :  { %3541 = vmatpush.msrb.mxu0 %v2922_v43 }
 0x926   :  { %6785 = vmatmul.msk.f32.vlgmr.msra.gmra.mxu0 %vm1499_vm7, %v3414_v32 }
 0x929   :  { %v3023_v37 = vpop.f32.mrf.mxu3 }
 0x92a   :  { %v3026_v36 = vadd.f32 %v3023_v37, %v3002_v0  ;;  %v2925_v37 = vld [vmem:[%s12005_s16 + $0x20] sm:$0xff]  ;;  %v9902_v0 = vld [vmem:[%s12005_s16 + $0x70] sm:$0xff] }
 0x92b   :  { %3192 = vmatpush.msrb.mxu1 %v2925_v37  ;;  %3520 = vmatpush.msrb.mxu3 %v2925_v37 }
 0x92c   :  { %v3050_v12 = vadd.f32 %v3047_v42, %v3026_v36  ;;  %v9914_v36 = vld [vmem:[%s12005_s16 + $0x50] sm:$0xff]  ;;  %v9919_v42 = vld [vmem:[%s12005_s16 + $0x58] sm:$0xff] }
 0x92d   :  { %3193 = vmatpush.msrb.mxu1 %v2921_v6  ;;  %3521 = vmatpush.msrb.mxu3 %v2921_v6 }
 0x92e   :  { %v3074_v48 = vadd.f32 %v3071_v16, %v3050_v12  ;;  %3251 = vmatpush.msra.mxu2 %v9919_v42  ;;  %v2927_v12 = vld [vmem:[%s12005_s16 + $0x30] sm:$0xff]  ;;  %v2928_v16 = vld [vmem:[%s12005_s16 + $0x38] sm:$0xff] }
 0x92f   :  { %3230 = vmatpush.msra.mxu1 %v9902_v0 }
 0x930   :  { %v3098_v2 = vadd.f32 %v3095_v13, %v3074_v48  ;;  %v2923_v48 = vld [vmem:[%s12005_s16 + $0x10] sm:$0xff]  ;;  %3252 = vmatpush.msra.mxu2 %v2928_v16  ;;  %v2924_v13 = vld [vmem:[%s12005_s16 + $0x18] sm:$0xff] }
 0x931   :  { %3231 = vmatpush.msra.mxu1 %v9914_v36 }
 0x932   :  { %3253 = vmatpush.msra.mxu2 %v2924_v13 }
 0x933   :  { %3232 = vmatpush.msra.mxu1 %v2927_v12 }
 0x935   :  { %3233 = vmatpush.msra.mxu1 %v2923_v48 }
 0x939   :  { %v3119_v63 = vpop.f32.mrf.mxu3 }
 0x93a   :  { %v3122_v9 = vadd.f32 %v3119_v63, %v3098_v2  ;;  %v3155_v2 = vld [vmem:[%s12190_s5] sm:$0x1] }
 0x93c   :  { %v9881_v32 = vadd.f32 %v3143_v51, %v3122_v9 }
 0x93e   :  { %12189 = vst [vmem:[#allocation32_spill] sm:$0xff] %v9881_v32  ;;  %v3156_v24 = vmul.f32 1.442695, %v9881_v32 }
 0x93f   :  { %3148 = vst.msk [vmem:[#allocation3] sm:$0x1] %vm12054_vm10, %v9881_v32 }
 0x940   :  { %7357 = vpow2.f32 %v3156_v24 }
 0x946   :  { %v7358_v8 = vpop.eup %7357 }
 0x947   :  { %v3159_v20 = vperm.slane %v7358_v8, 0 }
 0x949   :  { %3160 = vrot.lane.b32.xlu2 %v3159_v20, %s7419_s27 }
 0x9a3   :  { %v3161_v63 = vpop.permute.xlu2 %3160 }
 0x9a4   :  { %v3163_v9 = vmul.f32 %v3161_v63, %v3155_v2  ;;  %v10048_v2 = vld [vmem:[%s12007_s18 + $0x78] sm:$0xff]  ;;  %v10053_v63 = vld [vmem:[%s12007_s18 + $0x30] sm:$0xff] }
 0x9a6   :  { %v3164_v51 = vadd.f32 %v3163_v9, %v9881_v32  ;;  %v10060_v9 = vld [vmem:[%s12007_s18 + $0x70] sm:$0xff] }
 0x9a8   :  { %6776 = vmatmul.msk.f32.vlgmr.msrb.gmra.mxu1 %vm3174_vm12, %v3164_v51  ;;  %6777 = vmatmul.msk.f32.vlgmr.msrb.gmra.mxu2 %vm3174_vm12, %v3164_v51 }
 0x9a9   :  { %3353 = vmatpush.msrb.mxu1 %v9737_v26  ;;  %3377 = vmatpush.msrb.mxu2 %v9615_v52  ;;  %v3342_v52 = vrot.slane %v9853_v38, 2  ;;  %v10013_v26 = vsel %vm2944_vm11, 1.0, %v12181_v54  ;;  %vm2952_vm11 = vcmp.eq.s32.totalorder %v8141_v17, 7 }
 0x9ab   :  { %3354 = vmatpush.msrb.mxu1 %v9744_v60  ;;  %3378 = vmatpush.msrb.mxu2 %v9623_v62  ;;  %v3366_v62 = vrot.slane %v9853_v38, 3 }
 0x9ad   :  { %3355 = vmatpush.msrb.mxu1 %v9750_v33  ;;  %3379 = vmatpush.msrb.mxu2 %v9629_v35  ;;  %v3438_v35 = vrot.slane %v9853_v38, 6 }
 0x9af   :  { %3356 = vmatpush.msrb.mxu1 %v9756_v23  ;;  %3380 = vmatpush.msrb.mxu2 %v9635_v11  ;;  %v3462_v11 = vrot.slane %v9853_v38, 7 }
 0x9b0   :  { %6778 = vmatmul.msk.f32.vlgmr.msra.gmra.mxu1 %vm3174_vm12, %v3164_v51  ;;  %6779 = vmatmul.msk.f32.vlgmr.msra.gmra.mxu2 %vm3174_vm12, %v3164_v51 }
 0x9b1   :  { %3357 = vmatpush.msrb.mxu1 %v9762_v45  ;;  %3381 = vmatpush.msrb.mxu2 %v9641_v59  ;;  %v9990_v59 = vld [vmem:[%s12006_s17] sm:$0xf]  ;;  %s7420_s17 = smov 64  }
 0x9b3   :  { %3358 = vmatpush.msrb.mxu1 %v9768_v46  ;;  %3382 = vmatpush.msrb.mxu2 %v9649_v14  ;;  %v3166_v14 = vperm.slane %v9990_v59, 0 }
 0x9b5   :  { %3359 = vmatpush.msrb.mxu1 %v9774_v18  ;;  %3383 = vmatpush.msrb.mxu2 %v9655_v19 }
 0x9b7   :  { %3360 = vmatpush.msrb.mxu1 %v9780_v10  ;;  %3384 = vmatpush.msrb.mxu2 %v9661_v29 }
 0x9b8   :  { %6782 = vmatmul.msk.f32.vlgmr.msrb.gmra.mxu1 %vm1499_vm7, %v3342_v52  ;;  %6783 = vmatmul.msk.f32.vlgmr.msrb.gmra.mxu2 %vm1499_vm7, %v3366_v62 }
 0x9b9   :  { %3449 = vmatpush.msra.mxu1 %v9787_v1  ;;  %3473 = vmatpush.msra.mxu2 %v9667_v21  ;;  %v9999_v21 = vsel %vm2940_vm1, 1.0, %v12181_v54  ;;  %vm2948_vm1 = vcmp.eq.s32.totalorder %v8141_v17, 5  ;;  %v3314_v1 = vpop.f32.mrf.mxu3 }
 0x9ba   :  { %v10018_v23 = vsel %vm2948_vm1, 1.0, %v12181_v54  ;;  %vm2938_vm1 = vcmp.eq.s32.totalorder %v8141_v17, 0 }
 0x9bb   :  { %3450 = vmatpush.msra.mxu1 %v9794_v31  ;;  %3474 = vmatpush.msra.mxu2 %v9674_v28  ;;  %v3317_v31 = vadd.f32 %v3314_v1, %v9865_v44  ;;  %v3169_v44 = vperm.slane %v9990_v59, 3  ;;  %v10067_v51 = vsel %vm2938_vm1, 1.0, %v12181_v54  ;;  %v10089_v1 = vld [vmem:[%s12007_s18 + $0x28] sm:$0xff] }
 0x9bd   :  { %3451 = vmatpush.msra.mxu1 %v9800_v61  ;;  %3475 = vmatpush.msra.mxu2 %v9681_v57  ;;  %v3167_v57 = vperm.slane %v9990_v59, 1  ;;  %v3338_v61 = vpop.f32.mrf.mxu0 }
 0x9bf   :  { %3452 = vmatpush.msra.mxu1 %v9806_v22  ;;  %3476 = vmatpush.msra.mxu2 %v9687_v58 }
 0x9c1   :  { %3453 = vmatpush.msra.mxu1 %v9812_v34  ;;  %3477 = vmatpush.msra.mxu2 %v9693_v49  ;;  %v3168_v49 = vperm.slane %v9990_v59, 2  ;;  %v3341_v34 = vadd.f32 %v3338_v61, %v3317_v31  ;;  %v3410_v38 = vpop.f32.mrf.mxu3  ;;  %v10094_v31 = vld [vmem:[%s12007_s18 + $0x68] sm:$0xff]  ;;  %v10106_v61 = vld [vmem:[%s12007_s18 + $0x60] sm:$0xff]  ;;  %v10201_v59 = vld [vmem:[%s12007_s18 + $0xb0] sm:$0xff] }
 0x9c3   :  { %3454 = vmatpush.msra.mxu1 %v9818_v25  ;;  %3478 = vmatpush.msra.mxu2 %v9699_v7 }
 0x9c5   :  { %3455 = vmatpush.msra.mxu1 %v9824_v39  ;;  %3479 = vmatpush.msra.mxu2 %v9705_v50  ;;  %v3434_v8 = vpop.f32.mrf.mxu0 }
 0x9c7   :  { %3456 = vmatpush.msra.mxu1 %v9830_v56  ;;  %3480 = vmatpush.msra.mxu2 %v9711_v47 }
 0x9c8   :  { %6786 = vmatmul.msk.f32.vlgmr.msra.gmra.mxu1 %vm1499_vm7, %v3438_v35  ;;  %6787 = vmatmul.msk.f32.vlgmr.msra.gmra.mxu2 %vm1499_vm7, %v3462_v11 }
 0x9c9   :  { %3558 = vmatpush.msrb.mxu1 %v9902_v0  ;;  %3578 = vmatpush.msrb.mxu2 %v9907_v55 }
 0x9cb   :  { %3559 = vmatpush.msrb.mxu1 %v9914_v36  ;;  %3579 = vmatpush.msrb.mxu2 %v9919_v42 }
 0x9cd   :  { %3560 = vmatpush.msrb.mxu1 %v2927_v12  ;;  %3580 = vmatpush.msrb.mxu2 %v2928_v16  ;;  %v10036_v16 = vsel %vm2952_vm11, 1.0, %v12181_v54  ;;  %vm2942_vm11 = vcmp.eq.s32.totalorder %v8141_v17, 2 }
 0x9ce   :  { %v10070_v52 = vsel %vm2942_vm11, 1.0, %v12181_v54 }
 0x9cf   :  { %3561 = vmatpush.msrb.mxu1 %v2923_v48  ;;  %3581 = vmatpush.msrb.mxu2 %v2924_v13  ;;  %v10043_v13 = vld [vmem:[%s12007_s18 + $0x38] sm:$0xff] }
 0x9d0   :  { %3688 = vmatpush.msra.mxu3 %v10043_v13 }
 0x9d1   :  { %3738 = vmatpush.msra.mxu1 %v10048_v2 }
 0x9d2   :  { %3689 = vmatpush.msra.mxu3 %v10053_v63 }
 0x9d3   :  { %3739 = vmatpush.msra.mxu1 %v10060_v9 }
 0x9d4   :  { %3690 = vmatpush.msra.mxu3 %v10089_v1 }
 0x9d5   :  { %3740 = vmatpush.msra.mxu1 %v10094_v31 }
 0x9d7   :  { %3741 = vmatpush.msra.mxu1 %v10106_v61 }
 0xa25   :  { %v3195_v19 = vpop.f32.mrf.mxu1 }
 0xa26   :  { %v9996_v29 = vadd.f32 %v3195_v19, %v3166_v14 }
 0xa28   :  { %v3258_v28 = vperm.slane %v9996_v29, 0 }
 0xa2a   :  { %v3261_v58 = vmul.f32 %v3258_v28, %v9999_v21  ;;  %v3259_v62 = vmul.f32 %v3258_v28, %v10067_v51 }
 0xa2b   :  { %v3215_v7 = vpop.f32.mrf.mxu2 }
 0xa2c   :  { %v3216_v50 = vadd.f32 %v3215_v7, %v3167_v57  ;;  %3263 = vrot.lane.b32.xlu1 %v3261_v58, %s7420_s17 }
 0xa2d   :  { %v3235_v47 = vpop.f32.mrf.mxu1 }
 0xa2e   :  { %v3267_v60 = vperm.slane %v3216_v50, 0  ;;  %v3236_v33 = vadd.f32 %v3235_v47, %v3168_v49 }
 0xa30   :  { %v3276_v45 = vperm.slane %v3236_v33, 0  ;;  %v3270_v46 = vmul.f32 %v3267_v60, %v10013_v26  ;;  %v3268_v11 = vmul.f32 %v3267_v60, %v10070_v52 }
 0xa32   :  { %3272 = vrot.lane.b32.xlu2 %v3270_v46, %s7420_s17  ;;  %v3279_v18 = vmul.f32 %v3276_v45, %v10018_v23  ;;  %v10083_v46 = vsel %vm2950_vm0, 1.0, %v12181_v54 }
 0xa33   :  { %v3255_v10 = vpop.f32.mrf.mxu2 }
 0xa34   :  { %3281 = vrot.lane.b32.xlu1 %v3279_v18, %s7420_s17  ;;  %v3256_v36 = vadd.f32 %v3255_v10, %v3169_v44 }
 0xa35   :  { %v3362_v22 = vpop.f32.mrf.mxu1 }
 0xa36   :  { %v3365_v39 = vadd.f32 %v3362_v22, %v3341_v34  ;;  %v3285_v12 = vperm.slane %v3256_v36, 0  ;;  %v10113_v22 = vld [vmem:[%s12007_s18 + $0x18] sm:$0xff] }
 0xa37   :  { %v10118_v34 = vld [vmem:[%s12007_s18 + $0x58] sm:$0xff] }
 0xa38   :  { %v3288_v48 = vmul.f32 %v3285_v12, %v10036_v16  ;;  %v3286_v28 = vmul.f32 %v3285_v12, %v10083_v46  ;;  %3742 = vmatpush.msra.mxu1 %v10118_v34 }
 0xa3b   :  { %v3386_v25 = vpop.f32.mrf.mxu2 }
 0xa3c   :  { %v3389_v56 = vadd.f32 %v3386_v25, %v3365_v39  ;;  %v10123_v25 = vld [vmem:[%s12007_s18 + $0x10] sm:$0xff] }
 0xa3d   :  { %v10128_v39 = vld [vmem:[%s12007_s18 + $0x50] sm:$0xff] }
 0xa3e   :  { %v3413_v24 = vadd.f32 %v3410_v38, %v3389_v56  ;;  %v10135_v56 = vld [vmem:[%s12007_s18 + $0x8] sm:$0xff]  ;;  %3743 = vmatpush.msra.mxu1 %v10128_v39 }
 0xa3f   :  { %v10140_v38 = vld [vmem:[%s12007_s18 + $0x48] sm:$0xff] }
 0xa40   :  { %v3437_v37 = vadd.f32 %v3434_v8, %v3413_v24  ;;  %v10147_v24 = vld [vmem:[%s12007_s18] sm:$0xff]  ;;  %3744 = vmatpush.msra.mxu1 %v10140_v38 }
 0xa41   :  { %v10152_v8 = vld [vmem:[%s12007_s18 + $0x40] sm:$0xff] }
 0xa42   :  { %3745 = vmatpush.msra.mxu1 %v10152_v8 }
 0xa45   :  { %v3458_v20 = vpop.f32.mrf.mxu1 }
 0xa46   :  { %v3461_v3 = vadd.f32 %v3458_v20, %v3437_v37  ;;  %v3493_v20 = vld [vmem:[%s12190_s5 + $0x1] sm:$0x1]  ;;  %s6598_s5 = sshll.u32 %s12014_s25, 4  ;;  %s6599_s5 = int_to_ptr.hbm [resolvable:$true] %s6598_s5 }
 0xa4b   :  { %v3482_v6 = vpop.f32.mrf.mxu2 }
 0xa4c   :  { %v10025_v43 = vadd.f32 %v3482_v6, %v3461_v3 }
 0xa4e   :  { %12191 = vst [vmem:[#allocation33_spill] sm:$0xff] %v10025_v43  ;;  %v3494_v0 = vmul.f32 1.442695, %v10025_v43 }
 0xa4f   :  { %3486 = vst.msk [vmem:[#allocation3 + $0x1] sm:$0x1] %vm12054_vm10, %v10025_v43  ;;  %vm2946_vm10 = vcmp.eq.s32.totalorder %v8141_v17, 4 }
 0xa50   :  { %7359 = vpow2.f32 %v3494_v0  ;;  %v10078_v58 = vsel %vm2946_vm10, 1.0, %v12181_v54 }
 0xa51   :  { %v3277_v47 = vmul.f32 %v3276_v45, %v10078_v58  ;;  %v10099_v45 = vld [vmem:[%s12007_s18 + $0x20] sm:$0xff] }
 0xa52   :  { %3691 = vmatpush.msra.mxu3 %v10099_v45 }
 0xa54   :  { %3692 = vmatpush.msra.mxu3 %v10113_v22 }
 0xa56   :  { %v7360_v55 = vpop.eup %7359  ;;  %3693 = vmatpush.msra.mxu3 %v10123_v25 }
 0xa57   :  { %v3497_v42 = vperm.slane %v7360_v55, 0 }
 0xa58   :  { %3694 = vmatpush.msra.mxu3 %v10135_v56 }
 0xa59   :  { %3498 = vrot.lane.b32.xlu0 %v3497_v42, %s7419_s27 }
 0xa5a   :  { %3695 = vmatpush.msra.mxu3 %v10147_v24 }
 0xa61   :  { %3290 = vrot.lane.b32.xlu0 %v3288_v48, %s7420_s17  ;;  %v3622_v48 = vadd.s32 4294967295, %v8141_v17 }
 0xa63   :  { %vm3624_vm0 = vcmp.eq.s32.totalorder %v8159_v41, %v3622_v48 }
 0xa8c   :  { %v3273_v50 = vpop.permute.xlu2 %3272 }
 0xa9e   :  { %v3264_v35 = vpop.permute.xlu1 %3263 }
 0xa9f   :  { %v3266_v19 = vadd.f32 %v3264_v35, %v3259_v62 }
 0xaa1   :  { %v3269_v7 = vadd.f32 %v3268_v11, %v3266_v19 }
 0xaa3   :  { %v3275_v33 = vadd.f32 %v3273_v50, %v3269_v7 }
 0xaa5   :  { %v3278_v18 = vadd.f32 %v3277_v47, %v3275_v33  ;;  %v10181_v33 = vsel %vm3624_vm0, 1.0, %v12181_v54 }
 0xaa6   :  { %v3282_v29 = vpop.permute.xlu1 %3281 }
 0xaa7   :  { %v3284_v10 = vadd.f32 %v3282_v29, %v3278_v18 }
 0xaa9   :  { %v3287_v60 = vadd.f32 %v3286_v28, %v3284_v10  ;;  %v10194_v28 = vld [vmem:[%s12007_s18 + $0xb8] sm:$0xff] }
 0xacb   :  { %v3499_v37 = vpop.permute.xlu0 %3498 }
 0xacc   :  { %v3501_v3 = vmul.f32 %v3499_v37, %v3493_v20  ;;  %v10219_v20 = vld [vmem:[%s12007_s18 + $0xa0] sm:$0xff]  ;;  %v10226_v37 = vld [vmem:[%s12007_s18 + $0x98] sm:$0xff] }
 0xace   :  { %v3502_v6 = vadd.f32 %v3501_v3, %v10025_v43  ;;  %v10240_v3 = vld [vmem:[%s12007_s18 + $0x88] sm:$0xff] }
 0xad0   :  { %6788 = vmatmul.msk.f32.vlgmr.msrb.gmra.mxu3 %vm3174_vm12, %v3502_v6  ;;  %6789 = vmatmul.msk.f32.vlgmr.msrb.gmra.mxu0 %vm3174_vm12, %v3502_v6 }
 0xad1   :  { %6790 = vmatmul.msk.f32.vlgmr.msrb.gmra.mxu1 %vm3174_vm12, %v3502_v6  ;;  %6791 = vmatmul.msk.f32.vlgmr.msrb.gmra.mxu2 %vm3174_vm12, %v3502_v6  ;;  %vm3700_vm12 = vcmask 64512   ;;  %v10246_v6 = vld [vmem:[%s12007_s18 + $0x80] sm:$0xff] }
 0xad3   :  { %v3291_v0 = vpop.permute.xlu0 %3290 }
 0xad4   :  { %v3293_v55 = vadd.f32 %v3291_v0, %v3287_v60 }
 0xad8   :  { %6792 = vmatmul.msk.f32.vlgmr.msra.gmra.mxu3 %vm1499_vm7, %v3293_v55 }
 0xad9   :  { %6795 = vmatmul.msk.f32.vlgmr.msra.gmra.mxu1 %vm1499_vm7, %v3293_v55 }
 0xb4d   :  { %v3543_v36 = vpop.f32.mrf.mxu0 }
 0xb4e   :  { %v3544_v42 = vadd.f32 %v3543_v36, %v3167_v57  ;;  %v3563_v12 = vpop.f32.mrf.mxu1 }
 0xb4f   :  { %v3564_v62 = vadd.f32 %v3563_v12, %v3168_v49 }
 0xb50   :  { %v3595_v35 = vperm.slane %v3544_v42, 0 }
 0xb51   :  { %v3604_v11 = vperm.slane %v3564_v62, 0 }
 0xb52   :  { %v3598_v19 = vmul.f32 %v3595_v35, %v10013_v26  ;;  %v3623_v26 = vadd.s32 4294967295, %v8169_v4  ;;  %v3596_v42 = vmul.f32 %v3595_v35, %v10070_v52  ;;  %v3629_v35 = vadd.s32 4294967294, %v8169_v4 }
 0xb53   :  { %v3523_v7 = vpop.f32.mrf.mxu3  ;;  %v3607_v50 = vmul.f32 %v3604_v11, %v10018_v23 }
 0xb54   :  { %v3524_v47 = vadd.f32 %v3523_v7, %v3166_v14  ;;  %3600 = vrot.lane.b32.xlu1 %v3598_v19, %s7420_s17  ;;  %v3583_v57 = vpop.f32.mrf.mxu2  ;;  %vm3625_vm10 = vcmp.eq.s32.totalorder %v8159_v41, %v3623_v26  ;;  %v3605_v19 = vmul.f32 %v3604_v11, %v10078_v58  ;;  %vm3631_vm11 = vcmp.eq.s32.totalorder %v8159_v41, %v3629_v35 }
 0xb55   :  { %3609 = vrot.lane.b32.xlu0 %v3607_v50, %s7420_s17  ;;  %v3584_v23 = vadd.f32 %v3583_v57, %v3169_v44  ;;  %v10210_v44 = vld [vmem:[%s12007_s18 + $0xa8] sm:$0xff]  ;;  %v10268_v58 = vsel %vm3631_vm11, 1.0, %v12181_v54 }
 0xb56   :  { %v3586_v49 = vperm.slane %v3524_v47, 0  ;;  %v3747_v18 = vpop.f32.mrf.mxu1 }
 0xb57   :  { %3771 = vmatpush.msra.mxu2 %v3747_v18  ;;  %v3613_v10 = vperm.slane %v3584_v23, 0 }
 0xb58   :  { %6796 = vmatmul.msk.f32.vlgmr.msra.gmra.mxu2 %vm3700_vm12, %v10181_v33  ;;  %v3589_v14 = vmul.f32 %v3586_v49, %v9999_v21  ;;  %v10204_v21 = vsel %vm3625_vm10, 1.0, %v12181_v54  ;;  %v3587_v0 = vmul.f32 %v3586_v49, %v10067_v51 }
 0xb59   :  { %v3616_v60 = vmul.f32 %v3613_v10, %v10036_v16  ;;  %v10234_v16 = vld [vmem:[%s12007_s18 + $0x90] sm:$0xff]  ;;  %v3614_v57 = vmul.f32 %v3613_v10, %v10083_v46 }
 0xb5a   :  { %3591 = vrot.lane.b32.xlu2 %v3589_v14, %s7420_s17 }
 0xb5b   :  { %v3697_v29 = vpop.f32.mrf.mxu3 }
 0xb5c   :  { %3720 = vmatpush.msra.mxu0 %v3697_v29  ;;  %v10289_v29 = vmul.u32 2, %v8159_v41 }
 0xb5d   :  { %6793 = vmatmul.msk.f32.vlgmr.msra.gmra.mxu0 %vm3700_vm12, %v9008_v15 }
 0xb5e   :  { %3789 = vmatpush.msrb.mxu0 %v10194_v28  ;;  %vm3660_vm11 = vcmp.eq.s32.totalorder %v8169_v4, %v10289_v29 }
 0xb60   :  { %3790 = vmatpush.msrb.mxu0 %v10201_v59  ;;  %6797 = vmatmul.msk.f32.gmra.mxu2 %vm3700_vm12, %v10204_v21 }
 0xb62   :  { %3618 = vrot.lane.b32.xlu2 %v3616_v60, %s7420_s17  ;;  %3791 = vmatpush.msrb.mxu0 %v10210_v44  ;;  %v2366_v60 = vsel %vm2364_vm5, 1.0, %v12181_v54  ;;  %vm3659_vm5 = vcmp.eq.s32.totalorder %v8141_v17, %v10289_v29 }
 0xb64   :  { %3792 = vmatpush.msrb.mxu0 %v10219_v20 }
 0xb65   :  { %6794 = vmatmul.msk.f32.gmra.mxu0 %vm3700_vm12, %v9017_v27 }
 0xb66   :  { %3793 = vmatpush.msrb.mxu0 %v10226_v37 }
 0xb68   :  { %3794 = vmatpush.msrb.mxu0 %v10234_v16 }
 0xb6a   :  { %3795 = vmatpush.msrb.mxu0 %v10240_v3 }
 0xb6c   :  { %3796 = vmatpush.msrb.mxu0 %v10246_v6 }
 0xb6d   :  { %6798 = vmatmul.msk.f32.vlgmr.msrb.gmra.mxu0 %vm1499_vm7, %v3293_v55  ;;  %v3628_v55 = vadd.s32 4294967294, %v8141_v17 }
 0xb6f   :  { %vm3630_vm1 = vcmp.eq.s32.totalorder %v8159_v41, %v3628_v55  ;;  %v4153_v55 = vld [vmem:[%s12009_s20 + $0x8] sm:$0xff] }
 0xb70   :  { %v10258_v51 = vsel %vm3630_vm1, 1.0, %v12181_v54 }
 0xbb4   :  { %v3592_v36 = vpop.permute.xlu2 %3591 }
 0xbb5   :  { %v3594_v12 = vadd.f32 %v3592_v36, %v3587_v0 }
 0xbb7   :  { %v3597_v48 = vadd.f32 %v3596_v42, %v3594_v12  ;;  %v10296_v42 = vadd.s32 1, %v10289_v29  ;;  %v2365_v12 = vsel %vm2363_vm4, 1.0, %v12181_v54 }
 0xbb8   :  { %v3838_v30 = vsub.f32 1.0, %v2365_v12 }
 0xbb9   :  { %vm3666_vm1 = vcmp.eq.s32.totalorder %v8141_v17, %v10296_v42  ;;  %vm3667_vm4 = vcmp.eq.s32.totalorder %v8169_v4, %v10296_v42 }
 0xbbc   :  { %v3619_v46 = vpop.permute.xlu2 %3618 }
 0xbc6   :  { %v3601_v62 = vpop.permute.xlu1 %3600 }
 0xbc7   :  { %v3603_v7 = vadd.f32 %v3601_v62, %v3597_v48  ;;  %v3610_v47 = vpop.permute.xlu0 %3609  ;;  %v3839_v62 = vsub.f32 1.0, %v2366_v60 }
 0xbc9   :  { %v3606_v50 = vadd.f32 %v3605_v19, %v3603_v7 }
 0xbcb   :  { %v3612_v18 = vadd.f32 %v3610_v47, %v3606_v50 }
 0xbcd   :  { %v3615_v26 = vadd.f32 %v3614_v57, %v3612_v18  ;;  %v10309_v57 = vsel %vm3666_vm1, 1.0, %v12181_v54  ;;  %v10312_v18 = vsel %vm3659_vm5, 1.0, %v12181_v54 }
 0xbce   :  { %12192 = vst [vmem:[#allocation34_spill] sm:$0xff] %v10309_v57 }
 0xbda   :  { %v3722_v23 = vpop.f32.mrf.mxu0 }
 0xbe2   :  { %v3725_v14 = vpop.f32.mrf.mxu0 }
 0xbea   :  { %v3798_v52 = vpop.f32.mrf.mxu0 }
 0xbeb   :  { %3822 = vmatpush.msrb.mxu3 %v3798_v52  ;;  %v4152_v52 = vld [vmem:[%s12009_s20] sm:$0xff] }
 0xbec   :  { %6799 = vmatmul.msk.f32.vlgmr.msrb.gmra.mxu3 %vm3700_vm12, %v10258_v51 }
 0xbed   :  { %3931 = vmatpush.msra.mxu3 %v10043_v13  ;;  %v10276_v13 = vadd.f32 %v3619_v46, %v3615_v26  ;;  %v10330_v26 = vsel %vm3667_vm4, 1.0, %v12181_v54  ;;  %v10415_v46 = vld [vmem:[%s12009_s20 + $0xb8] sm:$0xff] }
 0xbee   :  { %12193 = vst [vmem:[#allocation35_spill] sm:$0xff] %v10330_v26 }
 0xbef   :  { %3932 = vmatpush.msra.mxu3 %v10053_v63  ;;  %v3773_v63 = vpop.f32.mrf.mxu2 }
 0xbf1   :  { %3933 = vmatpush.msra.mxu3 %v10089_v1  ;;  %v10284_v1 = vld [vmem:[%s12008_s19] ss:$0 sm:$0xff]  ;;  %s7422_s19 = smov 127  }
 0xbf2   :  { %v3729_v11 = vadd.f32 %v10284_v1, %v3725_v14  ;;  %v4154_v14 = vld [vmem:[%s12009_s20 + $0x10] sm:$0xff] }
 0xbf3   :  { %3934 = vmatpush.msra.mxu3 %v10099_v45  ;;  %v3728_v45 = vadd.f32 %v10284_v1, %v3722_v23  ;;  %v10333_v23 = vsel %vm3660_vm11, 1.0, %v12181_v54 }
 0xbf4   :  { %6800 = vmatmul.msk.f32.gmra.mxu3 %vm3700_vm12, %v10268_v58 }
 0xbf5   :  { %3935 = vmatpush.msra.mxu3 %v10113_v22 }
 0xbf7   :  { %3936 = vmatpush.msra.mxu3 %v10123_v25  ;;  %v3779_v25 = vadd.f32 %v3773_v63, %v3728_v45  ;;  %v10430_v45 = vld [vmem:[%s12009_s20 + $0xa8] sm:$0xff] }
 0xbf9   :  { %3937 = vmatpush.msra.mxu3 %v10135_v56  ;;  %v3776_v56 = vpop.f32.mrf.mxu2 }
 0xbfb   :  { %3938 = vmatpush.msra.mxu3 %v10147_v24  ;;  %v3780_v24 = vadd.f32 %v3776_v56, %v3729_v11  ;;  %v10444_v11 = vld [vmem:[%s12009_s20 + $0x98] sm:$0xff]  ;;  %v10452_v56 = vld [vmem:[%s12009_s20 + $0x90] sm:$0xff] }
 0xbfc   :  { %6809 = vmatmul.msk.f32.vlgmr.msra.gmra.mxu3 %vm1499_vm7, %v10276_v13 }
 0xc6f   :  { %v3824_v22 = vpop.f32.mrf.mxu3 }
 0xc70   :  { %v3830_v49 = vadd.f32 %v3824_v22, %v3779_v25  ;;  %v10436_v22 = vld [vmem:[%s12009_s20 + $0xa0] sm:$0xff] }
 0xc72   :  { %v3834_v0 = vmul.f32 0.01, %v3830_v49  ;;  %vm3832_vm0 = vcmp.gt.f32.partialorder %v3830_v49, 0.0 }
 0xc74   :  { %v3836_v7 = vsel %vm3832_vm0, %v3830_v49, %v3834_v0  ;;  %v10458_v49 = vld [vmem:[%s12009_s20 + $0x88] sm:$0xff]  ;;  %v10472_v0 = vld [vmem:[%s12009_s20 + $0x138] sm:$0xff] }
 0xc75   :  { %v3842_v40 = vmul.f32 %v3836_v7, %v2365_v12  ;;  %v3840_v47 = vmul.f32 %v3838_v30, %v3836_v7  ;;  %v10486_v12 = vld [vmem:[%s12009_s20 + $0x128] sm:$0xff]  ;;  %v10518_v30 = vld [vmem:[%s12009_s20 + $0x100] sm:$0xff] }
 0xc76   :  { %v10512_v7 = vld [vmem:[%s12009_s20 + $0x108] sm:$0xff] }
 0xc77   :  { %v3827_v10 = vpop.f32.mrf.mxu3 }
 0xc78   :  { %v3831_v36 = vadd.f32 %v3827_v10, %v3780_v24  ;;  %v10464_v10 = vld [vmem:[%s12009_s20 + $0x80] sm:$0xff] }
 0xc7a   :  { %vm3833_vm10 = vcmp.gt.f32.partialorder %v3831_v36, 0.0  ;;  %v3835_v48 = vmul.f32 0.01, %v3831_v36 }
 0xc7c   :  { %v3837_v19 = vsel %vm3833_vm10, %v3831_v36, %v3835_v48  ;;  %v10480_v36 = vld [vmem:[%s12009_s20 + $0x130] sm:$0xff]  ;;  %v10492_v48 = vld [vmem:[%s12009_s20 + $0x120] sm:$0xff] }
 0xc7d   :  { %v3841_v53 = vmul.f32 %v3839_v62, %v3837_v19  ;;  %v3843_v50 = vmul.f32 %v3837_v19, %v2366_v60  ;;  %v10498_v62 = vld [vmem:[%s12009_s20 + $0x118] sm:$0xff]  ;;  %v10506_v19 = vld [vmem:[%s12009_s20 + $0x110] sm:$0xff] }
 0xc7f   :  { %6801 = vmatpush.msk.msrb.mxu1 %vm2586_vm9, %v3843_v50  ;;  %6805 = vmatpush.msk.msrb.mxu2 %vm2586_vm9, %v3841_v53  ;;  %v3940_v5 = vpop.f32.mrf.mxu3  ;;  %v4167_v50 = vld [vmem:[%s12009_s20 + $0x78] sm:$0xff] }
 0xc80   :  { %3958 = vmatpush.msra.mxu0 %v3940_v5  ;;  %v4166_v5 = vld [vmem:[%s12009_s20 + $0x70] sm:$0xff] }
 0xc81   :  { %3871 = vmatpush.msrb.mxu1 %v3842_v40  ;;  %3909 = vmatpush.msrb.mxu2 %v3840_v47 }
 0xc82   :  { %6810 = vmatmul.msk.f32.vlgmr.msra.gmra.mxu0 %vm3700_vm12, %v9008_v15  ;;  %6802 = vmatmul.msk.f32.vlgmr.msrb.gmra.mxu1 %vm2583_vm14, %v10309_v57 }
 0xc83   :  { %6806 = vmatmul.msk.f32.vlgmr.msrb.gmra.mxu2 %vm2583_vm14, %v10312_v18  ;;  %3976 = vmatpush.msrb.mxu0 %v10048_v2  ;;  %v12194_v2 = vld [vmem:[#allocation11_spill] sm:$0xff] }
 0xc84   :  { %4021 = vmatpush.msra.mxu1 %v10194_v28  ;;  %vm3668_vm0 = vcmp.eq.s32.totalorder %v12194_v2, %v10296_v42  ;;  %vm3661_vm10 = vcmp.eq.s32.totalorder %v12194_v2, %v10289_v29 }
 0xc85   :  { %3977 = vmatpush.msrb.mxu0 %v10060_v9  ;;  %v10353_v9 = vsel %vm3668_vm0, 1.0, %v12181_v54 }
 0xc86   :  { %4022 = vmatpush.msra.mxu1 %v10201_v59  ;;  %12195 = vst [vmem:[#allocation36_spill] sm:$0xff] %v10353_v9  ;;  %v10377_v59 = vld [vmem:[%s12009_s20 + $0x38] sm:$0xff] }
 0xc87   :  { %3978 = vmatpush.msrb.mxu0 %v10094_v31  ;;  %v10356_v31 = vsel %vm3661_vm10, 1.0, %v12181_v54 }
 0xc88   :  { %4023 = vmatpush.msra.mxu1 %v10210_v44  ;;  %v10384_v44 = vld [vmem:[%s12009_s20 + $0x30] sm:$0xff] }
 0xc89   :  { %3979 = vmatpush.msrb.mxu0 %v10106_v61 }
 0xc8a   :  { %6811 = vmatmul.msk.f32.gmra.mxu0 %vm3700_vm12, %v9017_v27  ;;  %6803 = vmatmul.msk.f32.gmra.mxu1 %vm2583_vm14, %v10330_v26 }
 0xc8b   :  { %6807 = vmatmul.msk.f32.gmra.mxu2 %vm2583_vm14, %v10333_v23  ;;  %3980 = vmatpush.msrb.mxu0 %v10118_v34 }
 0xc8c   :  { %4024 = vmatpush.msra.mxu1 %v10219_v20  ;;  %v4157_v20 = vld [vmem:[%s12009_s20 + $0x28] sm:$0xff] }
 0xc8d   :  { %3981 = vmatpush.msrb.mxu0 %v10128_v39 }
 0xc8e   :  { %4025 = vmatpush.msra.mxu1 %v10226_v37  ;;  %v4156_v37 = vld [vmem:[%s12009_s20 + $0x20] sm:$0xff] }
 0xc8f   :  { %3982 = vmatpush.msrb.mxu0 %v10140_v38 }
 0xc90   :  { %4026 = vmatpush.msra.mxu1 %v10234_v16 }
 0xc91   :  { %3983 = vmatpush.msrb.mxu0 %v10152_v8 }
 0xc92   :  { %6812 = vmatmul.msk.f32.vlgmr.msrb.gmra.mxu0 %vm1499_vm7, %v10276_v13  ;;  %6804 = vmatmul.msk.f32.gmra.mxu1 %vm2583_vm14, %v10353_v9 }
 0xc93   :  { %6808 = vmatmul.msk.f32.gmra.mxu2 %vm2583_vm14, %v10356_v31  ;;  %4027 = vmatpush.msra.mxu1 %v10240_v3  ;;  %v4155_v3 = vld [vmem:[%s12009_s20 + $0x18] sm:$0xff] }
 0xc95   :  { %4028 = vmatpush.msra.mxu1 %v10246_v6 }
 0xc9a   :  { %6815 = vmatmul.msk.f32.vlgmr.msra.gmra.mxu1 %vm1499_vm7, %v10276_v13  ;;  %v10424_v13 = vld [vmem:[%s12009_s20 + $0xb0] sm:$0xff] }
 0xcff   :  { %v10370_v61 = vpop.f32.mrf.mxu0  ;;  %v3873_v34 = vpop.f32.mrf.mxu1 }
 0xd06   :  { %v3911_v6 = vpop.f32.mrf.mxu2 }
 0xd07   :  { %v10372_v39 = vpop.f32.mrf.mxu0  ;;  %v3876_v38 = vpop.f32.mrf.mxu1  ;;  %v10410_v35 = vadd.f32 %v3911_v6, %v3873_v34  ;;  %v3966_v34 = vadd.f32 %v10284_v1, %v10370_v61 }
 0xd0e   :  { %v3914_v63 = vpop.f32.mrf.mxu2 }
 0xd0f   :  { %v3985_v8 = vpop.f32.mrf.mxu0  ;;  %v3879_v28 = vpop.f32.mrf.mxu1  ;;  %v10439_v25 = vadd.f32 %v3914_v63, %v3876_v38  ;;  %v4165_v38 = vld [vmem:[%s12009_s20 + $0x68] sm:$0xff] }
 0xd10   :  { %4003 = vmatpush.msrb.mxu3 %v3985_v8 }
 0xd11   :  { %6813 = vmatmul.msk.f32.vlgmr.msrb.gmra.mxu3 %vm3700_vm12, %v10181_v33 }
 0xd12   :  { %4226 = vmatpush.msra.mxu3 %v10377_v59 }
 0xd14   :  { %4227 = vmatpush.msra.mxu3 %v10384_v44 }
 0xd16   :  { %4228 = vmatpush.msra.mxu3 %v4157_v20  ;;  %v3917_v24 = vpop.f32.mrf.mxu2 }
 0xd17   :  { %v4030_v16 = vpop.f32.mrf.mxu1  ;;  %v10467_v60 = vadd.f32 %v3917_v24, %v3879_v28  ;;  %v4164_v28 = vld [vmem:[%s12009_s20 + $0x60] sm:$0xff] }
 0xd18   :  { %4229 = vmatpush.msra.mxu3 %v4156_v37  ;;  %4048 = vmatpush.msra.mxu2 %v4030_v16 }
 0xd19   :  { %6814 = vmatmul.msk.f32.gmra.mxu3 %vm3700_vm12, %v10204_v21  ;;  %6816 = vmatmul.msk.f32.vlgmr.msra.gmra.mxu2 %vm3700_vm12, %v10258_v51 }
 0xd1a   :  { %4230 = vmatpush.msra.mxu3 %v4155_v3 }
 0xd1c   :  { %4231 = vmatpush.msra.mxu3 %v4154_v14 }
 0xd1e   :  { %4232 = vmatpush.msra.mxu3 %v4153_v55 }
 0xd20   :  { %4233 = vmatpush.msra.mxu3 %v4152_v52 }
 0xd21   :  { %6826 = vmatmul.msk.f32.vlgmr.msra.gmra.mxu3 %vm1499_vm7, %v10410_v35  ;;  %6817 = vmatmul.msk.f32.gmra.mxu2 %vm3700_vm12, %v10268_v58 }
 0xd22   :  { %4355 = vmatpush.msrb.mxu3 %v10415_v46 }
 0xd24   :  { %4356 = vmatpush.msrb.mxu3 %v10424_v13 }
 0xd26   :  { %4357 = vmatpush.msrb.mxu3 %v10430_v45 }
 0xd28   :  { %4358 = vmatpush.msrb.mxu3 %v10436_v22 }
 0xd29   :  { %6827 = vmatmul.msk.f32.gmra.mxu3 %vm1499_vm7, %v10439_v25 }
 0xd2a   :  { %4359 = vmatpush.msrb.mxu3 %v10444_v11 }
 0xd2c   :  { %4360 = vmatpush.msrb.mxu3 %v10452_v56 }
 0xd2e   :  { %4361 = vmatpush.msrb.mxu3 %v10458_v49 }
 0xd30   :  { %4362 = vmatpush.msrb.mxu3 %v10464_v10 }
 0xd31   :  { %6828 = vmatmul.msk.f32.gmra.mxu3 %vm1499_vm7, %v10467_v60 }
 0xd32   :  { %4487 = vmatpush.msra.mxu3 %v10472_v0 }
 0xd34   :  { %4488 = vmatpush.msra.mxu3 %v10480_v36 }
 0xd36   :  { %4489 = vmatpush.msra.mxu3 %v10486_v12 }
 0xd38   :  { %4490 = vmatpush.msra.mxu3 %v10492_v48 }
 0xd39   :  { %6840 = vmatmul.msk.f32.vlgmr.msrb.gmra.mxu3 %vm1499_vm7, %v10410_v35 }
 0xd3a   :  { %4491 = vmatpush.msra.mxu3 %v10498_v62 }
 0xd3c   :  { %4492 = vmatpush.msra.mxu3 %v10506_v19 }
 0xd3e   :  { %4493 = vmatpush.msra.mxu3 %v10512_v7 }
 0xd40   :  { %4494 = vmatpush.msra.mxu3 %v10518_v30 }
 0xd41   :  { %6841 = vmatmul.msk.f32.gmra.mxu3 %vm1499_vm7, %v10439_v25 }
 0xd42   :  { %4681 = vmatpush.msrb.mxu3 %v10377_v59  ;;  %v3967_v59 = vadd.f32 %v10284_v1, %v10372_v39 }
 0xd44   :  { %4682 = vmatpush.msrb.mxu3 %v10384_v44 }
 0xd46   :  { %4683 = vmatpush.msrb.mxu3 %v4157_v20  ;;  %v4163_v20 = vld [vmem:[%s12009_s20 + $0x58] sm:$0xff] }
 0xd48   :  { %4684 = vmatpush.msrb.mxu3 %v4156_v37  ;;  %v4162_v37 = vld [vmem:[%s12009_s20 + $0x50] sm:$0xff] }
 0xd49   :  { %6842 = vmatmul.msk.f32.gmra.mxu3 %vm1499_vm7, %v10467_v60 }
 0xd4a   :  { %4685 = vmatpush.msrb.mxu3 %v4155_v3 }
 0xd4c   :  { %4686 = vmatpush.msrb.mxu3 %v4154_v14 }
 0xd4e   :  { %4687 = vmatpush.msrb.mxu3 %v4153_v55  ;;  %v2427_v55 = vsel %vm2425_vm13, 1.0, %v12181_v54 }
 0xd50   :  { %4688 = vmatpush.msrb.mxu3 %v4152_v52  ;;  %v4161_v52 = vld [vmem:[%s12009_s20 + $0x48] sm:$0xff] }
 0xd51   :  { %6854 = vmatmul.msk.f32.vlgmr.msra.gmra.mxu3 %vm1499_vm7, %v10410_v35 }
 0xd52   :  { %4739 = vmatpush.msra.mxu3 %v4167_v50 }
 0xd54   :  { %4740 = vmatpush.msra.mxu3 %v4166_v5 }
 0xd56   :  { %4741 = vmatpush.msra.mxu3 %v4165_v38 }
 0xd58   :  { %4742 = vmatpush.msra.mxu3 %v4164_v28 }
 0xd59   :  { %6855 = vmatmul.msk.f32.gmra.mxu3 %vm1499_vm7, %v10439_v25 }
 0xd5a   :  { %4743 = vmatpush.msra.mxu3 %v4163_v20 }
 0xd5c   :  { %4744 = vmatpush.msra.mxu3 %v4162_v37 }
 0xd5e   :  { %4745 = vmatpush.msra.mxu3 %v4161_v52 }
 0xd61   :  { %6856 = vmatmul.msk.f32.gmra.mxu3 %vm1499_vm7, %v10467_v60 }
 0xd94   :  { %v4005_v53 = vpop.f32.mrf.mxu3 }
 0xd95   :  { %v4011_v8 = vadd.f32 %v4005_v53, %v3966_v34  ;;  %v2426_v53 = vsel %vm2424_vm8, 1.0, %v12181_v54  ;;  %v4065_v34 = vsub.f32 1.0, %v2427_v55 }
 0xd9c   :  { %v4008_v40 = vpop.f32.mrf.mxu3  ;;  %v4050_v47 = vpop.f32.mrf.mxu2 }
 0xd9d   :  { %v4056_v44 = vadd.f32 %v4050_v47, %v4011_v8  ;;  %v4012_v61 = vadd.f32 %v4008_v40, %v3967_v59  ;;  %v4160_v47 = vld [vmem:[%s12009_s20 + $0x40] sm:$0xff] }
 0xd9e   :  { %4746 = vmatpush.msra.mxu3 %v4160_v47 }
 0xd9f   :  { %v4060_v1 = vmul.f32 0.01, %v4056_v44  ;;  %vm4058_vm12 = vcmp.gt.f32.partialorder %v4056_v44, 0.0 }
 0xda1   :  { %v4062_v59 = vsel %vm4058_vm12, %v4056_v44, %v4060_v1  ;;  %v4177_v1 = vld [vmem:[%s12009_s20 + $0xc8] sm:$0xff] }
 0xda2   :  { %v4068_v63 = vmul.f32 %v4062_v59, %v2426_v53 }
 0xda4   :  { %v4235_v16 = vpop.f32.mrf.mxu3  ;;  %v4053_v3 = vpop.f32.mrf.mxu2 }
 0xda5   :  { %v4057_v39 = vadd.f32 %v4053_v3, %v4012_v61  ;;  %v4064_v61 = vsub.f32 1.0, %v2426_v53 }
 0xda7   :  { %vm4059_vm1 = vcmp.gt.f32.partialorder %v4057_v39, 0.0  ;;  %v4061_v40 = vmul.f32 0.01, %v4057_v39  ;;  %v4066_v24 = vmul.f32 %v4064_v61, %v4062_v59 }
 0xda9   :  { %v4063_v8 = vsel %vm4059_vm1, %v4057_v39, %v4061_v40  ;;  %v12200_v39 = vld [vmem:[#allocation27_spill] sm:$0xff] }
 0xdaa   :  { %v4067_v3 = vmul.f32 %v4065_v34, %v4063_v8  ;;  %v4069_v6 = vmul.f32 %v4063_v8, %v2427_v55  ;;  %v4178_v55 = vld [vmem:[%s12009_s20 + $0xd0] sm:$0xff] }
 0xdac   :  { %v4238_v14 = vpop.f32.mrf.mxu3  ;;  %6818 = vmatpush.msk.msra.mxu0 %vm2586_vm9, %v4069_v6  ;;  %6822 = vmatpush.msk.msrb.mxu1 %vm2586_vm9, %v4067_v3 }
 0xdae   :  { %4088 = vmatpush.msra.mxu0 %v4068_v63  ;;  %4117 = vmatpush.msrb.mxu1 %v4066_v24  ;;  %v4131_v24 = vadd.s32 4294967294, %v12194_v2 }
 0xdaf   :  { %6819 = vmatmul.msk.f32.vlgmr.msra.gmra.mxu0 %vm2583_vm14, %v10309_v57  ;;  %6823 = vmatmul.msk.f32.vlgmr.msrb.gmra.mxu1 %vm2583_vm14, %v10312_v18 }
 0xdb0   :  { %4290 = vmatpush.msrb.mxu0 %v4167_v50  ;;  %vm4132_vm8 = vcmp.eq.s32.totalorder %v8159_v41, %v4131_v24 }
 0xdb2   :  { %4291 = vmatpush.msrb.mxu0 %v4166_v5  ;;  %v4183_v5 = vld [vmem:[%s12009_s20 + $0xf8] sm:$0xff] }
 0xdb4   :  { %v4241_v44 = vpop.f32.mrf.mxu3  ;;  %4292 = vmatpush.msrb.mxu0 %v4165_v38  ;;  %v4182_v38 = vld [vmem:[%s12009_s20 + $0xf0] sm:$0xff] }
 0xdb5   :  { %6829 = vmatpush.msk.msrb.mxu2 %vm621_vm6, %v4241_v44  ;;  %v10648_v44 = vsel %vm4132_vm8, 1.0, %v12181_v54 }
 0xdb6   :  { %4293 = vmatpush.msrb.mxu0 %v4164_v28  ;;  %v4181_v28 = vld [vmem:[%s12009_s20 + $0xe8] sm:$0xff] }
 0xdb7   :  { %4267 = vmatpush.msrb.mxu2 %v4238_v14  ;;  %6820 = vmatmul.msk.f32.gmra.mxu0 %vm2583_vm14, %v10330_v26 }
 0xdb8   :  { %6824 = vmatmul.msk.f32.gmra.mxu1 %vm2583_vm14, %v10333_v23  ;;  %4294 = vmatpush.msrb.mxu0 %v4163_v20  ;;  %v4180_v20 = vld [vmem:[%s12009_s20 + $0xe0] sm:$0xff] }
 0xdb9   :  { %4268 = vmatpush.msrb.mxu2 %v4235_v16  ;;  %v4179_v16 = vld [vmem:[%s12009_s20 + $0xd8] sm:$0xff] }
 0xdba   :  { %4295 = vmatpush.msrb.mxu0 %v4162_v37  ;;  %6830 = vmatmul.msk.f32.vlgmr.msrb.gmra.mxu2 %vm2305_vm3, %v9008_v15 }
 0xdbc   :  { %v4364_v50 = vpop.f32.mrf.mxu3  ;;  %4296 = vmatpush.msrb.mxu0 %v4161_v52  ;;  %v4176_v52 = vld [vmem:[%s12009_s20 + $0xc0] sm:$0xff]  ;;  %s6607_s20 = sshll.u32 %s7427_s30, 4  ;;  %s6608_s20 = int_to_ptr.vmem [resolvable:$true] %s6607_s20 }
 0xdbe   :  { %4297 = vmatpush.msrb.mxu0 %v4160_v47 }
 0xdbf   :  { %6821 = vmatmul.msk.f32.gmra.mxu0 %vm2583_vm14, %v10353_v9 }
 0xdc0   :  { %6825 = vmatmul.msk.f32.gmra.mxu1 %vm2583_vm14, %v10356_v31  ;;  %4420 = vmatpush.msra.mxu0 %v4183_v5 }
 0xdc2   :  { %4421 = vmatpush.msra.mxu0 %v4182_v38  ;;  %6831 = vmatmul.msk.f32.gmra.mxu2 %vm2305_vm3, %v9017_v27 }
 0xdc4   :  { %v4367_v37 = vpop.f32.mrf.mxu3  ;;  %4422 = vmatpush.msra.mxu0 %v4181_v28 }
 0xdc6   :  { %4423 = vmatpush.msra.mxu0 %v4180_v20 }
 0xdc7   :  { %6833 = vmatmul.msk.f32.vlgmr.msrb.gmra.mxu0 %vm1499_vm7, %v10410_v35 }
 0xdc8   :  { %4424 = vmatpush.msra.mxu0 %v4179_v16 }
 0xdca   :  { %4425 = vmatpush.msra.mxu0 %v4178_v55  ;;  %6832 = vmatmul.msk.f32.gmra.mxu2 %vm2305_vm3, %v12200_v39 }
 0xdcc   :  { %v4370_v53 = vpop.f32.mrf.mxu3  ;;  %4426 = vmatpush.msra.mxu0 %v4177_v1 }
 0xdcd   :  { %6843 = vmatpush.msk.msra.mxu2 %vm621_vm6, %v4370_v53 }
 0xdce   :  { %4427 = vmatpush.msra.mxu0 %v4176_v52 }
 0xdcf   :  { %4397 = vmatpush.msra.mxu2 %v4367_v37  ;;  %6834 = vmatmul.msk.f32.gmra.mxu0 %vm1499_vm7, %v10439_v25 }
 0xdd1   :  { %4398 = vmatpush.msra.mxu2 %v4364_v50 }
 0xdd2   :  { %6844 = vmatmul.msk.f32.vlgmr.msra.gmra.mxu2 %vm2305_vm3, %v10258_v51 }
 0xdd4   :  { %v4496_v40 = vpop.f32.mrf.mxu3 }
 0xdd7   :  { %6835 = vmatmul.msk.f32.gmra.mxu0 %vm1499_vm7, %v10467_v60 }
 0xdda   :  { %6845 = vmatmul.msk.f32.gmra.mxu2 %vm2305_vm3, %v10268_v58 }
 0xddc   :  { %v4499_v47 = vpop.f32.mrf.mxu3 }
 0xddf   :  { %6847 = vmatmul.msk.f32.vlgmr.msra.gmra.mxu0 %vm1499_vm7, %v10410_v35 }
 0xde2   :  { %6846 = vmatmul.msk.f32.gmra.mxu2 %vm2305_vm3, %v10648_v44 }
 0xde4   :  { %v4502_v34 = vpop.f32.mrf.mxu3 }
 0xde5   :  { %6857 = vmatpush.msk.msrb.mxu2 %vm621_vm6, %v4502_v34 }
 0xde7   :  { %4531 = vmatpush.msrb.mxu2 %v4499_v47  ;;  %6848 = vmatmul.msk.f32.gmra.mxu0 %vm1499_vm7, %v10439_v25  ;;  %v4134_v47 = vadd.s32 4294967293, %v8141_v17 }
 0xde9   :  { %4532 = vmatpush.msrb.mxu2 %v4496_v40  ;;  %vm4137_vm4 = vcmp.eq.s32.totalorder %v8159_v41, %v4134_v47 }
 0xdef   :  { %6849 = vmatmul.msk.f32.gmra.mxu0 %vm1499_vm7, %v10467_v60 }
 0xe2c   :  { %v4090_v8 = vpop.f32.mrf.mxu0  ;;  %v4119_v59 = vpop.f32.mrf.mxu1 }
 0xe2d   :  { %v10633_v61 = vadd.f32 %v4119_v59, %v4090_v8  ;;  %v4140_v8 = vsel %vm4137_vm4, 1.0, %v12181_v54  ;;  %v4135_v59 = vadd.s32 4294967293, %v8169_v4 }
 0xe2f   :  { %6873 = vmatmul.msk.f32.vlgmr.msrb.gmra.mxu3 %vm1499_vm7, %v10633_v61  ;;  %vm4138_vm11 = vcmp.eq.s32.totalorder %v8159_v41, %v4135_v59 }
 0xe30   :  { %4855 = vmatpush.msrb.mxu3 %v4183_v5  ;;  %v4143_v5 = vadd.s32 4294967292, %v8141_v17 }
 0xe32   :  { %4856 = vmatpush.msrb.mxu3 %v4182_v38  ;;  %vm4146_vm13 = vcmp.eq.s32.totalorder %v8159_v41, %v4143_v5 }
 0xe33   :  { %v10657_v38 = vsel %vm4146_vm13, 1.0, %v12181_v54 }
 0xe34   :  { %v4093_v35 = vpop.f32.mrf.mxu0  ;;  %4857 = vmatpush.msrb.mxu3 %v4181_v28  ;;  %6858 = vmatmul.msk.f32.vlgmr.msrb.gmra.mxu2 %vm2305_vm3, %v10657_v38  ;;  %v4144_v28 = vadd.s32 4294967292, %v8169_v4 }
 0xe35   :  { %v4122_v3 = vpop.f32.mrf.mxu1 }
 0xe36   :  { %v10637_v6 = vadd.f32 %v4122_v3, %v4093_v35  ;;  %4858 = vmatpush.msrb.mxu3 %v4180_v20  ;;  %vm4147_vm9 = vcmp.eq.s32.totalorder %v8159_v41, %v4144_v28  ;;  %v4141_v35 = vsel %vm4138_vm11, 1.0, %v12181_v54  ;;  %v4136_v3 = vadd.s32 4294967293, %v12194_v2 }
 0xe37   :  { %v10667_v37 = vsel %vm4147_vm9, 1.0, %v12181_v54 }
 0xe38   :  { %6874 = vmatmul.msk.f32.gmra.mxu3 %vm1499_vm7, %v10637_v6  ;;  %vm4139_vm0 = vcmp.eq.s32.totalorder %v8159_v41, %v4136_v3 }
 0xe39   :  { %4859 = vmatpush.msrb.mxu3 %v4179_v16  ;;  %v4145_v16 = vadd.s32 4294967292, %v12194_v2 }
 0xe3b   :  { %4860 = vmatpush.msrb.mxu3 %v4178_v55  ;;  %vm4148_vm14 = vcmp.eq.s32.totalorder %v8159_v41, %v4145_v16 }
 0xe3c   :  { %v4096_v25 = vpop.f32.mrf.mxu0  ;;  %6859 = vmatmul.msk.f32.gmra.mxu2 %vm2305_vm3, %v10667_v37 }
 0xe3d   :  { %v4125_v60 = vpop.f32.mrf.mxu1  ;;  %4861 = vmatpush.msrb.mxu3 %v4177_v1  ;;  %v10678_v1 = vsel %vm4148_vm14, 1.0, %v12181_v54 }
 0xe3e   :  { %v10641_v14 = vadd.f32 %v4125_v60, %v4096_v25  ;;  %12201 = vst [vmem:[#allocation31_spill] sm:$0xff] %v10678_v1  ;;  %v10706_v25 = vsel %vm4139_vm0, 1.0, %v12181_v54  ;;  %v4270_v60 = vpop.f32.mrf.mxu2 }
 0xe3f   :  { %4862 = vmatpush.msrb.mxu3 %v4176_v52  ;;  %v4128_v52 = vadd.s32 4294967295, %v12194_v2 }
 0xe40   :  { %6875 = vmatmul.msk.f32.gmra.mxu3 %vm1499_vm7, %v10641_v14 }
 0xe41   :  { %vm4129_vm5 = vcmp.eq.s32.totalorder %v8159_v41, %v4128_v52 }
 0xe42   :  { %v4130_v40 = vsel %vm4129_vm5, 1.0, %v12181_v54 }
 0xe44   :  { %v4299_v63 = vpop.f32.mrf.mxu0  ;;  %6860 = vmatmul.msk.f32.gmra.mxu2 %vm2305_vm3, %v10678_v1 }
 0xe46   :  { %v4273_v24 = vpop.f32.mrf.mxu2 }
 0xe48   :  { %6880 = vmatmul.msk.f32.vlgmr.msra.gmra.mxu3 %vm1499_vm7, %v10633_v61 }
 0xe4c   :  { %v4302_v50 = vpop.f32.mrf.mxu0 }
 0xe4e   :  { %v4276_v28 = vpop.f32.mrf.mxu2 }
 0xe50   :  { %6881 = vmatmul.msk.f32.gmra.mxu3 %vm1499_vm7, %v10637_v6 }
 0xe54   :  { %v4305_v20 = vpop.f32.mrf.mxu0 }
 0xe55   :  { %6836 = vmatpush.msk.msra.mxu1 %vm621_vm6, %v4305_v20 }
 0xe56   :  { %v4400_v20 = vpop.f32.mrf.mxu2 }
 0xe57   :  { %4332 = vmatpush.msra.mxu1 %v4302_v50 }
 0xe58   :  { %6882 = vmatmul.msk.f32.gmra.mxu3 %vm1499_vm7, %v10641_v14 }
 0xe59   :  { %4333 = vmatpush.msra.mxu1 %v4299_v63 }
 0xe5a   :  { %6837 = vmatmul.msk.f32.vlgmr.msra.gmra.mxu1 %vm2305_vm3, %v10181_v33 }
 0xe5c   :  { %v4429_v55 = vpop.f32.mrf.mxu0 }
 0xe5e   :  { %v4403_v52 = vpop.f32.mrf.mxu2 }
 0xe60   :  { %6894 = vmatmul.msk.f32.vlgmr.msrb.gmra.mxu3 %vm1499_vm7, %v10633_v61 }
 0xe62   :  { %6838 = vmatmul.msk.f32.gmra.mxu1 %vm2305_vm3, %v10204_v21 }
 0xe64   :  { %v4432_v53 = vpop.f32.mrf.mxu0 }
 0xe68   :  { %6895 = vmatmul.msk.f32.gmra.mxu3 %vm1499_vm7, %v10637_v6 }
 0xe6a   :  { %6839 = vmatmul.msk.f32.gmra.mxu1 %vm2305_vm3, %v4130_v40 }
 0xe6c   :  { %v4435_v34 = vpop.f32.mrf.mxu0 }
 0xe6d   :  { %6850 = vmatpush.msk.msrb.mxu1 %vm621_vm6, %v4435_v34  ;;  %v4406_v34 = vpop.f32.mrf.mxu2 }
 0xe6f   :  { %4464 = vmatpush.msrb.mxu1 %v4432_v53 }
 0xe70   :  { %6896 = vmatmul.msk.f32.gmra.mxu3 %vm1499_vm7, %v10641_v14 }
 0xe71   :  { %4465 = vmatpush.msrb.mxu1 %v4429_v55 }
 0xe72   :  { %6851 = vmatmul.msk.f32.vlgmr.msrb.gmra.mxu1 %vm2305_vm3, %v4140_v8 }
 0xe7a   :  { %6852 = vmatmul.msk.f32.gmra.mxu1 %vm2305_vm3, %v4141_v35 }
 0xe82   :  { %6853 = vmatmul.msk.f32.gmra.mxu1 %vm2305_vm3, %v10706_v25 }
 0xeb2   :  { %v4690_v63 = vpop.f32.mrf.mxu3 }
 0xeb7   :  { %v4534_v3 = vpop.f32.mrf.mxu2 }
 0xebb   :  { %v4693_v50 = vpop.f32.mrf.mxu3 }
 0xec3   :  { %v4696_v5 = vpop.f32.mrf.mxu3 }
 0xec4   :  { %6876 = vmatpush.msk.msra.mxu2 %vm621_vm6, %v4696_v5 }
 0xec6   :  { %4716 = vmatpush.msra.mxu2 %v4693_v50 }
 0xec8   :  { %4717 = vmatpush.msra.mxu2 %v4690_v63 }
 0xec9   :  { %6877 = vmatmul.msk.f32.vlgmr.msra.gmra.mxu2 %vm2305_vm3, %v9008_v15 }
 0xecb   :  { %v4748_v41 = vpop.f32.mrf.mxu3 }
 0xed1   :  { %6878 = vmatmul.msk.f32.gmra.mxu2 %vm2305_vm3, %v9017_v27 }
 0xed3   :  { %v4751_v16 = vpop.f32.mrf.mxu3 }
 0xed7   :  { %v4335_v55 = vpop.f32.mrf.mxu1 }
 0xed9   :  { %6879 = vmatmul.msk.f32.gmra.mxu2 %vm2305_vm3, %v12200_v39  ;;  %v10725_v39 = vld [vmem:[%s12010_s21] ss:$0 sm:$0xff] }
 0xeda   :  { %v4280_v50 = vadd.f32 %v10725_v39, %v4273_v24  ;;  %v4281_v32 = vadd.f32 %v10725_v39, %v4276_v28  ;;  %v1414_v28 = vsel %vm1411_vm2, 1.0, %v12181_v54 }
 0xedb   :  { %v4754_v53 = vpop.f32.mrf.mxu3 }
 0xedc   :  { %6883 = vmatpush.msk.msrb.mxu2 %vm621_vm6, %v4754_v53 }
 0xede   :  { %4774 = vmatpush.msrb.mxu2 %v4751_v16  ;;  %v4537_v16 = vpop.f32.mrf.mxu2 }
 0xedf   :  { %v4338_v47 = vpop.f32.mrf.mxu1 }
 0xee0   :  { %4775 = vmatpush.msrb.mxu2 %v4748_v41  ;;  %v4345_v41 = vadd.f32 %v4338_v47, %v4280_v50 }
 0xee1   :  { %6884 = vmatmul.msk.f32.vlgmr.msrb.gmra.mxu2 %vm2305_vm3, %v10181_v33  ;;  %v4279_v33 = vadd.f32 %v10725_v39, %v4270_v60 }
 0xee2   :  { %v4410_v43 = vadd.f32 %v4403_v52, %v4345_v41 }
 0xee3   :  { %v4864_v15 = vpop.f32.mrf.mxu3 }
 0xee6   :  { %v4540_v47 = vpop.f32.mrf.mxu2 }
 0xee7   :  { %v4341_v59 = vpop.f32.mrf.mxu1 }
 0xee9   :  { %6885 = vmatmul.msk.f32.gmra.mxu2 %vm2305_vm3, %v10204_v21  ;;  %v4344_v21 = vadd.f32 %v4335_v55, %v4279_v33 }
 0xeeb   :  { %v4867_v27 = vpop.f32.mrf.mxu3  ;;  %v4409_v2 = vadd.f32 %v4400_v20, %v4344_v21  ;;  %v4557_v20 = vsub.f32 1.0, %v1414_v28 }
 0xeef   :  { %v4467_v63 = vpop.f32.mrf.mxu1 }
 0xef0   :  { %v4476_v24 = vadd.f32 %v4467_v63, %v4409_v2  ;;  %v1413_v2 = vsel %vm1410_vm15, 1.0, %v12181_v54  ;;  %vm12209_vm15 = vcmask 195584  }
 0xef1   :  { %6886 = vmatmul.msk.f32.gmra.mxu2 %vm2305_vm3, %v4130_v40  ;;  %v4346_v40 = vadd.f32 %v4341_v59, %v4281_v32  ;;  %v4556_v63 = vsub.f32 1.0, %v1413_v2  ;;  %vm12210_vm2 = vmmov %vm12209_vm15 }
 0xef2   :  { %v4543_v50 = vadd.f32 %v4534_v3, %v4476_v24  ;;  %vm12211_vm13 = vmmov %vm12210_vm2 }
 0xef3   :  { %v4870_v5 = vpop.f32.mrf.mxu3  ;;  %v4411_v17 = vadd.f32 %v4406_v34, %v4346_v40  ;;  %vm12212_vm9 = vmmov %vm12210_vm2 }
 0xef4   :  { %6897 = vmatpush.msk.msra.mxu2 %vm621_vm6, %v4870_v5  ;;  %vm4546_vm1 = vcmp.gt.f32.partialorder %v4543_v50, 0.0  ;;  %vm12213_vm14 = vmmov %vm12210_vm2 }
 0xef5   :  { %vm12214_vm5 = vmmov %vm12210_vm2 }
 0xef6   :  { %4890 = vmatpush.msra.mxu2 %v4867_v27  ;;  %vm12217_vm0 = vmmov %vm12210_vm2 }
 0xef7   :  { %v4470_v53 = vpop.f32.mrf.mxu1 }
 0xef8   :  { %4891 = vmatpush.msra.mxu2 %v4864_v15  ;;  %v4477_v4 = vadd.f32 %v4470_v53, %v4410_v43 }
 0xef9   :  { %6898 = vmatmul.msk.f32.vlgmr.msra.gmra.mxu2 %vm2305_vm3, %v4140_v8 }
 0xefa   :  { %v4544_v1 = vadd.f32 %v4537_v16, %v4477_v4  ;;  %v4549_v4 = vmul.f32 0.01, %v4543_v50 }
 0xefc   :  { %v4550_v52 = vmul.f32 0.01, %v4544_v1  ;;  %vm4547_vm10 = vcmp.gt.f32.partialorder %v4544_v1, 0.0  ;;  %v4552_v16 = vsel %vm4546_vm1, %v4543_v50, %v4549_v4 }
 0xefe   :  { %v4553_v3 = vsel %vm4547_vm10, %v4544_v1, %v4550_v52  ;;  %vm12218_vm10 = vmmov %vm12217_vm0  ;;  %v10874_v1 = vld [vmem:[%s12011_s22] sm:$0xff] }
 0xeff   :  { %v4473_v60 = vpop.f32.mrf.mxu1  ;;  %v4562_v53 = vmul.f32 %v4553_v3, %v1413_v2  ;;  %v4559_v40 = vmul.f32 %v4556_v63, %v4553_v3 }
 0xf00   :  { %v4478_v5 = vadd.f32 %v4473_v60, %v4411_v17  ;;  %v12206_v17 = vld [vmem:[#allocation16_spill] sm:$0xff] }
 0xf01   :  { %6899 = vmatmul.msk.f32.gmra.mxu2 %vm2305_vm3, %v4141_v35  ;;  %v12207_v35 = vld [vmem:[#allocation15_spill] sm:$0xff] }
 0xf02   :  { %v4545_v15 = vadd.f32 %v4540_v47, %v4478_v5  ;;  %vm12208_vm8 = vcmp.gt.f32.partialorder %v12206_v17, %v12207_v35 }
 0xf03   :  { %v1412_v34 = vsel %vm12208_vm8, 1.0, %v12181_v54  ;;  %vm12221_vm8 = vmmov %vm12217_vm0 }
 0xf04   :  { %vm4548_vm12 = vcmp.gt.f32.partialorder %v4545_v15, 0.0  ;;  %v4551_v8 = vmul.f32 0.01, %v4545_v15  ;;  %v4555_v21 = vsub.f32 1.0, %v1412_v34  ;;  %v4561_v24 = vmul.f32 %v4552_v16, %v1412_v34 }
 0xf06   :  { %v4554_v59 = vsel %vm4548_vm12, %v4545_v15, %v4551_v8  ;;  %v4558_v60 = vmul.f32 %v4555_v21, %v4552_v16 }
 0xf07   :  { %v4560_v33 = vmul.f32 %v4557_v20, %v4554_v59  ;;  %v4563_v41 = vmul.f32 %v4554_v59, %v1414_v28 }
 0xf09   :  { %4592 = vmatpush.msrb.mxu0 %v4563_v41  ;;  %4642 = vmatpush.msra.mxu1 %v4560_v33 }
 0xf0a   :  { %6900 = vmatmul.msk.f32.gmra.mxu2 %vm2305_vm3, %v10706_v25 }
 0xf0b   :  { %4593 = vmatpush.msrb.mxu0 %v4562_v53  ;;  %4643 = vmatpush.msra.mxu1 %v4559_v40 }
 0xf0d   :  { %4594 = vmatpush.msrb.mxu0 %v4561_v24  ;;  %4644 = vmatpush.msra.mxu1 %v4558_v60 }
 0xf0e   :  { %6861 = vmatmul.msk.f32.vlgmr.msrb.gmra.mxu0 %vm12209_vm15, %v10309_v57  ;;  %6867 = vmatmul.msk.f32.vlgmr.msra.gmra.mxu1 %vm12210_vm2, %v10312_v18  ;;  %vm12222_vm15 = vmmov %vm12217_vm0 }
 0xf0f   :  { %4797 = vmatpush.msra.mxu0 %v10415_v46  ;;  %v12215_v46 = vld [vmem:[#allocation12_spill] sm:$0xff] }
 0xf10   :  { %vm4198_vm4 = vcmp.eq.s32.totalorder %v12215_v46, %v10296_v42  ;;  %vm4192_vm11 = vcmp.eq.s32.totalorder %v12215_v46, %v10289_v29 }
 0xf11   :  { %4798 = vmatpush.msra.mxu0 %v10424_v13  ;;  %v10775_v13 = vsel %vm4198_vm4, 1.0, %v12181_v54 }
 0xf12   :  { %12216 = vst [vmem:[#allocation30_spill] sm:$0xff] %v10775_v13 }
 0xf13   :  { %4799 = vmatpush.msra.mxu0 %v10430_v45  ;;  %v10778_v45 = vsel %vm4192_vm11, 1.0, %v12181_v54 }
 0xf15   :  { %4800 = vmatpush.msra.mxu0 %v10436_v22  ;;  %v12219_v22 = vld [vmem:[#allocation13_spill] sm:$0xff] }
 0xf16   :  { %6862 = vmatmul.msk.f32.gmra.mxu0 %vm12211_vm13, %v10330_v26  ;;  %6868 = vmatmul.msk.f32.gmra.mxu1 %vm12212_vm9, %v10333_v23  ;;  %vm4199_vm12 = vcmp.eq.s32.totalorder %v12219_v22, %v10296_v42  ;;  %vm4193_vm1 = vcmp.eq.s32.totalorder %v12219_v22, %v10289_v29  ;;  %vm12225_vm9 = vmmov %vm12217_vm0 }
 0xf17   :  { %4801 = vmatpush.msra.mxu0 %v10444_v11  ;;  %v10793_v11 = vsel %vm4199_vm12, 1.0, %v12181_v54 }
 0xf18   :  { %12220 = vst [vmem:[#allocation29_spill] sm:$0xff] %v10793_v11 }
 0xf19   :  { %4802 = vmatpush.msra.mxu0 %v10452_v56  ;;  %v10796_v56 = vsel %vm4193_vm1, 1.0, %v12181_v54 }
 0xf1b   :  { %4803 = vmatpush.msra.mxu0 %v10458_v49  ;;  %v12223_v49 = vld [vmem:[#allocation14_spill] sm:$0xff] }
 0xf1c   :  { %vm4200_vm2 = vcmp.eq.s32.totalorder %v12223_v49, %v10296_v42  ;;  %vm4194_vm13 = vcmp.eq.s32.totalorder %v12223_v49, %v10289_v29 }
 0xf1d   :  { %4804 = vmatpush.msra.mxu0 %v10464_v10  ;;  %v10809_v10 = vsel %vm4200_vm2, 1.0, %v12181_v54 }
 0xf1e   :  { %6863 = vmatmul.msk.f32.gmra.mxu0 %vm12213_vm14, %v10353_v9  ;;  %6869 = vmatmul.msk.f32.gmra.mxu1 %vm12214_vm5, %v10356_v31  ;;  %12224 = vst [vmem:[#allocation28_spill] sm:$0xff] %v10809_v10  ;;  %vm12226_vm14 = vmmov %vm12217_vm0 }
 0xf1f   :  { %4913 = vmatpush.msrb.mxu0 %v10472_v0  ;;  %v10812_v0 = vsel %vm4194_vm13, 1.0, %v12181_v54 }
 0xf21   :  { %4914 = vmatpush.msrb.mxu0 %v10480_v36  ;;  %v10825_v36 = vld [vmem:[%s12011_s22 + $0x38] sm:$0xff] }
 0xf23   :  { %4915 = vmatpush.msrb.mxu0 %v10486_v12  ;;  %v10830_v12 = vld [vmem:[%s12011_s22 + $0x30] sm:$0xff] }
 0xf25   :  { %4916 = vmatpush.msrb.mxu0 %v10492_v48  ;;  %v10836_v48 = vld [vmem:[%s12011_s22 + $0x28] sm:$0xff] }
 0xf26   :  { %6864 = vmatmul.msk.f32.gmra.mxu0 %vm12217_vm0, %v10775_v13  ;;  %6870 = vmatmul.msk.f32.gmra.mxu1 %vm12218_vm10, %v10778_v45 }
 0xf27   :  { %4917 = vmatpush.msrb.mxu0 %v10498_v62  ;;  %v10842_v62 = vld [vmem:[%s12011_s22 + $0x20] sm:$0xff] }
 0xf29   :  { %4918 = vmatpush.msrb.mxu0 %v10506_v19  ;;  %v10848_v19 = vld [vmem:[%s12011_s22 + $0x18] sm:$0xff] }
 0xf2b   :  { %4919 = vmatpush.msrb.mxu0 %v10512_v7  ;;  %v10856_v7 = vld [vmem:[%s12011_s22 + $0x10] sm:$0xff] }
 0xf2d   :  { %4920 = vmatpush.msrb.mxu0 %v10518_v30  ;;  %v10869_v30 = vld [vmem:[%s12011_s22 + $0x8] sm:$0xff]  ;;  %s7421_s22 = smov 126  }
 0xf2e   :  { %6865 = vmatmul.msk.f32.gmra.mxu0 %vm12221_vm8, %v10793_v11  ;;  %6871 = vmatmul.msk.f32.gmra.mxu1 %vm12222_vm15, %v10796_v56 }
 0xf36   :  { %6866 = vmatmul.msk.f32.gmra.mxu0 %vm12225_vm9, %v10809_v10  ;;  %6872 = vmatmul.msk.f32.gmra.mxu1 %vm12226_vm14, %v10812_v0 }
 0xf3e   :  { %6887 = vmatmul.msk.f32.vlgmr.msra.gmra.mxu0 %vm1499_vm7, %v10633_v61 }
 0xf3f   :  { %5228 = vmatpush.msra.mxu0 %v10825_v36 }
 0xf41   :  { %5229 = vmatpush.msra.mxu0 %v10830_v12 }
 0xf43   :  { %5230 = vmatpush.msra.mxu0 %v10836_v48 }
 0xf45   :  { %5231 = vmatpush.msra.mxu0 %v10842_v62 }
 0xf46   :  { %6888 = vmatmul.msk.f32.gmra.mxu0 %vm1499_vm7, %v10637_v6 }
 0xf47   :  { %5232 = vmatpush.msra.mxu0 %v10848_v19 }
 0xf49   :  { %5233 = vmatpush.msra.mxu0 %v10856_v7 }
 0xf4b   :  { %5234 = vmatpush.msra.mxu0 %v10869_v30 }
 0xf4c   :  { %v4719_v21 = vpop.f32.mrf.mxu2 }
 0xf4d   :  { %5235 = vmatpush.msra.mxu0 %v10874_v1 }
 0xf4e   :  { %6889 = vmatmul.msk.f32.gmra.mxu0 %vm1499_vm7, %v10641_v14 }
 0xf56   :  { %6901 = vmatmul.msk.f32.vlgmr.msrb.gmra.mxu0 %vm1499_vm7, %v10633_v61 }
 0xf5e   :  { %6902 = vmatmul.msk.f32.gmra.mxu0 %vm1499_vm7, %v10637_v6 }
 0xf66   :  { %6903 = vmatmul.msk.f32.gmra.mxu0 %vm1499_vm7, %v10641_v14 }
 0xf8b   :  { %v4596_v61 = vpop.f32.mrf.mxu0  ;;  %v4646_v25 = vpop.f32.mrf.mxu1 }
 0xf8c   :  { %v4647_v6 = vadd.f32 %v4646_v25, %v4596_v61 }
 0xf8e   :  { %6920 = vmatmul.msk.f32.vlgmr.msra.gmra.mxu0 %vm1499_vm7, %v4647_v6 }
 0xf93   :  { %v4599_v14 = vpop.f32.mrf.mxu0  ;;  %v4649_v47 = vpop.f32.mrf.mxu1 }
 0xf94   :  { %v4650_v50 = vadd.f32 %v4649_v47, %v4599_v14 }
 0xf96   :  { %6921 = vmatmul.msk.f32.gmra.mxu0 %vm1499_vm7, %v4650_v50 }
 0xf9b   :  { %v4602_v5 = vpop.f32.mrf.mxu0  ;;  %v4652_v55 = vpop.f32.mrf.mxu1 }
 0xf9c   :  { %v4653_v27 = vadd.f32 %v4652_v55, %v4602_v5 }
 0xf9e   :  { %6922 = vmatmul.msk.f32.gmra.mxu0 %vm1499_vm7, %v4653_v27  ;;  %v12233_v27 = vld [vmem:[#allocation9_spill] sm:$0xff] }
 0xfa3   :  { %v4605_v28 = vpop.f32.mrf.mxu0  ;;  %v4655_v52 = vpop.f32.mrf.mxu1 }
 0xfa4   :  { %v4656_v15 = vadd.f32 %v4655_v52, %v4605_v28  ;;  %v10924_v28 = vadd.s32 48, %v12233_v27 }
 0xfa6   :  { %6923 = vmatmul.msk.f32.gmra.mxu0 %vm1499_vm7, %v4656_v15  ;;  %vm5066_vm10 = vcmp.eq.s32.totalorder %v10924_v28, %v10289_v29 }
 0xfab   :  { %v4608_v32 = vpop.f32.mrf.mxu0  ;;  %v4658_v43 = vpop.f32.mrf.mxu1 }
 0xfac   :  { %v4659_v2 = vadd.f32 %v4658_v43, %v4608_v32  ;;  %v4728_v32 = vadd.f32 %v10725_v39, %v4719_v21  ;;  %v12236_v21 = vld [vmem:[#allocation25_spill] sm:$0xff] }
 0xfae   :  { %6924 = vmatmul.msk.f32.gmra.mxu0 %vm1499_vm7, %v4659_v2 }
 0xfb3   :  { %v4611_v4 = vpop.f32.mrf.mxu0  ;;  %v4661_v8 = vpop.f32.mrf.mxu1 }
 0xfb4   :  { %v4662_v20 = vadd.f32 %v4661_v8, %v4611_v4 }
 0xfb6   :  { %6925 = vmatmul.msk.f32.gmra.mxu0 %vm1499_vm7, %v4662_v20  ;;  %v10934_v20 = vsel %vm5066_vm10, 1.0, %v12181_v54 }
 0xfbb   :  { %v4806_v17 = vpop.f32.mrf.mxu0 }
 0xfc3   :  { %v4809_v35 = vpop.f32.mrf.mxu0 }
 0xfcb   :  { %v4812_v34 = vpop.f32.mrf.mxu0 }
 0xfcc   :  { %6890 = vmatpush.msk.msrb.mxu1 %vm621_vm6, %v4812_v34 }
 0xfce   :  { %4832 = vmatpush.msrb.mxu1 %v4809_v35  ;;  %v10937_v35 = vadd.s32 56, %v12233_v27 }
 0xfd0   :  { %4833 = vmatpush.msrb.mxu1 %v4806_v17  ;;  %vm5067_vm1 = vcmp.eq.s32.totalorder %v10937_v35, %v10289_v29 }
 0xfd1   :  { %6891 = vmatmul.msk.f32.vlgmr.msrb.gmra.mxu1 %vm2305_vm3, %v10258_v51  ;;  %v12227_v51 = vld [vmem:[#allocation31_spill] sm:$0xff] }
 0xfd3   :  { %v4922_v59 = vpop.f32.mrf.mxu0 }
 0xfd9   :  { %6892 = vmatmul.msk.f32.gmra.mxu1 %vm2305_vm3, %v10268_v58 }
 0xfdb   :  { %v4925_v3 = vpop.f32.mrf.mxu0 }
 0xfe1   :  { %6893 = vmatmul.msk.f32.gmra.mxu1 %vm2305_vm3, %v10648_v44 }
 0xfe3   :  { %v4928_v63 = vpop.f32.mrf.mxu0 }
 0xfe4   :  { %6904 = vmatpush.msk.msra.mxu1 %vm621_vm6, %v4928_v63  ;;  %vm12228_vm6 = vcmask 392192  }
 0xfe6   :  { %4948 = vmatpush.msra.mxu1 %v4925_v3 }
 0xfe8   :  { %4949 = vmatpush.msra.mxu1 %v4922_v59 }
 0xfe9   :  { %6905 = vmatmul.msk.f32.vlgmr.msra.gmra.mxu1 %vm2305_vm3, %v10657_v38 }
 0xff1   :  { %6906 = vmatmul.msk.f32.gmra.mxu1 %vm2305_vm3, %v10667_v37  ;;  %v4722_v37 = vpop.f32.mrf.mxu2 }
 0xff2   :  { %v4729_v52 = vadd.f32 %v10725_v39, %v4722_v37 }
 0xff9   :  { %6907 = vmatmul.msk.f32.gmra.mxu1 %vm2305_vm3, %v12227_v51  ;;  %v4725_v60 = vpop.f32.mrf.mxu2  ;;  %vm12229_vm3 = vmmov %vm12228_vm6 }
 0xffa   :  { %vm12230_vm5 = vmmov %vm12229_vm3  ;;  %v4730_v43 = vadd.f32 %v10725_v39, %v4725_v60  ;;  %v12240_v60 = vld [vmem:[#allocation23_spill] sm:$0xff] }
 0xffb   :  { %vm12231_vm4 = vmmov %vm12229_vm3 }
 0xffc   :  { %vm12232_vm11 = vmmov %vm12229_vm3 }
 0xffd   :  { %vm12234_vm0 = vmmov %vm12229_vm3 }
 0xffe   :  { %vm12235_vm12 = vmmov %vm12234_vm0 }
 0xfff   :  { %vm12239_vm2 = vmmov %vm12234_vm0 }
0x1000   :  { %vm12251_vm10 = vmmov %vm12239_vm2 }
0x1001   :  { %v4777_v61 = vpop.f32.mrf.mxu2 }
0x1002   :  { %v4786_v4 = vadd.f32 %v4777_v61, %v4728_v32  ;;  %v12241_v61 = vld [vmem:[#allocation24_spill] sm:$0xff] }
0x1003   :  { %vm12242_vm13 = vcmp.gt.f32.partialorder %v12240_v60, %v12241_v61 }
0x1009   :  { %v4780_v25 = vpop.f32.mrf.mxu2 }
0x100a   :  { %v4787_v2 = vadd.f32 %v4780_v25, %v4729_v52  ;;  %v1483_v25 = vsel %vm12242_vm13, 1.0, %v12181_v54 }
0x100b   :  { %v5237_v33 = vpop.f32.mrf.mxu0  ;;  %v4973_v32 = vsub.f32 1.0, %v1483_v25 }
0x1011   :  { %v4783_v14 = vpop.f32.mrf.mxu2 }
0x1012   :  { %v4788_v34 = vadd.f32 %v4783_v14, %v4730_v43 }
0x1013   :  { %v5240_v58 = vpop.f32.mrf.mxu0 }
0x1014   :  { %v7170_v41 = vpack.i.bf16 %v5237_v33, %v5240_v58 }
0x1016   :  { %7171 = vrot.lane.b32.xlu2 %v7170_v41, %s7421_s22 }
0x1019   :  { %v4893_v50 = vpop.f32.mrf.mxu2 }
0x101b   :  { %v5243_v44 = vpop.f32.mrf.mxu0 }
0x101e   :  { %7181 = vrot.lane.b32.xlu2 %v7170_v41, %s7422_s19 }
0x1021   :  { %v4896_v15 = vpop.f32.mrf.mxu2 }
0x1023   :  { %v5246_v16 = vpop.f32.mrf.mxu0 }
0x1024   :  { %v7165_v53 = vpack.i.bf16 %v5243_v44, %v5246_v16 }
0x1026   :  { %7201 = vrot.lane.b32.xlu2 %v7170_v41, %s7423_s9  ;;  %7166 = vrot.lane.b32.xlu0 %v7165_v53, %s7421_s22 }
0x1029   :  { %v4899_v51 = vpop.f32.mrf.mxu2 }
0x102b   :  { %v5249_v38 = vpop.f32.mrf.mxu0 }
0x102e   :  { %7206 = vrot.lane.b32.xlu2 %v7165_v53, %s7424_s15  ;;  %7176 = vrot.lane.b32.xlu0 %v7165_v53, %s7422_s19 }
0x1033   :  { %v5252_v40 = vpop.f32.mrf.mxu0 }
0x1034   :  { %5303 = vmatpush.msrb.mxu1 %v5252_v40  ;;  %v7160_v24 = vpack.i.bf16 %v5249_v38, %v5252_v40 }
0x1036   :  { %7216 = vrot.lane.b32.xlu2 %v7170_v41, %s7424_s15  ;;  %7196 = vrot.lane.b32.xlu0 %v7165_v53, %s7423_s9 }
0x1037   :  { %7161 = vrot.lane.b32.xlu1 %v7160_v24, %s7421_s22  ;;  %5304 = vmatpush.msrb.mxu1 %v5249_v38 }
0x1039   :  { %5305 = vmatpush.msrb.mxu1 %v5246_v16 }
0x103b   :  { %5306 = vmatpush.msrb.mxu1 %v5243_v44  ;;  %v10944_v44 = vsel %vm5067_vm1, 1.0, %v12181_v54 }
0x103d   :  { %5307 = vmatpush.msrb.mxu1 %v5240_v58 }
0x103e   :  { %7211 = vrot.lane.b32.xlu0 %v7165_v53, %s7425_s23  ;;  %v12237_v53 = vld [vmem:[#allocation26_spill] sm:$0xff] }
0x103f   :  { %7186 = vrot.lane.b32.xlu1 %v7160_v24, %s7422_s19  ;;  %5308 = vmatpush.msrb.mxu1 %v5237_v33  ;;  %vm12238_vm8 = vcmp.gt.f32.partialorder %v12236_v21, %v12237_v53  ;;  %v11011_v21 = vadd.s32 96, %v12233_v27 }
0x1040   :  { %6926 = vmatmul.msk.f32.vlgmr.msrb.gmra.mxu1 %vm12228_vm6, %v10312_v18  ;;  %v1484_v38 = vsel %vm12238_vm8, 1.0, %v12181_v54 }
0x1046   :  { %7226 = vrot.lane.b32.xlu0 %v7160_v24, %s7425_s23 }
0x1047   :  { %7191 = vrot.lane.b32.xlu1 %v7160_v24, %s7423_s9 }
0x1048   :  { %6927 = vmatmul.msk.f32.gmra.mxu1 %vm12229_vm3, %v10333_v23 }
0x104e   :  { %v4835_v6 = vpop.f32.mrf.mxu1  ;;  %7241 = vrot.lane.b32.xlu0 %v7170_v41, %s7425_s23 }
0x104f   :  { %7221 = vrot.lane.b32.xlu1 %v7160_v24, %s7424_s15  ;;  %v4844_v59 = vadd.f32 %v4835_v6, %v4786_v4  ;;  %v10951_v24 = vadd.s32 64, %v12233_v27 }
0x1050   :  { %6928 = vmatmul.msk.f32.gmra.mxu1 %vm12230_vm5, %v10356_v31  ;;  %vm12247_vm5 = vmmov %vm12234_vm0 }
0x1051   :  { %v4902_v39 = vadd.f32 %v4893_v50, %v4844_v59  ;;  %v12243_v50 = vld [vmem:[#allocation21_spill] sm:$0xff]  ;;  %vm5068_vm3 = vcmp.eq.s32.totalorder %v10951_v24, %v10289_v29 }
0x1052   :  { %v10966_v59 = vsel %vm5068_vm3, 1.0, %v12181_v54 }
0x1053   :  { %12246 = vst [vmem:[#allocation27_spill] sm:$0xff] %v10966_v59 }
0x1056   :  { %v4838_v47 = vpop.f32.mrf.mxu1 }
0x1057   :  { %v4845_v8 = vadd.f32 %v4838_v47, %v4787_v2  ;;  %v4974_v47 = vsub.f32 1.0, %v1484_v38 }
0x1058   :  { %6929 = vmatmul.msk.f32.gmra.mxu1 %vm12231_vm4, %v10778_v45  ;;  %vm12248_vm4 = vcmask 195584  }
0x1059   :  { %v4903_v3 = vadd.f32 %v4896_v15, %v4845_v8  ;;  %vm12253_vm1 = vmmov %vm12248_vm4 }
0x105a   :  { %vm12257_vm13 = vmmov %vm12253_vm1 }
0x105b   :  { %vm12261_vm3 = vmmov %vm12253_vm1 }
0x105e   :  { %v4841_v5 = vpop.f32.mrf.mxu1 }
0x105f   :  { %v4846_v63 = vadd.f32 %v4841_v5, %v4788_v34  ;;  %v12244_v5 = vld [vmem:[#allocation22_spill] sm:$0xff] }
0x1060   :  { %6930 = vmatmul.msk.f32.gmra.mxu1 %vm12232_vm11, %v10796_v56  ;;  %vm12245_vm6 = vcmp.gt.f32.partialorder %v12243_v50, %v12244_v5  ;;  %vm12249_vm11 = vmmov %vm12248_vm4 }
0x1061   :  { %v4904_v58 = vadd.f32 %v4899_v51, %v4846_v63 }
0x1066   :  { %v4951_v55 = vpop.f32.mrf.mxu1 }
0x1067   :  { %v4960_v41 = vadd.f32 %v4951_v55, %v4902_v39  ;;  %v1482_v55 = vsel %vm12245_vm6, 1.0, %v12181_v54  ;;  %vm12260_vm6 = vmmov %vm12253_vm1 }
0x1068   :  { %6931 = vmatmul.msk.f32.gmra.mxu1 %vm12234_vm0, %v10812_v0  ;;  %v4972_v8 = vsub.f32 1.0, %v1482_v55 }
0x1069   :  { %v4966_v6 = vmul.f32 0.01, %v4960_v41  ;;  %vm4963_vm14 = vcmp.gt.f32.partialorder %v4960_v41, 0.0 }
0x106b   :  { %v4969_v4 = vsel %vm4963_vm14, %v4960_v41, %v4966_v6  ;;  %v10997_v41 = vadd.s32 88, %v12233_v27  ;;  %vm12259_vm14 = vmmov %vm12247_vm5 }
0x106c   :  { %v4978_v63 = vmul.f32 %v4969_v4, %v1482_v55  ;;  %v4975_v51 = vmul.f32 %v4972_v8, %v4969_v4 }
0x106e   :  { %v4954_v17 = vpop.f32.mrf.mxu1 }
0x106f   :  { %v4961_v33 = vadd.f32 %v4954_v17, %v4903_v3  ;;  %v10969_v3 = vadd.s32 72, %v12233_v27 }
0x1070   :  { %6932 = vmatmul.msk.f32.gmra.mxu1 %vm12235_vm12, %v10934_v20  ;;  %vm12252_vm12 = vmmov %vm12248_vm4 }
0x1071   :  { %v4967_v37 = vmul.f32 0.01, %v4961_v33  ;;  %vm4964_vm15 = vcmp.gt.f32.partialorder %v4961_v33, 0.0  ;;  %vm5069_vm0 = vcmp.eq.s32.totalorder %v10969_v3, %v10289_v29 }
0x1072   :  { %v10980_v39 = vsel %vm5069_vm0, 1.0, %v12181_v54  ;;  %vm12265_vm0 = vmmov %vm12253_vm1 }
0x1073   :  { %v4970_v15 = vsel %vm4964_vm15, %v4961_v33, %v4967_v37  ;;  %12250 = vst [vmem:[#allocation20_spill] sm:$0xff] %v10980_v39  ;;  %v10983_v33 = vadd.s32 80, %v12233_v27  ;;  %vm12255_vm15 = vmmov %vm12239_vm2  ;;  %v7172_v37 = vpop.permute.xlu2 %7171 }
0x1074   :  { %v4979_v17 = vmul.f32 %v4970_v15, %v1483_v25  ;;  %v4976_v34 = vmul.f32 %v4973_v32, %v4970_v15  ;;  %v7173_v15 = vunpack.i.l.bf16 %v7172_v37 }
0x1075   :  { %vm5070_vm8 = vcmp.eq.s32.totalorder %v10983_v33, %v10289_v29 }
0x1076   :  { %v4957_v16 = vpop.f32.mrf.mxu1 }
0x1077   :  { %v4962_v40 = vadd.f32 %v4957_v16, %v4904_v58  ;;  %v10994_v58 = vsel %vm5070_vm8, 1.0, %v12181_v54 }
0x1078   :  { %6933 = vmatmul.msk.f32.gmra.mxu1 %vm12239_vm2, %v10944_v44  ;;  %12254 = vst [vmem:[#allocation19_spill] sm:$0xff] %v10994_v58  ;;  %vm12256_vm2 = vmmov %vm12253_vm1 }
0x1079   :  { %vm4965_vm9 = vcmp.gt.f32.partialorder %v4962_v40, 0.0  ;;  %v4968_v14 = vmul.f32 0.01, %v4962_v40 }
0x107b   :  { %v4971_v52 = vsel %vm4965_vm9, %v4962_v40, %v4968_v14  ;;  %vm5071_vm9 = vcmp.eq.s32.totalorder %v10997_v41, %v10289_v29  ;;  %v7182_v25 = vpop.permute.xlu2 %7181 }
0x107c   :  { %v4977_v43 = vmul.f32 %v4974_v47, %v4971_v52  ;;  %v4980_v2 = vmul.f32 %v4971_v52, %v1484_v38  ;;  %v11008_v16 = vsel %vm5071_vm9, 1.0, %v12181_v54  ;;  %v11037_v47 = vadd.s32 2, %v10289_v29 }
0x107d   :  { %12258 = vst [vmem:[#allocation18_spill] sm:$0xff] %v11008_v16 }
0x107e   :  { %4994 = vmatpush.msra.mxu3 %v4980_v2  ;;  %5029 = vmatpush.msrb.mxu2 %v4977_v43  ;;  %vm5100_vm8 = vcmp.eq.s32.totalorder %v12223_v49, %v11037_v47  ;;  %v7174_v43 = vunpack.i.h.bf16 %v7172_v37  ;;  %vm5101_vm9 = vcmp.eq.s32.totalorder %v10924_v28, %v11037_v47 }
0x1080   :  { %4995 = vmatpush.msra.mxu3 %v4979_v17  ;;  %5030 = vmatpush.msrb.mxu2 %v4976_v34  ;;  %v11051_v17 = vsel %vm5100_vm8, 1.0, %v12181_v54 }
0x1081   :  { %6934 = vmatmul.msk.f32.gmra.mxu1 %vm12247_vm5, %v10966_v59  ;;  %vm5072_vm5 = vcmp.eq.s32.totalorder %v11011_v21, %v10289_v29  ;;  %12269 = vst [vmem:[#allocation15_spill] sm:$0xff] %v11051_v17 }
0x1082   :  { %4996 = vmatpush.msra.mxu3 %v4978_v63  ;;  %5031 = vmatpush.msrb.mxu2 %v4975_v51  ;;  %v11022_v38 = vsel %vm5072_vm5, 1.0, %v12181_v54 }
0x1083   :  { %6908 = vmatmul.msk.f32.vlgmr.msra.gmra.mxu3 %vm12248_vm4, %v10309_v57  ;;  %6914 = vmatmul.msk.f32.vlgmr.msrb.gmra.mxu2 %vm12249_vm11, %v10312_v18  ;;  %12262 = vst [vmem:[#allocation17_spill] sm:$0xff] %v11022_v38  ;;  %vm12263_vm4 = vmmov %vm12251_vm10  ;;  %v11045_v2 = vpop.permute.xlu2 %7201 }
0x1084   :  { %vm12264_vm11 = vmmov %vm12253_vm1 }
0x1089   :  { %6935 = vmatmul.msk.f32.gmra.mxu1 %vm12251_vm10, %v10980_v39  ;;  %vm12266_vm10 = vmmov %vm12265_vm0 }
0x108b   :  { %6909 = vmatmul.msk.f32.gmra.mxu3 %vm12252_vm12, %v10330_v26  ;;  %6915 = vmatmul.msk.f32.gmra.mxu2 %vm12253_vm1, %v10333_v23  ;;  %vm12267_vm12 = vmmov %vm12265_vm0  ;;  %vm5095_vm1 = vcmp.eq.s32.totalorder %v12233_v27, %v11037_v47 }
0x108c   :  { %v11048_v8 = vsel %vm5095_vm1, 1.0, %v12181_v54  ;;  %vm5098_vm1 = vcmp.eq.s32.totalorder %v12215_v46, %v11037_v47 }
0x108d   :  { %12268 = vst [vmem:[#allocation16_spill] sm:$0xff] %v11048_v8 }
0x1091   :  { %6936 = vmatmul.msk.f32.gmra.mxu1 %vm12255_vm15, %v10994_v58  ;;  %vm12270_vm15 = vmmov %vm12263_vm4 }
0x1093   :  { %6910 = vmatmul.msk.f32.gmra.mxu3 %vm12256_vm2, %v10353_v9  ;;  %6916 = vmatmul.msk.f32.gmra.mxu2 %vm12257_vm13, %v10356_v31  ;;  %vm12271_vm2 = vmmov %vm12263_vm4 }
0x1094   :  { %vm12278_vm5 = vmmov %vm12271_vm2 }
0x1098   :  { %v7167_v53 = vpop.permute.xlu0 %7166 }
0x1099   :  { %6937 = vmatmul.msk.f32.gmra.mxu1 %vm12259_vm14, %v11008_v16  ;;  %v7168_v50 = vunpack.i.l.bf16 %v7167_v53  ;;  %v7169_v5 = vunpack.i.h.bf16 %v7167_v53  ;;  %vm12275_vm14 = vmmov %vm12271_vm2 }
0x109b   :  { %6911 = vmatmul.msk.f32.gmra.mxu3 %vm12260_vm6, %v10775_v13  ;;  %6917 = vmatmul.msk.f32.gmra.mxu2 %vm12261_vm3, %v10778_v45  ;;  %vm12276_vm6 = vmmov %vm12271_vm2 }
0x10a0   :  { %v7177_v40 = vpop.permute.xlu0 %7176 }
0x10a1   :  { %6938 = vmatmul.msk.f32.gmra.mxu1 %vm12263_vm4, %v11022_v38  ;;  %v7178_v34 = vunpack.i.l.bf16 %v7177_v40  ;;  %v7179_v63 = vunpack.i.h.bf16 %v7177_v40  ;;  %v7184_v40 = vunpack.i.h.bf16 %v7182_v25 }
0x10a3   :  { %6912 = vmatmul.msk.f32.gmra.mxu3 %vm12264_vm11, %v10793_v11  ;;  %6918 = vmatmul.msk.f32.gmra.mxu2 %vm12265_vm0, %v10796_v56  ;;  %vm5102_vm11 = vcmp.eq.s32.totalorder %v10937_v35, %v11037_v47  ;;  %vm12282_vm0 = vmmov %vm12271_vm2 }
0x10a4   :  { %vm12285_vm8 = vmmov %vm12282_vm0 }
0x10a8   :  { %v11030_v60 = vpop.permute.xlu0 %7196 }
0x10a9   :  { %v7162_v61 = vpop.permute.xlu1 %7161 }
0x10aa   :  { %v7163_v6 = vunpack.i.l.bf16 %v7162_v61  ;;  %v7164_v14 = vunpack.i.h.bf16 %v7162_v61  ;;  %v12272_v61 = vld [vmem:[#allocation10_spill] sm:$0xff] }
0x10ab   :  { %6913 = vmatmul.msk.f32.gmra.mxu3 %vm12266_vm10, %v10809_v10  ;;  %6919 = vmatmul.msk.f32.gmra.mxu2 %vm12267_vm12, %v10812_v0  ;;  %vm5096_vm13 = vcmp.eq.s32.totalorder %v12272_v61, %v11037_v47  ;;  %vm12283_vm10 = vmmov %vm12282_vm0 }
0x10ac   :  { %5555 = vmatpush.msra.mxu1 %v7163_v6  ;;  %7109 = vmatpush.msra.mxu2 %v7163_v6  ;;  %v7183_v6 = vunpack.i.l.bf16 %v7182_v25  ;;  %vm12284_vm12 = vmmov %vm12282_vm0 }
0x10ae   :  { %5556 = vmatpush.msra.mxu1 %v7164_v14  ;;  %7110 = vmatpush.msra.mxu2 %v7164_v14 }
0x10b0   :  { %5557 = vmatpush.msra.mxu1 %v7168_v50  ;;  %7111 = vmatpush.msra.mxu2 %v7168_v50  ;;  %v11039_v55 = vpop.permute.xlu0 %7211 }
0x10b1   :  { %v7187_v52 = vpop.permute.xlu1 %7186  ;;  %v7214_v25 = vunpack.i.h.bf16 %v11039_v55 }
0x10b2   :  { %v7188_v32 = vunpack.i.l.bf16 %v7187_v52  ;;  %5558 = vmatpush.msra.mxu1 %v7169_v5  ;;  %7112 = vmatpush.msra.mxu2 %v7169_v5  ;;  %v7189_v4 = vunpack.i.h.bf16 %v7187_v52  ;;  %v11064_v52 = vsel %vm5096_vm13, 1.0, %v12181_v54  ;;  %vm12289_vm13 = vmmov %vm12282_vm0 }
0x10b3   :  { %12273 = vst [vmem:[#allocation12_spill] sm:$0xff] %v11064_v52 }
0x10b4   :  { %5429 = vmatpush.msrb.mxu3 %v7188_v32  ;;  %5559 = vmatpush.msra.mxu1 %v7173_v15  ;;  %v7213_v32 = vunpack.i.l.bf16 %v11039_v55 }
0x10b5   :  { %7113 = vmatpush.msra.mxu2 %v7173_v15  ;;  %v7198_v15 = vunpack.i.l.bf16 %v11030_v60 }
0x10b6   :  { %5430 = vmatpush.msrb.mxu3 %v7189_v4  ;;  %5560 = vmatpush.msra.mxu1 %v7174_v43 }
0x10b7   :  { %7114 = vmatpush.msra.mxu2 %v7174_v43  ;;  %6952 = vmatmul.msk.f32.vlgmr.msra.gmra.mxu1 %vm12270_vm15, %v11048_v8  ;;  %v11070_v43 = vadd.s32 3, %v10289_v29 }
0x10b8   :  { %5431 = vmatpush.msrb.mxu3 %v7178_v34  ;;  %v7227_v51 = vpop.permute.xlu0 %7226  ;;  %6957 = vmatmul.msk.f32.vlgmr.msra.gmra.mxu2 %vm12271_vm2, %v11051_v17  ;;  %vm5103_vm2 = vcmp.eq.s32.totalorder %v10951_v24, %v11037_v47 }
0x10b9   :  { %v7228_v53 = vunpack.i.l.bf16 %v7227_v51  ;;  %v7192_v37 = vpop.permute.xlu1 %7191  ;;  %6033 = vmatpush.msrb.mxu2 %v10825_v36  ;;  %v7229_v50 = vunpack.i.h.bf16 %v7227_v51  ;;  %v7207_v36 = vpop.permute.xlu2 %7206  ;;  %v12277_v51 = vld [vmem:[#allocation11_spill] sm:$0xff]  ;;  %vm5122_vm4 = vcmp.eq.s32.totalorder %v12233_v27, %v11070_v43  ;;  %vm5123_vm15 = vcmp.eq.s32.totalorder %v12272_v61, %v11070_v43 }
0x10ba   :  { %v7193_v14 = vunpack.i.l.bf16 %v7192_v37  ;;  %5432 = vmatpush.msrb.mxu3 %v7179_v63  ;;  %v7194_v5 = vunpack.i.h.bf16 %v7192_v37  ;;  %vm5097_vm3 = vcmp.eq.s32.totalorder %v12277_v51, %v11037_v47 }
0x10bb   :  { %5807 = vmatpush.msrb.mxu1 %v7228_v53  ;;  %6034 = vmatpush.msrb.mxu2 %v10830_v12  ;;  %v11073_v12 = vsel %vm5101_vm9, 1.0, %v12181_v54  ;;  %v7203_v53 = vunpack.i.l.bf16 %v11045_v2  ;;  %vm12290_vm9 = vmmov %vm12282_vm0 }
0x10bc   :  { %5433 = vmatpush.msrb.mxu3 %v7183_v6  ;;  %5681 = vmatpush.msrb.mxu0 %v7193_v14  ;;  %12274 = vst [vmem:[#allocation13_spill] sm:$0xff] %v11073_v12  ;;  %v11093_v6 = vsel %vm5097_vm3, 1.0, %v12181_v54  ;;  %vm12292_vm3 = vmmov %vm12282_vm0 }
0x10bd   :  { %5808 = vmatpush.msrb.mxu1 %v7229_v50  ;;  %6035 = vmatpush.msrb.mxu2 %v10836_v48  ;;  %v7199_v48 = vunpack.i.h.bf16 %v11030_v60  ;;  %v7204_v60 = vunpack.i.h.bf16 %v11045_v2  ;;  %12279 = vst [vmem:[#allocation14_spill] sm:$0xff] %v11093_v6  ;;  %v11096_v50 = vsel %vm5122_vm4, 1.0, %v12181_v54  ;;  %vm5104_vm4 = vcmp.eq.s32.totalorder %v10969_v3, %v11037_v47 }
0x10be   :  { %5434 = vmatpush.msrb.mxu3 %v7184_v40  ;;  %5682 = vmatpush.msrb.mxu0 %v7194_v5  ;;  %12280 = vst [vmem:[#allocation31_spill] sm:$0xff] %v11096_v50  ;;  %v11100_v40 = vsel %vm5102_vm11, 1.0, %v12181_v54  ;;  %v7209_v5 = vunpack.i.h.bf16 %v7207_v36  ;;  %vm12296_vm11 = vmmov %vm12282_vm0 }
0x10bf   :  { %6939 = vmatmul.msk.f32.vlgmr.msrb.gmra.mxu3 %vm12275_vm14, %v10309_v57  ;;  %6953 = vmatmul.msk.f32.gmra.mxu1 %vm12276_vm6, %v11064_v52  ;;  %12281 = vst [vmem:[#allocation9_spill] sm:$0xff] %v11100_v40  ;;  %vm12291_vm14 = vmmov %vm12282_vm0  ;;  %vm5099_vm6 = vcmp.eq.s32.totalorder %v12219_v22, %v11037_v47 }
0x10c0   :  { %5683 = vmatpush.msrb.mxu0 %v7198_v15  ;;  %5809 = vmatpush.msrb.mxu1 %v7213_v32  ;;  %v7242_v4 = vpop.permute.xlu0 %7241  ;;  %v11118_v15 = vsel %vm5098_vm1, 1.0, %v12181_v54  ;;  %v11122_v32 = vsel %vm5123_vm15, 1.0, %v12181_v54  ;;  %vm12298_vm1 = vmmov %vm12282_vm0  ;;  %vm5105_vm15 = vcmp.eq.s32.totalorder %v10983_v33, %v11037_v47 }
0x10c1   :  { %v7243_v34 = vunpack.i.l.bf16 %v7242_v4  ;;  %v7222_v63 = vpop.permute.xlu1 %7221  ;;  %6958 = vmatmul.msk.f32.gmra.mxu2 %vm12278_vm5, %v11073_v12  ;;  %v7244_v55 = vunpack.i.h.bf16 %v7242_v4  ;;  %v7217_v2 = vpop.permute.xlu2 %7216  ;;  %12286 = vst [vmem:[#allocation25_spill] sm:$0xff] %v11118_v15  ;;  %vm5124_vm5 = vcmp.eq.s32.totalorder %v12277_v51, %v11070_v43 }
0x10c2   :  { %v7223_v37 = vunpack.i.l.bf16 %v7222_v63  ;;  %5684 = vmatpush.msrb.mxu0 %v7199_v48  ;;  %5810 = vmatpush.msrb.mxu1 %v7214_v25  ;;  %v7224_v14 = vunpack.i.h.bf16 %v7222_v63  ;;  %12287 = vst [vmem:[#allocation26_spill] sm:$0xff] %v11122_v32  ;;  %v11125_v48 = vsel %vm5103_vm2, 1.0, %v12181_v54  ;;  %v11152_v25 = vsel %vm5104_vm4, 1.0, %v12181_v54  ;;  %v11166_v4 = vpop.f32.mrf.mxu1  ;;  %vm12302_vm2 = vmmov %vm12282_vm0 }
0x10c3   :  { %6036 = vmatpush.msrb.mxu2 %v10842_v62  ;;  %v7208_v62 = vunpack.i.l.bf16 %v7207_v36  ;;  %v7219_v36 = vunpack.i.h.bf16 %v7217_v2  ;;  %12288 = vst [vmem:[#allocation23_spill] sm:$0xff] %v11125_v48  ;;  %vm12309_vm4 = vmmov %vm12282_vm0 }
0x10c4   :  { %5685 = vmatpush.msrb.mxu0 %v7203_v53  ;;  %5811 = vmatpush.msrb.mxu1 %v7243_v34  ;;  %12295 = vst [vmem:[#allocation22_spill] sm:$0xff] %v11152_v25  ;;  %v11177_v53 = vsel %vm5105_vm15, 1.0, %v12181_v54  ;;  %vm5107_vm15 = vcmp.eq.s32.totalorder %v11011_v21, %v11037_v47 }
0x10c5   :  { %5933 = vmatpush.msra.mxu3 %v7223_v37  ;;  %6037 = vmatpush.msrb.mxu2 %v10848_v19  ;;  %v7218_v19 = vunpack.i.l.bf16 %v7217_v2  ;;  %12301 = vst [vmem:[#allocation37_spill] sm:$0xff] %v11177_v53 }
0x10c6   :  { %5686 = vmatpush.msrb.mxu0 %v7204_v60  ;;  %5812 = vmatpush.msrb.mxu1 %v7244_v55 }
0x10c7   :  { %5934 = vmatpush.msra.mxu3 %v7224_v14  ;;  %6954 = vmatmul.msk.f32.gmra.mxu1 %vm12282_vm0, %v11093_v6 }
0x10c8   :  { %6940 = vmatmul.msk.f32.gmra.mxu3 %vm12283_vm10, %v10330_v26  ;;  %6965 = vmatmul.msk.f32.vlgmr.msrb.gmra.mxu0 %vm12284_vm12, %v11096_v50  ;;  %vm12297_vm10 = vmmov %vm12282_vm0 }
0x10c9   :  { %5935 = vmatpush.msra.mxu3 %v7208_v62  ;;  %6959 = vmatmul.msk.f32.gmra.mxu2 %vm12285_vm8, %v11100_v40  ;;  %vm5125_vm8 = vcmp.eq.s32.totalorder %v12215_v46, %v11070_v43 }
0x10ca   :  { %6038 = vmatpush.msrb.mxu2 %v10856_v7  ;;  %v11143_v7 = vsel %vm5099_vm6, 1.0, %v12181_v54  ;;  %v11174_v63 = vsel %vm5125_vm8, 1.0, %v12181_v54  ;;  %vm12305_vm6 = vmmov %vm12282_vm0  ;;  %v11196_v60 = vpop.f32.mrf.mxu1  ;;  %vm5127_vm8 = vcmp.eq.s32.totalorder %v12223_v49, %v11070_v43 }
0x10cb   :  { %5936 = vmatpush.msra.mxu3 %v7209_v5  ;;  %12293 = vst [vmem:[#allocation24_spill] sm:$0xff] %v11143_v7  ;;  %v11227_v5 = vsel %vm5127_vm8, 1.0, %v12181_v54  ;;  %vm12328_vm8 = vmmov %vm12282_vm0 }
0x10cc   :  { %6039 = vmatpush.msrb.mxu2 %v10869_v30  ;;  %v11146_v30 = vsel %vm5124_vm5, 1.0, %v12181_v54  ;;  %12300 = vst [vmem:[#allocation11_spill] sm:$0xff] %v11174_v63  ;;  %vm5106_vm5 = vcmp.eq.s32.totalorder %v10997_v41, %v11037_v47 }
0x10cd   :  { %5937 = vmatpush.msra.mxu3 %v7218_v19  ;;  %12294 = vst [vmem:[#allocation21_spill] sm:$0xff] %v11146_v30  ;;  %v11202_v14 = vsel %vm5106_vm5, 1.0, %v12181_v54  ;;  %v11230_v19 = vsel %vm5107_vm15, 1.0, %v12181_v54  ;;  %vm5128_vm5 = vcmp.eq.s32.totalorder %v10924_v28, %v11070_v43  ;;  %vm12329_vm15 = vmmov %vm12282_vm0 }
0x10ce   :  { %6040 = vmatpush.msrb.mxu2 %v10874_v1  ;;  %v11149_v1 = vadd.s32 4, %v10289_v29  ;;  %12308 = vst [vmem:[#allocation40_spill] sm:$0xff] %v11202_v14 }
0x10cf   :  { %5938 = vmatpush.msra.mxu3 %v7219_v36  ;;  %6955 = vmatmul.msk.f32.gmra.mxu1 %vm12289_vm13, %v11118_v15  ;;  %vm12303_vm13 = vmmov %vm12282_vm0  ;;  %12314 = vst [vmem:[#allocation43_spill] sm:$0xff] %v11227_v5 }
0x10d0   :  { %6941 = vmatmul.msk.f32.gmra.mxu3 %vm12290_vm9, %v10353_v9  ;;  %6966 = vmatmul.msk.f32.gmra.mxu0 %vm12291_vm14, %v11122_v32  ;;  %vm5149_vm12 = vcmp.eq.s32.totalorder %v12233_v27, %v11149_v1  ;;  %vm12304_vm9 = vmmov %vm12282_vm0  ;;  %vm5150_vm14 = vcmp.eq.s32.totalorder %v12272_v61, %v11149_v1  ;;  %12315 = vst [vmem:[#allocation44_spill] sm:$0xff] %v11230_v19 }
0x10d1   :  { %6960 = vmatmul.msk.f32.gmra.mxu2 %vm12292_vm3, %v11125_v48  ;;  %v11171_v34 = vsel %vm5149_vm12, 1.0, %v12181_v54  ;;  %vm5126_vm3 = vcmp.eq.s32.totalorder %v12219_v22, %v11070_v43  ;;  %v11194_v37 = vsel %vm5150_vm14, 1.0, %v12181_v54  ;;  %vm12311_vm12 = vmmov %vm12282_vm0  ;;  %vm5152_vm14 = vcmp.eq.s32.totalorder %v12215_v46, %v11149_v1 }
0x10d2   :  { %12299 = vst [vmem:[#allocation10_spill] sm:$0xff] %v11171_v34  ;;  %v11199_v55 = vsel %vm5126_vm3, 1.0, %v12181_v54  ;;  %v11232_v36 = vpop.f32.mrf.mxu1  ;;  %vm5081_vm3 = vcmp.eq.s32.totalorder %v10937_v35, %v10296_v42  ;;  %v11249_v47 = vsel %vm5152_vm14, 1.0, %v12181_v54  ;;  %vm5130_vm14 = vcmp.eq.s32.totalorder %v10951_v24, %v11070_v43 }
0x10d3   :  { %12306 = vst [vmem:[#allocation38_spill] sm:$0xff] %v11194_v37 }
0x10d4   :  { %12307 = vst [vmem:[#allocation39_spill] sm:$0xff] %v11199_v55 }
0x10d5   :  { %12320 = vst [vmem:[#allocation45_spill] sm:$0xff] %v11249_v47 }
0x10d7   :  { %6956 = vmatmul.msk.f32.gmra.mxu1 %vm12296_vm11, %v11143_v7  ;;  %vm12310_vm11 = vmmov %vm12282_vm0 }
0x10d8   :  { %6942 = vmatmul.msk.f32.gmra.mxu3 %vm12282_vm0, %v10775_v13  ;;  %6967 = vmatmul.msk.f32.gmra.mxu0 %vm12297_vm10, %v11146_v30  ;;  %vm5151_vm10 = vcmp.eq.s32.totalorder %v12277_v51, %v11149_v1 }
0x10d9   :  { %6961 = vmatmul.msk.f32.gmra.mxu2 %vm12298_vm1, %v11152_v25  ;;  %vm5080_vm1 = vcmp.eq.s32.totalorder %v10924_v28, %v10296_v42  ;;  %v11221_v62 = vsel %vm5151_vm10, 1.0, %v12181_v54  ;;  %vm5153_vm10 = vcmp.eq.s32.totalorder %v12219_v22, %v11149_v1 }
0x10da   :  { %12312 = vst [vmem:[#allocation41_spill] sm:$0xff] %v11221_v62  ;;  %v11224_v2 = vsel %vm5080_vm1, 1.0, %v12181_v54  ;;  %vm5129_vm1 = vcmp.eq.s32.totalorder %v10937_v35, %v11070_v43  ;;  %v11272_v25 = vsel %vm5153_vm10, 1.0, %v12181_v54 }
0x10db   :  { %12313 = vst [vmem:[#allocation42_spill] sm:$0xff] %v11224_v2 }
0x10dc   :  { %12325 = vst [vmem:[#allocation48_spill] sm:$0xff] %v11272_v25 }
0x10df   :  { %6978 = vmatmul.msk.f32.vlgmr.msrb.gmra.mxu1 %vm12302_vm2, %v11171_v34  ;;  %vm12316_vm2 = vmmov %vm12282_vm0 }
0x10e0   :  { %6943 = vmatmul.msk.f32.gmra.mxu3 %vm12303_vm13, %v10793_v11  ;;  %6968 = vmatmul.msk.f32.gmra.mxu0 %vm12304_vm9, %v11174_v63  ;;  %vm12317_vm13 = vmmov %vm12282_vm0 }
0x10e1   :  { %6962 = vmatmul.msk.f32.gmra.mxu2 %vm12305_vm6, %v11177_v53  ;;  %vm12318_vm9 = vmmov %vm12282_vm0  ;;  %v11255_v53 = vsel %vm5128_vm5, 1.0, %v12181_v54 }
0x10e2   :  { %vm12319_vm6 = vmmov %vm12282_vm0  ;;  %12322 = vst [vmem:[#allocation47_spill] sm:$0xff] %v11255_v53 }
0x10e3   :  { %vm12336_vm5 = vmmov %vm12282_vm0 }
0x10e7   :  { %6979 = vmatmul.msk.f32.gmra.mxu1 %vm12309_vm4, %v11194_v37  ;;  %vm12323_vm4 = vmmov %vm12282_vm0 }
0x10e8   :  { %6944 = vmatmul.msk.f32.gmra.mxu3 %vm12310_vm11, %v10809_v10  ;;  %6969 = vmatmul.msk.f32.gmra.mxu0 %vm12282_vm0, %v11199_v55  ;;  %vm12324_vm11 = vmmov %vm12282_vm0 }
0x10e9   :  { %6963 = vmatmul.msk.f32.gmra.mxu2 %vm12311_vm12, %v11202_v14  ;;  %v11252_v14 = vsel %vm5081_vm3, 1.0, %v12181_v54  ;;  %vm5082_vm12 = vcmp.eq.s32.totalorder %v10951_v24, %v10296_v42  ;;  %vm12335_vm3 = vmmov %vm12282_vm0 }
0x10ea   :  { %12321 = vst [vmem:[#allocation46_spill] sm:$0xff] %v11252_v14  ;;  %v11275_v48 = vsel %vm5082_vm12, 1.0, %v12181_v54 }
0x10eb   :  { %12326 = vst [vmem:[#allocation49_spill] sm:$0xff] %v11275_v48 }
0x10ef   :  { %6980 = vmatmul.msk.f32.gmra.mxu1 %vm12316_vm2, %v11221_v62  ;;  %vm12330_vm2 = vmmov %vm12282_vm0 }
0x10f0   :  { %6945 = vmatmul.msk.f32.gmra.mxu3 %vm12317_vm13, %v11224_v2  ;;  %6970 = vmatmul.msk.f32.gmra.mxu0 %vm12318_vm9, %v11227_v5  ;;  %vm5154_vm13 = vcmp.eq.s32.totalorder %v12223_v49, %v11149_v1  ;;  %vm5083_vm9 = vcmp.eq.s32.totalorder %v10969_v3, %v10296_v42  ;;  %vm12340_vm10 = vmmov %vm12330_vm2 }
0x10f1   :  { %6964 = vmatmul.msk.f32.gmra.mxu2 %vm12319_vm6, %v11230_v19  ;;  %v11263_v19 = vpop.f32.mrf.mxu1  ;;  %vm12334_vm6 = vmmov %vm12282_vm0 }
0x10f2   :  { %vm12341_vm12 = vmmov %vm12330_vm2 }
0x10f7   :  { %6981 = vmatmul.msk.f32.gmra.mxu1 %vm12323_vm4, %v11249_v47  ;;  %v11278_v47 = vsel %vm5129_vm1, 1.0, %v12181_v54  ;;  %vm5155_vm4 = vcmp.eq.s32.totalorder %v10924_v28, %v11149_v1  ;;  %vm12342_vm1 = vmmov %vm12330_vm2 }
0x10f8   :  { %6946 = vmatmul.msk.f32.gmra.mxu3 %vm12324_vm11, %v11252_v14  ;;  %6971 = vmatmul.msk.f32.gmra.mxu0 %vm12282_vm0, %v11255_v53  ;;  %12327 = vst [vmem:[#allocation50_spill] sm:$0xff] %v11278_v47  ;;  %v11295_v14 = vsel %vm5154_vm13, 1.0, %v12181_v54  ;;  %vm5084_vm11 = vcmp.eq.s32.totalorder %v10983_v33, %v10296_v42  ;;  %vm5131_vm0 = vcmp.eq.s32.totalorder %v10969_v3, %v11070_v43  ;;  %vm12346_vm13 = vmmov %vm12342_vm1 }
0x10f9   :  { %v11292_v53 = vpop.f32.mrf.mxu1  ;;  %12331 = vst [vmem:[#allocation51_spill] sm:$0xff] %v11295_v14 }
0x10ff   :  { %6982 = vmatmul.msk.f32.gmra.mxu1 %vm12328_vm8, %v11272_v25  ;;  %v11298_v25 = vsel %vm5083_vm9, 1.0, %v12181_v54  ;;  %vm5156_vm8 = vcmp.eq.s32.totalorder %v10937_v35, %v11149_v1  ;;  %vm12347_vm9 = vmmov %vm12342_vm1 }
0x1100   :  { %6947 = vmatmul.msk.f32.gmra.mxu3 %vm12329_vm15, %v11275_v48  ;;  %6972 = vmatmul.msk.f32.gmra.mxu0 %vm12330_vm2, %v11278_v47  ;;  %12332 = vst [vmem:[#allocation52_spill] sm:$0xff] %v11298_v25  ;;  %v11301_v48 = vsel %vm5130_vm14, 1.0, %v12181_v54  ;;  %vm5085_vm15 = vcmp.eq.s32.totalorder %v10997_v41, %v10296_v42  ;;  %vm5132_vm2 = vcmp.eq.s32.totalorder %v10983_v33, %v11070_v43  ;;  %vm12348_vm14 = vmmov %vm12342_vm1 }
0x1101   :  { %12333 = vst [vmem:[#allocation53_spill] sm:$0xff] %v11301_v48 }
0x1106   :  { %v4998_v47 = vpop.f32.mrf.mxu3  ;;  %v5033_v40 = vpop.f32.mrf.mxu2 }
0x1107   :  { %v5034_v5 = vadd.f32 %v5033_v40, %v4998_v47  ;;  %6983 = vmatmul.msk.f32.gmra.mxu1 %vm12334_vm6, %v11295_v14  ;;  %v11317_v40 = vsel %vm5155_vm4, 1.0, %v12181_v54  ;;  %v11319_v47 = vpop.f32.mrf.mxu1  ;;  %v11322_v14 = vsel %vm5084_vm11, 1.0, %v12181_v54  ;;  %vm5157_vm6 = vcmp.eq.s32.totalorder %v10951_v24, %v11149_v1  ;;  %vm12352_vm4 = vmmov %vm12342_vm1 }
0x1108   :  { %6948 = vmatmul.msk.f32.gmra.mxu3 %vm12335_vm3, %v11298_v25  ;;  %6973 = vmatmul.msk.f32.gmra.mxu0 %vm12336_vm5, %v11301_v48  ;;  %12337 = vst [vmem:[#allocation54_spill] sm:$0xff] %v11317_v40  ;;  %v11325_v48 = vsel %vm5131_vm0, 1.0, %v12181_v54  ;;  %vm5086_vm3 = vcmp.eq.s32.totalorder %v11011_v21, %v10296_v42  ;;  %vm5133_vm5 = vcmp.eq.s32.totalorder %v10997_v41, %v11070_v43  ;;  %vm12353_vm11 = vmmov %vm12342_vm1 }
0x1109   :  { %7004 = vmatmul.msk.f32.vlgmr.msrb.gmra.mxu2 %vm1499_vm7, %v5034_v5  ;;  %12338 = vst [vmem:[#allocation55_spill] sm:$0xff] %v11322_v14  ;;  %vm12354_vm0 = vmmov %vm12342_vm1 }
0x110a   :  { %12339 = vst [vmem:[#allocation56_spill] sm:$0xff] %v11325_v48 }
0x110e   :  { %v5001_v5 = vpop.f32.mrf.mxu3  ;;  %v5036_v25 = vpop.f32.mrf.mxu2 }
0x110f   :  { %v5037_v62 = vadd.f32 %v5036_v25, %v5001_v5  ;;  %6984 = vmatmul.msk.f32.gmra.mxu1 %vm12340_vm10, %v11317_v40  ;;  %v11341_v25 = vsel %vm5156_vm8, 1.0, %v12181_v54  ;;  %v11344_v5 = vsel %vm5085_vm15, 1.0, %v12181_v54  ;;  %v11347_v40 = vsel %vm5132_vm2, 1.0, %v12181_v54  ;;  %vm12358_vm8 = vmmov %vm12354_vm0 }
0x1110   :  { %6949 = vmatmul.msk.f32.gmra.mxu3 %vm12341_vm12, %v11322_v14  ;;  %6974 = vmatmul.msk.f32.gmra.mxu0 %vm12342_vm1, %v11325_v48  ;;  %12343 = vst [vmem:[#allocation57_spill] sm:$0xff] %v11341_v25  ;;  %v11349_v14 = vpop.f32.mrf.mxu1  ;;  %vm5158_vm10 = vcmp.eq.s32.totalorder %v10969_v3, %v11149_v1  ;;  %vm5134_vm1 = vcmp.eq.s32.totalorder %v11011_v21, %v11070_v43  ;;  %vm12359_vm15 = vmmov %vm12354_vm0 }
0x1111   :  { %7005 = vmatmul.msk.f32.gmra.mxu2 %vm1499_vm7, %v5037_v62  ;;  %12344 = vst [vmem:[#allocation58_spill] sm:$0xff] %v11344_v5  ;;  %vm12360_vm2 = vmmov %vm12354_vm0 }
0x1112   :  { %12345 = vst [vmem:[#allocation59_spill] sm:$0xff] %v11347_v40 }
0x1116   :  { %v5004_v48 = vpop.f32.mrf.mxu3  ;;  %v5039_v62 = vpop.f32.mrf.mxu2 }
0x1117   :  { %v5040_v2 = vadd.f32 %v5039_v62, %v5004_v48  ;;  %6985 = vmatmul.msk.f32.gmra.mxu1 %vm12346_vm13, %v11341_v25  ;;  %v11365_v48 = vsel %vm5157_vm6, 1.0, %v12181_v54  ;;  %v11368_v62 = vsel %vm5086_vm3, 1.0, %v12181_v54  ;;  %v11371_v25 = vsel %vm5133_vm5, 1.0, %v12181_v54  ;;  %vm12364_vm6 = vmmov %vm12354_vm0 }
0x1118   :  { %6950 = vmatmul.msk.f32.gmra.mxu3 %vm12347_vm9, %v11344_v5  ;;  %6975 = vmatmul.msk.f32.gmra.mxu0 %vm12348_vm14, %v11347_v40  ;;  %12349 = vst [vmem:[#allocation60_spill] sm:$0xff] %v11365_v48  ;;  %v11374_v5 = vadd.s32 5, %v10289_v29  ;;  %v11382_v42 = vpop.f32.mrf.mxu1  ;;  %v11392_v29 = vsel %vm5158_vm10, 1.0, %v12181_v54  ;;  %vm5159_vm13 = vcmp.eq.s32.totalorder %v10983_v33, %v11149_v1  ;;  %vm12363_vm14 = vmmov %vm12354_vm0  ;;  %vm5160_vm3 = vcmp.eq.s32.totalorder %v10997_v41, %v11149_v1 }
0x1119   :  { %7006 = vmatmul.msk.f32.gmra.mxu2 %vm1499_vm7, %v5040_v2  ;;  %12350 = vst [vmem:[#allocation61_spill] sm:$0xff] %v11368_v62  ;;  %v11414_v43 = vsel %vm5159_vm13, 1.0, %v12181_v54  ;;  %vm12371_vm10 = vmmov %vm12360_vm2 }
0x111a   :  { %12351 = vst [vmem:[#allocation62_spill] sm:$0xff] %v11371_v25  ;;  %vm5176_vm12 = vcmp.eq.s32.totalorder %v12233_v27, %v11374_v5  ;;  %vm5177_vm9 = vcmp.eq.s32.totalorder %v12272_v61, %v11374_v5  ;;  %vm5178_vm5 = vcmp.eq.s32.totalorder %v12277_v51, %v11374_v5  ;;  %v11429_v61 = vsel %vm5160_vm3, 1.0, %v12181_v54 }
0x111b   :  { %12355 = vst [vmem:[#allocation63_spill] sm:$0xff] %v11392_v29  ;;  %vm5182_vm13 = vcmp.eq.s32.totalorder %v10924_v28, %v11374_v5  ;;  %vm5184_vm3 = vcmp.eq.s32.totalorder %v10951_v24, %v11374_v5 }
0x111c   :  { %12361 = vst [vmem:[#allocation66_spill] sm:$0xff] %v11414_v43 }
0x111d   :  { %12365 = vst [vmem:[#allocation68_spill] sm:$0xff] %v11429_v61 }
0x111e   :  { %v5007_v40 = vpop.f32.mrf.mxu3  ;;  %v5042_v2 = vpop.f32.mrf.mxu2 }
0x111f   :  { %v5043_v12 = vadd.f32 %v5042_v2, %v5007_v40  ;;  %6986 = vmatmul.msk.f32.gmra.mxu1 %vm12352_vm4, %v11365_v48  ;;  %v11395_v40 = vsel %vm5176_vm12, 1.0, %v12181_v54  ;;  %v11398_v2 = vsel %vm5134_vm1, 1.0, %v12181_v54  ;;  %vm12367_vm4 = vmmov %vm12354_vm0  ;;  %vm5180_vm1 = vcmp.eq.s32.totalorder %v12219_v22, %v11374_v5 }
0x1120   :  { %6951 = vmatmul.msk.f32.gmra.mxu3 %vm12353_vm11, %v11368_v62  ;;  %6976 = vmatmul.msk.f32.gmra.mxu0 %vm12354_vm0, %v11371_v25  ;;  %12356 = vst [vmem:[#allocation64_spill] sm:$0xff] %v11395_v40  ;;  %v11411_v27 = vpop.f32.mrf.mxu1  ;;  %vm12368_vm11 = vmmov %vm12354_vm0  ;;  %vm5179_vm0 = vcmp.eq.s32.totalorder %v12215_v46, %v11374_v5  ;;  %v11463_v46 = vsel %vm5180_vm1, 1.0, %v12181_v54  ;;  %vm5188_vm1 = vcmp.eq.s32.totalorder %v11011_v21, %v11374_v5 }
0x1121   :  { %7007 = vmatmul.msk.f32.gmra.mxu2 %vm1499_vm7, %v5043_v12  ;;  %12357 = vst [vmem:[#allocation65_spill] sm:$0xff] %v11398_v2  ;;  %vm12372_vm12 = vmmov %vm12360_vm2 }
0x1122   :  { %12373 = vst [vmem:[#allocation72_spill] sm:$0xff] %v11463_v46 }
0x1126   :  { %v5010_v25 = vpop.f32.mrf.mxu3  ;;  %v5045_v12 = vpop.f32.mrf.mxu2 }
0x1127   :  { %v5046_v48 = vadd.f32 %v5045_v12, %v5010_v25  ;;  %6987 = vmatmul.msk.f32.gmra.mxu1 %vm12358_vm8, %v11392_v29  ;;  %v11417_v25 = vsel %vm5177_vm9, 1.0, %v12181_v54  ;;  %vm12374_vm8 = vmmov %vm12360_vm2 }
0x1128   :  { %6991 = vmatmul.msk.f32.vlgmr.msra.gmra.mxu3 %vm12359_vm15, %v11395_v40  ;;  %6977 = vmatmul.msk.f32.gmra.mxu0 %vm12360_vm2, %v11398_v2  ;;  %12362 = vst [vmem:[#allocation67_spill] sm:$0xff] %v11417_v25  ;;  %vm5181_vm15 = vcmp.eq.s32.totalorder %v12223_v49, %v11374_v5  ;;  %v11489_v2 = vsel %vm5182_vm13, 1.0, %v12181_v54  ;;  %vm12377_vm9 = vmmov %vm12360_vm2 }
0x1129   :  { %7008 = vmatmul.msk.f32.gmra.mxu2 %vm1499_vm7, %v5046_v48  ;;  %v11431_v48 = vpop.f32.mrf.mxu1  ;;  %12376 = vst [vmem:[#allocation74_spill] sm:$0xff] %v11489_v2 }
0x112e   :  { %v5013_v12 = vpop.f32.mrf.mxu3  ;;  %v5048_v29 = vpop.f32.mrf.mxu2 }
0x112f   :  { %v5049_v40 = vadd.f32 %v5048_v29, %v5013_v12  ;;  %6988 = vmatmul.msk.f32.gmra.mxu1 %vm12363_vm14, %v11414_v43  ;;  %v11434_v29 = vsel %vm5178_vm5, 1.0, %v12181_v54  ;;  %v11450_v12 = vsel %vm5179_vm0, 1.0, %v12181_v54  ;;  %vm5183_vm14 = vcmp.eq.s32.totalorder %v10937_v35, %v11374_v5  ;;  %vm12381_vm5 = vmmov %vm12360_vm2 }
0x1130   :  { %6992 = vmatmul.msk.f32.gmra.mxu3 %vm12364_vm6, %v11417_v25  ;;  %12366 = vst [vmem:[#allocation69_spill] sm:$0xff] %v11434_v29  ;;  %v11500_v28 = vsel %vm5183_vm14, 1.0, %v12181_v54  ;;  %vm12379_vm6 = vmmov %vm12360_vm2  ;;  %v11511_v35 = vsel %vm5184_vm3, 1.0, %v12181_v54 }
0x1131   :  { %7009 = vmatmul.msk.f32.gmra.mxu2 %vm1499_vm7, %v5049_v40  ;;  %vm5161_vm7 = vcmp.eq.s32.totalorder %v11011_v21, %v11149_v1  ;;  %12370 = vst [vmem:[#allocation71_spill] sm:$0xff] %v11450_v12  ;;  %v11452_v43 = vpop.f32.mrf.mxu1  ;;  %vm12385_vm0 = vmmov %vm12360_vm2 }
0x1132   :  { %v11445_v51 = vsel %vm5161_vm7, 1.0, %v12181_v54  ;;  %12378 = vst [vmem:[#allocation75_spill] sm:$0xff] %v11500_v28  ;;  %vm5186_vm7 = vcmp.eq.s32.totalorder %v10983_v33, %v11374_v5  ;;  %vm12394_vm13 = vmmov %vm12385_vm0 }
0x1133   :  { %12369 = vst [vmem:[#allocation70_spill] sm:$0xff] %v11445_v51  ;;  %vm12396_vm14 = vmmov %vm12385_vm0 }
0x1134   :  { %12380 = vst [vmem:[#allocation76_spill] sm:$0xff] %v11511_v35  ;;  %vm12399_vm3 = vmmov %vm12385_vm0 }
0x1137   :  { %6989 = vmatmul.msk.f32.gmra.mxu1 %vm12367_vm4, %v11429_v61  ;;  %vm5185_vm4 = vcmp.eq.s32.totalorder %v10969_v3, %v11374_v5 }
0x1138   :  { %6993 = vmatmul.msk.f32.gmra.mxu3 %vm12368_vm11, %v11434_v29  ;;  %vm12383_vm11 = vmmov %vm12360_vm2 }
0x1139   :  { %v11469_v29 = vpop.f32.mrf.mxu1 }
0x113b   :  { %v11447_v40 = vpop.f32.mrf.mxu2 }
0x113f   :  { %6990 = vmatmul.msk.f32.gmra.mxu1 %vm12371_vm10, %v11445_v51  ;;  %vm5187_vm10 = vcmp.eq.s32.totalorder %v10997_v41, %v11374_v5  ;;  %v11557_v41 = vsel %vm5188_vm1, 1.0, %v12181_v54  ;;  %v11570_v5 = vld [vmem:[#allocation2] ss:$0 sm:$0xff] }
0x1140   :  { %6994 = vmatmul.msk.f32.gmra.mxu3 %vm12372_vm12, %v11450_v12  ;;  %v11476_v12 = vsel %vm5181_vm15, 1.0, %v12181_v54  ;;  %v11544_v11 = vsel %vm5187_vm10, 1.0, %v12181_v54  ;;  %vm12388_vm12 = vmmov %vm12385_vm0  ;;  %12390 = vst [vmem:[#allocation82_spill] sm:$0xff] %v11557_v41  ;;  %v5350_v57 = vadd.f32 %v11570_v5, %v11196_v60  ;;  %vm5992_vm15 = vcmask 7168  }
0x1141   :  { %12375 = vst [vmem:[#allocation73_spill] sm:$0xff] %v11476_v12  ;;  %v11484_v25 = vpop.f32.mrf.mxu1 }
0x1142   :  { %v11458_v1 = vpop.f32.mrf.mxu3  ;;  %12387 = vst [vmem:[#allocation80_spill] sm:$0xff] %v11544_v11 }
0x1144   :  { %v11465_v61 = vpop.f32.mrf.mxu2 }
0x1148   :  { %6995 = vmatmul.msk.f32.gmra.mxu3 %vm12374_vm8, %v11463_v46  ;;  %vm12391_vm8 = vmmov %vm12385_vm0 }
0x1149   :  { %v5562_v62 = vpop.f32.mrf.mxu1 }
0x114b   :  { %v11473_v51 = vpop.f32.mrf.mxu3 }
0x114c   :  { %v11480_v22 = vpop.f32.mrf.mxu2 }
0x1150   :  { %6996 = vmatmul.msk.f32.gmra.mxu3 %vm12360_vm2, %v11476_v12  ;;  %vm12392_vm2 = vmmov %vm12385_vm0 }
0x1151   :  { %v5565_v37 = vpop.f32.mrf.mxu1  ;;  %vm12409_vm10 = vmmov %vm12392_vm2 }
0x1152   :  { %vm12413_vm1 = vmmov %vm12392_vm2 }
0x1153   :  { %v11486_v46 = vpop.f32.mrf.mxu3 }
0x1154   :  { %v11495_v49 = vpop.f32.mrf.mxu2 }
0x1158   :  { %6997 = vmatmul.msk.f32.gmra.mxu3 %vm12377_vm9, %v11489_v2  ;;  %vm12395_vm9 = vmmov %vm12385_vm0 }
0x1159   :  { %v5568_v17 = vpop.f32.mrf.mxu1 }
0x115b   :  { %v11497_v12 = vpop.f32.mrf.mxu3 }
0x115c   :  { %v11508_v2 = vpop.f32.mrf.mxu2 }
0x1160   :  { %6998 = vmatmul.msk.f32.gmra.mxu3 %vm12379_vm6, %v11500_v28  ;;  %v11520_v28 = vsel %vm5185_vm4, 1.0, %v12181_v54  ;;  %vm12397_vm6 = vmmov %vm12385_vm0 }
0x1161   :  { %12382 = vst [vmem:[#allocation77_spill] sm:$0xff] %v11520_v28  ;;  %v11539_v34 = vpop.f32.mrf.mxu1  ;;  %vm12401_vm4 = vmmov %vm12385_vm0 }
0x1163   :  { %v11506_v55 = vpop.f32.mrf.mxu3 }
0x1164   :  { %v11522_v24 = vpop.f32.mrf.mxu2 }
0x1168   :  { %6999 = vmatmul.msk.f32.gmra.mxu3 %vm12381_vm5, %v11511_v35  ;;  %v11531_v35 = vsel %vm5186_vm7, 1.0, %v12181_v54  ;;  %v5349_v54 = vadd.f32 %v11570_v5, %v11166_v4  ;;  %v5351_v4 = vadd.f32 %v11570_v5, %v11232_v36  ;;  %vm12400_vm5 = vmmov %vm12385_vm0 }
0x1169   :  { %12384 = vst [vmem:[#allocation78_spill] sm:$0xff] %v11531_v35  ;;  %v11554_v7 = vpop.f32.mrf.mxu1  ;;  %vm12407_vm7 = vmmov %vm12385_vm0 }
0x116a   :  { %v5475_v26 = vadd.f32 %v11458_v1, %v5349_v54 }
0x116b   :  { %v11517_v10 = vpop.f32.mrf.mxu3 }
0x116c   :  { %v11535_v3 = vpop.f32.mrf.mxu2  ;;  %v5601_v8 = vadd.f32 %v5562_v62, %v5475_v26 }
0x116d   :  { %12386 = vst [vmem:[#allocation79_spill] sm:$0xff] %v11535_v3 }
0x1170   :  { %7000 = vmatmul.msk.f32.gmra.mxu3 %vm12383_vm11, %v11520_v28  ;;  %vm12404_vm11 = vmmov %vm12385_vm0 }
0x1171   :  { %v5814_v15 = vpop.f32.mrf.mxu1 }
0x1173   :  { %v11528_v63 = vpop.f32.mrf.mxu3 }
0x1174   :  { %v11548_v33 = vpop.f32.mrf.mxu2 }
0x1175   :  { %12389 = vst [vmem:[#allocation81_spill] sm:$0xff] %v11548_v33  ;;  %v5476_v33 = vadd.f32 %v11473_v51, %v5350_v57 }
0x1177   :  { %v5602_v26 = vadd.f32 %v5565_v37, %v5476_v33 }
0x1178   :  { %7001 = vmatmul.msk.f32.gmra.mxu3 %vm12385_vm0, %v11531_v35  ;;  %vm6005_vm0 = vcmask 3072  }
0x117b   :  { %v11541_v28 = vpop.f32.mrf.mxu3 }
0x1180   :  { %7002 = vmatmul.msk.f32.gmra.mxu3 %vm12388_vm12, %v11544_v11  ;;  %v5688_v11 = vpop.f32.mrf.mxu0  ;;  %vm12411_vm12 = vmmov %vm12392_vm2 }
0x1181   :  { %v5727_v39 = vadd.f32 %v5688_v11, %v5601_v8  ;;  %v5477_v11 = vadd.f32 %v11486_v46, %v5351_v4 }
0x1183   :  { %v11552_v35 = vpop.f32.mrf.mxu3  ;;  %v5853_v60 = vadd.f32 %v5814_v15, %v5727_v39  ;;  %v5352_v39 = vadd.f32 %v11570_v5, %v11263_v19 }
0x1185   :  { %v5478_v46 = vadd.f32 %v11497_v12, %v5352_v39 }
0x1188   :  { %7003 = vmatmul.msk.f32.gmra.mxu3 %vm12391_vm8, %v11557_v41  ;;  %v5691_v6 = vpop.f32.mrf.mxu0  ;;  %v5817_v41 = vpop.f32.mrf.mxu1  ;;  %vm12415_vm8 = vmmov %vm12413_vm1 }
0x1189   :  { %v5728_v54 = vadd.f32 %v5691_v6, %v5602_v26  ;;  %v5603_v6 = vadd.f32 %v5568_v17, %v5477_v11  ;;  %v5604_v17 = vadd.f32 %v11539_v34, %v5478_v46  ;;  %v5354_v34 = vadd.f32 %v11570_v5, %v11319_v47 }
0x118b   :  { %v11561_v30 = vpop.f32.mrf.mxu3  ;;  %v5854_v15 = vadd.f32 %v5817_v41, %v5728_v54 }
0x118c   :  { %v11563_v13 = vpop.f32.mrf.mxu2 }
0x1190   :  { %v5694_v38 = vpop.f32.mrf.mxu0  ;;  %v5820_v16 = vpop.f32.mrf.mxu1 }
0x1191   :  { %v5729_v36 = vadd.f32 %v5694_v38, %v5603_v6  ;;  %v5353_v38 = vadd.f32 %v11570_v5, %v11292_v53 }
0x1193   :  { %v11565_v32 = vpop.f32.mrf.mxu3  ;;  %v5855_v19 = vadd.f32 %v5820_v16, %v5729_v36  ;;  %v5479_v54 = vadd.f32 %v11506_v55, %v5353_v38 }
0x1194   :  { %v6045_v9 = vpop.f32.mrf.mxu2 }
0x1195   :  { %v11568_v21 = vpack.i.bf16 %v11563_v13, %v6045_v9 }
0x1197   :  { %7246 = vrot.lane.b32.xlu2 %v11568_v21, %s7422_s19 }
0x1198   :  { %v5697_v62 = vpop.f32.mrf.mxu0  ;;  %v5823_v51 = vpop.f32.mrf.mxu1 }
0x1199   :  { %v5730_v41 = vadd.f32 %v5697_v62, %v5604_v17 }
0x119b   :  { %v11576_v50 = vpop.f32.mrf.mxu3  ;;  %v5856_v16 = vadd.f32 %v5823_v51, %v5730_v41  ;;  %v5355_v51 = vadd.f32 %v11570_v5, %v11349_v14  ;;  %v5356_v14 = vadd.f32 %v11570_v5, %v11382_v42  ;;  %v5357_v42 = vadd.f32 %v11570_v5, %v11411_v27 }
0x119c   :  { %v6048_v52 = vpop.f32.mrf.mxu2 }
0x11a0   :  { %v5700_v26 = vpop.f32.mrf.mxu0 }
0x11a3   :  { %v11581_v58 = vpop.f32.mrf.mxu3 }
0x11a4   :  { %v6051_v59 = vpop.f32.mrf.mxu2 }
0x11a5   :  { %v11584_v3 = vpack.i.bf16 %v6048_v52, %v6051_v59 }
0x11a7   :  { %7256 = vrot.lane.b32.xlu0 %v11584_v3, %s7421_s22  ;;  %7251 = vrot.lane.b32.xlu2 %v11584_v3, %s7423_s9 }
0x11a8   :  { %v5703_v53 = vpop.f32.mrf.mxu0 }
0x11ab   :  { %v5940_v1 = vpop.f32.mrf.mxu3 }
0x11ac   :  { %v5979_v57 = vadd.f32 %v5940_v1, %v5853_v60  ;;  %v6054_v8 = vpop.f32.mrf.mxu2  ;;  %v5826_v1 = vpop.f32.mrf.mxu1 }
0x11ae   :  { %5993 = vst.msk [vmem:[%s12013_s24] sm:$0xff] %vm5992_vm15, %v5979_v57  ;;  %v12393_v57 = vld [vmem:[#allocation33_spill] sm:$0xff] }
0x11af   :  { %7266 = vrot.lane.b32.xlu0 %v11584_v3, %s7424_s15  ;;  %7261 = vrot.lane.b32.xlu2 %v11568_v21, %s7423_s9 }
0x11b3   :  { %v5943_v37 = vpop.f32.mrf.mxu3 }
0x11b4   :  { %v5980_v33 = vadd.f32 %v5943_v37, %v5854_v15  ;;  %v6057_v4 = vpop.f32.mrf.mxu2  ;;  %v5481_v15 = vadd.f32 %v11528_v63, %v5355_v51  ;;  %v12403_v51 = vld [vmem:[#allocation27_spill] sm:$0xff] }
0x11b5   :  { %6075 = vmatpush.msra.mxu0 %v6057_v4  ;;  %v7280_v60 = vpack.i.bf16 %v6054_v8, %v6057_v4  ;;  %v5482_v4 = vadd.f32 %v11541_v28, %v5356_v14 }
0x11b6   :  { %5994 = vst.msk [vmem:[%s12013_s24 + $0x8] sm:$0xff] %vm5992_vm15, %v5980_v33 }
0x11b7   :  { %7271 = vrot.lane.b32.xlu2 %v11568_v21, %s7421_s22  ;;  %7281 = vrot.lane.b32.xlu0 %v7280_v60, %s7421_s22 }
0x11b8   :  { %7231 = vrot.lane.b32.xlu1 %v7280_v60, %s7422_s19  ;;  %6076 = vmatpush.msra.mxu0 %v6054_v8 }
0x11ba   :  { %6077 = vmatpush.msra.mxu0 %v6051_v59  ;;  %v5605_v59 = vadd.f32 %v11554_v7, %v5479_v54 }
0x11bb   :  { %v5946_v12 = vpop.f32.mrf.mxu3 }
0x11bc   :  { %v5981_v11 = vadd.f32 %v5946_v12, %v5855_v19  ;;  %6078 = vmatpush.msra.mxu0 %v6048_v52  ;;  %v5829_v52 = vpop.f32.mrf.mxu1  ;;  %v5731_v55 = vadd.f32 %v5700_v26, %v5605_v59 }
0x11be   :  { %5995 = vst.msk [vmem:[%s12013_s24 + $0x10] sm:$0xff] %vm5992_vm15, %v5981_v11  ;;  %6079 = vmatpush.msra.mxu0 %v6045_v9  ;;  %v5857_v7 = vadd.f32 %v5826_v1, %v5731_v55 }
0x11bf   :  { %7306 = vrot.lane.b32.xlu2 %v11568_v21, %s7425_s23  ;;  %7301 = vrot.lane.b32.xlu0 %v11568_v21, %s7424_s15  ;;  %v3488_v21 = vperm.slane %v12393_v57, 0 }
0x11c0   :  { %7236 = vrot.lane.b32.xlu1 %v11584_v3, %s7422_s19  ;;  %6080 = vmatpush.msra.mxu0 %v11563_v13  ;;  %v5480_v13 = vadd.f32 %v11517_v10, %v5354_v34 }
0x11c1   :  { %7010 = vmatmul.msk.f32.vlgmr.msra.gmra.mxu0 %vm12392_vm2, %v10312_v18  ;;  %v5706_v18 = vpop.f32.mrf.mxu0  ;;  %vm12416_vm2 = vcmask 253952  }
0x11c2   :  { %v5606_v39 = vadd.f32 %v11447_v40, %v5480_v13  ;;  %v5607_v40 = vadd.f32 %v11465_v61, %v5481_v15  ;;  %v5608_v61 = vadd.f32 %v11480_v22, %v5482_v4  ;;  %v5358_v22 = vadd.f32 %v11570_v5, %v11431_v48 }
0x11c3   :  { %v5949_v9 = vpop.f32.mrf.mxu3 }
0x11c4   :  { %v5982_v62 = vadd.f32 %v5949_v9, %v5856_v16  ;;  %v5832_v47 = vpop.f32.mrf.mxu1  ;;  %v5732_v10 = vadd.f32 %v5703_v53, %v5606_v39  ;;  %v5733_v63 = vadd.f32 %v5706_v18, %v5607_v40  ;;  %v5484_v11 = vadd.f32 %v11561_v30, %v5358_v22  ;;  %v12408_v40 = vld [vmem:[#allocation19_spill] sm:$0xff] }
0x11c5   :  { %v5359_v53 = vadd.f32 %v11570_v5, %v11452_v43  ;;  %v5360_v43 = vadd.f32 %v11570_v5, %v11469_v29  ;;  %v5361_v29 = vadd.f32 %v11570_v5, %v11484_v25 }
0x11c6   :  { %5996 = vst.msk [vmem:[%s12013_s24 + $0x18] sm:$0xff] %vm5992_vm15, %v5982_v62  ;;  %v5610_v59 = vadd.f32 %v11508_v2, %v5484_v11 }
0x11c7   :  { %3489 = vrot.lane.b32.xlu0 %v3488_v21, %s7419_s27 }
0x11c8   :  { %7276 = vrot.lane.b32.xlu1 %v7280_v60, %s7423_s9 }
0x11c9   :  { %7011 = vmatmul.msk.f32.gmra.mxu0 %vm12394_vm13, %v10333_v23  ;;  %v5858_v23 = vadd.f32 %v5829_v52, %v5732_v10  ;;  %v5709_v37 = vpop.f32.mrf.mxu0  ;;  %v5485_v52 = vadd.f32 %v11565_v32, %v5359_v53  ;;  %v5486_v32 = vadd.f32 %v11576_v50, %v5360_v43  ;;  %v5487_v50 = vadd.f32 %v11581_v58, %v5361_v29  ;;  %vm12418_vm13 = vmmov %vm12413_vm1 }
0x11ca   :  { %v5734_v17 = vadd.f32 %v5709_v37, %v5608_v61  ;;  %v12406_v37 = vld [vmem:[#allocation20_spill] sm:$0xff] }
0x11cb   :  { %v5952_v8 = vpop.f32.mrf.mxu3  ;;  %v5611_v2 = vadd.f32 %v11522_v24, %v5485_v52 }
0x11cc   :  { %v5983_v6 = vadd.f32 %v5952_v8, %v5857_v7  ;;  %v5835_v33 = vpop.f32.mrf.mxu1  ;;  %v12402_v7 = vld [vmem:[#allocation79_spill] sm:$0xff] }
0x11cd   :  { %v5612_v24 = vadd.f32 %v12402_v7, %v5486_v32 }
0x11ce   :  { %5997 = vst.msk [vmem:[%s12013_s24 + $0x20] sm:$0xff] %vm5992_vm15, %v5983_v6  ;;  %v12405_v6 = vld [vmem:[#allocation81_spill] sm:$0xff] }
0x11cf   :  { %v5613_v10 = vadd.f32 %v12405_v6, %v5487_v50  ;;  %v12429_v50 = vld [vmem:[#allocation26_spill] sm:$0xff] }
0x11d0   :  { %7286 = vrot.lane.b32.xlu1 %v7280_v60, %s7424_s15  ;;  %s7426_s15 = smov [#allocation3]  }
0x11d1   :  { %7012 = vmatmul.msk.f32.gmra.mxu0 %vm12395_vm9, %v10356_v31  ;;  %v5859_v31 = vadd.f32 %v5832_v47, %v5733_v63  ;;  %v5712_v38 = vpop.f32.mrf.mxu0  ;;  %v12410_v63 = vld [vmem:[#allocation18_spill] sm:$0xff]  ;;  %vm12420_vm9 = vmmov %vm12413_vm1 }
0x11d3   :  { %v5955_v36 = vpop.f32.mrf.mxu3 }
0x11d4   :  { %v5984_v46 = vadd.f32 %v5955_v36, %v5858_v23  ;;  %v5838_v28 = vpop.f32.mrf.mxu1 }
0x11d6   :  { %5998 = vst.msk [vmem:[%s12013_s24 + $0x28] sm:$0xff] %vm5992_vm15, %v5984_v46 }
0x11d8   :  { %7291 = vrot.lane.b32.xlu1 %v7280_v60, %s7425_s23  ;;  %v5483_v60 = vadd.f32 %v11552_v35, %v5357_v42  ;;  %v12398_v35 = vld [vmem:[#allocation32_spill] sm:$0xff] }
0x11d9   :  { %7013 = vmatmul.msk.f32.gmra.mxu0 %vm12396_vm14, %v10778_v45  ;;  %v5860_v45 = vadd.f32 %v5835_v33, %v5734_v17  ;;  %v3150_v41 = vperm.slane %v12398_v35, 0  ;;  %v5715_v54 = vpop.f32.mrf.mxu0  ;;  %vm12422_vm14 = vmmov %vm12413_vm1 }
0x11da   :  { %v5609_v19 = vadd.f32 %v11495_v49, %v5483_v60  ;;  %v5736_v30 = vadd.f32 %v5715_v54, %v5610_v59 }
0x11db   :  { %v5958_v26 = vpop.f32.mrf.mxu3 }
0x11dc   :  { %v5985_v1 = vadd.f32 %v5958_v26, %v5859_v31  ;;  %v12412_v26 = vld [vmem:[#allocation17_spill] sm:$0xff] }
0x11de   :  { %5999 = vst.msk [vmem:[%s12013_s24 + $0x30] sm:$0xff] %vm5992_vm15, %v5985_v1 }
0x11e0   :  { %7296 = vrot.lane.b32.xlu1 %v11584_v3, %s7425_s23  ;;  %v5735_v3 = vadd.f32 %v5712_v38, %v5609_v19  ;;  %s6596_s23 = sshll.u32 %s7426_s15, 4  ;;  %s6597_s23 = int_to_ptr.vmem [resolvable:$true] %s6596_s23 }
0x11e1   :  { %7014 = vmatmul.msk.f32.gmra.mxu0 %vm12397_vm6, %v10796_v56  ;;  %v5841_v56 = vpop.f32.mrf.mxu1  ;;  %v5718_v9 = vpop.f32.mrf.mxu0  ;;  %vm12424_vm6 = vmmov %vm12413_vm1  ;;  %6601 = dma.vmem_to_hbm [thread:$0]  %s6597_s23, 32, %s6599_s5, [#allocation4]  }
0x11e2   :  { %v5861_v48 = vadd.f32 %v5838_v28, %v5735_v3  ;;  %v5737_v57 = vadd.f32 %v5718_v9, %v5611_v2  ;;  %v12419_v9 = vld [vmem:[#allocation12_spill] sm:$0xff]  ;;  %v12421_v2 = vld [vmem:[#allocation35_spill] sm:$0xff] }
0x11e3   :  { %v5961_v27 = vpop.f32.mrf.mxu3 }
0x11e4   :  { %v5986_v12 = vadd.f32 %v5961_v27, %v5860_v45 }
0x11e6   :  { %6000 = vst.msk [vmem:[%s12013_s24 + $0x38] sm:$0xff] %vm5992_vm15, %v5986_v12 }
0x11e8   :  { %3151 = vrot.lane.b32.xlu1 %v3150_v41, %s7419_s27 }
0x11e9   :  { %7015 = vmatmul.msk.f32.gmra.mxu0 %vm12399_vm3, %v10812_v0  ;;  %v5862_v0 = vadd.f32 %v5841_v56, %v5736_v30  ;;  %v5844_v34 = vpop.f32.mrf.mxu1  ;;  %v5721_v21 = vpop.f32.mrf.mxu0  ;;  %v12414_v56 = vld [vmem:[#allocation16_spill] sm:$0xff]  ;;  %vm12426_vm3 = vmmov %vm12413_vm1 }
0x11ea   :  { %v5738_v8 = vadd.f32 %v5721_v21, %v5612_v24  ;;  %v12425_v21 = vld [vmem:[#allocation14_spill] sm:$0xff] }
0x11eb   :  { %v5964_v49 = vpop.f32.mrf.mxu3 }
0x11ec   :  { %v5987_v16 = vadd.f32 %v5964_v49, %v5861_v48 }
0x11ee   :  { %6001 = vst.msk [vmem:[%s12013_s24 + $0x40] sm:$0xff] %vm5992_vm15, %v5987_v16  ;;  %v12417_v16 = vld [vmem:[#allocation34_spill] sm:$0xff] }
0x11f1   :  { %7016 = vmatmul.msk.f32.gmra.mxu0 %vm12400_vm5, %v10934_v20  ;;  %v5863_v20 = vadd.f32 %v5844_v34, %v5737_v57  ;;  %v5847_v47 = vpop.f32.mrf.mxu1  ;;  %v5724_v5 = vpop.f32.mrf.mxu0  ;;  %vm12428_vm5 = vmmov %vm12413_vm1 }
0x11f2   :  { %v5739_v23 = vadd.f32 %v5724_v5, %v5613_v10  ;;  %v7247_v46 = vpop.permute.xlu2 %7246  ;;  %v12433_v10 = vld [vmem:[#allocation30_spill] sm:$0xff] }
0x11f3   :  { %v5967_v55 = vpop.f32.mrf.mxu3  ;;  %v7248_v11 = vunpack.i.l.bf16 %v7247_v46  ;;  %v7249_v48 = vunpack.i.h.bf16 %v7247_v46  ;;  %v12446_v46 = vld [vmem:[#allocation15_spill] sm:$0xff] }
0x11f4   :  { %v5988_v62 = vadd.f32 %v5967_v55, %v5862_v0 }
0x11f6   :  { %6002 = vst.msk [vmem:[%s12013_s24 + $0x48] sm:$0xff] %vm5992_vm15, %v5988_v62 }
0x11f9   :  { %7017 = vmatmul.msk.f32.gmra.mxu0 %vm12401_vm4, %v10944_v44  ;;  %v5864_v44 = vadd.f32 %v5847_v47, %v5738_v8  ;;  %v5850_v15 = vpop.f32.mrf.mxu1  ;;  %vm12430_vm4 = vmmov %vm12413_vm1 }
0x11fa   :  { %v5865_v58 = vadd.f32 %v5850_v15, %v5739_v23  ;;  %v12435_v15 = vld [vmem:[#allocation21_spill] sm:$0xff]  ;;  %v12437_v23 = vld [vmem:[#allocation24_spill] sm:$0xff] }
0x11fb   :  { %v5970_v13 = vpop.f32.mrf.mxu3 }
0x11fc   :  { %v5989_v18 = vadd.f32 %v5970_v13, %v5863_v20  ;;  %v12423_v20 = vld [vmem:[#allocation31_spill] sm:$0xff] }
0x11fe   :  { %6003 = vst.msk [vmem:[%s12013_s24 + $0x50] sm:$0xff] %vm5992_vm15, %v5989_v18  ;;  %v12427_v18 = vld [vmem:[#allocation36_spill] sm:$0xff] }
0x1201   :  { %7018 = vmatmul.msk.f32.gmra.mxu0 %vm12404_vm11, %v12403_v51  ;;  %v7252_v4 = vpop.permute.xlu2 %7251  ;;  %v12431_v51 = vld [vmem:[#allocation25_spill] sm:$0xff]  ;;  %vm12432_vm11 = vmmov %vm12413_vm1 }
0x1202   :  { %v7253_v52 = vunpack.i.l.bf16 %v7252_v4  ;;  %v7254_v0 = vunpack.i.h.bf16 %v7252_v4  ;;  %v12452_v4 = vld [vmem:[#allocation39_spill] sm:$0xff] }
0x1203   :  { %v5973_v39 = vpop.f32.mrf.mxu3 }
0x1204   :  { %v5990_v25 = vadd.f32 %v5973_v39, %v5864_v44 }
0x1206   :  { %6004 = vst.msk [vmem:[%s12013_s24 + $0x58] sm:$0xff] %vm5992_vm15, %v5990_v25 }
0x1209   :  { %7019 = vmatmul.msk.f32.gmra.mxu0 %vm12407_vm7, %v12406_v37  ;;  %v7262_v42 = vpop.permute.xlu2 %7261  ;;  %vm12434_vm7 = vmmov %vm12413_vm1 }
0x120a   :  { %v7263_v55 = vunpack.i.l.bf16 %v7262_v42  ;;  %v7264_v62 = vunpack.i.h.bf16 %v7262_v42  ;;  %v12458_v42 = vld [vmem:[#allocation41_spill] sm:$0xff] }
0x120b   :  { %v5976_v36 = vpop.f32.mrf.mxu3 }
0x120c   :  { %v5991_v14 = vadd.f32 %v5976_v36, %v5865_v58  ;;  %v12440_v36 = vld [vmem:[#allocation29_spill] sm:$0xff] }
0x120e   :  { %6006 = vst.msk [vmem:[%s12013_s24 + $0x60] sm:$0xf] %vm6005_vm0, %v5991_v14  ;;  %v12442_v14 = vld [vmem:[#allocation10_spill] sm:$0xff] }
0x1211   :  { %7020 = vmatmul.msk.f32.gmra.mxu0 %vm12409_vm10, %v12408_v40  ;;  %v7272_v27 = vpop.permute.xlu2 %7271  ;;  %vm12436_vm10 = vmmov %vm12413_vm1  ;;  %v12444_v40 = vld [vmem:[#allocation11_spill] sm:$0xff] }
0x1212   :  { %v7273_v12 = vunpack.i.l.bf16 %v7272_v27  ;;  %v7274_v54 = vunpack.i.h.bf16 %v7272_v27  ;;  %v12474_v27 = vld [vmem:[#allocation48_spill] sm:$0xff] }
0x1219   :  { %v7257_v33 = vpop.permute.xlu0 %7256  ;;  %7021 = vmatmul.msk.f32.gmra.mxu0 %vm12411_vm12, %v12410_v63  ;;  %v7307_v6 = vpop.permute.xlu2 %7306  ;;  %vm12438_vm12 = vmmov %vm12413_vm1  ;;  %v12450_v63 = vld [vmem:[#allocation38_spill] sm:$0xff] }
0x121a   :  { %v7258_v45 = vunpack.i.l.bf16 %v7257_v33  ;;  %v7259_v22 = vunpack.i.h.bf16 %v7257_v33  ;;  %v7308_v5 = vunpack.i.l.bf16 %v7307_v6  ;;  %v7309_v37 = vunpack.i.h.bf16 %v7307_v6  ;;  %v12448_v33 = vld [vmem:[#allocation28_spill] sm:$0xff]  ;;  %v12528_v6 = vld [vmem:[#allocation73_spill] sm:$0xff] }
0x1221   :  { %v11733_v31 = vpop.permute.xlu0 %7266  ;;  %7022 = vmatmul.msk.f32.gmra.mxu0 %vm12413_vm1, %v12412_v26  ;;  %vm12439_vm1 = vmmov %vm12416_vm2  ;;  %v12456_v26 = vld [vmem:[#allocation42_spill] sm:$0xff] }
0x1222   :  { %v7268_v32 = vunpack.i.l.bf16 %v11733_v31  ;;  %v7269_v13 = vunpack.i.h.bf16 %v11733_v31  ;;  %v12454_v31 = vld [vmem:[#allocation13_spill] sm:$0xff] }
0x1229   :  { %v7282_v61 = vpop.permute.xlu0 %7281 }
0x122a   :  { %v7283_v1 = vunpack.i.l.bf16 %v7282_v61  ;;  %v7232_v38 = vpop.permute.xlu1 %7231  ;;  %v7284_v17 = vunpack.i.h.bf16 %v7282_v61  ;;  %v12460_v61 = vld [vmem:[#allocation43_spill] sm:$0xff] }
0x122b   :  { %v7233_v28 = vunpack.i.l.bf16 %v7232_v38  ;;  %v7234_v60 = vunpack.i.h.bf16 %v7232_v38  ;;  %v12464_v38 = vld [vmem:[#allocation46_spill] sm:$0xff] }
0x122c   :  { %6255 = vmatpush.msra.mxu1 %v7283_v1  ;;  %v12462_v1 = vld [vmem:[#allocation9_spill] sm:$0xff] }
0x122d   :  { %6168 = vmatpush.msra.mxu2 %v7233_v28  ;;  %v12466_v28 = vld [vmem:[#allocation45_spill] sm:$0xff] }
0x122e   :  { %6256 = vmatpush.msra.mxu1 %v7284_v17  ;;  %v12468_v17 = vld [vmem:[#allocation47_spill] sm:$0xff] }
0x122f   :  { %6169 = vmatpush.msra.mxu2 %v7234_v60  ;;  %v12470_v60 = vld [vmem:[#allocation23_spill] sm:$0xff] }
0x1230   :  { %6257 = vmatpush.msra.mxu1 %v7258_v45  ;;  %v12472_v45 = vld [vmem:[#allocation49_spill] sm:$0xff] }
0x1231   :  { %v7302_v19 = vpop.permute.xlu0 %7301 }
0x1232   :  { %v7237_v35 = vpop.permute.xlu1 %7236  ;;  %6258 = vmatpush.msra.mxu1 %v7259_v22  ;;  %v7303_v7 = vunpack.i.l.bf16 %v7302_v19  ;;  %v7304_v47 = vunpack.i.h.bf16 %v7302_v19  ;;  %v12476_v22 = vld [vmem:[#allocation50_spill] sm:$0xff] }
0x1233   :  { %v7238_v41 = vunpack.i.l.bf16 %v7237_v35  ;;  %v7239_v3 = vunpack.i.h.bf16 %v7237_v35  ;;  %v12478_v19 = vld [vmem:[#allocation22_spill] sm:$0xff]  ;;  %v12482_v35 = vld [vmem:[#allocation51_spill] sm:$0xff] }
0x1234   :  { %6259 = vmatpush.msra.mxu1 %v7273_v12  ;;  %v12480_v12 = vld [vmem:[#allocation52_spill] sm:$0xff] }
0x1235   :  { %6170 = vmatpush.msra.mxu2 %v7238_v41  ;;  %v12484_v41 = vld [vmem:[#allocation53_spill] sm:$0xff] }
0x1236   :  { %6260 = vmatpush.msra.mxu1 %v7274_v54  ;;  %v12486_v54 = vld [vmem:[#allocation37_spill] sm:$0xff] }
0x1237   :  { %6171 = vmatpush.msra.mxu2 %v7239_v3  ;;  %7036 = vmatmul.msk.f32.vlgmr.msra.gmra.mxu1 %vm12415_vm8, %v12414_v56  ;;  %vm12441_vm8 = vmmov %vm12426_vm3  ;;  %v12490_v56 = vld [vmem:[#allocation54_spill] sm:$0xff] }
0x1239   :  { %6172 = vmatpush.msra.mxu2 %v7248_v11  ;;  %v3490_v49 = vpop.permute.xlu0 %3489  ;;  %v12488_v11 = vld [vmem:[#allocation55_spill] sm:$0xff] }
0x123a   :  { %3492 = vst.msk [vmem:[#allocation5 + $0x1] sm:$0x1] %vm12416_vm2, %v3490_v49  ;;  %v7277_v53 = vpop.permute.xlu1 %7276  ;;  %vm12443_vm2 = vmmov %vm12426_vm3  ;;  %v12494_v49 = vld [vmem:[#allocation40_spill] sm:$0xff] }
0x123b   :  { %v7278_v59 = vunpack.i.l.bf16 %v7277_v53  ;;  %6173 = vmatpush.msra.mxu2 %v7249_v48  ;;  %v7279_v30 = vunpack.i.h.bf16 %v7277_v53  ;;  %v12492_v48 = vld [vmem:[#allocation56_spill] sm:$0xff] }
0x123c   :  { %7023 = vmatmul.msk.f32.vlgmr.msra.gmra.mxu2 %vm12418_vm13, %v12417_v16  ;;  %vm12445_vm13 = vmmov %vm12443_vm2  ;;  %v12497_v16 = vld [vmem:[#allocation57_spill] sm:$0xff] }
0x123d   :  { %6342 = vmatpush.msrb.mxu3 %v7278_v59  ;;  %v12495_v59 = vld [vmem:[#allocation58_spill] sm:$0xff] }
0x123e   :  { %v11813_v3 = vpop.f32.mrf.mxu0 }
0x123f   :  { %6343 = vmatpush.msrb.mxu3 %v7279_v30  ;;  %7037 = vmatmul.msk.f32.gmra.mxu1 %vm12420_vm9, %v12419_v9  ;;  %vm12447_vm9 = vmmov %vm12443_vm2  ;;  %v12499_v30 = vld [vmem:[#allocation59_spill] sm:$0xff]  ;;  %v12503_v9 = vld [vmem:[#allocation61_spill] sm:$0xff] }
0x1241   :  { %6344 = vmatpush.msrb.mxu3 %v7253_v52  ;;  %v12501_v52 = vld [vmem:[#allocation44_spill] sm:$0xff] }
0x1242   :  { %v7287_v34 = vpop.permute.xlu1 %7286 }
0x1243   :  { %v7288_v43 = vunpack.i.l.bf16 %v7287_v34  ;;  %6345 = vmatpush.msrb.mxu3 %v7254_v0  ;;  %v7289_v57 = vunpack.i.h.bf16 %v7287_v34  ;;  %v12505_v0 = vld [vmem:[#allocation60_spill] sm:$0xff] }
0x1244   :  { %7024 = vmatmul.msk.f32.gmra.mxu2 %vm12422_vm14, %v12421_v2  ;;  %vm12449_vm14 = vmmov %vm12443_vm2  ;;  %v12511_v2 = vld [vmem:[#allocation63_spill] sm:$0xff] }
0x1245   :  { %6346 = vmatpush.msrb.mxu3 %v7263_v55  ;;  %6516 = vmatpush.msrb.mxu2 %v7288_v43  ;;  %v12507_v55 = vld [vmem:[#allocation62_spill] sm:$0xff]  ;;  %v12509_v43 = vld [vmem:[#allocation64_spill] sm:$0xff] }
0x1246   :  { %v11823_v53 = vpop.f32.mrf.mxu0 }
0x1247   :  { %6347 = vmatpush.msrb.mxu3 %v7264_v62  ;;  %6517 = vmatpush.msrb.mxu2 %v7289_v57  ;;  %v12513_v57 = vld [vmem:[#allocation65_spill] sm:$0xff] }
0x1248   :  { %7049 = vmatmul.msk.f32.vlgmr.msrb.gmra.mxu3 %vm12424_vm6, %v12423_v20  ;;  %7038 = vmatmul.msk.f32.gmra.mxu1 %vm12426_vm3, %v12425_v21  ;;  %vm12451_vm6 = vmmov %vm12443_vm2  ;;  %v12517_v20 = vld [vmem:[#allocation66_spill] sm:$0xff] }
0x1249   :  { %6518 = vmatpush.msrb.mxu2 %v7268_v32  ;;  %vm12453_vm3 = vmmov %vm12443_vm2  ;;  %v12515_v32 = vld [vmem:[#allocation67_spill] sm:$0xff] }
0x124a   :  { %v7292_v29 = vpop.permute.xlu1 %7291 }
0x124b   :  { %v7293_v24 = vunpack.i.l.bf16 %v7292_v29  ;;  %6519 = vmatpush.msrb.mxu2 %v7269_v13  ;;  %v7294_v8 = vunpack.i.h.bf16 %v7292_v29  ;;  %v12519_v13 = vld [vmem:[#allocation69_spill] sm:$0xff]  ;;  %v12521_v29 = vld [vmem:[#allocation68_spill] sm:$0xff] }
0x124c   :  { %7025 = vmatmul.msk.f32.gmra.mxu2 %vm12428_vm5, %v12427_v18  ;;  %vm12455_vm5 = vmmov %vm12443_vm2  ;;  %v12524_v18 = vld [vmem:[#allocation70_spill] sm:$0xff] }
0x124d   :  { %6429 = vmatpush.msrb.mxu0 %v7293_v24  ;;  %6520 = vmatpush.msrb.mxu2 %v7303_v7  ;;  %v12522_v24 = vld [vmem:[#allocation71_spill] sm:$0xff] }
0x124e   :  { %v6088_v34 = vpop.f32.mrf.mxu0 }
0x124f   :  { %6430 = vmatpush.msrb.mxu0 %v7294_v8  ;;  %6521 = vmatpush.msrb.mxu2 %v7304_v47  ;;  %v12526_v8 = vld [vmem:[#allocation72_spill] sm:$0xff] }
0x1250   :  { %7050 = vmatmul.msk.f32.gmra.mxu3 %vm12430_vm4, %v12429_v50  ;;  %7039 = vmatmul.msk.f32.gmra.mxu1 %vm12432_vm11, %v12431_v51  ;;  %vm12457_vm4 = vmmov %vm12443_vm2 }
0x1251   :  { %vm12459_vm11 = vmmov %vm12443_vm2 }
0x1252   :  { %v7297_v44 = vpop.permute.xlu1 %7296 }
0x1253   :  { %v7298_v39 = vunpack.i.l.bf16 %v7297_v44  ;;  %v7299_v25 = vunpack.i.h.bf16 %v7297_v44  ;;  %v11863_v44 = vld [vmem:[#allocation2] ss:$0 sm:$0xff] }
0x1254   :  { %7026 = vmatmul.msk.f32.gmra.mxu2 %vm12434_vm7, %v12433_v10  ;;  %vm12461_vm7 = vmmov %vm12443_vm2 }
0x1255   :  { %6431 = vmatpush.msrb.mxu0 %v7298_v39  ;;  %v6123_v39 = vadd.f32 %v11863_v44, %v6088_v34 }
0x1256   :  { %v6091_v62 = vpop.f32.mrf.mxu0 }
0x1257   :  { %6432 = vmatpush.msrb.mxu0 %v7299_v25 }
0x1258   :  { %7051 = vmatmul.msk.f32.gmra.mxu3 %vm12436_vm10, %v12435_v15  ;;  %7040 = vmatmul.msk.f32.gmra.mxu1 %vm12438_vm12, %v12437_v23  ;;  %vm12463_vm10 = vmmov %vm12443_vm2  ;;  %v6124_v15 = vadd.f32 %v11863_v44, %v6091_v62  ;;  %v12530_v23 = vld [vmem:[#allocation74_spill] sm:$0xff] }
0x1259   :  { %6433 = vmatpush.msrb.mxu0 %v7308_v5  ;;  %vm12465_vm12 = vmmov %vm12443_vm2 }
0x125a   :  { %v3152_v58 = vpop.permute.xlu1 %3151 }
0x125b   :  { %3154 = vst.msk [vmem:[#allocation5] sm:$0x1] %vm12439_vm1, %v3152_v58  ;;  %6434 = vmatpush.msrb.mxu0 %v7309_v37  ;;  %vm12467_vm1 = vmmov %vm12443_vm2 }
0x125c   :  { %7027 = vmatmul.msk.f32.gmra.mxu2 %vm12441_vm8, %v12440_v36  ;;  %7062 = vmatmul.msk.f32.vlgmr.msrb.gmra.mxu0 %vm12443_vm2, %v12442_v14  ;;  %vm12469_vm8 = vmmov %vm12467_vm1  ;;  %6612 = dma.vmem_to_hbm [thread:$0]  %s6608_s20, 32, %s6610_s2, [#allocation6]  }
0x125d   :  { %vm12471_vm2 = vmmov %vm12467_vm1 }
0x125e   :  { %v6094_v21 = vpop.f32.mrf.mxu0 }
0x125f   :  { %v6125_v14 = vadd.f32 %v11863_v44, %v6094_v21 }
0x1260   :  { %7052 = vmatmul.msk.f32.gmra.mxu3 %vm12445_vm13, %v12444_v40  ;;  %7041 = vmatmul.msk.f32.gmra.mxu1 %vm12447_vm9, %v12446_v46  ;;  %vm12473_vm13 = vmmov %vm12467_vm1  ;;  %v12532_v40 = vld [vmem:[#allocation75_spill] sm:$0xff] }
0x1261   :  { %vm12475_vm9 = vmmov %vm12467_vm1 }
0x1264   :  { %7028 = vmatmul.msk.f32.gmra.mxu2 %vm12449_vm14, %v12448_v33  ;;  %7063 = vmatmul.msk.f32.gmra.mxu0 %vm12451_vm6, %v12450_v63  ;;  %vm12477_vm14 = vmmov %vm12467_vm1 }
0x1265   :  { %vm12479_vm6 = vmmov %vm12467_vm1 }
0x1266   :  { %v6097_v7 = vpop.f32.mrf.mxu0 }
0x1268   :  { %7053 = vmatmul.msk.f32.gmra.mxu3 %vm12453_vm3, %v12452_v4  ;;  %7042 = vmatmul.msk.f32.gmra.mxu1 %vm12455_vm5, %v12454_v31  ;;  %vm12481_vm3 = vmmov %vm12467_vm1  ;;  %v6126_v4 = vadd.f32 %v11863_v44, %v6097_v7  ;;  %v12534_v31 = vld [vmem:[#allocation76_spill] sm:$0xff] }
0x1269   :  { %vm12483_vm5 = vmmov %vm12467_vm1 }
0x126c   :  { %7029 = vmatmul.msk.f32.gmra.mxu2 %vm12457_vm4, %v12456_v26  ;;  %7064 = vmatmul.msk.f32.gmra.mxu0 %vm12459_vm11, %v12458_v42  ;;  %vm12485_vm4 = vmmov %vm12467_vm1 }
0x126d   :  { %vm12487_vm11 = vmmov %vm12467_vm1 }
0x126e   :  { %v6100_v50 = vpop.f32.mrf.mxu0 }
0x1270   :  { %7054 = vmatmul.msk.f32.gmra.mxu3 %vm12461_vm7, %v12460_v61  ;;  %7043 = vmatmul.msk.f32.gmra.mxu1 %vm12463_vm10, %v12462_v1  ;;  %vm12489_vm7 = vmmov %vm12467_vm1  ;;  %v6127_v61 = vadd.f32 %v11863_v44, %v6100_v50  ;;  %v12536_v1 = vld [vmem:[#allocation77_spill] sm:$0xff]  ;;  %v6122_v50 = vadd.f32 %v11863_v44, %v11823_v53 }
0x1271   :  { %vm12491_vm10 = vmmov %vm12467_vm1 }
0x1274   :  { %7030 = vmatmul.msk.f32.gmra.mxu2 %vm12465_vm12, %v12464_v38  ;;  %7065 = vmatmul.msk.f32.gmra.mxu0 %vm12467_vm1, %v12466_v28  ;;  %vm12493_vm12 = vmmov %vm12467_vm1 }
0x1276   :  { %v6103_v10 = vpop.f32.mrf.mxu0 }
0x1278   :  { %7055 = vmatmul.msk.f32.gmra.mxu3 %vm12469_vm8, %v12468_v17  ;;  %7044 = vmatmul.msk.f32.gmra.mxu1 %vm12471_vm2, %v12470_v60  ;;  %vm12496_vm8 = vmmov %vm12467_vm1  ;;  %v6128_v60 = vadd.f32 %v11863_v44, %v6103_v10 }
0x1279   :  { %vm12498_vm2 = vmmov %vm12467_vm1 }
0x127c   :  { %7031 = vmatmul.msk.f32.gmra.mxu2 %vm12473_vm13, %v12472_v45  ;;  %7066 = vmatmul.msk.f32.gmra.mxu0 %vm12475_vm9, %v12474_v27  ;;  %vm12500_vm13 = vmmov %vm12467_vm1  ;;  %v12538_v45 = vld [vmem:[#allocation78_spill] sm:$0xff] }
0x127d   :  { %vm12502_vm9 = vmmov %vm12467_vm1 }
0x127e   :  { %v6106_v36 = vpop.f32.mrf.mxu0 }
0x1280   :  { %7056 = vmatmul.msk.f32.gmra.mxu3 %vm12477_vm14, %v12476_v22  ;;  %7045 = vmatmul.msk.f32.gmra.mxu1 %vm12479_vm6, %v12478_v19  ;;  %vm12504_vm14 = vmmov %vm12467_vm1 }
0x1281   :  { %vm12506_vm6 = vmmov %vm12467_vm1 }
0x1284   :  { %7032 = vmatmul.msk.f32.gmra.mxu2 %vm12481_vm3, %v12480_v12  ;;  %7067 = vmatmul.msk.f32.gmra.mxu0 %vm12483_vm5, %v12482_v35  ;;  %vm12508_vm3 = vmmov %vm12467_vm1  ;;  %v6129_v12 = vadd.f32 %v11863_v44, %v6106_v36  ;;  %v12540_v35 = vld [vmem:[#allocation80_spill] sm:$0xff] }
0x1285   :  { %vm12510_vm5 = vmmov %vm12467_vm1 }
0x1286   :  { %v6109_v63 = vpop.f32.mrf.mxu0 }
0x1288   :  { %7057 = vmatmul.msk.f32.gmra.mxu3 %vm12485_vm4, %v12484_v41  ;;  %7046 = vmatmul.msk.f32.gmra.mxu1 %vm12487_vm11, %v12486_v54  ;;  %vm12512_vm4 = vmmov %vm12467_vm1 }
0x1289   :  { %vm12514_vm11 = vmmov %vm12467_vm1 }
0x128c   :  { %7033 = vmatmul.msk.f32.gmra.mxu2 %vm12489_vm7, %v12488_v11  ;;  %7068 = vmatmul.msk.f32.gmra.mxu0 %vm12491_vm10, %v12490_v56  ;;  %vm12516_vm7 = vmmov %vm12467_vm1  ;;  %v6130_v56 = vadd.f32 %v11863_v44, %v6109_v63 }
0x128d   :  { %vm12518_vm10 = vmmov %vm12467_vm1 }
0x128e   :  { %v6112_v38 = vpop.f32.mrf.mxu0 }
0x1290   :  { %7058 = vmatmul.msk.f32.gmra.mxu3 %vm12493_vm12, %v12492_v48  ;;  %7047 = vmatmul.msk.f32.gmra.mxu1 %vm12467_vm1, %v12494_v49  ;;  %vm12520_vm12 = vmmov %vm12467_vm1  ;;  %v12542_v48 = vld [vmem:[#allocation82_spill] sm:$0xff] }
0x1294   :  { %7034 = vmatmul.msk.f32.gmra.mxu2 %vm12496_vm8, %v12495_v59  ;;  %7069 = vmatmul.msk.f32.gmra.mxu0 %vm12498_vm2, %v12497_v16  ;;  %vm12523_vm8 = vmmov %vm12467_vm1 }
0x1295   :  { %vm12525_vm2 = vmmov %vm12467_vm1 }
0x1296   :  { %v6115_v27 = vpop.f32.mrf.mxu0 }
0x1298   :  { %7059 = vmatmul.msk.f32.gmra.mxu3 %vm12500_vm13, %v12499_v30  ;;  %7048 = vmatmul.msk.f32.gmra.mxu1 %vm12502_vm9, %v12501_v52  ;;  %vm12527_vm13 = vmmov %vm12467_vm1 }
0x1299   :  { %vm12529_vm9 = vmmov %vm12467_vm1 }
0x129c   :  { %7035 = vmatmul.msk.f32.gmra.mxu2 %vm12504_vm14, %v12503_v9  ;;  %7070 = vmatmul.msk.f32.gmra.mxu0 %vm12506_vm6, %v12505_v0  ;;  %vm12531_vm14 = vmmov %vm12467_vm1  ;;  %v6131_v9 = vadd.f32 %v11863_v44, %v6112_v38 }
0x129d   :  { %vm12533_vm6 = vmmov %vm12467_vm1 }
0x129e   :  { %v6118_v11 = vpop.f32.mrf.mxu0 }
0x12a0   :  { %7060 = vmatmul.msk.f32.gmra.mxu3 %vm12508_vm3, %v12507_v55  ;;  %vm12535_vm3 = vmmov %vm12467_vm1 }
0x12a4   :  { %7075 = vmatmul.msk.f32.vlgmr.msrb.gmra.mxu2 %vm12510_vm5, %v12509_v43  ;;  %7071 = vmatmul.msk.f32.gmra.mxu0 %vm12512_vm4, %v12511_v2  ;;  %vm12537_vm5 = vmmov %vm12467_vm1  ;;  %v6132_v2 = vadd.f32 %v11863_v44, %v6115_v27 }
0x12a5   :  { %vm12539_vm4 = vmmov %vm12467_vm1 }
0x12a8   :  { %7061 = vmatmul.msk.f32.gmra.mxu3 %vm12514_vm11, %v12513_v57  ;;  %vm12541_vm11 = vmmov %vm12467_vm1 }
0x12ac   :  { %7076 = vmatmul.msk.f32.gmra.mxu2 %vm12516_vm7, %v12515_v32  ;;  %7072 = vmatmul.msk.f32.gmra.mxu0 %vm12518_vm10, %v12517_v20  ;;  %vm12543_vm7 = vmmov %vm12467_vm1  ;;  %v6121_v20 = vadd.f32 %v11863_v44, %v11813_v3 }
0x12b4   :  { %7077 = vmatmul.msk.f32.gmra.mxu2 %vm12520_vm12, %v12519_v13  ;;  %7073 = vmatmul.msk.f32.gmra.mxu0 %vm12467_vm1, %v12521_v29  ;;  %v6262_v49 = vpop.f32.mrf.mxu1  ;;  %v6133_v13 = vadd.f32 %v11863_v44, %v6118_v11 }
0x12bc   :  { %7078 = vmatmul.msk.f32.gmra.mxu2 %vm12523_vm8, %v12522_v24  ;;  %7074 = vmatmul.msk.f32.gmra.mxu0 %vm12525_vm2, %v12524_v18  ;;  %v6265_v55 = vpop.f32.mrf.mxu1 }
0x12bf   :  { %v11857_v47 = vpop.f32.mrf.mxu2 }
0x12c0   :  { %v6214_v7 = vadd.f32 %v11857_v47, %v6121_v20 }
0x12c4   :  { %7079 = vmatmul.msk.f32.gmra.mxu2 %vm12527_vm13, %v12526_v8 }
0x12c5   :  { %v6268_v21 = vpop.f32.mrf.mxu1 }
0x12c7   :  { %v11861_v51 = vpop.f32.mrf.mxu2 }
0x12cb   :  { %v6349_v30 = vpop.f32.mrf.mxu3 }
0x12cc   :  { %7080 = vmatmul.msk.f32.gmra.mxu2 %vm12529_vm9, %v12528_v6 }
0x12cd   :  { %v6271_v10 = vpop.f32.mrf.mxu1 }
0x12cf   :  { %v6181_v25 = vpop.f32.mrf.mxu2 }
0x12d0   :  { %v11868_v5 = vadd.f32 %v6181_v25, %v6123_v39  ;;  %v6301_v39 = vadd.f32 %v6262_v49, %v6214_v7  ;;  %v6215_v25 = vadd.f32 %v11861_v51, %v6122_v50 }
0x12d2   :  { %v6388_v6 = vadd.f32 %v6349_v30, %v6301_v39 }
0x12d3   :  { %v6352_v43 = vpop.f32.mrf.mxu3 }
0x12d4   :  { %7081 = vmatmul.msk.f32.gmra.mxu2 %vm12531_vm14, %v12530_v23 }
0x12d7   :  { %v6184_v37 = vpop.f32.mrf.mxu2 }
0x12d8   :  { %v11873_v58 = vadd.f32 %v6184_v37, %v6124_v15 }
0x12d9   :  { %v6436_v52 = vpop.f32.mrf.mxu0 }
0x12da   :  { %v6475_v15 = vadd.f32 %v6436_v52, %v6388_v6 }
0x12db   :  { %v6355_v29 = vpop.f32.mrf.mxu3 }
0x12dc   :  { %7082 = vmatmul.msk.f32.gmra.mxu2 %vm12533_vm6, %v12532_v40 }
0x12df   :  { %v6187_v46 = vpop.f32.mrf.mxu2 }
0x12e0   :  { %v11878_v33 = vadd.f32 %v6187_v46, %v6125_v14  ;;  %v6302_v14 = vadd.f32 %v6265_v55, %v6215_v25  ;;  %v6274_v46 = vpop.f32.mrf.mxu1 }
0x12e1   :  { %v6439_v62 = vpop.f32.mrf.mxu0 }
0x12e2   :  { %v6389_v47 = vadd.f32 %v6352_v43, %v6302_v14 }
0x12e3   :  { %v6358_v3 = vpop.f32.mrf.mxu3 }
0x12e4   :  { %7083 = vmatmul.msk.f32.gmra.mxu2 %vm12535_vm3, %v12534_v31  ;;  %v6476_v40 = vadd.f32 %v6439_v62, %v6389_v47 }
0x12e7   :  { %v6190_v26 = vpop.f32.mrf.mxu2 }
0x12e8   :  { %v11883_v42 = vadd.f32 %v6190_v26, %v6126_v4  ;;  %v6303_v4 = vadd.f32 %v6268_v21, %v11868_v5  ;;  %v6277_v38 = vpop.f32.mrf.mxu1 }
0x12e9   :  { %v6442_v24 = vpop.f32.mrf.mxu0 }
0x12ea   :  { %v6390_v31 = vadd.f32 %v6355_v29, %v6303_v4  ;;  %v6306_v30 = vadd.f32 %v6277_v38, %v11883_v42 }
0x12eb   :  { %v6361_v63 = vpop.f32.mrf.mxu3 }
0x12ec   :  { %7084 = vmatmul.msk.f32.gmra.mxu2 %vm12537_vm5, %v12536_v1  ;;  %v6477_v26 = vadd.f32 %v6442_v24, %v6390_v31 }
0x12ef   :  { %v6193_v28 = vpop.f32.mrf.mxu2 }
0x12f0   :  { %v11888_v17 = vadd.f32 %v6193_v28, %v6127_v61  ;;  %v6304_v28 = vadd.f32 %v6271_v10, %v11873_v58 }
0x12f1   :  { %v6445_v36 = vpop.f32.mrf.mxu0 }
0x12f2   :  { %v6391_v5 = vadd.f32 %v6358_v3, %v6304_v28 }
0x12f4   :  { %7085 = vmatmul.msk.f32.gmra.mxu2 %vm12539_vm4, %v12538_v45  ;;  %v6478_v27 = vadd.f32 %v6445_v36, %v6391_v5 }
0x12f7   :  { %v6196_v22 = vpop.f32.mrf.mxu2 }
0x12f8   :  { %v11893_v19 = vadd.f32 %v6196_v22, %v6128_v60  ;;  %v6364_v60 = vpop.f32.mrf.mxu3 }
0x12f9   :  { %v6448_v51 = vpop.f32.mrf.mxu0 }
0x12fc   :  { %7086 = vmatmul.msk.f32.gmra.mxu2 %vm12541_vm11, %v12540_v35  ;;  %v6305_v35 = vadd.f32 %v6274_v46, %v11878_v33  ;;  %v6393_v33 = vadd.f32 %v6364_v60, %v6306_v30 }
0x12fe   :  { %v6392_v58 = vadd.f32 %v6361_v63, %v6305_v35 }
0x12ff   :  { %v6199_v41 = vpop.f32.mrf.mxu2 }
0x1300   :  { %v11898_v54 = vadd.f32 %v6199_v41, %v6129_v12  ;;  %v6280_v41 = vpop.f32.mrf.mxu1  ;;  %v6367_v11 = vpop.f32.mrf.mxu3 }
0x1301   :  { %v6451_v45 = vpop.f32.mrf.mxu0  ;;  %v6307_v62 = vadd.f32 %v6280_v41, %v11888_v17 }
0x1303   :  { %v6394_v42 = vadd.f32 %v6367_v11, %v6307_v62 }
0x1304   :  { %7087 = vmatmul.msk.f32.gmra.mxu2 %vm12543_vm7, %v12542_v48 }
0x1307   :  { %v6202_v59 = vpop.f32.mrf.mxu2 }
0x1308   :  { %v11903_v16 = vadd.f32 %v6202_v59, %v6130_v56  ;;  %v6479_v56 = vadd.f32 %v6448_v51, %v6392_v58  ;;  %v6283_v52 = vpop.f32.mrf.mxu1 }
0x1309   :  { %v6454_v48 = vpop.f32.mrf.mxu0  ;;  %v6308_v7 = vadd.f32 %v6283_v52, %v11893_v19 }
0x130f   :  { %v6205_v0 = vpop.f32.mrf.mxu2 }
0x1310   :  { %v11912_v34 = vadd.f32 %v6205_v0, %v6131_v9  ;;  %v6480_v9 = vadd.f32 %v6451_v45, %v6393_v33  ;;  %v6370_v0 = vpop.f32.mrf.mxu3  ;;  %v6286_v20 = vpop.f32.mrf.mxu1 }
0x1311   :  { %v6395_v17 = vadd.f32 %v6370_v0, %v6308_v7  ;;  %v6309_v10 = vadd.f32 %v6286_v20, %v11898_v54 }
0x1317   :  { %v6208_v57 = vpop.f32.mrf.mxu2 }
0x1318   :  { %v11915_v32 = vadd.f32 %v6208_v57, %v6132_v2  ;;  %v6457_v2 = vpop.f32.mrf.mxu0  ;;  %v6481_v57 = vadd.f32 %v6454_v48, %v6394_v42  ;;  %v6373_v29 = vpop.f32.mrf.mxu3 }
0x1319   :  { %v6289_v6 = vpop.f32.mrf.mxu1  ;;  %v6396_v19 = vadd.f32 %v6373_v29, %v6309_v10 }
0x131a   :  { %v6310_v36 = vadd.f32 %v6289_v6, %v11903_v16 }
0x131f   :  { %v6211_v18 = vpop.f32.mrf.mxu2 }
0x1320   :  { %v11921_v8 = vadd.f32 %v6211_v18, %v6133_v13  ;;  %v6460_v24 = vpop.f32.mrf.mxu0  ;;  %v6482_v18 = vadd.f32 %v6457_v2, %v6395_v17  ;;  %v6376_v25 = vpop.f32.mrf.mxu3 }
0x1321   :  { %v6483_v3 = vadd.f32 %v6460_v24, %v6396_v19  ;;  %v6292_v14 = vpop.f32.mrf.mxu1  ;;  %v6397_v54 = vadd.f32 %v6376_v25, %v6310_v36 }
0x1322   :  { %v6311_v63 = vadd.f32 %v6292_v14, %v11912_v34 }
0x1327   :  { %v6523_v23 = vpop.f32.mrf.mxu2 }
0x1328   :  { %v6562_v37 = vadd.f32 %v6523_v23, %v6475_v15  ;;  %v6463_v15 = vpop.f32.mrf.mxu0  ;;  %v6379_v47 = vpop.f32.mrf.mxu3 }
0x1329   :  { %v6398_v16 = vadd.f32 %v6379_v47, %v6311_v63  ;;  %v6295_v4 = vpop.f32.mrf.mxu1 }
0x132a   :  { %7088 = vst.msk [vmem:[%s12013_s24 + $0x68] sm:$0xff] %vm5992_vm15, %v6562_v37  ;;  %v6312_v38 = vadd.f32 %v6295_v4, %v11915_v32 }
0x132f   :  { %v6526_v53 = vpop.f32.mrf.mxu2 }
0x1330   :  { %v6563_v44 = vadd.f32 %v6526_v53, %v6476_v40  ;;  %v6484_v40 = vadd.f32 %v6463_v15, %v6397_v54  ;;  %v6466_v46 = vpop.f32.mrf.mxu0  ;;  %v6382_v31 = vpop.f32.mrf.mxu3 }
0x1331   :  { %v6485_v51 = vadd.f32 %v6466_v46, %v6398_v16  ;;  %v6399_v34 = vadd.f32 %v6382_v31, %v6312_v38  ;;  %v6298_v60 = vpop.f32.mrf.mxu1 }
0x1332   :  { %7089 = vst.msk [vmem:[%s12013_s24 + $0x70] sm:$0xff] %vm5992_vm15, %v6563_v44 }
0x1337   :  { %v6529_v61 = vpop.f32.mrf.mxu2 }
0x1338   :  { %v6564_v1 = vadd.f32 %v6529_v61, %v6477_v26 }
0x133a   :  { %7090 = vst.msk [vmem:[%s12013_s24 + $0x78] sm:$0xff] %vm5992_vm15, %v6564_v1  ;;  %v6469_v1 = vpop.f32.mrf.mxu0 }
0x133b   :  { %v6486_v28 = vadd.f32 %v6469_v1, %v6399_v34 }
0x133f   :  { %v6532_v22 = vpop.f32.mrf.mxu2 }
0x1340   :  { %v6565_v12 = vadd.f32 %v6532_v22, %v6478_v27  ;;  %v6385_v27 = vpop.f32.mrf.mxu3  ;;  %v6313_v22 = vadd.f32 %v6298_v60, %v11921_v8 }
0x1342   :  { %7091 = vst.msk [vmem:[%s12013_s24 + $0x80] sm:$0xff] %vm5992_vm15, %v6565_v12  ;;  %v6472_v12 = vpop.f32.mrf.mxu0  ;;  %v6400_v32 = vadd.f32 %v6385_v27, %v6313_v22 }
0x1344   :  { %v6487_v35 = vadd.f32 %v6472_v12, %v6400_v32 }
0x1347   :  { %v6535_v49 = vpop.f32.mrf.mxu2 }
0x1348   :  { %v6566_v59 = vadd.f32 %v6535_v49, %v6479_v56 }
0x134a   :  { %7092 = vst.msk [vmem:[%s12013_s24 + $0x88] sm:$0xff] %vm5992_vm15, %v6566_v59 }
0x134f   :  { %v6538_v55 = vpop.f32.mrf.mxu2 }
0x1350   :  { %v6567_v43 = vadd.f32 %v6538_v55, %v6480_v9 }
0x1352   :  { %7093 = vst.msk [vmem:[%s12013_s24 + $0x90] sm:$0xff] %vm5992_vm15, %v6567_v43 }
0x1357   :  { %v6541_v21 = vpop.f32.mrf.mxu2 }
0x1358   :  { %v6568_v13 = vadd.f32 %v6541_v21, %v6481_v57 }
0x135a   :  { %7094 = vst.msk [vmem:[%s12013_s24 + $0x98] sm:$0xff] %vm5992_vm15, %v6568_v13 }
0x135f   :  { %v6544_v50 = vpop.f32.mrf.mxu2 }
0x1360   :  { %v6569_v39 = vadd.f32 %v6544_v50, %v6482_v18 }
0x1362   :  { %7095 = vst.msk [vmem:[%s12013_s24 + $0xa0] sm:$0xff] %vm5992_vm15, %v6569_v39 }
0x1367   :  { %v6547_v23 = vpop.f32.mrf.mxu2 }
0x1368   :  { %v6570_v37 = vadd.f32 %v6547_v23, %v6483_v3 }
0x136a   :  { %7096 = vst.msk [vmem:[%s12013_s24 + $0xa8] sm:$0xff] %vm5992_vm15, %v6570_v37 }
0x136f   :  { %v6550_v53 = vpop.f32.mrf.mxu2 }
0x1370   :  { %v6571_v44 = vadd.f32 %v6550_v53, %v6484_v40 }
0x1372   :  { %7097 = vst.msk [vmem:[%s12013_s24 + $0xb0] sm:$0xff] %vm5992_vm15, %v6571_v44 }
0x1377   :  { %v6553_v26 = vpop.f32.mrf.mxu2 }
0x1378   :  { %v6572_v61 = vadd.f32 %v6553_v26, %v6485_v51 }
0x137a   :  { %7098 = vst.msk [vmem:[%s12013_s24 + $0xb8] sm:$0xff] %vm5992_vm15, %v6572_v61 }
0x137f   :  { %v6556_v5 = vpop.f32.mrf.mxu2 }
0x1380   :  { %v6573_v45 = vadd.f32 %v6556_v5, %v6486_v28 }
0x1382   :  { %7099 = vst.msk [vmem:[%s12013_s24 + $0xc0] sm:$0xff] %vm5992_vm15, %v6573_v45 }
0x1387   :  { %v6559_v41 = vpop.f32.mrf.mxu2 }
0x1388   :  { %v6574_v58 = vadd.f32 %v6559_v41, %v6487_v35 }
0x138a   :  { %7100 = vst.msk [vmem:[%s12013_s24 + $0xc8] sm:$0xf] %vm6005_vm0, %v6574_v58 }
0x138b   :  { %7409 = dma.done.wait [#allocation4], 32  }
0x138c   :  { %7410 = vsyncadd [#allocation4], 4294967264 }
0x138d   :  { %7411 = dma.done.wait [#allocation6], 32  }
0x138e   :  { %7412 = vsyncadd [#allocation6], 4294967264 }
0x138f   :  { %6623 = vsyncpa [#allocation4], 1 }
0x1390   :  { %6624 = vsyncpa [#allocation6], 1 }

</bundles_post_ra>
